<compile_context>
chip_gen: v5e
topology: v5e:2x2
jax: 0.10.0
libtpu: 0.0.40
codegen_flags: <defaults>
</compile_context>

<pallas_src>
import jax
import jax.numpy as jnp
from jax import lax
from jax.experimental import pallas as pl
from jax.experimental.pallas import tpu as pltpu


def reid_kernel(x_ref,
                w1_ref, b1_ref, w2_ref, b2_ref, w3_ref, b3_ref, w4_ref, b4_ref,
                o_ref,
                pad128, pad64, pad24):
    H = x_ref.shape[1]
    W = x_ref.shape[2]

    def zero_halo(pad_ref):
        # Zero only the 1-pixel halo that the 3x3 taps actually read; the
        # interior is fully overwritten before every use.  Done every grid
        # step (NOT under pl.when(program_id == 0)) so it stays correct if the
        # "parallel" batch axis is sharded across TensorCores, each of which
        # gets its own uninitialized scratch.
        wp = pad_ref.shape[1]
        c = pad_ref.shape[2]
        zrow = jnp.zeros((1, wp, c), pad_ref.dtype)
        pad_ref[0:1, :, :] = zrow
        pad_ref[H + 1:H + 2, :, :] = zrow
        zcol = jnp.zeros((H, 1, c), pad_ref.dtype)
        pad_ref[1:H + 1, 0:1, :] = zcol
        pad_ref[1:H + 1, W + 1:W + 2, :] = zcol

    def conv_k384(x_f32, pad_ref, w_ref, b_ref):
        # 3x3 conv for Cin a multiple of 128: partial im2col along the kernel
        # width -> 3 matmuls with K = 3*Cin (much better MXU occupancy than
        # 9 matmuls with K = Cin).
        # x_f32: (H, W, Cin) f32; w_ref: (3, 3*Cin, Cout) bf16; b_ref: (1, Cout) f32
        cin = x_f32.shape[-1]
        pad_ref[1:H + 1, 1:W + 1, :] = x_f32
        acc = None
        for dy in range(3):
            patch = jnp.concatenate(
                [pad_ref[dy:dy + H, 0:W, :].astype(jnp.bfloat16),
                 pad_ref[dy:dy + H, 1:W + 1, :].astype(jnp.bfloat16),
                 pad_ref[dy:dy + H, 2:W + 2, :].astype(jnp.bfloat16)],
                axis=-1).reshape(H * W, 3 * cin)
            part = jnp.dot(patch, w_ref[dy], preferred_element_type=jnp.float32)
            acc = part if acc is None else acc + part
        return jnp.maximum(acc + b_ref[...], 0.0)          # (H*W, Cout) f32

    def conv_taps(x_f32, pad_ref, w_ref, b_ref):
        # 3x3 conv for small Cin (64 / 24): 9 shifted matmuls (a lane-level
        # concat would be 128-lane misaligned; FLOPs here are negligible).
        # w_ref: (3, 3, Cin, Cout) bf16
        cin = x_f32.shape[-1]
        pad_ref[1:H + 1, 1:W + 1, :] = x_f32
        acc = None
        for dy in range(3):
            for dx in range(3):
                patch = pad_ref[dy:dy + H, dx:dx + W, :].reshape(H * W, cin)
                part = jnp.dot(patch.astype(jnp.bfloat16), w_ref[dy, dx],
                               preferred_element_type=jnp.float32)
                acc = part if acc is None else acc + part
        return jnp.maximum(acc + b_ref[...], 0.0)

    zero_halo(pad128)
    zero_halo(pad64)
    zero_halo(pad24)

    x = x_ref[0]                                                  # (H, W, 128) f32
    y = conv_k384(x, pad128, w1_ref, b1_ref)                      # 128 -> 128
    y = conv_k384(y.reshape(H, W, 128), pad128, w2_ref, b2_ref)   # 128 -> 64 (scratch reuse)
    y = conv_taps(y.reshape(H, W, 64), pad64, w3_ref, b3_ref)     # 64  -> 24
    y = conv_taps(y.reshape(H, W, 24), pad24, w4_ref, b4_ref)     # 24  -> 6

    # Softmax over channels (PyTorch dim=1 in NCHW == last axis in NHWC).
    m = jnp.max(y, axis=-1, keepdims=True)
    e = jnp.exp(y - m)
    s = jnp.sum(e, axis=-1, keepdims=True)
    p = e * pl.reciprocal(s, approx=True)                         # divide on the EUP
    o_ref[...] = p.reshape(1, H, W, 6)


@jax.jit
def reid_forward(backbone_map_nchw, centers, params):
    """Pallas forward: NCHW input -> (N, 6, H, W) channel-softmax map."""
    del centers  # unused by the reference forward() (it only returns E)
    w1, b1, w2, b2, w3, b3, w4, b4 = params
    x = jnp.transpose(backbone_map_nchw, (0, 2, 3, 1)).astype(jnp.float32)
    N, H, W, C = x.shape
    assert C == 128
    w_pad = ((W + 2 + 7) // 8) * 8          # sublane-aligned padded scratch width

    # bf16 weights for the MXU; the two 128-channel layers get the per-row
    # im2col layout (3, 3*Cin, Cout).  Biases stay f32.
    w1k = w1.astype(jnp.bfloat16).reshape(3, 3 * 128, 128)
    w2k = w2.astype(jnp.bfloat16).reshape(3, 3 * 128, 64)
    w3k = w3.astype(jnp.bfloat16)
    w4k = w4.astype(jnp.bfloat16)

    flops = 2 * N * H * W * 9 * (128 * 128 + 128 * 64 + 64 * 24 + 24 * 6)
    bytes_accessed = (x.size * 4
                      + (w1k.size + w2k.size + w3k.size + w4k.size) * 2
                      + (b1.size + b2.size + b3.size + b4.size) * 4
                      + N * H * W * 6 * 4)
    cost = pl.CostEstimate(flops=flops, transcendentals=N * H * W * 6,
                           bytes_accessed=bytes_accessed)

    out_nhwc = pl.pallas_call(
        reid_kernel,
        out_shape=jax.ShapeDtypeStruct((N, H, W, 6), jnp.float32),
        grid_spec=pltpu.PrefetchScalarGridSpec(
            num_scalar_prefetch=0,
            grid=(N,),
            in_specs=[
                pl.BlockSpec((1, H, W, 128), lambda n: (n, 0, 0, 0)),
                pl.BlockSpec((3, 384, 128), lambda n: (0, 0, 0)),
                pl.BlockSpec((1, 128), lambda n: (0, 0)),
                pl.BlockSpec((3, 384, 64), lambda n: (0, 0, 0)),
                pl.BlockSpec((1, 64), lambda n: (0, 0)),
                pl.BlockSpec((3, 3, 64, 24), lambda n: (0, 0, 0, 0)),
                pl.BlockSpec((1, 24), lambda n: (0, 0)),
                pl.BlockSpec((3, 3, 24, 6), lambda n: (0, 0, 0, 0)),
                pl.BlockSpec((1, 6), lambda n: (0, 0)),
            ],
            out_specs=pl.BlockSpec((1, H, W, 6), lambda n: (n, 0, 0, 0)),
            scratch_shapes=[
                pltpu.VMEM((H + 2, w_pad, 128), jnp.float32),  # shared by conv1 & conv2
                pltpu.VMEM((H + 2, w_pad, 64), jnp.float32),
                pltpu.VMEM((H + 2, w_pad, 24), jnp.float32),
            ],
        ),
        compiler_params=pltpu.CompilerParams(dimension_semantics=("parallel",)),
        cost_estimate=cost,
    )(x, w1k, b1, w2k, b2, w3k, b3, w4k, b4)

    # Back to the PyTorch NCHW output convention: (N, 6, H, W).  (A lane-dense
    # (N, 6, H*W) in-kernel layout was considered but kept out for lowering
    # safety of the small (H*W, 6) transpose.)
    return jnp.transpose(out_nhwc, (0, 3, 1, 2))


def reid_reference(backbone_map_nchw, params, mixed_precision=False):
    """Pure-JAX reference (lax conv).  mixed_precision=True mirrors the
    kernel's bf16-operand / f32-accumulation matmuls."""
    w1, b1, w2, b2, w3, b3, w4, b4 = params
    x = jnp.transpose(backbone_map_nchw, (0, 2, 3, 1)).astype(jnp.float32)
    for w, b in ((w1, b1), (w2, b2), (w3, b3), (w4, b4)):
        lhs = x.astype(jnp.bfloat16) if mixed_precision else x
        rhs = w.astype(jnp.bfloat16) if mixed_precision else w
        y = lax.conv_general_dilated(
            lhs, rhs, window_strides=(1, 1), padding="SAME",
            dimension_numbers=("NHWC", "HWIO", "NHWC"),
            preferred_element_type=jnp.float32)
        x = jnp.maximum(y + b.reshape(1, 1, 1, -1), 0.0)
    x = jax.nn.softmax(x, axis=-1)
    return jnp.transpose(x, (0, 3, 1, 2))


def init_params(key):
    shapes = [(3, 3, 128, 128), (3, 3, 128, 64), (3, 3, 64, 24), (3, 3, 24, 6)]
    params = []
    for i, s in enumerate(shapes):
        kw, kb = jax.random.split(jax.random.fold_in(key, i))
        w = 0.05 * jax.random.normal(kw, s, dtype=jnp.float32)
        b = 0.05 * jax.random.normal(kb, (1, s[-1]), dtype=jnp.float32)
        params += [w, b]
    return tuple(params)


if __name__ == "__main__":
    key = jax.random.PRNGKey(0)
    k_x, k_c, k_p = jax.random.split(key, 3)

    # Small shapes consistent with the module: Conv2d requires 128 input channels.
    N, C, H, W = 2, 128, 16, 16
    backbone_map = jax.random.normal(k_x, (N, C, H, W), dtype=jnp.float32)
    centers = jax.random.randint(k_c, (4, 2), 0, H)  # unused by forward()

    params = init_params(k_p)

    out = reid_forward(backbone_map, centers, params)
    out = jax.block_until_ready(out)
    assert out.shape == (N, 6, H, W)

    # Tight check vs a reference that mirrors the kernel's mixed precision.
    ref_mixed = reid_reference(backbone_map, params, mixed_precision=True)
    assert jnp.allclose(out, ref_mixed, rtol=1e-2, atol=1e-2), \
        "mismatch vs mixed-precision reference"
    # Looser check vs the full-f32 semantic reference (bf16 MXU drift).
    ref_f32 = reid_reference(backbone_map, params, mixed_precision=False)
    assert jnp.allclose(out, ref_f32, rtol=5e-2, atol=5e-2), \
        "mismatch vs f32 reference"
    # Channel-softmax sanity: distributions sum to ~1 (approx reciprocal).
    assert jnp.allclose(jnp.sum(out, axis=1), 1.0, atol=1e-2)

    # TODO(synk): ReID.loss() is a standalone loss (outside forward) and the
    # `centers` argument is unused by the reference forward pass, so neither
    # is part of the kernel.
    print("KERNEL_OK")
</pallas_src>

<mosaic_0001>
module attributes {stable_mosaic.version = 11 : i64} {
  func.func @reid_kernel(%arg0: i32, %arg1: memref<1x16x16x128xf32, #tpu.memory_space<vmem>>, %arg2: memref<3x384x128xbf16, #tpu.memory_space<vmem>>, %arg3: memref<1x128xf32, #tpu.memory_space<vmem>>, %arg4: memref<3x384x64xbf16, #tpu.memory_space<vmem>>, %arg5: memref<1x64xf32, #tpu.memory_space<vmem>>, %arg6: memref<3x3x64x24xbf16, #tpu.memory_space<vmem>>, %arg7: memref<1x24xf32, #tpu.memory_space<vmem>>, %arg8: memref<3x3x24x6xbf16, #tpu.memory_space<vmem>>, %arg9: memref<1x6xf32, #tpu.memory_space<vmem>>, %arg10: memref<1x16x16x6xf32, #tpu.memory_space<vmem>>, %arg11: memref<18x24x128xf32, #tpu.memory_space<vmem>>, %arg12: memref<18x24x64xf32, #tpu.memory_space<vmem>>, %arg13: memref<18x24x24xf32, #tpu.memory_space<vmem>>) attributes {dimension_semantics = [#tpu.dimension_semantics<parallel>], iteration_bounds = array<i64: 2>, scalar_prefetch = 0 : i64, scratch_operands = 3 : i64, tpu.core_type = #tpu.core_type<tc>, window_params = [{transform_indices = @transform_0, window_bounds = array<i64: 1, 16, 16, 128>}, {pipeline_mode = #tpu.pipeline_mode<synchronous>, transform_indices = @transform_1, window_bounds = array<i64: 3, 384, 128>}, {pipeline_mode = #tpu.pipeline_mode<synchronous>, transform_indices = @transform_2, window_bounds = array<i64: 1, 128>}, {pipeline_mode = #tpu.pipeline_mode<synchronous>, transform_indices = @transform_3, window_bounds = array<i64: 3, 384, 64>}, {pipeline_mode = #tpu.pipeline_mode<synchronous>, transform_indices = @transform_4, window_bounds = array<i64: 1, 64>}, {pipeline_mode = #tpu.pipeline_mode<synchronous>, transform_indices = @transform_5, window_bounds = array<i64: 3, 3, 64, 24>}, {pipeline_mode = #tpu.pipeline_mode<synchronous>, transform_indices = @transform_6, window_bounds = array<i64: 1, 24>}, {pipeline_mode = #tpu.pipeline_mode<synchronous>, transform_indices = @transform_7, window_bounds = array<i64: 3, 3, 24, 6>}, {pipeline_mode = #tpu.pipeline_mode<synchronous>, transform_indices = @transform_8, window_bounds = array<i64: 1, 6>}, {transform_indices = @transform_9, window_bounds = array<i64: 1, 16, 16, 6>}]} {
    %cst = arith.constant 0.000000e+00 : f32
    %0 = vector.broadcast %cst : f32 to vector<1x24x128xf32>
    %c0 = arith.constant 0 : index
    %c0_0 = arith.constant 0 : index
    %c0_1 = arith.constant 0 : index
    %1 = vector.load %arg11[%c0, %c0_0, %c0_1] : memref<18x24x128xf32, #tpu.memory_space<vmem>>, vector<1x24x128xf32>
    tpu.vector_store %arg11[%c0, %c0_0, %c0_1], %0 {strides = array<i32>} : memref<18x24x128xf32, #tpu.memory_space<vmem>>, vector<1x24x128xf32>,
    %c17 = arith.constant 17 : index
    %c0_2 = arith.constant 0 : index
    %c0_3 = arith.constant 0 : index
    %2 = vector.load %arg11[%c17, %c0_2, %c0_3] : memref<18x24x128xf32, #tpu.memory_space<vmem>>, vector<1x24x128xf32>
    tpu.vector_store %arg11[%c17, %c0_2, %c0_3], %0 {strides = array<i32>} : memref<18x24x128xf32, #tpu.memory_space<vmem>>, vector<1x24x128xf32>,
    %cst_4 = arith.constant 0.000000e+00 : f32
    %3 = vector.broadcast %cst_4 : f32 to vector<16x1x128xf32>
    %c1 = arith.constant 1 : index
    %c0_5 = arith.constant 0 : index
    %c0_6 = arith.constant 0 : index
    %4 = vector.load %arg11[%c1, %c0_5, %c0_6] : memref<18x24x128xf32, #tpu.memory_space<vmem>>, vector<16x1x128xf32>
    tpu.vector_store %arg11[%c1, %c0_5, %c0_6], %3 {strides = array<i32>} : memref<18x24x128xf32, #tpu.memory_space<vmem>>, vector<16x1x128xf32>,
    %c1_7 = arith.constant 1 : index
    %c17_8 = arith.constant 17 : index
    %c0_9 = arith.constant 0 : index
    %5 = vector.load %arg11[%c1_7, %c17_8, %c0_9] : memref<18x24x128xf32, #tpu.memory_space<vmem>>, vector<16x1x128xf32>
    tpu.vector_store %arg11[%c1_7, %c17_8, %c0_9], %3 {strides = array<i32>} : memref<18x24x128xf32, #tpu.memory_space<vmem>>, vector<16x1x128xf32>,
    %cst_10 = arith.constant 0.000000e+00 : f32
    %6 = vector.broadcast %cst_10 : f32 to vector<1x24x64xf32>
    %c0_11 = arith.constant 0 : index
    %c0_12 = arith.constant 0 : index
    %c0_13 = arith.constant 0 : index
    %7 = vector.load %arg12[%c0_11, %c0_12, %c0_13] : memref<18x24x64xf32, #tpu.memory_space<vmem>>, vector<1x24x64xf32>
    tpu.vector_store %arg12[%c0_11, %c0_12, %c0_13], %6 {strides = array<i32>} : memref<18x24x64xf32, #tpu.memory_space<vmem>>, vector<1x24x64xf32>,
    %c17_14 = arith.constant 17 : index
    %c0_15 = arith.constant 0 : index
    %c0_16 = arith.constant 0 : index
    %8 = vector.load %arg12[%c17_14, %c0_15, %c0_16] : memref<18x24x64xf32, #tpu.memory_space<vmem>>, vector<1x24x64xf32>
    tpu.vector_store %arg12[%c17_14, %c0_15, %c0_16], %6 {strides = array<i32>} : memref<18x24x64xf32, #tpu.memory_space<vmem>>, vector<1x24x64xf32>,
    %cst_17 = arith.constant 0.000000e+00 : f32
    %9 = vector.broadcast %cst_17 : f32 to vector<16x1x64xf32>
    %c1_18 = arith.constant 1 : index
    %c0_19 = arith.constant 0 : index
    %c0_20 = arith.constant 0 : index
    %10 = vector.load %arg12[%c1_18, %c0_19, %c0_20] : memref<18x24x64xf32, #tpu.memory_space<vmem>>, vector<16x1x64xf32>
    tpu.vector_store %arg12[%c1_18, %c0_19, %c0_20], %9 {strides = array<i32>} : memref<18x24x64xf32, #tpu.memory_space<vmem>>, vector<16x1x64xf32>,
    %c1_21 = arith.constant 1 : index
    %c17_22 = arith.constant 17 : index
    %c0_23 = arith.constant 0 : index
    %11 = vector.load %arg12[%c1_21, %c17_22, %c0_23] : memref<18x24x64xf32, #tpu.memory_space<vmem>>, vector<16x1x64xf32>
    tpu.vector_store %arg12[%c1_21, %c17_22, %c0_23], %9 {strides = array<i32>} : memref<18x24x64xf32, #tpu.memory_space<vmem>>, vector<16x1x64xf32>,
    %cst_24 = arith.constant 0.000000e+00 : f32
    %12 = vector.broadcast %cst_24 : f32 to vector<1x24x24xf32>
    %c0_25 = arith.constant 0 : index
    %c0_26 = arith.constant 0 : index
    %c0_27 = arith.constant 0 : index
    %13 = vector.load %arg13[%c0_25, %c0_26, %c0_27] : memref<18x24x24xf32, #tpu.memory_space<vmem>>, vector<1x24x24xf32>
    tpu.vector_store %arg13[%c0_25, %c0_26, %c0_27], %12 {strides = array<i32>} : memref<18x24x24xf32, #tpu.memory_space<vmem>>, vector<1x24x24xf32>,
    %c17_28 = arith.constant 17 : index
    %c0_29 = arith.constant 0 : index
    %c0_30 = arith.constant 0 : index
    %14 = vector.load %arg13[%c17_28, %c0_29, %c0_30] : memref<18x24x24xf32, #tpu.memory_space<vmem>>, vector<1x24x24xf32>
    tpu.vector_store %arg13[%c17_28, %c0_29, %c0_30], %12 {strides = array<i32>} : memref<18x24x24xf32, #tpu.memory_space<vmem>>, vector<1x24x24xf32>,
    %cst_31 = arith.constant 0.000000e+00 : f32
    %15 = vector.broadcast %cst_31 : f32 to vector<16x1x24xf32>
    %c1_32 = arith.constant 1 : index
    %c0_33 = arith.constant 0 : index
    %c0_34 = arith.constant 0 : index
    %16 = vector.load %arg13[%c1_32, %c0_33, %c0_34] : memref<18x24x24xf32, #tpu.memory_space<vmem>>, vector<16x1x24xf32>
    tpu.vector_store %arg13[%c1_32, %c0_33, %c0_34], %15 {strides = array<i32>} : memref<18x24x24xf32, #tpu.memory_space<vmem>>, vector<16x1x24xf32>,
    %c1_35 = arith.constant 1 : index
    %c17_36 = arith.constant 17 : index
    %c0_37 = arith.constant 0 : index
    %17 = vector.load %arg13[%c1_35, %c17_36, %c0_37] : memref<18x24x24xf32, #tpu.memory_space<vmem>>, vector<16x1x24xf32>
    tpu.vector_store %arg13[%c1_35, %c17_36, %c0_37], %15 {strides = array<i32>} : memref<18x24x24xf32, #tpu.memory_space<vmem>>, vector<16x1x24xf32>,
    %c0_38 = arith.constant 0 : index
    %c0_39 = arith.constant 0 : index
    %c0_40 = arith.constant 0 : index
    %c0_41 = arith.constant 0 : index
    %18 = vector.load %arg1[%c0_38, %c0_39, %c0_40, %c0_41] : memref<1x16x16x128xf32, #tpu.memory_space<vmem>>, vector<1x16x16x128xf32>
    %19 = vector.shape_cast %18 : vector<1x16x16x128xf32> to vector<16x16x128xf32>
    %c1_42 = arith.constant 1 : index
    %c1_43 = arith.constant 1 : index
    %c0_44 = arith.constant 0 : index
    %20 = vector.load %arg11[%c1_42, %c1_43, %c0_44] : memref<18x24x128xf32, #tpu.memory_space<vmem>>, vector<16x16x128xf32>
    tpu.vector_store %arg11[%c1_42, %c1_43, %c0_44], %19 {strides = array<i32>} : memref<18x24x128xf32, #tpu.memory_space<vmem>>, vector<16x16x128xf32>,
    %c0_45 = arith.constant 0 : index
    %c0_46 = arith.constant 0 : index
    %c0_47 = arith.constant 0 : index
    %21 = vector.load %arg11[%c0_45, %c0_46, %c0_47] : memref<18x24x128xf32, #tpu.memory_space<vmem>>, vector<16x16x128xf32>
    %22 = arith.truncf %21 : vector<16x16x128xf32> to vector<16x16x128xbf16>
    %c0_48 = arith.constant 0 : index
    %c1_49 = arith.constant 1 : index
    %c0_50 = arith.constant 0 : index
    %23 = vector.load %arg11[%c0_48, %c1_49, %c0_50] : memref<18x24x128xf32, #tpu.memory_space<vmem>>, vector<16x16x128xf32>
    %24 = arith.truncf %23 : vector<16x16x128xf32> to vector<16x16x128xbf16>
    %c0_51 = arith.constant 0 : index
    %c2 = arith.constant 2 : index
    %c0_52 = arith.constant 0 : index
    %25 = vector.load %arg11[%c0_51, %c2, %c0_52] : memref<18x24x128xf32, #tpu.memory_space<vmem>>, vector<16x16x128xf32>
    %26 = arith.truncf %25 : vector<16x16x128xf32> to vector<16x16x128xbf16>
    %27 = tpu.concatenate %22, %24, %26 in 2 : vector<16x16x128xbf16>, vector<16x16x128xbf16>, vector<16x16x128xbf16> -> vector<16x16x384xbf16>
    %28 = vector.shape_cast %27 : vector<16x16x384xbf16> to vector<256x384xbf16>
    %c0_53 = arith.constant 0 : index
    %c0_54 = arith.constant 0 : index
    %c0_55 = arith.constant 0 : index
    %29 = vector.load %arg2[%c0_53, %c0_54, %c0_55] : memref<3x384x128xbf16, #tpu.memory_space<vmem>>, vector<1x384x128xbf16>
    %30 = vector.shape_cast %29 : vector<1x384x128xbf16> to vector<384x128xbf16>
    %cst_56 = arith.constant dense<0.000000e+00> : vector<256x128xf32>
    %31 = tpu.matmul %28, %30, %cst_56 {dimension_numbers = #tpu.dot_dimension_numbers<[1], [0], [0], [1], [0, 0, 1, 1], [], []>} : vector<256x384xbf16>, vector<384x128xbf16>, vector<256x128xf32> -> vector<256x128xf32>
    %c1_57 = arith.constant 1 : index
    %c0_58 = arith.constant 0 : index
    %c0_59 = arith.constant 0 : index
    %32 = vector.load %arg11[%c1_57, %c0_58, %c0_59] : memref<18x24x128xf32, #tpu.memory_space<vmem>>, vector<16x16x128xf32>
    %33 = arith.truncf %32 : vector<16x16x128xf32> to vector<16x16x128xbf16>
    %c1_60 = arith.constant 1 : index
    %c1_61 = arith.constant 1 : index
    %c0_62 = arith.constant 0 : index
    %34 = vector.load %arg11[%c1_60, %c1_61, %c0_62] : memref<18x24x128xf32, #tpu.memory_space<vmem>>, vector<16x16x128xf32>
    %35 = arith.truncf %34 : vector<16x16x128xf32> to vector<16x16x128xbf16>
    %c1_63 = arith.constant 1 : index
    %c2_64 = arith.constant 2 : index
    %c0_65 = arith.constant 0 : index
    %36 = vector.load %arg11[%c1_63, %c2_64, %c0_65] : memref<18x24x128xf32, #tpu.memory_space<vmem>>, vector<16x16x128xf32>
    %37 = arith.truncf %36 : vector<16x16x128xf32> to vector<16x16x128xbf16>
    %38 = tpu.concatenate %33, %35, %37 in 2 : vector<16x16x128xbf16>, vector<16x16x128xbf16>, vector<16x16x128xbf16> -> vector<16x16x384xbf16>
    %39 = vector.shape_cast %38 : vector<16x16x384xbf16> to vector<256x384xbf16>
    %c1_66 = arith.constant 1 : index
    %c0_67 = arith.constant 0 : index
    %c0_68 = arith.constant 0 : index
    %40 = vector.load %arg2[%c1_66, %c0_67, %c0_68] : memref<3x384x128xbf16, #tpu.memory_space<vmem>>, vector<1x384x128xbf16>
    %41 = vector.shape_cast %40 : vector<1x384x128xbf16> to vector<384x128xbf16>
    %cst_69 = arith.constant dense<0.000000e+00> : vector<256x128xf32>
    %42 = tpu.matmul %39, %41, %cst_69 {dimension_numbers = #tpu.dot_dimension_numbers<[1], [0], [0], [1], [0, 0, 1, 1], [], []>} : vector<256x384xbf16>, vector<384x128xbf16>, vector<256x128xf32> -> vector<256x128xf32>
    %43 = arith.addf %31, %42 : vector<256x128xf32>
    %c2_70 = arith.constant 2 : index
    %c0_71 = arith.constant 0 : index
    %c0_72 = arith.constant 0 : index
    %44 = vector.load %arg11[%c2_70, %c0_71, %c0_72] : memref<18x24x128xf32, #tpu.memory_space<vmem>>, vector<16x16x128xf32>
    %45 = arith.truncf %44 : vector<16x16x128xf32> to vector<16x16x128xbf16>
    %c2_73 = arith.constant 2 : index
    %c1_74 = arith.constant 1 : index
    %c0_75 = arith.constant 0 : index
    %46 = vector.load %arg11[%c2_73, %c1_74, %c0_75] : memref<18x24x128xf32, #tpu.memory_space<vmem>>, vector<16x16x128xf32>
    %47 = arith.truncf %46 : vector<16x16x128xf32> to vector<16x16x128xbf16>
    %c2_76 = arith.constant 2 : index
    %c2_77 = arith.constant 2 : index
    %c0_78 = arith.constant 0 : index
    %48 = vector.load %arg11[%c2_76, %c2_77, %c0_78] : memref<18x24x128xf32, #tpu.memory_space<vmem>>, vector<16x16x128xf32>
    %49 = arith.truncf %48 : vector<16x16x128xf32> to vector<16x16x128xbf16>
    %50 = tpu.concatenate %45, %47, %49 in 2 : vector<16x16x128xbf16>, vector<16x16x128xbf16>, vector<16x16x128xbf16> -> vector<16x16x384xbf16>
    %51 = vector.shape_cast %50 : vector<16x16x384xbf16> to vector<256x384xbf16>
    %c2_79 = arith.constant 2 : index
    %c0_80 = arith.constant 0 : index
    %c0_81 = arith.constant 0 : index
    %52 = vector.load %arg2[%c2_79, %c0_80, %c0_81] : memref<3x384x128xbf16, #tpu.memory_space<vmem>>, vector<1x384x128xbf16>
    %53 = vector.shape_cast %52 : vector<1x384x128xbf16> to vector<384x128xbf16>
    %cst_82 = arith.constant dense<0.000000e+00> : vector<256x128xf32>
    %54 = tpu.matmul %51, %53, %cst_82 {dimension_numbers = #tpu.dot_dimension_numbers<[1], [0], [0], [1], [0, 0, 1, 1], [], []>} : vector<256x384xbf16>, vector<384x128xbf16>, vector<256x128xf32> -> vector<256x128xf32>
    %55 = arith.addf %43, %54 : vector<256x128xf32>
    %c0_83 = arith.constant 0 : index
    %c0_84 = arith.constant 0 : index
    %56 = vector.load %arg3[%c0_83, %c0_84] : memref<1x128xf32, #tpu.memory_space<vmem>>, vector<1x128xf32>
    %57 = vector.broadcast %56 : vector<1x128xf32> to vector<256x128xf32>
    %58 = arith.addf %55, %57 : vector<256x128xf32>
    %cst_85 = arith.constant 0.000000e+00 : f32
    %59 = vector.broadcast %cst_85 : f32 to vector<256x128xf32>
    %60 = arith.maximumf %58, %59 : vector<256x128xf32>
    %61 = vector.shape_cast %60 : vector<256x128xf32> to vector<16x16x128xf32>
    %c1_86 = arith.constant 1 : index
    %c1_87 = arith.constant 1 : index
    %c0_88 = arith.constant 0 : index
    %62 = vector.load %arg11[%c1_86, %c1_87, %c0_88] : memref<18x24x128xf32, #tpu.memory_space<vmem>>, vector<16x16x128xf32>
    tpu.vector_store %arg11[%c1_86, %c1_87, %c0_88], %61 {strides = array<i32>} : memref<18x24x128xf32, #tpu.memory_space<vmem>>, vector<16x16x128xf32>,
    %c0_89 = arith.constant 0 : index
    %c0_90 = arith.constant 0 : index
    %c0_91 = arith.constant 0 : index
    %63 = vector.load %arg11[%c0_89, %c0_90, %c0_91] : memref<18x24x128xf32, #tpu.memory_space<vmem>>, vector<16x16x128xf32>
    %64 = arith.truncf %63 : vector<16x16x128xf32> to vector<16x16x128xbf16>
    %c0_92 = arith.constant 0 : index
    %c1_93 = arith.constant 1 : index
    %c0_94 = arith.constant 0 : index
    %65 = vector.load %arg11[%c0_92, %c1_93, %c0_94] : memref<18x24x128xf32, #tpu.memory_space<vmem>>, vector<16x16x128xf32>
    %66 = arith.truncf %65 : vector<16x16x128xf32> to vector<16x16x128xbf16>
    %c0_95 = arith.constant 0 : index
    %c2_96 = arith.constant 2 : index
    %c0_97 = arith.constant 0 : index
    %67 = vector.load %arg11[%c0_95, %c2_96, %c0_97] : memref<18x24x128xf32, #tpu.memory_space<vmem>>, vector<16x16x128xf32>
    %68 = arith.truncf %67 : vector<16x16x128xf32> to vector<16x16x128xbf16>
    %69 = tpu.concatenate %64, %66, %68 in 2 : vector<16x16x128xbf16>, vector<16x16x128xbf16>, vector<16x16x128xbf16> -> vector<16x16x384xbf16>
    %70 = vector.shape_cast %69 : vector<16x16x384xbf16> to vector<256x384xbf16>
    %c0_98 = arith.constant 0 : index
    %c0_99 = arith.constant 0 : index
    %c0_100 = arith.constant 0 : index
    %71 = vector.load %arg4[%c0_98, %c0_99, %c0_100] : memref<3x384x64xbf16, #tpu.memory_space<vmem>>, vector<1x384x64xbf16>
    %72 = vector.shape_cast %71 : vector<1x384x64xbf16> to vector<384x64xbf16>
    %cst_101 = arith.constant dense<0.000000e+00> : vector<256x64xf32>
    %73 = tpu.matmul %70, %72, %cst_101 {dimension_numbers = #tpu.dot_dimension_numbers<[1], [0], [0], [1], [0, 0, 1, 1], [], []>} : vector<256x384xbf16>, vector<384x64xbf16>, vector<256x64xf32> -> vector<256x64xf32>
    %c1_102 = arith.constant 1 : index
    %c0_103 = arith.constant 0 : index
    %c0_104 = arith.constant 0 : index
    %74 = vector.load %arg11[%c1_102, %c0_103, %c0_104] : memref<18x24x128xf32, #tpu.memory_space<vmem>>, vector<16x16x128xf32>
    %75 = arith.truncf %74 : vector<16x16x128xf32> to vector<16x16x128xbf16>
    %c1_105 = arith.constant 1 : index
    %c1_106 = arith.constant 1 : index
    %c0_107 = arith.constant 0 : index
    %76 = vector.load %arg11[%c1_105, %c1_106, %c0_107] : memref<18x24x128xf32, #tpu.memory_space<vmem>>, vector<16x16x128xf32>
    %77 = arith.truncf %76 : vector<16x16x128xf32> to vector<16x16x128xbf16>
    %c1_108 = arith.constant 1 : index
    %c2_109 = arith.constant 2 : index
    %c0_110 = arith.constant 0 : index
    %78 = vector.load %arg11[%c1_108, %c2_109, %c0_110] : memref<18x24x128xf32, #tpu.memory_space<vmem>>, vector<16x16x128xf32>
    %79 = arith.truncf %78 : vector<16x16x128xf32> to vector<16x16x128xbf16>
    %80 = tpu.concatenate %75, %77, %79 in 2 : vector<16x16x128xbf16>, vector<16x16x128xbf16>, vector<16x16x128xbf16> -> vector<16x16x384xbf16>
    %81 = vector.shape_cast %80 : vector<16x16x384xbf16> to vector<256x384xbf16>
    %c1_111 = arith.constant 1 : index
    %c0_112 = arith.constant 0 : index
    %c0_113 = arith.constant 0 : index
    %82 = vector.load %arg4[%c1_111, %c0_112, %c0_113] : memref<3x384x64xbf16, #tpu.memory_space<vmem>>, vector<1x384x64xbf16>
    %83 = vector.shape_cast %82 : vector<1x384x64xbf16> to vector<384x64xbf16>
    %cst_114 = arith.constant dense<0.000000e+00> : vector<256x64xf32>
    %84 = tpu.matmul %81, %83, %cst_114 {dimension_numbers = #tpu.dot_dimension_numbers<[1], [0], [0], [1], [0, 0, 1, 1], [], []>} : vector<256x384xbf16>, vector<384x64xbf16>, vector<256x64xf32> -> vector<256x64xf32>
    %85 = arith.addf %73, %84 : vector<256x64xf32>
    %c2_115 = arith.constant 2 : index
    %c0_116 = arith.constant 0 : index
    %c0_117 = arith.constant 0 : index
    %86 = vector.load %arg11[%c2_115, %c0_116, %c0_117] : memref<18x24x128xf32, #tpu.memory_space<vmem>>, vector<16x16x128xf32>
    %87 = arith.truncf %86 : vector<16x16x128xf32> to vector<16x16x128xbf16>
    %c2_118 = arith.constant 2 : index
    %c1_119 = arith.constant 1 : index
    %c0_120 = arith.constant 0 : index
    %88 = vector.load %arg11[%c2_118, %c1_119, %c0_120] : memref<18x24x128xf32, #tpu.memory_space<vmem>>, vector<16x16x128xf32>
    %89 = arith.truncf %88 : vector<16x16x128xf32> to vector<16x16x128xbf16>
    %c2_121 = arith.constant 2 : index
    %c2_122 = arith.constant 2 : index
    %c0_123 = arith.constant 0 : index
    %90 = vector.load %arg11[%c2_121, %c2_122, %c0_123] : memref<18x24x128xf32, #tpu.memory_space<vmem>>, vector<16x16x128xf32>
    %91 = arith.truncf %90 : vector<16x16x128xf32> to vector<16x16x128xbf16>
    %92 = tpu.concatenate %87, %89, %91 in 2 : vector<16x16x128xbf16>, vector<16x16x128xbf16>, vector<16x16x128xbf16> -> vector<16x16x384xbf16>
    %93 = vector.shape_cast %92 : vector<16x16x384xbf16> to vector<256x384xbf16>
    %c2_124 = arith.constant 2 : index
    %c0_125 = arith.constant 0 : index
    %c0_126 = arith.constant 0 : index
    %94 = vector.load %arg4[%c2_124, %c0_125, %c0_126] : memref<3x384x64xbf16, #tpu.memory_space<vmem>>, vector<1x384x64xbf16>
    %95 = vector.shape_cast %94 : vector<1x384x64xbf16> to vector<384x64xbf16>
    %cst_127 = arith.constant dense<0.000000e+00> : vector<256x64xf32>
    %96 = tpu.matmul %93, %95, %cst_127 {dimension_numbers = #tpu.dot_dimension_numbers<[1], [0], [0], [1], [0, 0, 1, 1], [], []>} : vector<256x384xbf16>, vector<384x64xbf16>, vector<256x64xf32> -> vector<256x64xf32>
    %97 = arith.addf %85, %96 : vector<256x64xf32>
    %c0_128 = arith.constant 0 : index
    %c0_129 = arith.constant 0 : index
    %98 = vector.load %arg5[%c0_128, %c0_129] : memref<1x64xf32, #tpu.memory_space<vmem>>, vector<1x64xf32>
    %99 = vector.broadcast %98 : vector<1x64xf32> to vector<256x64xf32>
    %100 = arith.addf %97, %99 : vector<256x64xf32>
    %cst_130 = arith.constant 0.000000e+00 : f32
    %101 = vector.broadcast %cst_130 : f32 to vector<256x64xf32>
    %102 = arith.maximumf %100, %101 : vector<256x64xf32>
    %103 = vector.shape_cast %102 : vector<256x64xf32> to vector<16x16x64xf32>
    %c1_131 = arith.constant 1 : index
    %c1_132 = arith.constant 1 : index
    %c0_133 = arith.constant 0 : index
    %104 = vector.load %arg12[%c1_131, %c1_132, %c0_133] : memref<18x24x64xf32, #tpu.memory_space<vmem>>, vector<16x16x64xf32>
    tpu.vector_store %arg12[%c1_131, %c1_132, %c0_133], %103 {strides = array<i32>} : memref<18x24x64xf32, #tpu.memory_space<vmem>>, vector<16x16x64xf32>,
    %c0_134 = arith.constant 0 : index
    %c0_135 = arith.constant 0 : index
    %c0_136 = arith.constant 0 : index
    %105 = vector.load %arg12[%c0_134, %c0_135, %c0_136] : memref<18x24x64xf32, #tpu.memory_space<vmem>>, vector<16x16x64xf32>
    %106 = vector.shape_cast %105 : vector<16x16x64xf32> to vector<256x64xf32>
    %107 = arith.truncf %106 : vector<256x64xf32> to vector<256x64xbf16>
    %c0_137 = arith.constant 0 : index
    %c0_138 = arith.constant 0 : index
    %c0_139 = arith.constant 0 : index
    %c0_140 = arith.constant 0 : index
    %108 = vector.load %arg6[%c0_137, %c0_138, %c0_139, %c0_140] : memref<3x3x64x24xbf16, #tpu.memory_space<vmem>>, vector<1x1x64x24xbf16>
    %109 = vector.shape_cast %108 : vector<1x1x64x24xbf16> to vector<64x24xbf16>
    %cst_141 = arith.constant dense<0.000000e+00> : vector<256x24xf32>
    %110 = tpu.matmul %107, %109, %cst_141 {dimension_numbers = #tpu.dot_dimension_numbers<[1], [0], [0], [1], [0, 0, 1, 1], [], []>} : vector<256x64xbf16>, vector<64x24xbf16>, vector<256x24xf32> -> vector<256x24xf32>
    %c0_142 = arith.constant 0 : index
    %c1_143 = arith.constant 1 : index
    %c0_144 = arith.constant 0 : index
    %111 = vector.load %arg12[%c0_142, %c1_143, %c0_144] : memref<18x24x64xf32, #tpu.memory_space<vmem>>, vector<16x16x64xf32>
    %112 = vector.shape_cast %111 : vector<16x16x64xf32> to vector<256x64xf32>
    %113 = arith.truncf %112 : vector<256x64xf32> to vector<256x64xbf16>
    %c0_145 = arith.constant 0 : index
    %c1_146 = arith.constant 1 : index
    %c0_147 = arith.constant 0 : index
    %c0_148 = arith.constant 0 : index
    %114 = vector.load %arg6[%c0_145, %c1_146, %c0_147, %c0_148] : memref<3x3x64x24xbf16, #tpu.memory_space<vmem>>, vector<1x1x64x24xbf16>
    %115 = vector.shape_cast %114 : vector<1x1x64x24xbf16> to vector<64x24xbf16>
    %cst_149 = arith.constant dense<0.000000e+00> : vector<256x24xf32>
    %116 = tpu.matmul %113, %115, %cst_149 {dimension_numbers = #tpu.dot_dimension_numbers<[1], [0], [0], [1], [0, 0, 1, 1], [], []>} : vector<256x64xbf16>, vector<64x24xbf16>, vector<256x24xf32> -> vector<256x24xf32>
    %117 = arith.addf %110, %116 : vector<256x24xf32>
    %c0_150 = arith.constant 0 : index
    %c2_151 = arith.constant 2 : index
    %c0_152 = arith.constant 0 : index
    %118 = vector.load %arg12[%c0_150, %c2_151, %c0_152] : memref<18x24x64xf32, #tpu.memory_space<vmem>>, vector<16x16x64xf32>
    %119 = vector.shape_cast %118 : vector<16x16x64xf32> to vector<256x64xf32>
    %120 = arith.truncf %119 : vector<256x64xf32> to vector<256x64xbf16>
    %c0_153 = arith.constant 0 : index
    %c2_154 = arith.constant 2 : index
    %c0_155 = arith.constant 0 : index
    %c0_156 = arith.constant 0 : index
    %121 = vector.load %arg6[%c0_153, %c2_154, %c0_155, %c0_156] : memref<3x3x64x24xbf16, #tpu.memory_space<vmem>>, vector<1x1x64x24xbf16>
    %122 = vector.shape_cast %121 : vector<1x1x64x24xbf16> to vector<64x24xbf16>
    %cst_157 = arith.constant dense<0.000000e+00> : vector<256x24xf32>
    %123 = tpu.matmul %120, %122, %cst_157 {dimension_numbers = #tpu.dot_dimension_numbers<[1], [0], [0], [1], [0, 0, 1, 1], [], []>} : vector<256x64xbf16>, vector<64x24xbf16>, vector<256x24xf32> -> vector<256x24xf32>
    %124 = arith.addf %117, %123 : vector<256x24xf32>
    %c1_158 = arith.constant 1 : index
    %c0_159 = arith.constant 0 : index
    %c0_160 = arith.constant 0 : index
    %125 = vector.load %arg12[%c1_158, %c0_159, %c0_160] : memref<18x24x64xf32, #tpu.memory_space<vmem>>, vector<16x16x64xf32>
    %126 = vector.shape_cast %125 : vector<16x16x64xf32> to vector<256x64xf32>
    %127 = arith.truncf %126 : vector<256x64xf32> to vector<256x64xbf16>
    %c1_161 = arith.constant 1 : index
    %c0_162 = arith.constant 0 : index
    %c0_163 = arith.constant 0 : index
    %c0_164 = arith.constant 0 : index
    %128 = vector.load %arg6[%c1_161, %c0_162, %c0_163, %c0_164] : memref<3x3x64x24xbf16, #tpu.memory_space<vmem>>, vector<1x1x64x24xbf16>
    %129 = vector.shape_cast %128 : vector<1x1x64x24xbf16> to vector<64x24xbf16>
    %cst_165 = arith.constant dense<0.000000e+00> : vector<256x24xf32>
    %130 = tpu.matmul %127, %129, %cst_165 {dimension_numbers = #tpu.dot_dimension_numbers<[1], [0], [0], [1], [0, 0, 1, 1], [], []>} : vector<256x64xbf16>, vector<64x24xbf16>, vector<256x24xf32> -> vector<256x24xf32>
    %131 = arith.addf %124, %130 : vector<256x24xf32>
    %c1_166 = arith.constant 1 : index
    %c1_167 = arith.constant 1 : index
    %c0_168 = arith.constant 0 : index
    %132 = vector.load %arg12[%c1_166, %c1_167, %c0_168] : memref<18x24x64xf32, #tpu.memory_space<vmem>>, vector<16x16x64xf32>
    %133 = vector.shape_cast %132 : vector<16x16x64xf32> to vector<256x64xf32>
    %134 = arith.truncf %133 : vector<256x64xf32> to vector<256x64xbf16>
    %c1_169 = arith.constant 1 : index
    %c1_170 = arith.constant 1 : index
    %c0_171 = arith.constant 0 : index
    %c0_172 = arith.constant 0 : index
    %135 = vector.load %arg6[%c1_169, %c1_170, %c0_171, %c0_172] : memref<3x3x64x24xbf16, #tpu.memory_space<vmem>>, vector<1x1x64x24xbf16>
    %136 = vector.shape_cast %135 : vector<1x1x64x24xbf16> to vector<64x24xbf16>
    %cst_173 = arith.constant dense<0.000000e+00> : vector<256x24xf32>
    %137 = tpu.matmul %134, %136, %cst_173 {dimension_numbers = #tpu.dot_dimension_numbers<[1], [0], [0], [1], [0, 0, 1, 1], [], []>} : vector<256x64xbf16>, vector<64x24xbf16>, vector<256x24xf32> -> vector<256x24xf32>
    %138 = arith.addf %131, %137 : vector<256x24xf32>
    %c1_174 = arith.constant 1 : index
    %c2_175 = arith.constant 2 : index
    %c0_176 = arith.constant 0 : index
    %139 = vector.load %arg12[%c1_174, %c2_175, %c0_176] : memref<18x24x64xf32, #tpu.memory_space<vmem>>, vector<16x16x64xf32>
    %140 = vector.shape_cast %139 : vector<16x16x64xf32> to vector<256x64xf32>
    %141 = arith.truncf %140 : vector<256x64xf32> to vector<256x64xbf16>
    %c1_177 = arith.constant 1 : index
    %c2_178 = arith.constant 2 : index
    %c0_179 = arith.constant 0 : index
    %c0_180 = arith.constant 0 : index
    %142 = vector.load %arg6[%c1_177, %c2_178, %c0_179, %c0_180] : memref<3x3x64x24xbf16, #tpu.memory_space<vmem>>, vector<1x1x64x24xbf16>
    %143 = vector.shape_cast %142 : vector<1x1x64x24xbf16> to vector<64x24xbf16>
    %cst_181 = arith.constant dense<0.000000e+00> : vector<256x24xf32>
    %144 = tpu.matmul %141, %143, %cst_181 {dimension_numbers = #tpu.dot_dimension_numbers<[1], [0], [0], [1], [0, 0, 1, 1], [], []>} : vector<256x64xbf16>, vector<64x24xbf16>, vector<256x24xf32> -> vector<256x24xf32>
    %145 = arith.addf %138, %144 : vector<256x24xf32>
    %c2_182 = arith.constant 2 : index
    %c0_183 = arith.constant 0 : index
    %c0_184 = arith.constant 0 : index
    %146 = vector.load %arg12[%c2_182, %c0_183, %c0_184] : memref<18x24x64xf32, #tpu.memory_space<vmem>>, vector<16x16x64xf32>
    %147 = vector.shape_cast %146 : vector<16x16x64xf32> to vector<256x64xf32>
    %148 = arith.truncf %147 : vector<256x64xf32> to vector<256x64xbf16>
    %c2_185 = arith.constant 2 : index
    %c0_186 = arith.constant 0 : index
    %c0_187 = arith.constant 0 : index
    %c0_188 = arith.constant 0 : index
    %149 = vector.load %arg6[%c2_185, %c0_186, %c0_187, %c0_188] : memref<3x3x64x24xbf16, #tpu.memory_space<vmem>>, vector<1x1x64x24xbf16>
    %150 = vector.shape_cast %149 : vector<1x1x64x24xbf16> to vector<64x24xbf16>
    %cst_189 = arith.constant dense<0.000000e+00> : vector<256x24xf32>
    %151 = tpu.matmul %148, %150, %cst_189 {dimension_numbers = #tpu.dot_dimension_numbers<[1], [0], [0], [1], [0, 0, 1, 1], [], []>} : vector<256x64xbf16>, vector<64x24xbf16>, vector<256x24xf32> -> vector<256x24xf32>
    %152 = arith.addf %145, %151 : vector<256x24xf32>
    %c2_190 = arith.constant 2 : index
    %c1_191 = arith.constant 1 : index
    %c0_192 = arith.constant 0 : index
    %153 = vector.load %arg12[%c2_190, %c1_191, %c0_192] : memref<18x24x64xf32, #tpu.memory_space<vmem>>, vector<16x16x64xf32>
    %154 = vector.shape_cast %153 : vector<16x16x64xf32> to vector<256x64xf32>
    %155 = arith.truncf %154 : vector<256x64xf32> to vector<256x64xbf16>
    %c2_193 = arith.constant 2 : index
    %c1_194 = arith.constant 1 : index
    %c0_195 = arith.constant 0 : index
    %c0_196 = arith.constant 0 : index
    %156 = vector.load %arg6[%c2_193, %c1_194, %c0_195, %c0_196] : memref<3x3x64x24xbf16, #tpu.memory_space<vmem>>, vector<1x1x64x24xbf16>
    %157 = vector.shape_cast %156 : vector<1x1x64x24xbf16> to vector<64x24xbf16>
    %cst_197 = arith.constant dense<0.000000e+00> : vector<256x24xf32>
    %158 = tpu.matmul %155, %157, %cst_197 {dimension_numbers = #tpu.dot_dimension_numbers<[1], [0], [0], [1], [0, 0, 1, 1], [], []>} : vector<256x64xbf16>, vector<64x24xbf16>, vector<256x24xf32> -> vector<256x24xf32>
    %159 = arith.addf %152, %158 : vector<256x24xf32>
    %c2_198 = arith.constant 2 : index
    %c2_199 = arith.constant 2 : index
    %c0_200 = arith.constant 0 : index
    %160 = vector.load %arg12[%c2_198, %c2_199, %c0_200] : memref<18x24x64xf32, #tpu.memory_space<vmem>>, vector<16x16x64xf32>
    %161 = vector.shape_cast %160 : vector<16x16x64xf32> to vector<256x64xf32>
    %162 = arith.truncf %161 : vector<256x64xf32> to vector<256x64xbf16>
    %c2_201 = arith.constant 2 : index
    %c2_202 = arith.constant 2 : index
    %c0_203 = arith.constant 0 : index
    %c0_204 = arith.constant 0 : index
    %163 = vector.load %arg6[%c2_201, %c2_202, %c0_203, %c0_204] : memref<3x3x64x24xbf16, #tpu.memory_space<vmem>>, vector<1x1x64x24xbf16>
    %164 = vector.shape_cast %163 : vector<1x1x64x24xbf16> to vector<64x24xbf16>
    %cst_205 = arith.constant dense<0.000000e+00> : vector<256x24xf32>
    %165 = tpu.matmul %162, %164, %cst_205 {dimension_numbers = #tpu.dot_dimension_numbers<[1], [0], [0], [1], [0, 0, 1, 1], [], []>} : vector<256x64xbf16>, vector<64x24xbf16>, vector<256x24xf32> -> vector<256x24xf32>
    %166 = arith.addf %159, %165 : vector<256x24xf32>
    %c0_206 = arith.constant 0 : index
    %c0_207 = arith.constant 0 : index
    %167 = vector.load %arg7[%c0_206, %c0_207] : memref<1x24xf32, #tpu.memory_space<vmem>>, vector<1x24xf32>
    %168 = vector.broadcast %167 : vector<1x24xf32> to vector<256x24xf32>
    %169 = arith.addf %166, %168 : vector<256x24xf32>
    %cst_208 = arith.constant 0.000000e+00 : f32
    %170 = vector.broadcast %cst_208 : f32 to vector<256x24xf32>
    %171 = arith.maximumf %169, %170 : vector<256x24xf32>
    %172 = vector.shape_cast %171 : vector<256x24xf32> to vector<16x16x24xf32>
    %c1_209 = arith.constant 1 : index
    %c1_210 = arith.constant 1 : index
    %c0_211 = arith.constant 0 : index
    %173 = vector.load %arg13[%c1_209, %c1_210, %c0_211] : memref<18x24x24xf32, #tpu.memory_space<vmem>>, vector<16x16x24xf32>
    tpu.vector_store %arg13[%c1_209, %c1_210, %c0_211], %172 {strides = array<i32>} : memref<18x24x24xf32, #tpu.memory_space<vmem>>, vector<16x16x24xf32>,
    %c0_212 = arith.constant 0 : index
    %c0_213 = arith.constant 0 : index
    %c0_214 = arith.constant 0 : index
    %174 = vector.load %arg13[%c0_212, %c0_213, %c0_214] : memref<18x24x24xf32, #tpu.memory_space<vmem>>, vector<16x16x24xf32>
    %175 = vector.shape_cast %174 : vector<16x16x24xf32> to vector<256x24xf32>
    %176 = arith.truncf %175 : vector<256x24xf32> to vector<256x24xbf16>
    %c0_215 = arith.constant 0 : index
    %c0_216 = arith.constant 0 : index
    %c0_217 = arith.constant 0 : index
    %c0_218 = arith.constant 0 : index
    %177 = vector.load %arg8[%c0_215, %c0_216, %c0_217, %c0_218] : memref<3x3x24x6xbf16, #tpu.memory_space<vmem>>, vector<1x1x24x6xbf16>
    %178 = vector.shape_cast %177 : vector<1x1x24x6xbf16> to vector<24x6xbf16>
    %cst_219 = arith.constant dense<0.000000e+00> : vector<256x6xf32>
    %179 = tpu.matmul %176, %178, %cst_219 {dimension_numbers = #tpu.dot_dimension_numbers<[1], [0], [0], [1], [0, 0, 1, 1], [], []>} : vector<256x24xbf16>, vector<24x6xbf16>, vector<256x6xf32> -> vector<256x6xf32>
    %c0_220 = arith.constant 0 : index
    %c1_221 = arith.constant 1 : index
    %c0_222 = arith.constant 0 : index
    %180 = vector.load %arg13[%c0_220, %c1_221, %c0_222] : memref<18x24x24xf32, #tpu.memory_space<vmem>>, vector<16x16x24xf32>
    %181 = vector.shape_cast %180 : vector<16x16x24xf32> to vector<256x24xf32>
    %182 = arith.truncf %181 : vector<256x24xf32> to vector<256x24xbf16>
    %c0_223 = arith.constant 0 : index
    %c1_224 = arith.constant 1 : index
    %c0_225 = arith.constant 0 : index
    %c0_226 = arith.constant 0 : index
    %183 = vector.load %arg8[%c0_223, %c1_224, %c0_225, %c0_226] : memref<3x3x24x6xbf16, #tpu.memory_space<vmem>>, vector<1x1x24x6xbf16>
    %184 = vector.shape_cast %183 : vector<1x1x24x6xbf16> to vector<24x6xbf16>
    %cst_227 = arith.constant dense<0.000000e+00> : vector<256x6xf32>
    %185 = tpu.matmul %182, %184, %cst_227 {dimension_numbers = #tpu.dot_dimension_numbers<[1], [0], [0], [1], [0, 0, 1, 1], [], []>} : vector<256x24xbf16>, vector<24x6xbf16>, vector<256x6xf32> -> vector<256x6xf32>
    %186 = arith.addf %179, %185 : vector<256x6xf32>
    %c0_228 = arith.constant 0 : index
    %c2_229 = arith.constant 2 : index
    %c0_230 = arith.constant 0 : index
    %187 = vector.load %arg13[%c0_228, %c2_229, %c0_230] : memref<18x24x24xf32, #tpu.memory_space<vmem>>, vector<16x16x24xf32>
    %188 = vector.shape_cast %187 : vector<16x16x24xf32> to vector<256x24xf32>
    %189 = arith.truncf %188 : vector<256x24xf32> to vector<256x24xbf16>
    %c0_231 = arith.constant 0 : index
    %c2_232 = arith.constant 2 : index
    %c0_233 = arith.constant 0 : index
    %c0_234 = arith.constant 0 : index
    %190 = vector.load %arg8[%c0_231, %c2_232, %c0_233, %c0_234] : memref<3x3x24x6xbf16, #tpu.memory_space<vmem>>, vector<1x1x24x6xbf16>
    %191 = vector.shape_cast %190 : vector<1x1x24x6xbf16> to vector<24x6xbf16>
    %cst_235 = arith.constant dense<0.000000e+00> : vector<256x6xf32>
    %192 = tpu.matmul %189, %191, %cst_235 {dimension_numbers = #tpu.dot_dimension_numbers<[1], [0], [0], [1], [0, 0, 1, 1], [], []>} : vector<256x24xbf16>, vector<24x6xbf16>, vector<256x6xf32> -> vector<256x6xf32>
    %193 = arith.addf %186, %192 : vector<256x6xf32>
    %c1_236 = arith.constant 1 : index
    %c0_237 = arith.constant 0 : index
    %c0_238 = arith.constant 0 : index
    %194 = vector.load %arg13[%c1_236, %c0_237, %c0_238] : memref<18x24x24xf32, #tpu.memory_space<vmem>>, vector<16x16x24xf32>
    %195 = vector.shape_cast %194 : vector<16x16x24xf32> to vector<256x24xf32>
    %196 = arith.truncf %195 : vector<256x24xf32> to vector<256x24xbf16>
    %c1_239 = arith.constant 1 : index
    %c0_240 = arith.constant 0 : index
    %c0_241 = arith.constant 0 : index
    %c0_242 = arith.constant 0 : index
    %197 = vector.load %arg8[%c1_239, %c0_240, %c0_241, %c0_242] : memref<3x3x24x6xbf16, #tpu.memory_space<vmem>>, vector<1x1x24x6xbf16>
    %198 = vector.shape_cast %197 : vector<1x1x24x6xbf16> to vector<24x6xbf16>
    %cst_243 = arith.constant dense<0.000000e+00> : vector<256x6xf32>
    %199 = tpu.matmul %196, %198, %cst_243 {dimension_numbers = #tpu.dot_dimension_numbers<[1], [0], [0], [1], [0, 0, 1, 1], [], []>} : vector<256x24xbf16>, vector<24x6xbf16>, vector<256x6xf32> -> vector<256x6xf32>
    %200 = arith.addf %193, %199 : vector<256x6xf32>
    %c1_244 = arith.constant 1 : index
    %c1_245 = arith.constant 1 : index
    %c0_246 = arith.constant 0 : index
    %201 = vector.load %arg13[%c1_244, %c1_245, %c0_246] : memref<18x24x24xf32, #tpu.memory_space<vmem>>, vector<16x16x24xf32>
    %202 = vector.shape_cast %201 : vector<16x16x24xf32> to vector<256x24xf32>
    %203 = arith.truncf %202 : vector<256x24xf32> to vector<256x24xbf16>
    %c1_247 = arith.constant 1 : index
    %c1_248 = arith.constant 1 : index
    %c0_249 = arith.constant 0 : index
    %c0_250 = arith.constant 0 : index
    %204 = vector.load %arg8[%c1_247, %c1_248, %c0_249, %c0_250] : memref<3x3x24x6xbf16, #tpu.memory_space<vmem>>, vector<1x1x24x6xbf16>
    %205 = vector.shape_cast %204 : vector<1x1x24x6xbf16> to vector<24x6xbf16>
    %cst_251 = arith.constant dense<0.000000e+00> : vector<256x6xf32>
    %206 = tpu.matmul %203, %205, %cst_251 {dimension_numbers = #tpu.dot_dimension_numbers<[1], [0], [0], [1], [0, 0, 1, 1], [], []>} : vector<256x24xbf16>, vector<24x6xbf16>, vector<256x6xf32> -> vector<256x6xf32>
    %207 = arith.addf %200, %206 : vector<256x6xf32>
    %c1_252 = arith.constant 1 : index
    %c2_253 = arith.constant 2 : index
    %c0_254 = arith.constant 0 : index
    %208 = vector.load %arg13[%c1_252, %c2_253, %c0_254] : memref<18x24x24xf32, #tpu.memory_space<vmem>>, vector<16x16x24xf32>
    %209 = vector.shape_cast %208 : vector<16x16x24xf32> to vector<256x24xf32>
    %210 = arith.truncf %209 : vector<256x24xf32> to vector<256x24xbf16>
    %c1_255 = arith.constant 1 : index
    %c2_256 = arith.constant 2 : index
    %c0_257 = arith.constant 0 : index
    %c0_258 = arith.constant 0 : index
    %211 = vector.load %arg8[%c1_255, %c2_256, %c0_257, %c0_258] : memref<3x3x24x6xbf16, #tpu.memory_space<vmem>>, vector<1x1x24x6xbf16>
    %212 = vector.shape_cast %211 : vector<1x1x24x6xbf16> to vector<24x6xbf16>
    %cst_259 = arith.constant dense<0.000000e+00> : vector<256x6xf32>
    %213 = tpu.matmul %210, %212, %cst_259 {dimension_numbers = #tpu.dot_dimension_numbers<[1], [0], [0], [1], [0, 0, 1, 1], [], []>} : vector<256x24xbf16>, vector<24x6xbf16>, vector<256x6xf32> -> vector<256x6xf32>
    %214 = arith.addf %207, %213 : vector<256x6xf32>
    %c2_260 = arith.constant 2 : index
    %c0_261 = arith.constant 0 : index
    %c0_262 = arith.constant 0 : index
    %215 = vector.load %arg13[%c2_260, %c0_261, %c0_262] : memref<18x24x24xf32, #tpu.memory_space<vmem>>, vector<16x16x24xf32>
    %216 = vector.shape_cast %215 : vector<16x16x24xf32> to vector<256x24xf32>
    %217 = arith.truncf %216 : vector<256x24xf32> to vector<256x24xbf16>
    %c2_263 = arith.constant 2 : index
    %c0_264 = arith.constant 0 : index
    %c0_265 = arith.constant 0 : index
    %c0_266 = arith.constant 0 : index
    %218 = vector.load %arg8[%c2_263, %c0_264, %c0_265, %c0_266] : memref<3x3x24x6xbf16, #tpu.memory_space<vmem>>, vector<1x1x24x6xbf16>
    %219 = vector.shape_cast %218 : vector<1x1x24x6xbf16> to vector<24x6xbf16>
    %cst_267 = arith.constant dense<0.000000e+00> : vector<256x6xf32>
    %220 = tpu.matmul %217, %219, %cst_267 {dimension_numbers = #tpu.dot_dimension_numbers<[1], [0], [0], [1], [0, 0, 1, 1], [], []>} : vector<256x24xbf16>, vector<24x6xbf16>, vector<256x6xf32> -> vector<256x6xf32>
    %221 = arith.addf %214, %220 : vector<256x6xf32>
    %c2_268 = arith.constant 2 : index
    %c1_269 = arith.constant 1 : index
    %c0_270 = arith.constant 0 : index
    %222 = vector.load %arg13[%c2_268, %c1_269, %c0_270] : memref<18x24x24xf32, #tpu.memory_space<vmem>>, vector<16x16x24xf32>
    %223 = vector.shape_cast %222 : vector<16x16x24xf32> to vector<256x24xf32>
    %224 = arith.truncf %223 : vector<256x24xf32> to vector<256x24xbf16>
    %c2_271 = arith.constant 2 : index
    %c1_272 = arith.constant 1 : index
    %c0_273 = arith.constant 0 : index
    %c0_274 = arith.constant 0 : index
    %225 = vector.load %arg8[%c2_271, %c1_272, %c0_273, %c0_274] : memref<3x3x24x6xbf16, #tpu.memory_space<vmem>>, vector<1x1x24x6xbf16>
    %226 = vector.shape_cast %225 : vector<1x1x24x6xbf16> to vector<24x6xbf16>
    %cst_275 = arith.constant dense<0.000000e+00> : vector<256x6xf32>
    %227 = tpu.matmul %224, %226, %cst_275 {dimension_numbers = #tpu.dot_dimension_numbers<[1], [0], [0], [1], [0, 0, 1, 1], [], []>} : vector<256x24xbf16>, vector<24x6xbf16>, vector<256x6xf32> -> vector<256x6xf32>
    %228 = arith.addf %221, %227 : vector<256x6xf32>
    %c2_276 = arith.constant 2 : index
    %c2_277 = arith.constant 2 : index
    %c0_278 = arith.constant 0 : index
    %229 = vector.load %arg13[%c2_276, %c2_277, %c0_278] : memref<18x24x24xf32, #tpu.memory_space<vmem>>, vector<16x16x24xf32>
    %230 = vector.shape_cast %229 : vector<16x16x24xf32> to vector<256x24xf32>
    %231 = arith.truncf %230 : vector<256x24xf32> to vector<256x24xbf16>
    %c2_279 = arith.constant 2 : index
    %c2_280 = arith.constant 2 : index
    %c0_281 = arith.constant 0 : index
    %c0_282 = arith.constant 0 : index
    %232 = vector.load %arg8[%c2_279, %c2_280, %c0_281, %c0_282] : memref<3x3x24x6xbf16, #tpu.memory_space<vmem>>, vector<1x1x24x6xbf16>
    %233 = vector.shape_cast %232 : vector<1x1x24x6xbf16> to vector<24x6xbf16>
    %cst_283 = arith.constant dense<0.000000e+00> : vector<256x6xf32>
    %234 = tpu.matmul %231, %233, %cst_283 {dimension_numbers = #tpu.dot_dimension_numbers<[1], [0], [0], [1], [0, 0, 1, 1], [], []>} : vector<256x24xbf16>, vector<24x6xbf16>, vector<256x6xf32> -> vector<256x6xf32>
    %235 = arith.addf %228, %234 : vector<256x6xf32>
    %c0_284 = arith.constant 0 : index
    %c0_285 = arith.constant 0 : index
    %236 = vector.load %arg9[%c0_284, %c0_285] : memref<1x6xf32, #tpu.memory_space<vmem>>, vector<1x6xf32>
    %237 = vector.broadcast %236 : vector<1x6xf32> to vector<256x6xf32>
    %238 = arith.addf %235, %237 : vector<256x6xf32>
    %cst_286 = arith.constant 0.000000e+00 : f32
    %239 = vector.broadcast %cst_286 : f32 to vector<256x6xf32>
    %240 = arith.maximumf %238, %239 : vector<256x6xf32>
    %cst_287 = arith.constant dense<0xFF800000> : vector<256xf32>
    %241 = vector.multi_reduction <maximumf>, %240, %cst_287 [1] : vector<256x6xf32> to vector<256xf32>
    %242 = vector.shape_cast %241 : vector<256xf32> to vector<256x1xf32>
    %243 = vector.broadcast %242 : vector<256x1xf32> to vector<256x6xf32>
    %244 = arith.subf %240, %243 : vector<256x6xf32>
    %245 = math.exp %244 : vector<256x6xf32>
    %cst_288 = arith.constant dense<0.000000e+00> : vector<256xf32>
    %246 = vector.multi_reduction <add>, %245, %cst_288 [1] : vector<256x6xf32> to vector<256xf32>
    %247 = vector.shape_cast %246 : vector<256xf32> to vector<256x1xf32>
    %248 = tpu.reciprocal %247 {approx = true} : vector<256x1xf32> -> vector<256x1xf32>
    %249 = vector.broadcast %248 : vector<256x1xf32> to vector<256x6xf32>
    %250 = arith.mulf %245, %249 : vector<256x6xf32>
    %251 = vector.shape_cast %250 : vector<256x6xf32> to vector<1x16x16x6xf32>
    %c0_289 = arith.constant 0 : index
    %c0_290 = arith.constant 0 : index
    %c0_291 = arith.constant 0 : index
    %c0_292 = arith.constant 0 : index
    %252 = vector.load %arg10[%c0_289, %c0_290, %c0_291, %c0_292] : memref<1x16x16x6xf32, #tpu.memory_space<vmem>>, vector<1x16x16x6xf32>
    tpu.vector_store %arg10[%c0_289, %c0_290, %c0_291, %c0_292], %251 {strides = array<i32>} : memref<1x16x16x6xf32, #tpu.memory_space<vmem>>, vector<1x16x16x6xf32>,
    return
  }
  func.func @transform_0(%arg0: i32) -> (i32, i32, i32, i32) {
    %c0_i32 = arith.constant 0 : i32
    %c0_i32_0 = arith.constant 0 : i32
    %c0_i32_1 = arith.constant 0 : i32
    %c0_i32_2 = arith.constant 0 : i32
    return %arg0, %c0_i32, %c0_i32_0, %c0_i32_1 : i32, i32, i32, i32
  }
  func.func @transform_1(%arg0: i32) -> (i32, i32, i32) {
    %c0_i32 = arith.constant 0 : i32
    %c0_i32_0 = arith.constant 0 : i32
    %c0_i32_1 = arith.constant 0 : i32
    %c0_i32_2 = arith.constant 0 : i32
    return %c0_i32, %c0_i32_0, %c0_i32_1 : i32, i32, i32
  }
  func.func @transform_2(%arg0: i32) -> (i32, i32) {
    %c0_i32 = arith.constant 0 : i32
    %c0_i32_0 = arith.constant 0 : i32
    %c0_i32_1 = arith.constant 0 : i32
    return %c0_i32, %c0_i32_0 : i32, i32
  }
  func.func @transform_3(%arg0: i32) -> (i32, i32, i32) {
    %c0_i32 = arith.constant 0 : i32
    %c0_i32_0 = arith.constant 0 : i32
    %c0_i32_1 = arith.constant 0 : i32
    %c0_i32_2 = arith.constant 0 : i32
    return %c0_i32, %c0_i32_0, %c0_i32_1 : i32, i32, i32
  }
  func.func @transform_4(%arg0: i32) -> (i32, i32) {
    %c0_i32 = arith.constant 0 : i32
    %c0_i32_0 = arith.constant 0 : i32
    %c0_i32_1 = arith.constant 0 : i32
    return %c0_i32, %c0_i32_0 : i32, i32
  }
  func.func @transform_5(%arg0: i32) -> (i32, i32, i32, i32) {
    %c0_i32 = arith.constant 0 : i32
    %c0_i32_0 = arith.constant 0 : i32
    %c0_i32_1 = arith.constant 0 : i32
    %c0_i32_2 = arith.constant 0 : i32
    %c0_i32_3 = arith.constant 0 : i32
    return %c0_i32, %c0_i32_0, %c0_i32_1, %c0_i32_2 : i32, i32, i32, i32
  }
  func.func @transform_6(%arg0: i32) -> (i32, i32) {
    %c0_i32 = arith.constant 0 : i32
    %c0_i32_0 = arith.constant 0 : i32
    %c0_i32_1 = arith.constant 0 : i32
    return %c0_i32, %c0_i32_0 : i32, i32
  }
  func.func @transform_7(%arg0: i32) -> (i32, i32, i32, i32) {
    %c0_i32 = arith.constant 0 : i32
    %c0_i32_0 = arith.constant 0 : i32
    %c0_i32_1 = arith.constant 0 : i32
    %c0_i32_2 = arith.constant 0 : i32
    %c0_i32_3 = arith.constant 0 : i32
    return %c0_i32, %c0_i32_0, %c0_i32_1, %c0_i32_2 : i32, i32, i32, i32
  }
  func.func @transform_8(%arg0: i32) -> (i32, i32) {
    %c0_i32 = arith.constant 0 : i32
    %c0_i32_0 = arith.constant 0 : i32
    %c0_i32_1 = arith.constant 0 : i32
    return %c0_i32, %c0_i32_0 : i32, i32
  }
  func.func @transform_9(%arg0: i32) -> (i32, i32, i32, i32) {
    %c0_i32 = arith.constant 0 : i32
    %c0_i32_0 = arith.constant 0 : i32
    %c0_i32_1 = arith.constant 0 : i32
    %c0_i32_2 = arith.constant 0 : i32
    return %arg0, %c0_i32, %c0_i32_0, %c0_i32_1 : i32, i32, i32, i32
  }
}

</mosaic_0001>

<bundles_post_ra>
// kernel: reid_forward.1
= control target key start
LH: loop header
LB: loop body
LE: loop exit
PB: predicated region body
PF: predicated region fallthrough
CT: control target
= control target key end

     0   :  { %s12986_s30 = smov 0   ;;  %s17294_s0 = inlined_call_operand.vmem [shape: f32[2,16,16,128], index: 0, kind: input, shape index: {}]   ;;  %s17295_s1 = inlined_call_operand.vmem [shape: bf16[3,384,128], index: 1, kind: input, shape index: {}]   ;;  %s17296_s2 = inlined_call_operand.vmem [shape: f32[1,128], index: 2, kind: input, shape index: {}]   ;;  %s17297_s3 = inlined_call_operand.vmem [shape: bf16[3,384,64], index: 3, kind: input, shape index: {}]   ;;  %s17298_s4 = inlined_call_operand.vmem [shape: f32[1,64], index: 4, kind: input, shape index: {}]   ;;  %s17299_s5 = inlined_call_operand.vmem [shape: bf16[3,3,64,24], index: 5, kind: input, shape index: {}]   ;;  %s17300_s6 = inlined_call_operand.vmem [shape: f32[1,24], index: 6, kind: input, shape index: {}]   ;;  %s17301_s7 = inlined_call_operand.vmem [shape: bf16[3,3,24,6], index: 7, kind: input, shape index: {}]   ;;  %s17302_s8 = inlined_call_operand.vmem [shape: f32[1,6], index: 8, kind: input, shape index: {}]   ;;  %s17303_s9 = inlined_call_operand.vmem [shape: f32[2,16,16,6], index: 9, kind: output, shape index: {}]  }
   0x1 LB: > { %s11253_s10 = sadd.s32 4294967295, %s12932_s30   ;;  %p11257_p0 = scmp.ge.s32.totalorder %s12932_s30, 1  ;;  %s12932_s30 = sphi %s12986_s30, %s19_s30  }
   0x2   : > { %p287_p1 = scmp.lt.s32.totalorder %s12932_s30, 3 }
   0x4   : > { %p288_p2 = pnand %p11257_p0, %p287_p1 }
   0x6   : > { %291 = sbr.rel (%p288_p2) target bundleno = 3173 (0xc65), region = 56 }
   0xb   : > { %v12621_v0 = vld [vmem:[%s17295_s1 + $0xf8] sm:$0xff]  ;;  %p323_p3 = scmp.lt.s32.totalorder %s11253_s10, 1  ;;  %v12934_v4 = vmov 0.0   ;;  %v12620_v5 = vld [vmem:[%s17295_s1 + $0xf0] sm:$0xff]  ;;  %v12619_v9 = vld [vmem:[%s17295_s1 + $0xe8] sm:$0xff]  ;;  %v12935_v44 = vmov 0.0|0.0  }
   0xc   : > { %v12629_v1 = vld [vmem:[%s17295_s1 + $0x138] sm:$0xff]  ;;  %342 = vst [vmem:[#allocation2 + $0x18] sm:$0x1] %v12934_v4  ;;  %1723 = vmatpush.bf16.msra.mxu0 %v12621_v0  ;;  %v12628_v6 = vld [vmem:[%s17295_s1 + $0x130] sm:$0xff]  ;;  %v12627_v10 = vld [vmem:[%s17295_s1 + $0x128] sm:$0xff]  ;;  %v746_v45 = vunpack.c.l.b16 %v12935_v44  ;;  %vm374_vm0 = vcmask 523264  }
   0xd   : > { %v12637_v2 = vld [vmem:[%s17295_s1 + $0x178] sm:$0xff]  ;;  %1812 = vmatpush.bf16.msra.mxu1 %v12629_v1  ;;  %s17604_s10 = smov (!%p323_p3, %s11253_s10), 1  ;;  %334 = vst [vmem:[#allocation2] sm:$0xff] %v12934_v4  ;;  %v12636_v7 = vld [vmem:[%s17295_s1 + $0x170] sm:$0xff]  ;;  %v12635_v11 = vld [vmem:[%s17295_s1 + $0x168] sm:$0xff]  ;;  %vm383_vm1 = vcmask 516096  }
   0xe   : > { %v12597_v3 = vld [vmem:[%s17295_s1 + $0x38] sm:$0xff]  ;;  %1901 = vmatpush.bf16.msra.mxu2 %v12637_v2  ;;  %v12596_v8 = vld [vmem:[%s17295_s1 + $0x30] sm:$0xff]  ;;  %335 = vst [vmem:[#allocation2 + $0x8] sm:$0xff] %v12934_v4  ;;  %s12588_s27 = sshll.u32 %s17604_s10, 8  ;;  %v12595_v12 = vld [vmem:[%s17295_s1 + $0x28] sm:$0xff]  ;;  %v778_v52 = vpack.c.b16 %v746_v45, %v746_v45  ;;  %vm8871_vm2 = vcmask 1043456  }
   0xf   : > { %2134 = vmatpush.bf16.msra.mxu3 %v12597_v3  ;;  %336 = vst [vmem:[#allocation2 + $0x10] sm:$0xff] %v12934_v4  ;;  %s13044_s19 = scalar_lea.vmem %s17294_s0, %s12588_s27  ;;  %v12618_v13 = vld [vmem:[%s17295_s1 + $0xe0] sm:$0xff]  ;;  %v12617_v19 = vld [vmem:[%s17295_s1 + $0xd8] sm:$0xff]  ;;  %v12616_v23 = vld [vmem:[%s17295_s1 + $0xd0] sm:$0xff]  ;;  %vm416_vm3 = vcmask 195584   ;;  %vm425_vm4 = vcmask 188416   ;;  %s17091_s14 = scalar_lea.vmem %s17303_s9, %s12588_s27 }
  0x10   : > { %338 = vst [vmem:[#allocation2 + $0x198] sm:$0xff] %v12934_v4  ;;  %1724 = vmatpush.bf16.msra.mxu0 %v12620_v5  ;;  %v12626_v14 = vld [vmem:[%s17295_s1 + $0x120] sm:$0xff]  ;;  %v459_v18 = vld [vmem:[%s13044_s19 + $0x8] sm:$0xff]  ;;  %v12625_v20 = vld [vmem:[%s17295_s1 + $0x118] sm:$0xff]  ;;  %vm10813_vm5 = vcmask 48128  }
  0x11   : > { %1813 = vmatpush.bf16.msra.mxu1 %v12628_v6  ;;  %339 = vst [vmem:[#allocation2 + $0x1a0] sm:$0xff] %v12934_v4  ;;  %v458_v15 = vld [vmem:[%s13044_s19] sm:$0xff]  ;;  %v12633_v21 = vld [vmem:[%s17295_s1 + $0x158] sm:$0xff]  ;;  %v12624_v24 = vld [vmem:[%s17295_s1 + $0x110] sm:$0xff]  ;;  %v1147_v32 = vpack.c.bf16 %v459_v18, %v459_v18 }
  0x12   : > { %1902 = vmatpush.bf16.msra.mxu2 %v12636_v7  ;;  %340 = vst [vmem:[#allocation2 + $0x1a8] sm:$0xff] %v12934_v4  ;;  %v12634_v16 = vld [vmem:[%s17295_s1 + $0x160] sm:$0xff]  ;;  %v12593_v22 = vld [vmem:[%s17295_s1 + $0x18] sm:$0xff]  ;;  %v12632_v26 = vld [vmem:[%s17295_s1 + $0x150] sm:$0xff]  ;;  %v1146_v31 = vpack.c.bf16 %v458_v15, %v458_v15 }
  0x13   : > { %2135 = vmatpush.bf16.msra.mxu3 %v12596_v8  ;;  %343 = vst [vmem:[#allocation2 + $0x30] sm:$0x1] %v12934_v4  ;;  %v12594_v17 = vld [vmem:[%s17295_s1 + $0x20] sm:$0xff]  ;;  %v12592_v27 = vld [vmem:[%s17295_s1 + $0x10] sm:$0xff]  ;;  %v12615_v33 = vld [vmem:[%s17295_s1 + $0xc8] sm:$0xff]  ;;  %v1371_v40 = vunpack.c.l.b16 %v1147_v32 }
  0x14   : > { %344 = vst [vmem:[#allocation2 + $0x48] sm:$0x1] %v12934_v4  ;;  %1725 = vmatpush.bf16.msra.mxu0 %v12619_v9  ;;  %v12623_v34 = vld [vmem:[%s17295_s1 + $0x108] sm:$0xff]  ;;  %v1370_v39 = vunpack.c.l.b16 %v1146_v31  ;;  %v12614_v41 = vld [vmem:[%s17295_s1 + $0xc0] sm:$0xff]  ;;  %v12605_v48 = vld [vmem:[%s17295_s1 + $0x78] sm:$0xff] }
  0x15   : > { %1814 = vmatpush.bf16.msra.mxu1 %v12627_v10  ;;  %345 = vst [vmem:[#allocation2 + $0x60] sm:$0x1] %v12934_v4  ;;  %v12631_v35 = vld [vmem:[%s17295_s1 + $0x148] sm:$0xff]  ;;  %v12622_v42 = vld [vmem:[%s17295_s1 + $0x100] sm:$0xff]  ;;  %v460_v57 = vld [vmem:[%s13044_s19 + $0x10] sm:$0xff] }
  0x16   : > { %1903 = vmatpush.bf16.msra.mxu2 %v12635_v11  ;;  %490 = vst [vmem:[#allocation2 + $0x19] sm:$0xff] %v458_v15  ;;  %v12591_v36 = vld [vmem:[%s17295_s1 + $0x8] sm:$0xff]  ;;  %v12630_v46 = vld [vmem:[%s17295_s1 + $0x140] sm:$0xff]  ;;  %v1402_v50 = vpack.c.b16 %v1371_v40, %v1370_v39  ;;  %v461_v58 = vld [vmem:[%s13044_s19 + $0x18] sm:$0xff]  ;;  %v1148_v60 = vpack.c.bf16 %v460_v57, %v460_v57 }
  0x17   : > { %2136 = vmatpush.bf16.msra.mxu3 %v12595_v12  ;;  %491 = vst [vmem:[#allocation2 + $0x21] sm:$0xff] %v459_v18  ;;  %v12590_v47 = vld [vmem:[%s17295_s1] sm:$0xff]  ;;  %v1149_v61 = vpack.c.bf16 %v461_v58, %v461_v58  ;;  %v12604_v63 = vld [vmem:[%s17295_s1 + $0x70] sm:$0xff]  ;;  %v463_v2 = vld [vmem:[%s13044_s19 + $0x28] sm:$0xff] }
  0x18   : > { %346 = vst [vmem:[#allocation2 + $0x78] sm:$0x1] %v12934_v4  ;;  %1726 = vmatpush.bf16.msra.mxu0 %v12618_v13  ;;  %v462_v62 = vld [vmem:[%s13044_s19 + $0x20] sm:$0xff]  ;;  %v1372_v0 = vunpack.c.l.b16 %v1148_v60  ;;  %v464_v3 = vld [vmem:[%s13044_s19 + $0x30] sm:$0xff]  ;;  %v465_v5 = vld [vmem:[%s13044_s19 + $0x38] sm:$0xff] }
  0x19   : > { %1815 = vmatpush.bf16.msra.mxu1 %v12626_v14  ;;  %347 = vst [vmem:[#allocation2 + $0x90] sm:$0x1] %v12934_v4  ;;  %v1373_v1 = vunpack.c.l.b16 %v1149_v61  ;;  %v1150_v18 = vpack.c.bf16 %v462_v62, %v462_v62  ;;  %v12603_v44 = vld [vmem:[%s17295_s1 + $0x68] sm:$0xff]  ;;  %v468_v45 = vld [vmem:[%s13044_s19 + $0x50] sm:$0xff] }
  0x1a   : > { %1904 = vmatpush.bf16.msra.mxu2 %v12634_v16  ;;  %348 = vst [vmem:[#allocation2 + $0xa8] sm:$0x1] %v12934_v4 }
  0x1b   : > { %2137 = vmatpush.bf16.msra.mxu3 %v12594_v17  ;;  %349 = vst [vmem:[#allocation2 + $0xc0] sm:$0x1] %v12934_v4  ;;  %v1403_v6 = vpack.c.b16 %v1373_v1, %v1372_v0 }
  0x1c   : > { %350 = vst [vmem:[#allocation2 + $0xd8] sm:$0x1] %v12934_v4  ;;  %1727 = vmatpush.bf16.msra.mxu0 %v12617_v19  ;;  %v1151_v19 = vpack.c.bf16 %v463_v2, %v463_v2 }
  0x1d   : > { %1816 = vmatpush.bf16.msra.mxu1 %v12625_v20  ;;  %v1050_v25 = vld [vmem:[#allocation2 + $0x18] sm:$0xff]  ;;  %351 = vst [vmem:[#allocation2 + $0xf0] sm:$0x1] %v12934_v4 }
  0x1e   : > { %1905 = vmatpush.bf16.msra.mxu2 %v12633_v21  ;;  %v1051_v28 = vld [vmem:[#allocation2 + $0x20] sm:$0xff]  ;;  %352 = vst [vmem:[#allocation2 + $0x108] sm:$0x1] %v12934_v4  ;;  %v1082_v29 = vpack.c.bf16 %v1050_v25, %v1050_v25 }
  0x1f   : > { %2138 = vmatpush.bf16.msra.mxu3 %v12593_v22  ;;  %353 = vst [vmem:[#allocation2 + $0x120] sm:$0x1] %v12934_v4  ;;  %v1083_v30 = vpack.c.bf16 %v1051_v28, %v1051_v28  ;;  %v1178_v43 = vld [vmem:[#allocation2 + $0x1a] sm:$0xff] }
  0x20   : > { %354 = vst [vmem:[#allocation2 + $0x138] sm:$0x1] %v12934_v4  ;;  %1728 = vmatpush.bf16.msra.mxu0 %v12616_v23  ;;  %v1274_v37 = vunpack.c.l.b16 %v1082_v29  ;;  %v1210_v51 = vpack.c.bf16 %v1178_v43, %v1178_v43  ;;  %v466_v23 = vld [vmem:[%s13044_s19 + $0x40] sm:$0xff] }
  0x21   : > { %1817 = vmatpush.bf16.msra.mxu1 %v12624_v24  ;;  %355 = vst [vmem:[#allocation2 + $0x150] sm:$0x1] %v12934_v4  ;;  %v1275_v38 = vunpack.c.l.b16 %v1083_v30  ;;  %v467_v24 = vld [vmem:[%s13044_s19 + $0x48] sm:$0xff] }
  0x22   : > { %1906 = vmatpush.bf16.msra.mxu2 %v12632_v26  ;;  %356 = vst [vmem:[#allocation2 + $0x168] sm:$0x1] %v12934_v4  ;;  %v1466_v55 = vunpack.c.l.b16 %v1210_v51  ;;  %v1374_v26 = vunpack.c.l.b16 %v1150_v18  ;;  %v1155_v0 = vpack.c.bf16 %v467_v24, %v467_v24 }
  0x23   : > { %2139 = vmatpush.bf16.msra.mxu3 %v12592_v27  ;;  %357 = vst [vmem:[#allocation2 + $0x180] sm:$0x1] %v12934_v4  ;;  %v1306_v49 = vpack.c.b16 %v1275_v38, %v1274_v37  ;;  %v1375_v27 = vunpack.c.l.b16 %v1151_v19 }
  0x24   : > { %358 = vst [vmem:[#allocation2 + $0x29] sm:$0x1] %v12934_v4  ;;  %1729 = vmatpush.bf16.msra.mxu0 %v12615_v33 }
  0x25   : > { %1818 = vmatpush.bf16.msra.mxu1 %v12623_v34  ;;  %359 = vst [vmem:[#allocation2 + $0x41] sm:$0x1] %v12934_v4  ;;  %v1404_v34 = vpack.c.b16 %v1375_v27, %v1374_v26 }
  0x26   : > { %1907 = vmatpush.bf16.msra.mxu2 %v12631_v35  ;;  %360 = vst [vmem:[#allocation2 + $0x59] sm:$0x1] %v12934_v4 }
  0x27   : > { %2140 = vmatpush.bf16.msra.mxu3 %v12591_v36  ;;  %361 = vst [vmem:[#allocation2 + $0x71] sm:$0x1] %v12934_v4 }
  0x28   : > { %362 = vst [vmem:[#allocation2 + $0x89] sm:$0x1] %v12934_v4  ;;  %1730 = vmatpush.bf16.msra.mxu0 %v12614_v41  ;;  %v1152_v41 = vpack.c.bf16 %v464_v3, %v464_v3 }
  0x29   : > { %1819 = vmatpush.bf16.msra.mxu1 %v12622_v42  ;;  %363 = vst [vmem:[#allocation2 + $0xa1] sm:$0x1] %v12934_v4  ;;  %v1153_v42 = vpack.c.bf16 %v465_v5, %v465_v5 }
  0x2a   : > { %1908 = vmatpush.bf16.msra.mxu2 %v12630_v46  ;;  %364 = vst [vmem:[#allocation2 + $0xb9] sm:$0x1] %v12934_v4  ;;  %v469_v46 = vld [vmem:[%s13044_s19 + $0x58] sm:$0xff] }
  0x2b   : > { %2141 = vmatpush.bf16.msra.mxu3 %v12590_v47  ;;  %365 = vst [vmem:[#allocation2 + $0xd1] sm:$0x1] %v12934_v4  ;;  %v1179_v53 = vld [vmem:[#allocation2 + $0x22] sm:$0xff]  ;;  %1731 = vmatmul.bf16.vlgmr.msra.gmra.mxu0 %v1306_v49 }
  0x2c   : > { %2223 = vmatpush.bf16.msrb.mxu0 %v12605_v48  ;;  %366 = vst [vmem:[#allocation2 + $0xe9] sm:$0x1] %v12934_v4  ;;  %1820 = vmatmul.bf16.vlgmr.msra.gmra.mxu1 %v1402_v50  ;;  %v1211_v54 = vpack.c.bf16 %v1179_v53, %v1179_v53  ;;  %v1376_v48 = vunpack.c.l.b16 %v1152_v41 }
  0x2d   : > { %367 = vst [vmem:[#allocation2 + $0x101] sm:$0x1] %v12934_v4 }
  0x2e   : > { %2142 = vmatmul.bf16.vlgmr.msra.gmra.mxu3 %v778_v52  ;;  %368 = vst [vmem:[#allocation2 + $0x119] sm:$0x1] %v12934_v4  ;;  %v1467_v56 = vunpack.c.l.b16 %v1211_v54 }
  0x2f   : > { %369 = vst [vmem:[#allocation2 + $0x131] sm:$0x1] %v12934_v4 }
  0x30   : > { %370 = vst [vmem:[#allocation2 + $0x149] sm:$0x1] %v12934_v4  ;;  %v1498_v59 = vpack.c.b16 %v1467_v56, %v1466_v55  ;;  %2224 = vmatpush.bf16.msrb.mxu0 %v12604_v63  ;;  %v1154_v63 = vpack.c.bf16 %v466_v23, %v466_v23 }
  0x31   : > { %371 = vst [vmem:[#allocation2 + $0x161] sm:$0x1] %v12934_v4 }
  0x32   : > { %372 = vst [vmem:[#allocation2 + $0x179] sm:$0x1] %v12934_v4  ;;  %1909 = vmatmul.bf16.vlgmr.msra.gmra.mxu2 %v1498_v59 }
  0x33   : > { %373 = vst [vmem:[#allocation2 + $0x191] sm:$0x1] %v12934_v4 }
  0x34   : > { %492 = vst [vmem:[#allocation2 + $0x31] sm:$0xff] %v460_v57  ;;  %2225 = vmatpush.bf16.msrb.mxu0 %v12603_v44 }
  0x35   : > { %493 = vst [vmem:[#allocation2 + $0x39] sm:$0xff] %v461_v58 }
  0x36   : > { %494 = vst [vmem:[#allocation2 + $0x49] sm:$0xff] %v462_v62 }
  0x37   : > { %495 = vst [vmem:[#allocation2 + $0x51] sm:$0xff] %v463_v2  ;;  %v470_v2 = vld [vmem:[%s13044_s19 + $0x60] sm:$0xff] }
  0x38   : > { %496 = vst [vmem:[#allocation2 + $0x61] sm:$0xff] %v464_v3  ;;  %v471_v3 = vld [vmem:[%s13044_s19 + $0x68] sm:$0xff] }
  0x39   : > { %497 = vst [vmem:[#allocation2 + $0x69] sm:$0xff] %v465_v5 }
  0x3a   : > { %498 = vst [vmem:[#allocation2 + $0x79] sm:$0xff] %v466_v23  ;;  %v12602_v23 = vld [vmem:[%s17295_s1 + $0x60] sm:$0xff] }
  0x3b   : > { %v1052_v7 = vld [vmem:[#allocation2 + $0x30] sm:$0xff]  ;;  %499 = vst [vmem:[#allocation2 + $0x81] sm:$0xff] %v467_v24  ;;  %2226 = vmatpush.bf16.msrb.mxu0 %v12602_v23 }
  0x3c   : > { %v1053_v4 = vld [vmem:[#allocation2 + $0x38] sm:$0xff]  ;;  %v1084_v8 = vpack.c.bf16 %v1052_v7, %v1052_v7  ;;  %1825 = vmatmul.bf16.gmra.mxu1 %v1403_v6  ;;  %500 = vst [vmem:[#allocation2 + $0x91] sm:$0xff] %v468_v45  ;;  %v1378_v6 = vunpack.c.l.b16 %v1154_v63  ;;  %v1379_v7 = vunpack.c.l.b16 %v1155_v0  ;;  %v472_v24 = vld [vmem:[%s13044_s19 + $0x70] sm:$0xff] }
  0x3d   : > { %v1180_v9 = vld [vmem:[#allocation2 + $0x32] sm:$0xff]  ;;  %v1181_v10 = vld [vmem:[#allocation2 + $0x3a] sm:$0xff]  ;;  %v1085_v11 = vpack.c.bf16 %v1053_v4, %v1053_v4  ;;  %v1054_v22 = vld [vmem:[#allocation2 + $0x48] sm:$0xff]  ;;  %501 = vst [vmem:[#allocation2 + $0x99] sm:$0xff] %v469_v46  ;;  %v1160_v63 = vpack.c.bf16 %v472_v24, %v472_v24 }
  0x3e   : > { %v1212_v12 = vpack.c.bf16 %v1180_v9, %v1180_v9  ;;  %v1213_v13 = vpack.c.bf16 %v1181_v10, %v1181_v10  ;;  %2147 = vmatmul.bf16.gmra.mxu3 %v1306_v49  ;;  %v1276_v14 = vunpack.c.l.b16 %v1084_v8  ;;  %v1055_v25 = vld [vmem:[#allocation2 + $0x50] sm:$0xff]  ;;  %v1086_v30 = vpack.c.bf16 %v1054_v22, %v1054_v22  ;;  %502 = vst [vmem:[#allocation2 + $0xa9] sm:$0xff] %v470_v2 }
  0x3f   : > { %v1277_v15 = vunpack.c.l.b16 %v1085_v11  ;;  %v1182_v28 = vld [vmem:[#allocation2 + $0x4a] sm:$0xff]  ;;  %v1183_v29 = vld [vmem:[#allocation2 + $0x52] sm:$0xff]  ;;  %v1087_v31 = vpack.c.bf16 %v1055_v25, %v1055_v25  ;;  %v1056_v43 = vld [vmem:[#allocation2 + $0x60] sm:$0xff]  ;;  %v1377_v49 = vunpack.c.l.b16 %v1153_v42  ;;  %503 = vst [vmem:[#allocation2 + $0xb1] sm:$0xff] %v471_v3  ;;  %v1158_v42 = vpack.c.bf16 %v470_v2, %v470_v2 }
  0x40   : > { %v1468_v16 = vunpack.c.l.b16 %v1212_v12  ;;  %v1469_v17 = vunpack.c.l.b16 %v1213_v13  ;;  %v1214_v32 = vpack.c.bf16 %v1182_v28, %v1182_v28  ;;  %v1215_v33 = vpack.c.bf16 %v1183_v29, %v1183_v29  ;;  %v1057_v47 = vld [vmem:[#allocation2 + $0x68] sm:$0xff]  ;;  %v473_v25 = vld [vmem:[%s13044_s19 + $0x78] sm:$0xff]  ;;  %504 = vst [vmem:[#allocation2 + $0xc1] sm:$0xff] %v472_v24 }
  0x41   : > { %v1307_v20 = vpack.c.b16 %v1277_v15, %v1276_v14  ;;  %v1278_v35 = vunpack.c.l.b16 %v1086_v30  ;;  %v1279_v36 = vunpack.c.l.b16 %v1087_v31  ;;  %v1184_v50 = vld [vmem:[#allocation2 + $0x62] sm:$0xff]  ;;  %v1185_v51 = vld [vmem:[#allocation2 + $0x6a] sm:$0xff]  ;;  %v1088_v52 = vpack.c.bf16 %v1056_v43, %v1056_v43  ;;  %v1058_v1 = vld [vmem:[#allocation2 + $0x78] sm:$0xff]  ;;  %505 = vst [vmem:[#allocation2 + $0xc9] sm:$0xff] %v473_v25 }
  0x42   : > { %v1499_v21 = vpack.c.b16 %v1469_v17, %v1468_v16  ;;  %v1470_v37 = vunpack.c.l.b16 %v1214_v32  ;;  %v1471_v38 = vunpack.c.l.b16 %v1215_v33  ;;  %v1089_v53 = vpack.c.bf16 %v1057_v47, %v1057_v47  ;;  %v1059_v5 = vld [vmem:[#allocation2 + $0x80] sm:$0xff] }
  0x43   : > { %1736 = vmatmul.bf16.gmra.mxu0 %v1307_v20  ;;  %v1308_v39 = vpack.c.b16 %v1279_v36, %v1278_v35  ;;  %v1216_v54 = vpack.c.bf16 %v1184_v50, %v1184_v50  ;;  %v1217_v55 = vpack.c.bf16 %v1185_v51, %v1185_v51  ;;  %v1405_v56 = vpack.c.b16 %v1377_v49, %v1376_v48  ;;  %v1186_v4 = vld [vmem:[#allocation2 + $0x7a] sm:$0xff]  ;;  %v1187_v8 = vld [vmem:[#allocation2 + $0x82] sm:$0xff]  ;;  %v1060_v22 = vld [vmem:[#allocation2 + $0x90] sm:$0xff] }
  0x44   : > { %1914 = vmatmul.bf16.gmra.mxu2 %v1499_v21  ;;  %v1500_v40 = vpack.c.b16 %v1471_v38, %v1470_v37  ;;  %v1280_v57 = vunpack.c.l.b16 %v1088_v52  ;;  %v1281_v58 = vunpack.c.l.b16 %v1089_v53  ;;  %v1090_v9 = vpack.c.bf16 %v1058_v1, %v1058_v1  ;;  %v1061_v26 = vld [vmem:[#allocation2 + $0x98] sm:$0xff]  ;;  %v474_v50 = vld [vmem:[%s13044_s19 + $0x80] sm:$0xff]  ;;  %v475_v51 = vld [vmem:[%s13044_s19 + $0x88] sm:$0xff] }
  0x45   : > { %v1472_v59 = vunpack.c.l.b16 %v1216_v54  ;;  %v1473_v60 = vunpack.c.l.b16 %v1217_v55  ;;  %v1091_v10 = vpack.c.bf16 %v1059_v5, %v1059_v5  ;;  %v1218_v11 = vpack.c.bf16 %v1186_v4, %v1186_v4  ;;  %v1188_v29 = vld [vmem:[#allocation2 + $0x92] sm:$0xff]  ;;  %v1189_v30 = vld [vmem:[#allocation2 + $0x9a] sm:$0xff]  ;;  %v1062_v44 = vld [vmem:[#allocation2 + $0xa8] sm:$0xff]  ;;  %506 = vst [vmem:[#allocation2 + $0xd9] sm:$0xff] %v474_v50 }
  0x46   : > { %v1309_v61 = vpack.c.b16 %v1281_v58, %v1280_v57  ;;  %v1219_v12 = vpack.c.bf16 %v1187_v8, %v1187_v8  ;;  %v1406_v13 = vpack.c.b16 %v1379_v7, %v1378_v6  ;;  %v1282_v14 = vunpack.c.l.b16 %v1090_v9  ;;  %v1191_v49 = vld [vmem:[#allocation2 + $0xb2] sm:$0xff]  ;;  %507 = vst [vmem:[#allocation2 + $0xe1] sm:$0xff] %v475_v51 }
  0x47   : > { %v1501_v62 = vpack.c.b16 %v1473_v60, %v1472_v59  ;;  %v1283_v15 = vunpack.c.l.b16 %v1091_v10  ;;  %v1474_v16 = vunpack.c.l.b16 %v1218_v11  ;;  %v1157_v21 = vpack.c.bf16 %v469_v46, %v469_v46  ;;  %v1190_v46 = vld [vmem:[#allocation2 + $0xaa] sm:$0xff]  ;;  %v1064_v1 = vld [vmem:[#allocation2 + $0xc0] sm:$0xff]  ;;  %v12601_v5 = vld [vmem:[%s17295_s1 + $0x58] sm:$0xff] }
  0x48   : > { %v1475_v17 = vunpack.c.l.b16 %v1219_v12  ;;  %v1092_v31 = vpack.c.bf16 %v1060_v22, %v1060_v22  ;;  %v1093_v32 = vpack.c.bf16 %v1061_v26, %v1061_v26  ;;  %v1220_v33 = vpack.c.bf16 %v1188_v29, %v1188_v29  ;;  %v1065_v2 = vld [vmem:[#allocation2 + $0xc8] sm:$0xff]  ;;  %v476_v8 = vld [vmem:[%s13044_s19 + $0x90] sm:$0xff]  ;;  %v477_v9 = vld [vmem:[%s13044_s19 + $0x98] sm:$0xff]  ;;  %2227 = vmatpush.bf16.msrb.mxu0 %v12601_v5 }
  0x49   : > { %v1310_v18 = vpack.c.b16 %v1283_v15, %v1282_v14  ;;  %v1381_v28 = vunpack.c.l.b16 %v1157_v21  ;;  %v1159_v43 = vpack.c.bf16 %v471_v3, %v471_v3  ;;  %v1382_v47 = vunpack.c.l.b16 %v1158_v42  ;;  %v1192_v3 = vld [vmem:[#allocation2 + $0xc2] sm:$0xff]  ;;  %v1193_v4 = vld [vmem:[#allocation2 + $0xca] sm:$0xff]  ;;  %508 = vst [vmem:[#allocation2 + $0xf1] sm:$0xff] %v476_v8 }
  0x4a   : > { %v1502_v19 = vpack.c.b16 %v1475_v17, %v1474_v16  ;;  %v1284_v36 = vunpack.c.l.b16 %v1092_v31  ;;  %v1285_v37 = vunpack.c.l.b16 %v1093_v32  ;;  %v1476_v38 = vunpack.c.l.b16 %v1220_v33  ;;  %509 = vst [vmem:[#allocation2 + $0xf9] sm:$0xff] %v477_v9  ;;  %v13174_v29 = vld [vmem:[%s13044_s19 + $0xa0] sm:$0xff] }
  0x4b   : > { %v1383_v48 = vunpack.c.l.b16 %v1159_v43  ;;  %v1094_v52 = vpack.c.bf16 %v1062_v44, %v1062_v44  ;;  %v1222_v54 = vpack.c.bf16 %v1190_v46, %v1190_v46  ;;  %v1223_v55 = vpack.c.bf16 %v1191_v49, %v1191_v49  ;;  %510 = vst [vmem:[#allocation2 + $0x109] sm:$0xff] %v13174_v29 }
  0x4c   : > { %1830 = vmatmul.bf16.gmra.mxu1 %v1404_v34  ;;  %v1221_v34 = vpack.c.bf16 %v1189_v30, %v1189_v30  ;;  %v1161_v0 = vpack.c.bf16 %v473_v25, %v473_v25  ;;  %v1384_v6 = vunpack.c.l.b16 %v1160_v63  ;;  %v1096_v10 = vpack.c.bf16 %v1064_v1, %v1064_v1  ;;  %v1066_v23 = vld [vmem:[#allocation2 + $0xd8] sm:$0xff]  ;;  %v13177_v30 = vld [vmem:[%s13044_s19 + $0xa8] sm:$0xff] }
  0x4d   : > { %v1286_v57 = vunpack.c.l.b16 %v1094_v52  ;;  %v1478_v59 = vunpack.c.l.b16 %v1222_v54  ;;  %v1479_v60 = vunpack.c.l.b16 %v1223_v55  ;;  %v1097_v11 = vpack.c.bf16 %v1065_v2, %v1065_v2  ;;  %v1067_v24 = vld [vmem:[#allocation2 + $0xe0] sm:$0xff]  ;;  %511 = vst [vmem:[#allocation2 + $0x111] sm:$0xff] %v13177_v30 }
  0x4e   : > { %2152 = vmatmul.bf16.gmra.mxu3 %v1307_v20  ;;  %v1156_v20 = vpack.c.bf16 %v468_v45, %v468_v45  ;;  %v1063_v45 = vld [vmem:[#allocation2 + $0xb0] sm:$0xff]  ;;  %v1385_v7 = vunpack.c.l.b16 %v1161_v0  ;;  %v1224_v12 = vpack.c.bf16 %v1192_v3, %v1192_v3  ;;  %v1288_v15 = vunpack.c.l.b16 %v1096_v10  ;;  %v1194_v25 = vld [vmem:[#allocation2 + $0xda] sm:$0xff] }
  0x4f   : > { %v1095_v53 = vpack.c.bf16 %v1063_v45, %v1063_v45  ;;  %v1289_v16 = vunpack.c.l.b16 %v1097_v11  ;;  %v1162_v21 = vpack.c.bf16 %v474_v50, %v474_v50  ;;  %v1163_v22 = vpack.c.bf16 %v475_v51, %v475_v51  ;;  %v12613_v45 = vld [vmem:[%s17295_s1 + $0xb8] sm:$0xff] }
  0x50   : > { %v1380_v27 = vunpack.c.l.b16 %v1156_v20  ;;  %v1409_v14 = vpack.c.b16 %v1385_v7, %v1384_v6  ;;  %v1480_v17 = vunpack.c.l.b16 %v1224_v12  ;;  %v1098_v31 = vpack.c.bf16 %v1066_v23, %v1066_v23  ;;  %2312 = vmatpush.bf16.msrb.mxu1 %v12613_v45  ;;  %v1068_v50 = vld [vmem:[#allocation2 + $0xf0] sm:$0xff] }
  0x51   : > { %v1287_v58 = vunpack.c.l.b16 %v1095_v53  ;;  %v1386_v26 = vunpack.c.l.b16 %v1162_v21  ;;  %v1099_v32 = vpack.c.bf16 %v1067_v24, %v1067_v24  ;;  %v1226_v33 = vpack.c.bf16 %v1194_v25, %v1194_v25  ;;  %v1069_v51 = vld [vmem:[#allocation2 + $0xf8] sm:$0xff]  ;;  %v12600_v53 = vld [vmem:[%s17295_s1 + $0x50] sm:$0xff] }
  0x52   : > { %v1407_v35 = vpack.c.b16 %v1381_v28, %v1380_v27  ;;  %v1387_v27 = vunpack.c.l.b16 %v1163_v22  ;;  %v1195_v28 = vld [vmem:[#allocation2 + $0xe2] sm:$0xff]  ;;  %v1196_v52 = vld [vmem:[#allocation2 + $0xf2] sm:$0xff]  ;;  %2228 = vmatpush.bf16.msrb.mxu0 %v12600_v53  ;;  %v1101_v63 = vpack.c.bf16 %v1069_v51, %v1069_v51 }
  0x53   : > { %1741 = vmatmul.bf16.gmra.mxu0 %v1308_v39  ;;  %v1228_v0 = vpack.c.bf16 %v1196_v52, %v1196_v52  ;;  %v1070_v22 = vld [vmem:[#allocation2 + $0x108] sm:$0xff] }
  0x54   : > { %1919 = vmatmul.bf16.gmra.mxu2 %v1500_v40  ;;  %v1311_v40 = vpack.c.b16 %v1285_v37, %v1284_v36  ;;  %v1071_v23 = vld [vmem:[#allocation2 + $0x110] sm:$0xff] }
  0x55   : > { %v1198_v24 = vld [vmem:[#allocation2 + $0x10a] sm:$0xff] }
  0x5c   : > { %1835 = vmatmul.bf16.gmra.mxu1 %v1405_v56  ;;  %v1408_v56 = vpack.c.b16 %v1383_v48, %v1382_v47  ;;  %v1164_v47 = vpack.c.bf16 %v476_v8, %v476_v8  ;;  %v1165_v48 = vpack.c.bf16 %v477_v9, %v477_v9  ;;  %v1484_v8 = vunpack.c.l.b16 %v1228_v0 }
  0x5e   : > { %2157 = vmatmul.bf16.gmra.mxu3 %v1308_v39  ;;  %v1477_v39 = vunpack.c.l.b16 %v1221_v34  ;;  %v1227_v34 = vpack.c.bf16 %v1195_v28, %v1195_v28  ;;  %v1388_v54 = vunpack.c.l.b16 %v1164_v47  ;;  %v1389_v55 = vunpack.c.l.b16 %v1165_v48  ;;  %v13204_v28 = vld [vmem:[%s13044_s19 + $0xc0] sm:$0xff] }
  0x5f   : > { %514 = vst [vmem:[#allocation2 + $0x139] sm:$0xff] %v13204_v28 }
  0x60   : > { %v1503_v41 = vpack.c.b16 %v1477_v39, %v1476_v38  ;;  %v1290_v39 = vunpack.c.l.b16 %v1098_v31  ;;  %v1483_v42 = vunpack.c.l.b16 %v1227_v34  ;;  %v1411_v5 = vpack.c.b16 %v1389_v55, %v1388_v54  ;;  %v13207_v31 = vld [vmem:[%s13044_s19 + $0xc8] sm:$0xff] }
  0x61   : > { %515 = vst [vmem:[#allocation2 + $0x141] sm:$0xff] %v13207_v31  ;;  %v1230_v34 = vpack.c.bf16 %v1198_v24, %v1198_v24 }
  0x63   : > { %1746 = vmatmul.bf16.gmra.mxu0 %v1309_v61 }
  0x64   : > { %1924 = vmatmul.bf16.gmra.mxu2 %v1501_v62  ;;  %v1504_v62 = vpack.c.b16 %v1479_v60, %v1478_v59 }
  0x6c   : > { %1840 = vmatmul.bf16.gmra.mxu1 %v1406_v13  ;;  %v1225_v13 = vpack.c.bf16 %v1193_v4, %v1193_v4  ;;  %v1293_v4 = vunpack.c.l.b16 %v1101_v63  ;;  %v12599_v63 = vld [vmem:[%s17295_s1 + $0x48] sm:$0xff] }
  0x6d   : > { %2229 = vmatpush.bf16.msrb.mxu0 %v12599_v63 }
  0x6e   : > { %2162 = vmatmul.bf16.gmra.mxu3 %v1309_v61  ;;  %v1312_v61 = vpack.c.b16 %v1287_v58, %v1286_v57  ;;  %v13188_v57 = vld [vmem:[%s13044_s19 + $0xb0] sm:$0xff]  ;;  %v13191_v58 = vld [vmem:[%s13044_s19 + $0xb8] sm:$0xff] }
  0x6f   : > { %512 = vst [vmem:[#allocation2 + $0x121] sm:$0xff] %v13188_v57  ;;  %v1168_v53 = vpack.c.bf16 %v13188_v57, %v13188_v57  ;;  %v1169_v54 = vpack.c.bf16 %v13191_v58, %v13191_v58 }
  0x70   : > { %513 = vst [vmem:[#allocation2 + $0x129] sm:$0xff] %v13191_v58  ;;  %v13229_v58 = vld [vmem:[%s13044_s19 + $0xd8] sm:$0xff] }
  0x71   : > { %v1392_v0 = vunpack.c.l.b16 %v1168_v53  ;;  %v1393_v57 = vunpack.c.l.b16 %v1169_v54  ;;  %517 = vst [vmem:[#allocation2 + $0x159] sm:$0xff] %v13229_v58 }
  0x73   : > { %1751 = vmatmul.bf16.gmra.mxu0 %v1310_v18 }
  0x74   : > { %1929 = vmatmul.bf16.gmra.mxu2 %v1502_v19  ;;  %v1313_v19 = vpack.c.b16 %v1289_v16, %v1288_v15 }
  0x7c   : > { %1845 = vmatmul.bf16.gmra.mxu1 %v1407_v35  ;;  %v1410_v35 = vpack.c.b16 %v1387_v27, %v1386_v26  ;;  %v1199_v27 = vld [vmem:[#allocation2 + $0x112] sm:$0xff] }
  0x7e   : > { %2167 = vmatmul.bf16.gmra.mxu3 %v1310_v18  ;;  %v1481_v18 = vunpack.c.l.b16 %v1225_v13 }
  0x80   : > { %v1505_v20 = vpack.c.b16 %v1481_v18, %v1480_v17  ;;  %v1166_v18 = vpack.c.bf16 %v13174_v29, %v13174_v29 }
  0x82   : > { %v1390_v25 = vunpack.c.l.b16 %v1166_v18 }
  0x83   : > { %1756 = vmatmul.bf16.gmra.mxu0 %v1311_v40 }
  0x84   : > { %1934 = vmatmul.bf16.gmra.mxu2 %v1503_v41  ;;  %v1482_v41 = vunpack.c.l.b16 %v1226_v33  ;;  %v1103_v33 = vpack.c.bf16 %v1071_v23, %v1071_v23 }
  0x86   : > { %v1506_v44 = vpack.c.b16 %v1483_v42, %v1482_v41 }
  0x8c   : > { %1850 = vmatmul.bf16.gmra.mxu1 %v1408_v56  ;;  %v1197_v56 = vld [vmem:[#allocation2 + $0xfa] sm:$0xff] }
  0x8d   : > { %v1229_v1 = vpack.c.bf16 %v1197_v56, %v1197_v56 }
  0x8e   : > { %2172 = vmatmul.bf16.gmra.mxu3 %v1311_v40  ;;  %v1291_v40 = vunpack.c.l.b16 %v1099_v32  ;;  %v1102_v32 = vpack.c.bf16 %v1070_v22, %v1070_v22 }
  0x8f   : > { %v1485_v9 = vunpack.c.l.b16 %v1229_v1  ;;  %v1201_v1 = vld [vmem:[#allocation2 + $0x12a] sm:$0xff] }
  0x90   : > { %v1314_v43 = vpack.c.b16 %v1291_v40, %v1290_v39  ;;  %v1294_v42 = vunpack.c.l.b16 %v1102_v32 }
  0x93   : > { %1761 = vmatmul.bf16.gmra.mxu0 %v1312_v61 }
  0x94   : > { %1939 = vmatmul.bf16.gmra.mxu2 %v1504_v62  ;;  %v1100_v62 = vpack.c.bf16 %v1068_v50, %v1068_v50  ;;  %v12612_v50 = vld [vmem:[%s17295_s1 + $0xb0] sm:$0xff] }
  0x95   : > { %2313 = vmatpush.bf16.msrb.mxu1 %v12612_v50 }
  0x96   : > { %v1292_v7 = vunpack.c.l.b16 %v1100_v62  ;;  %v1200_v62 = vld [vmem:[#allocation2 + $0x122] sm:$0xff] }
  0x98   : > { %v1315_v13 = vpack.c.b16 %v1293_v4, %v1292_v7 }
  0x9c   : > { %1855 = vmatmul.bf16.gmra.mxu1 %v1409_v14  ;;  %v1507_v14 = vpack.c.b16 %v1485_v9, %v1484_v8  ;;  %v1232_v8 = vpack.c.bf16 %v1200_v62, %v1200_v62  ;;  %v1233_v9 = vpack.c.bf16 %v1201_v1, %v1201_v1 }
  0x9e   : > { %2177 = vmatmul.bf16.gmra.mxu3 %v1312_v61 }
  0xa3   : > { %1766 = vmatmul.bf16.gmra.mxu0 %v1313_v19 }
  0xa4   : > { %1944 = vmatmul.bf16.gmra.mxu2 %v1505_v20 }
  0xa8   : > { %v1732_v36 = vpop.f32.mrf.mxu0 }
  0xa9   : > { %v1821_v37 = vpop.f32.mrf.mxu1 }
  0xaa   : > { %v1822_v38 = vadd.f32 %v1821_v37, %v1732_v36 }
  0xac   : > { %1860 = vmatmul.bf16.gmra.mxu1 %v1410_v35  ;;  %v1231_v35 = vpack.c.bf16 %v1199_v27, %v1199_v27  ;;  %v1170_v27 = vpack.c.bf16 %v13204_v28, %v13204_v28 }
  0xae   : > { %2182 = vmatmul.bf16.gmra.mxu3 %v1313_v19  ;;  %v1167_v19 = vpack.c.bf16 %v13177_v30, %v13177_v30  ;;  %v1487_v45 = vunpack.c.l.b16 %v1231_v35  ;;  %v1075_v35 = vld [vmem:[#allocation2 + $0x140] sm:$0xff] }
  0xb0   : > { %v1734_v61 = vpop.f32.mrf.mxu0  ;;  %v1391_v26 = vunpack.c.l.b16 %v1167_v19  ;;  %v1488_v19 = vunpack.c.l.b16 %v1232_v8 }
  0xb1   : > { %v2143_v46 = vpop.f32.mrf.mxu3  ;;  %v1823_v49 = vpop.f32.mrf.mxu1 }
  0xb2   : > { %v1824_v10 = vadd.f32 %v1823_v49, %v1734_v61  ;;  %v1073_v61 = vld [vmem:[#allocation2 + $0x128] sm:$0xff] }
  0xb3   : > { %1771 = vmatmul.bf16.gmra.mxu0 %v1314_v43  ;;  %v1105_v4 = vpack.c.bf16 %v1073_v61, %v1073_v61 }
  0xb4   : > { %1949 = vmatmul.bf16.gmra.mxu2 %v1506_v44  ;;  %v1486_v44 = vunpack.c.l.b16 %v1230_v34  ;;  %v1074_v34 = vld [vmem:[#allocation2 + $0x138] sm:$0xff] }
  0xb5   : > { %v1910_v59 = vpop.f32.mrf.mxu2  ;;  %v1297_v18 = vunpack.c.l.b16 %v1105_v4 }
  0xb6   : > { %v1911_v60 = vadd.f32 %v1910_v59, %v1822_v38  ;;  %v1412_v38 = vpack.c.b16 %v1391_v26, %v1390_v25  ;;  %v1508_v49 = vpack.c.b16 %v1487_v45, %v1486_v44  ;;  %v1107_v44 = vpack.c.bf16 %v1075_v35, %v1075_v35 }
  0xb8   : > { %v13195_v2 = vadd.f32 %v2143_v46, %v1911_v60  ;;  %v1072_v60 = vld [vmem:[#allocation2 + $0x120] sm:$0xff]  ;;  %v1299_v54 = vunpack.c.l.b16 %v1107_v44 }
  0xb9   : > { %v2145_v3 = vpop.f32.mrf.mxu3  ;;  %v1826_v6 = vpop.f32.mrf.mxu1 }
  0xbc   : > { %1865 = vmatmul.bf16.gmra.mxu1 %v1411_v5 }
  0xbd   : > { %v1912_v11 = vpop.f32.mrf.mxu2 }
  0xbe   : > { %2187 = vmatmul.bf16.gmra.mxu3 %v1314_v43  ;;  %v1913_v12 = vadd.f32 %v1912_v11, %v1824_v10  ;;  %v1295_v43 = vunpack.c.l.b16 %v1103_v33 }
  0xc0   : > { %v1737_v15 = vpop.f32.mrf.mxu0  ;;  %v13197_v16 = vadd.f32 %v2145_v3, %v1913_v12  ;;  %v1316_v48 = vpack.c.b16 %v1295_v43, %v1294_v42  ;;  %v13226_v3 = vld [vmem:[%s13044_s19 + $0xd0] sm:$0xff]  ;;  %v1413_v12 = vpack.c.b16 %v1393_v57, %v1392_v0  ;;  %v13245_v42 = vld [vmem:[%s13044_s19 + $0xe8] sm:$0xff] }
  0xc1   : > { %v2148_v17 = vpop.f32.mrf.mxu3  ;;  %v1827_v20 = vadd.f32 %v1826_v6, %v1737_v15  ;;  %v1828_v21 = vpop.f32.mrf.mxu1  ;;  %516 = vst [vmem:[#allocation2 + $0x151] sm:$0xff] %v13226_v3  ;;  %v1104_v6 = vpack.c.bf16 %v1072_v60, %v1072_v60  ;;  %v12611_v0 = vld [vmem:[%s17295_s1 + $0xa8] sm:$0xff]  ;;  %v1175_v44 = vpack.c.bf16 %v13245_v42, %v13245_v42 }
  0xc2   : > { %519 = vst [vmem:[#allocation2 + $0x171] sm:$0xff] %v13245_v42  ;;  %2314 = vmatpush.bf16.msrb.mxu1 %v12611_v0 }
  0xc3   : > { %1776 = vmatmul.bf16.gmra.mxu0 %v1315_v13 }
  0xc4   : > { %1954 = vmatmul.bf16.gmra.mxu2 %v1507_v14 }
  0xc7   : > { %v1915_v29 = vpop.f32.mrf.mxu2 }
  0xc8   : > { %v1916_v30 = vadd.f32 %v1915_v29, %v1827_v20  ;;  %v1739_v36 = vpop.f32.mrf.mxu0  ;;  %v1489_v20 = vunpack.c.l.b16 %v1233_v9  ;;  %v1171_v29 = vpack.c.bf16 %v13207_v31, %v13207_v31  ;;  %v1106_v31 = vpack.c.bf16 %v1074_v34, %v1074_v34  ;;  %v1076_v9 = vld [vmem:[#allocation2 + $0x150] sm:$0xff] }
  0xc9   : > { %v2150_v37 = vpop.f32.mrf.mxu3  ;;  %v1829_v39 = vadd.f32 %v1828_v21, %v1739_v36  ;;  %v1831_v41 = vpop.f32.mrf.mxu1  ;;  %v1202_v36 = vld [vmem:[#allocation2 + $0x13a] sm:$0xff] }
  0xca   : > { %v13211_v40 = vadd.f32 %v2148_v17, %v1916_v30  ;;  %v1296_v17 = vunpack.c.l.b16 %v1104_v6  ;;  %v1509_v24 = vpack.c.b16 %v1489_v20, %v1488_v19  ;;  %v1234_v45 = vpack.c.bf16 %v1202_v36, %v1202_v36 }
  0xcb   : > { %v1298_v53 = vunpack.c.l.b16 %v1106_v31  ;;  %v1173_v6 = vpack.c.bf16 %v13229_v58, %v13229_v58  ;;  %v13267_v58 = vld [vmem:[%s13044_s19 + $0xf8] sm:$0xff]  ;;  %v1108_v19 = vpack.c.bf16 %v1076_v9, %v1076_v9 }
  0xcc   : > { %1870 = vmatmul.bf16.gmra.mxu1 %v1412_v38  ;;  %v1317_v23 = vpack.c.b16 %v1297_v18, %v1296_v17  ;;  %v1395_v38 = vunpack.c.l.b16 %v1171_v29  ;;  %v13264_v17 = vld [vmem:[%s13044_s19 + $0xf0] sm:$0xff]  ;;  %521 = vst [vmem:[#allocation2 + $0x189] sm:$0xff] %v13267_v58  ;;  %v12653_v9 = vld [vmem:[%s17295_s1 + $0x1f8] sm:$0xff] }
  0xcd   : > { %v1318_v62 = vpack.c.b16 %v1299_v54, %v1298_v53  ;;  %520 = vst [vmem:[#allocation2 + $0x181] sm:$0xff] %v13264_v17  ;;  %v1207_v54 = vld [vmem:[#allocation2 + $0x172] sm:$0xff]  ;;  %3164 = vmatpush.bf16.msrb.mxu3 %v12653_v9 }
  0xce   : > { %2192 = vmatmul.bf16.gmra.mxu3 %v1315_v13 }
  0xcf   : > { %v1917_v46 = vpop.f32.mrf.mxu2 }
  0xd0   : > { %v1918_v47 = vadd.f32 %v1917_v46, %v1829_v39  ;;  %v1742_v51 = vpop.f32.mrf.mxu0  ;;  %v1203_v39 = vld [vmem:[#allocation2 + $0x142] sm:$0xff] }
  0xd1   : > { %v2153_v52 = vpop.f32.mrf.mxu3  ;;  %v1832_v55 = vadd.f32 %v1831_v41, %v1742_v51  ;;  %v1833_v59 = vpop.f32.mrf.mxu1  ;;  %v13242_v41 = vld [vmem:[%s13044_s19 + $0xe0] sm:$0xff]  ;;  %v1235_v46 = vpack.c.bf16 %v1203_v39, %v1203_v39 }
  0xd2   : > { %v13220_v56 = vadd.f32 %v2150_v37, %v1918_v47  ;;  %v1394_v37 = vunpack.c.l.b16 %v1170_v27  ;;  %518 = vst [vmem:[#allocation2 + $0x169] sm:$0xff] %v13242_v41 }
  0xd3   : > { %1781 = vmatmul.bf16.gmra.mxu0 %v1316_v48 }
  0xd4   : > { %1959 = vmatmul.bf16.gmra.mxu2 %v1508_v49  ;;  %v1414_v49 = vpack.c.b16 %v1395_v38, %v1394_v37 }
  0xd7   : > { %v1920_v5 = vpop.f32.mrf.mxu2 }
  0xd8   : > { %v1921_v7 = vadd.f32 %v1920_v5, %v1832_v55  ;;  %v1744_v10 = vpop.f32.mrf.mxu0  ;;  %v1490_v55 = vunpack.c.l.b16 %v1234_v45  ;;  %v1172_v5 = vpack.c.bf16 %v13226_v3, %v13226_v3  ;;  %v1397_v3 = vunpack.c.l.b16 %v1173_v6  ;;  %v12610_v45 = vld [vmem:[%s17295_s1 + $0xa0] sm:$0xff] }
  0xd9   : > { %v2155_v11 = vpop.f32.mrf.mxu3  ;;  %v1834_v13 = vadd.f32 %v1833_v59, %v1744_v10  ;;  %v1836_v15 = vpop.f32.mrf.mxu1  ;;  %v1491_v59 = vunpack.c.l.b16 %v1235_v46  ;;  %v1077_v10 = vld [vmem:[#allocation2 + $0x158] sm:$0xff]  ;;  %2315 = vmatpush.bf16.msrb.mxu1 %v12610_v45  ;;  %v1206_v53 = vld [vmem:[#allocation2 + $0x16a] sm:$0xff] }
  0xda   : > { %v13233_v14 = vadd.f32 %v2153_v52, %v1921_v7 }
  0xdb   : > { %v1510_v63 = vpack.c.b16 %v1491_v59, %v1490_v55 }
  0xdc   : > { %1875 = vmatmul.bf16.gmra.mxu1 %v1413_v12  ;;  %v12598_v12 = vld [vmem:[%s17295_s1 + $0x40] sm:$0xff] }
  0xdd   : > { %2230 = vmatpush.bf16.msrb.mxu0 %v12598_v12 }
  0xde   : > { %2197 = vmatmul.bf16.gmra.mxu3 %v1316_v48 }
  0xdf   : > { %v1922_v21 = vpop.f32.mrf.mxu2 }
  0xe0   : > { %v1923_v22 = vadd.f32 %v1922_v21, %v1834_v13  ;;  %v1747_v25 = vpop.f32.mrf.mxu0  ;;  %v1396_v13 = vunpack.c.l.b16 %v1172_v5  ;;  %v1109_v21 = vpack.c.bf16 %v1077_v10, %v1077_v10 }
  0xe1   : > { %v2158_v26 = vpop.f32.mrf.mxu3  ;;  %v1837_v32 = vadd.f32 %v1836_v15, %v1747_v25  ;;  %v1838_v33 = vpop.f32.mrf.mxu1  ;;  %v1205_v15 = vld [vmem:[#allocation2 + $0x15a] sm:$0xff] }
  0xe2   : > { %v13239_v30 = vadd.f32 %v2155_v11, %v1923_v22  ;;  %v1204_v11 = vld [vmem:[#allocation2 + $0x152] sm:$0xff]  ;;  %v1301_v34 = vunpack.c.l.b16 %v1109_v21 }
  0xe3   : > { %1786 = vmatmul.bf16.gmra.mxu0 %v1317_v23  ;;  %v1236_v22 = vpack.c.bf16 %v1204_v11, %v1204_v11 }
  0xe4   : > { %1964 = vmatmul.bf16.gmra.mxu2 %v1509_v24 }
  0xe5   : > { %v1492_v35 = vunpack.c.l.b16 %v1236_v22  ;;  %v1176_v22 = vpack.c.bf16 %v13264_v17, %v13264_v17 }
  0xe7   : > { %v1925_v28 = vpop.f32.mrf.mxu2 }
  0xe8   : > { %v1926_v43 = vadd.f32 %v1925_v28, %v1837_v32  ;;  %v1749_v47 = vpop.f32.mrf.mxu0 }
  0xe9   : > { %v2160_v48 = vpop.f32.mrf.mxu3  ;;  %v1839_v50 = vadd.f32 %v1838_v33, %v1749_v47  ;;  %v1841_v52 = vpop.f32.mrf.mxu1  ;;  %v1300_v33 = vunpack.c.l.b16 %v1108_v19 }
  0xea   : > { %v13249_v51 = vadd.f32 %v2158_v26, %v1926_v43  ;;  %v1415_v26 = vpack.c.b16 %v1397_v3, %v1396_v13  ;;  %v1174_v43 = vpack.c.bf16 %v13242_v41, %v13242_v41  ;;  %v12609_v41 = vld [vmem:[%s17295_s1 + $0x98] sm:$0xff]  ;;  %v12607_v3 = vld [vmem:[%s17295_s1 + $0x88] sm:$0xff] }
  0xeb   : > { %v1319_v38 = vpack.c.b16 %v1301_v34, %v1300_v33  ;;  %2316 = vmatpush.bf16.msrb.mxu1 %v12609_v41  ;;  %v1080_v33 = vld [vmem:[#allocation2 + $0x180] sm:$0xff]  ;;  %v12661_v34 = vld [vmem:[%s17295_s1 + $0x238] sm:$0xff] }
  0xec   : > { %1880 = vmatmul.bf16.gmra.mxu1 %v1414_v49  ;;  %v1079_v49 = vld [vmem:[#allocation2 + $0x170] sm:$0xff]  ;;  %3253 = vmatpush.bf16.msra.mxu0 %v12661_v34 }
  0xed   : > { %v12652_v34 = vld [vmem:[%s17295_s1 + $0x1f0] sm:$0xff] }
  0xee   : > { %2202 = vmatmul.bf16.gmra.mxu3 %v1317_v23  ;;  %v1237_v23 = vpack.c.bf16 %v1205_v15, %v1205_v15 }
  0xef   : > { %v1927_v60 = vpop.f32.mrf.mxu2  ;;  %3165 = vmatpush.bf16.msrb.mxu3 %v12652_v34  ;;  %v591_v34 = vld [vmem:[#allocation2 + $0x39] sm:$0xff] }
  0xf0   : > { %v1928_v61 = vadd.f32 %v1927_v60, %v1839_v50  ;;  %v1752_v57 = vpop.f32.mrf.mxu0  ;;  %v1493_v36 = vunpack.c.l.b16 %v1237_v23  ;;  %v1398_v50 = vunpack.c.l.b16 %v1174_v43  ;;  %v1111_v60 = vpack.c.bf16 %v1079_v49, %v1079_v49 }
  0xf1   : > { %v2163_v1 = vpop.f32.mrf.mxu3  ;;  %v1842_v7 = vadd.f32 %v1841_v52, %v1752_v57  ;;  %v1843_v8 = vpop.f32.mrf.mxu1  ;;  %v1399_v52 = vunpack.c.l.b16 %v1175_v44  ;;  %v1177_v23 = vpack.c.bf16 %v13267_v58, %v13267_v58 }
  0xf2   : > { %v13258_v4 = vadd.f32 %v2160_v48, %v1928_v61  ;;  %v1511_v39 = vpack.c.b16 %v1493_v36, %v1492_v35  ;;  %v1078_v48 = vld [vmem:[#allocation2 + $0x168] sm:$0xff]  ;;  %v1238_v61 = vpack.c.bf16 %v1206_v53, %v1206_v53  ;;  %v1303_v11 = vunpack.c.l.b16 %v1111_v60 }
  0xf3   : > { %1791 = vmatmul.bf16.gmra.mxu0 %v1318_v62  ;;  %v1110_v55 = vpack.c.bf16 %v1078_v48, %v1078_v48  ;;  %v1416_v57 = vpack.c.b16 %v1399_v52, %v1398_v50  ;;  %v1081_v35 = vld [vmem:[#allocation2 + $0x188] sm:$0xff]  ;;  %v1400_v36 = vunpack.c.l.b16 %v1176_v22  ;;  %v1401_v17 = vunpack.c.l.b16 %v1177_v23 }
  0xf4   : > { %1969 = vmatmul.bf16.gmra.mxu2 %v1510_v63  ;;  %v1494_v12 = vunpack.c.l.b16 %v1238_v61  ;;  %v1113_v43 = vpack.c.bf16 %v1081_v35, %v1081_v35 }
  0xf5   : > { %v1302_v10 = vunpack.c.l.b16 %v1110_v55  ;;  %v1417_v48 = vpack.c.b16 %v1401_v17, %v1400_v36  ;;  %v650_v55 = vld [vmem:[#allocation2 + $0x2] sm:$0xff]  ;;  %v652_v17 = vld [vmem:[#allocation2 + $0x1a] sm:$0xff] }
  0xf7   : > { %v1930_v18 = vpop.f32.mrf.mxu2 }
  0xf8   : > { %v1931_v20 = vadd.f32 %v1930_v18, %v1842_v7  ;;  %v1754_v24 = vpop.f32.mrf.mxu0  ;;  %v1320_v18 = vpack.c.b16 %v1303_v11, %v1302_v10  ;;  %v586_v10 = vld [vmem:[#allocation2 + $0x1] sm:$0xff]  ;;  %v587_v11 = vld [vmem:[#allocation2 + $0x9] sm:$0xff] }
  0xf9   : > { %v13271_v25 = vpop.f32.mrf.mxu3  ;;  %v13273_v27 = vadd.f32 %v1843_v8, %v1754_v24  ;;  %v1846_v32 = vpop.f32.mrf.mxu1  ;;  %v12645_v8 = vld [vmem:[%s17295_s1 + $0x1b8] sm:$0xff]  ;;  %v12606_v24 = vld [vmem:[%s17295_s1 + $0x80] sm:$0xff] }
  0xfa   : > { %v13275_v29 = vadd.f32 %v2163_v1, %v1931_v20  ;;  %v12608_v1 = vld [vmem:[%s17295_s1 + $0x90] sm:$0xff]  ;;  %3075 = vmatpush.bf16.msrb.mxu2 %v12645_v8 }
  0xfb   : > { %2317 = vmatpush.bf16.msrb.mxu1 %v12608_v1  ;;  %v682_v1 = vpack.c.bf16 %v650_v55, %v650_v55 }
  0xfc   : > { %1885 = vmatmul.bf16.gmra.mxu1 %v1415_v26 }
  0xfe   : > { %2207 = vmatmul.bf16.gmra.mxu3 %v1318_v62  ;;  %v1239_v62 = vpack.c.bf16 %v1207_v54, %v1207_v54  ;;  %v1305_v54 = vunpack.c.l.b16 %v1113_v43  ;;  %v684_v43 = vpack.c.bf16 %v652_v17, %v652_v17 }
  0xff   : > { %v13277_v37 = vpop.f32.mrf.mxu2  ;;  %2318 = vmatpush.bf16.msrb.mxu1 %v12607_v3 }
 0x100   : > { %v1757_v28 = vpop.f32.mrf.mxu0  ;;  %v1495_v13 = vunpack.c.l.b16 %v1239_v62 }
 0x101   : > { %v2168_v31 = vpop.f32.mrf.mxu3  ;;  %v1847_v46 = vadd.f32 %v1846_v32, %v1757_v28  ;;  %v1848_v47 = vpop.f32.mrf.mxu1  ;;  %v1112_v28 = vpack.c.bf16 %v1080_v33, %v1080_v33  ;;  %v12644_v33 = vld [vmem:[%s17295_s1 + $0x1b0] sm:$0xff] }
 0x102   : > { %v1512_v19 = vpack.c.b16 %v1495_v13, %v1494_v12  ;;  %v938_v12 = vunpack.c.l.b16 %v682_v1  ;;  %3076 = vmatpush.bf16.msrb.mxu2 %v12644_v33  ;;  %v590_v33 = vld [vmem:[#allocation2 + $0x31] sm:$0xff] }
 0x103   : > { %1796 = vmatmul.bf16.gmra.mxu0 %v1319_v38  ;;  %2319 = vmatpush.bf16.msrb.mxu1 %v12606_v24  ;;  %v1304_v53 = vunpack.c.l.b16 %v1112_v28 }
 0x104   : > { %1974 = vmatmul.bf16.gmra.mxu2 %v1511_v39  ;;  %v1209_v39 = vld [vmem:[#allocation2 + $0x18a] sm:$0xff] }
 0x105   : > { %v1241_v45 = vpack.c.bf16 %v1209_v39, %v1209_v39  ;;  %v1321_v61 = vpack.c.b16 %v1305_v54, %v1304_v53  ;;  %v589_v53 = vld [vmem:[#allocation2 + $0x21] sm:$0xff]  ;;  %v940_v54 = vunpack.c.l.b16 %v684_v43 }
 0x107   : > { %v1935_v42 = vpop.f32.mrf.mxu2 }
 0x108   : > { %v1936_v59 = vadd.f32 %v1935_v42, %v1847_v46  ;;  %v1759_v63 = vpop.f32.mrf.mxu0  ;;  %v1497_v42 = vunpack.c.l.b16 %v1241_v45 }
 0x109   : > { %v13289_v0 = vpop.f32.mrf.mxu3  ;;  %v13294_v5 = vadd.f32 %v1848_v47, %v1759_v63  ;;  %v1851_v7 = vpop.f32.mrf.mxu1 }
 0x10a   : > { %v13296_v6 = vadd.f32 %v2168_v31, %v1936_v59  ;;  %v651_v59 = vld [vmem:[#allocation2 + $0xa] sm:$0xff] }
 0x10c   : > { %1890 = vmatmul.bf16.gmra.mxu1 %v1416_v57 }
 0x10e   : > { %2212 = vmatmul.bf16.gmra.mxu3 %v1319_v38  ;;  %v1208_v38 = vld [vmem:[#allocation2 + $0x182] sm:$0xff] }
 0x10f   : > { %v13307_v15 = vpop.f32.mrf.mxu2  ;;  %v1240_v44 = vpack.c.bf16 %v1208_v38, %v1208_v38  ;;  %v653_v38 = vld [vmem:[#allocation2 + $0x22] sm:$0xff] }
 0x110   : > { %v1762_v20 = vpop.f32.mrf.mxu0 }
 0x111   : > { %v2173_v21 = vpop.f32.mrf.mxu3  ;;  %v1852_v26 = vadd.f32 %v1851_v7, %v1762_v20  ;;  %v1853_v32 = vpop.f32.mrf.mxu1  ;;  %v1496_v41 = vunpack.c.l.b16 %v1240_v44  ;;  %v683_v7 = vpack.c.bf16 %v651_v59, %v651_v59  ;;  %v619_v20 = vpack.c.bf16 %v587_v11, %v587_v11  ;;  %v654_v11 = vld [vmem:[#allocation2 + $0x32] sm:$0xff] }
 0x112   : > { %v685_v44 = vpack.c.bf16 %v653_v38, %v653_v38 }
 0x113   : > { %1801 = vmatmul.bf16.gmra.mxu0 %v1320_v18  ;;  %v1513_v62 = vpack.c.b16 %v1497_v42, %v1496_v41  ;;  %v939_v13 = vunpack.c.l.b16 %v683_v7  ;;  %v843_v36 = vunpack.c.l.b16 %v619_v20  ;;  %v686_v20 = vpack.c.bf16 %v654_v11, %v654_v11 }
 0x114   : > { %1979 = vmatmul.bf16.gmra.mxu2 %v1512_v19  ;;  %v618_v19 = vpack.c.bf16 %v586_v10, %v586_v10  ;;  %v941_v41 = vunpack.c.l.b16 %v685_v44 }
 0x115   : > { %v970_v23 = vpack.c.b16 %v939_v13, %v938_v12  ;;  %v655_v12 = vld [vmem:[#allocation2 + $0x3a] sm:$0xff] }
 0x116   : > { %v842_v35 = vunpack.c.l.b16 %v618_v19 }
 0x117   : > { %v1940_v58 = vpop.f32.mrf.mxu2 }
 0x118   : > { %v1941_v31 = vadd.f32 %v1940_v58, %v1852_v26  ;;  %v1764_v46 = vpop.f32.mrf.mxu0  ;;  %v874_v58 = vpack.c.b16 %v843_v36, %v842_v35  ;;  %v942_v35 = vunpack.c.l.b16 %v686_v20 }
 0x119   : > { %v13319_v47 = vpop.f32.mrf.mxu3  ;;  %v13321_v49 = vadd.f32 %v1853_v32, %v1764_v46  ;;  %v1856_v52 = vpop.f32.mrf.mxu1 }
 0x11a   : > { %v13323_v50 = vadd.f32 %v2173_v21, %v1941_v31 }
 0x11c   : > { %1895 = vmatmul.bf16.gmra.mxu1 %v1417_v48  ;;  %v12660_v48 = vld [vmem:[%s17295_s1 + $0x230] sm:$0xff] }
 0x11d   : > { %3254 = vmatpush.bf16.msra.mxu0 %v12660_v48 }
 0x11e   : > { %2217 = vmatmul.bf16.gmra.mxu3 %v1320_v18 }
 0x11f   : > { %v13325_v60 = vpop.f32.mrf.mxu2 }
 0x120   : > { %v1767_v63 = vpop.f32.mrf.mxu0 }
 0x121   : > { %v2178_v57 = vpop.f32.mrf.mxu3  ;;  %v1857_v8 = vadd.f32 %v1856_v52, %v1767_v63  ;;  %v1858_v9 = vpop.f32.mrf.mxu1  ;;  %v588_v52 = vld [vmem:[#allocation2 + $0x19] sm:$0xff] }
 0x122   : > { %v620_v59 = vpack.c.bf16 %v588_v52, %v588_v52  ;;  %v12643_v52 = vld [vmem:[%s17295_s1 + $0x1a8] sm:$0xff] }
 0x123   : > { %1806 = vmatmul.bf16.gmra.mxu0 %v1321_v61  ;;  %v621_v61 = vpack.c.bf16 %v589_v53, %v589_v53  ;;  %v12651_v53 = vld [vmem:[%s17295_s1 + $0x1e8] sm:$0xff]  ;;  %3077 = vmatpush.bf16.msrb.mxu2 %v12643_v52 }
 0x124   : > { %1984 = vmatmul.bf16.gmra.mxu2 %v1513_v62  ;;  %3166 = vmatpush.bf16.msrb.mxu3 %v12651_v53 }
 0x125   : > { %v845_v10 = vunpack.c.l.b16 %v621_v61 }
 0x127   : > { %v1945_v3 = vpop.f32.mrf.mxu2 }
 0x128   : > { %v1946_v18 = vadd.f32 %v1945_v3, %v1857_v8  ;;  %v1769_v21 = vpop.f32.mrf.mxu0 }
 0x129   : > { %v13327_v22 = vpop.f32.mrf.mxu3  ;;  %v13329_v24 = vadd.f32 %v1858_v9, %v1769_v21  ;;  %v1861_v32 = vpop.f32.mrf.mxu1  ;;  %v844_v9 = vunpack.c.l.b16 %v620_v59  ;;  %v687_v21 = vpack.c.bf16 %v655_v12, %v655_v12  ;;  %v12659_v12 = vld [vmem:[%s17295_s1 + $0x228] sm:$0xff] }
 0x12a   : > { %v13331_v26 = vadd.f32 %v2178_v57, %v1946_v18  ;;  %v971_v57 = vpack.c.b16 %v941_v41, %v940_v54  ;;  %3255 = vmatpush.bf16.msra.mxu0 %v12659_v12 }
 0x12b   : > { %v875_v3 = vpack.c.b16 %v845_v10, %v844_v9  ;;  %v943_v36 = vunpack.c.l.b16 %v687_v21 }
 0x12c   : > { %2320 = vmatmul.bf16.vlgmr.msrb.gmra.mxu1 %v970_v23 }
 0x12d   : > { %v972_v44 = vpack.c.b16 %v943_v36, %v942_v35 }
 0x12f   : > { %v13339_v39 = vpop.f32.mrf.mxu2 }
 0x130   : > { %v1772_v28 = vpop.f32.mrf.mxu0 }
 0x131   : > { %v2183_v31 = vpop.f32.mrf.mxu3  ;;  %v1862_v45 = vadd.f32 %v1861_v32, %v1772_v28  ;;  %v1863_v46 = vpop.f32.mrf.mxu1  ;;  %v623_v28 = vpack.c.bf16 %v591_v34, %v591_v34 }
 0x133   : > { %2231 = vmatmul.bf16.vlgmr.msrb.gmra.mxu0 %v874_v58  ;;  %v622_v58 = vpack.c.bf16 %v590_v33, %v590_v33  ;;  %v847_v41 = vunpack.c.l.b16 %v623_v28 }
 0x135   : > { %v846_v54 = vunpack.c.l.b16 %v622_v58 }
 0x137   : > { %v1950_v42 = vpop.f32.mrf.mxu2  ;;  %v13366_v61 = vpack.c.b16 %v847_v41, %v846_v54 }
 0x138   : > { %v1951_v55 = vadd.f32 %v1950_v42, %v1862_v45  ;;  %v1774_v62 = vpop.f32.mrf.mxu0  ;;  %v656_v42 = vld [vmem:[#allocation2 + $0x4a] sm:$0xff] }
 0x139   : > { %v13344_v63 = vpop.f32.mrf.mxu3  ;;  %v13346_v1 = vadd.f32 %v1863_v46, %v1774_v62  ;;  %v1866_v8 = vpop.f32.mrf.mxu1 }
 0x13a   : > { %v13348_v7 = vadd.f32 %v2183_v31, %v1951_v55  ;;  %v657_v55 = vld [vmem:[#allocation2 + $0x52] sm:$0xff] }
 0x13b   : > { %v689_v9 = vpack.c.bf16 %v657_v55, %v657_v55 }
 0x13c   : > { %2325 = vmatmul.bf16.gmra.mxu1 %v971_v57 }
 0x13d   : > { %v945_v20 = vunpack.c.l.b16 %v689_v9  ;;  %v595_v9 = vld [vmem:[#allocation2 + $0x69] sm:$0xff] }
 0x13f   : > { %v13350_v13 = vpop.f32.mrf.mxu2 }
 0x140   : > { %v1777_v18 = vpop.f32.mrf.mxu0 }
 0x141   : > { %v2188_v19 = vpop.f32.mrf.mxu3  ;;  %v1867_v23 = vadd.f32 %v1866_v8, %v1777_v18  ;;  %v1868_v32 = vpop.f32.mrf.mxu1  ;;  %v688_v8 = vpack.c.bf16 %v656_v42, %v656_v42  ;;  %v593_v18 = vld [vmem:[#allocation2 + $0x51] sm:$0xff] }
 0x142   : > { %v625_v33 = vpack.c.bf16 %v593_v18, %v593_v18 }
 0x143   : > { %2236 = vmatmul.bf16.gmra.mxu0 %v875_v3  ;;  %v592_v3 = vld [vmem:[#allocation2 + $0x49] sm:$0xff] }
 0x147   : > { %v1955_v17 = vpop.f32.mrf.mxu2 }
 0x148   : > { %v1956_v38 = vadd.f32 %v1955_v17, %v1867_v23  ;;  %v1779_v31 = vpop.f32.mrf.mxu0 }
 0x149   : > { %v13352_v43 = vpop.f32.mrf.mxu3  ;;  %v13354_v45 = vadd.f32 %v1868_v32, %v1779_v31  ;;  %v1871_v48 = vpop.f32.mrf.mxu1  ;;  %v624_v32 = vpack.c.bf16 %v592_v3, %v592_v3  ;;  %v849_v31 = vunpack.c.l.b16 %v625_v33 }
 0x14a   : > { %v13356_v46 = vadd.f32 %v2188_v19, %v1956_v38  ;;  %v944_v19 = vunpack.c.l.b16 %v688_v8 }
 0x14b   : > { %v848_v28 = vunpack.c.l.b16 %v624_v32 }
 0x14c   : > { %2330 = vmatmul.bf16.gmra.mxu1 %v972_v44  ;;  %v973_v36 = vpack.c.b16 %v945_v20, %v944_v19  ;;  %v658_v44 = vld [vmem:[#allocation2 + $0x62] sm:$0xff]  ;;  %v627_v19 = vpack.c.bf16 %v595_v9, %v595_v9 }
 0x14d   : > { %v13380_v53 = vpack.c.b16 %v849_v31, %v848_v28  ;;  %v690_v42 = vpack.c.bf16 %v658_v44, %v658_v44  ;;  %v660_v44 = vld [vmem:[#allocation2 + $0x7a] sm:$0xff] }
 0x14e   : > { %v851_v31 = vunpack.c.l.b16 %v627_v19 }
 0x14f   : > { %v13364_v59 = vpop.f32.mrf.mxu2 }
 0x150   : > { %v1782_v62 = vpop.f32.mrf.mxu0 }
 0x151   : > { %v2193_v57 = vpop.f32.mrf.mxu3  ;;  %v1872_v10 = vadd.f32 %v1871_v48, %v1782_v62  ;;  %v1873_v11 = vpop.f32.mrf.mxu1  ;;  %v659_v48 = vld [vmem:[#allocation2 + $0x6a] sm:$0xff] }
 0x152   : > { %v691_v55 = vpack.c.bf16 %v659_v48, %v659_v48  ;;  %v661_v48 = vld [vmem:[#allocation2 + $0x82] sm:$0xff] }
 0x153   : > { %2241 = vmatmul.bf16.gmra.mxu0 %v13366_v61 }
 0x157   : > { %v1960_v21 = vpop.f32.mrf.mxu2 }
 0x158   : > { %v1961_v23 = vadd.f32 %v1960_v21, %v1872_v10  ;;  %v1784_v34 = vpop.f32.mrf.mxu0  ;;  %v946_v10 = vunpack.c.l.b16 %v690_v42 }
 0x159   : > { %v13372_v35 = vpop.f32.mrf.mxu3  ;;  %v13374_v17 = vadd.f32 %v1873_v11, %v1784_v34  ;;  %v1876_v58 = vpop.f32.mrf.mxu1  ;;  %v947_v11 = vunpack.c.l.b16 %v691_v55 }
 0x15a   : > { %17334 = vst [vmem:[#allocation5_spill] sm:$0xff] %v13372_v35  ;;  %v13376_v38 = vadd.f32 %v2193_v57, %v1961_v23  ;;  %v594_v57 = vld [vmem:[#allocation2 + $0x61] sm:$0xff] }
 0x15b   : > { %v626_v18 = vpack.c.bf16 %v594_v57, %v594_v57  ;;  %v974_v23 = vpack.c.b16 %v947_v11, %v946_v10  ;;  %v12658_v10 = vld [vmem:[%s17295_s1 + $0x220] sm:$0xff] }
 0x15c   : > { %2335 = vmatmul.bf16.gmra.mxu1 %v973_v36  ;;  %v12642_v36 = vld [vmem:[%s17295_s1 + $0x1a0] sm:$0xff]  ;;  %3256 = vmatpush.bf16.msra.mxu0 %v12658_v10 }
 0x15d   : > { %v850_v28 = vunpack.c.l.b16 %v626_v18  ;;  %3078 = vmatpush.bf16.msrb.mxu2 %v12642_v36  ;;  %v596_v11 = vld [vmem:[#allocation2 + $0x79] sm:$0xff] }
 0x15f   : > { %v13378_v52 = vpop.f32.mrf.mxu2 }
 0x160   : > { %v1787_v54 = vpop.f32.mrf.mxu0 }
 0x161   : > { %v2198_v41 = vpop.f32.mrf.mxu3  ;;  %v1877_v62 = vadd.f32 %v1876_v58, %v1787_v54  ;;  %v1878_v8 = vpop.f32.mrf.mxu1  ;;  %v12650_v58 = vld [vmem:[%s17295_s1 + $0x1e0] sm:$0xff] }
 0x162   : > { %3167 = vmatpush.bf16.msrb.mxu3 %v12650_v58 }
 0x163   : > { %2246 = vmatmul.bf16.gmra.mxu0 %v13380_v53 }
 0x167   : > { %v1965_v12 = vpop.f32.mrf.mxu2 }
 0x168   : > { %v1966_v3 = vadd.f32 %v1965_v12, %v1877_v62  ;;  %v1789_v20 = vpop.f32.mrf.mxu0  ;;  %v692_v62 = vpack.c.bf16 %v660_v44, %v660_v44  ;;  %v597_v12 = vld [vmem:[#allocation2 + $0x81] sm:$0xff] }
 0x169   : > { %v13383_v21 = vpop.f32.mrf.mxu3  ;;  %v13385_v32 = vadd.f32 %v1878_v8, %v1789_v20  ;;  %v1881_v34 = vpop.f32.mrf.mxu1  ;;  %v693_v8 = vpack.c.bf16 %v661_v48, %v661_v48  ;;  %v629_v36 = vpack.c.bf16 %v597_v12, %v597_v12 }
 0x16a   : > { %17335 = vst [vmem:[#allocation6_spill] sm:$0xff] %v13383_v21  ;;  %v13387_v33 = vadd.f32 %v2198_v41, %v1966_v3  ;;  %v13397_v41 = vpack.c.b16 %v851_v31, %v850_v28  ;;  %v948_v3 = vunpack.c.l.b16 %v692_v62  ;;  %v663_v62 = vld [vmem:[#allocation2 + $0x9a] sm:$0xff] }
 0x16b   : > { %17336 = vst [vmem:[#allocation7_spill] sm:$0xff] %v13385_v32  ;;  %v949_v18 = vunpack.c.l.b16 %v693_v8  ;;  %v853_v21 = vunpack.c.l.b16 %v629_v36 }
 0x16c   : > { %17337 = vst [vmem:[#allocation8_spill] sm:$0xff] %v13387_v33  ;;  %2340 = vmatmul.bf16.gmra.mxu1 %v974_v23  ;;  %v628_v23 = vpack.c.bf16 %v596_v11, %v596_v11 }
 0x16f   : > { %v13395_v54 = vpop.f32.mrf.mxu2 }
 0x170   : > { %17338 = vst [vmem:[#allocation9_spill] sm:$0xff] %v13395_v54  ;;  %v1792_v42 = vpop.f32.mrf.mxu0  ;;  %v662_v54 = vld [vmem:[#allocation2 + $0x92] sm:$0xff] }
 0x171   : > { %v2203_v55 = vpop.f32.mrf.mxu3  ;;  %v1882_v57 = vadd.f32 %v1881_v34, %v1792_v42  ;;  %v1883_v9 = vpop.f32.mrf.mxu1  ;;  %v975_v34 = vpack.c.b16 %v949_v18, %v948_v3  ;;  %v852_v42 = vunpack.c.l.b16 %v628_v23  ;;  %v694_v12 = vpack.c.bf16 %v662_v54, %v662_v54 }
 0x173   : > { %2251 = vmatmul.bf16.gmra.mxu0 %v13397_v41  ;;  %v13411_v10 = vpack.c.b16 %v853_v21, %v852_v42  ;;  %v950_v18 = vunpack.c.l.b16 %v694_v12 }
 0x177   : > { %v1970_v19 = vpop.f32.mrf.mxu2 }
 0x178   : > { %v1971_v20 = vadd.f32 %v1970_v19, %v1882_v57  ;;  %v1794_v58 = vpop.f32.mrf.mxu0  ;;  %v695_v19 = vpack.c.bf16 %v663_v62, %v663_v62  ;;  %v12641_v62 = vld [vmem:[%s17295_s1 + $0x198] sm:$0xff] }
 0x179   : > { %v13403_v28 = vpop.f32.mrf.mxu3  ;;  %v13405_v31 = vadd.f32 %v1883_v9, %v1794_v58  ;;  %v1886_v48 = vpop.f32.mrf.mxu1  ;;  %v599_v9 = vld [vmem:[#allocation2 + $0x99] sm:$0xff]  ;;  %3079 = vmatpush.bf16.msrb.mxu2 %v12641_v62 }
 0x17a   : > { %17339 = vst [vmem:[#allocation10_spill] sm:$0xff] %v13403_v28  ;;  %v13407_v44 = vadd.f32 %v2203_v55, %v1971_v20  ;;  %v598_v55 = vld [vmem:[#allocation2 + $0x91] sm:$0xff]  ;;  %v951_v20 = vunpack.c.l.b16 %v695_v19 }
 0x17b   : > { %17340 = vst [vmem:[#allocation11_spill] sm:$0xff] %v13405_v31  ;;  %v630_v58 = vpack.c.bf16 %v598_v55, %v598_v55  ;;  %v664_v19 = vld [vmem:[#allocation2 + $0xaa] sm:$0xff]  ;;  %v665_v55 = vld [vmem:[#allocation2 + $0xb2] sm:$0xff] }
 0x17c   : > { %17341 = vst [vmem:[#allocation12_spill] sm:$0xff] %v13407_v44  ;;  %2345 = vmatmul.bf16.gmra.mxu1 %v975_v34  ;;  %v631_v34 = vpack.c.bf16 %v599_v9, %v599_v9  ;;  %v976_v21 = vpack.c.b16 %v951_v20, %v950_v18  ;;  %v696_v9 = vpack.c.bf16 %v664_v19, %v664_v19 }
 0x17d   : > { %v697_v18 = vpack.c.bf16 %v665_v55, %v665_v55 }
 0x17e   : > { %v855_v12 = vunpack.c.l.b16 %v631_v34  ;;  %v600_v34 = vld [vmem:[#allocation2 + $0xa9] sm:$0xff]  ;;  %v952_v62 = vunpack.c.l.b16 %v696_v9 }
 0x17f   : > { %v13409_v8 = vpop.f32.mrf.mxu2 }
 0x180   : > { %17342 = vst [vmem:[#allocation13_spill] sm:$0xff] %v13409_v8  ;;  %v1797_v57 = vpop.f32.mrf.mxu0 }
 0x181   : > { %v2208_v11 = vpop.f32.mrf.mxu3  ;;  %v1887_v28 = vadd.f32 %v1886_v48, %v1797_v57  ;;  %v1888_v3 = vpop.f32.mrf.mxu1  ;;  %v12649_v57 = vld [vmem:[%s17295_s1 + $0x1d8] sm:$0xff] }
 0x182   : > { %3168 = vmatpush.bf16.msrb.mxu3 %v12649_v57  ;;  %v953_v57 = vunpack.c.l.b16 %v697_v18  ;;  %v667_v18 = vld [vmem:[#allocation2 + $0xca] sm:$0xff] }
 0x183   : > { %2256 = vmatmul.bf16.gmra.mxu0 %v13411_v10 }
 0x184   : > { %v977_v55 = vpack.c.b16 %v953_v57, %v952_v62  ;;  %v2402_v62 = vld [vmem:[#allocation2 + $0x30] sm:$0xff] }
 0x187   : > { %v1975_v23 = vpop.f32.mrf.mxu2 }
 0x188   : > { %v1976_v36 = vadd.f32 %v1975_v23, %v1887_v28  ;;  %v1799_v31 = vpop.f32.mrf.mxu0  ;;  %v854_v28 = vunpack.c.l.b16 %v630_v58  ;;  %v12657_v58 = vld [vmem:[%s17295_s1 + $0x218] sm:$0xff] }
 0x189   : > { %v13414_v8 = vpop.f32.mrf.mxu3  ;;  %v13416_v42 = vadd.f32 %v1888_v3, %v1799_v31  ;;  %v1891_v48 = vpop.f32.mrf.mxu1  ;;  %3257 = vmatpush.bf16.msra.mxu0 %v12657_v58 }
 0x18a   : > { %17343 = vst [vmem:[#allocation14_spill] sm:$0xff] %v13414_v8  ;;  %v13418_v54 = vadd.f32 %v2208_v11, %v1976_v36  ;;  %v13428_v11 = vpack.c.b16 %v855_v12, %v854_v28  ;;  %v632_v12 = vpack.c.bf16 %v600_v34, %v600_v34 }
 0x18b   : > { %17344 = vst [vmem:[#allocation15_spill] sm:$0xff] %v13416_v42 }
 0x18c   : > { %17345 = vst [vmem:[#allocation16_spill] sm:$0xff] %v13418_v54  ;;  %2350 = vmatmul.bf16.gmra.mxu1 %v976_v21  ;;  %v601_v21 = vld [vmem:[#allocation2 + $0xb1] sm:$0xff]  ;;  %v856_v44 = vunpack.c.l.b16 %v632_v12  ;;  %v12638_v12 = vld [vmem:[%s17295_s1 + $0x180] sm:$0xff] }
 0x18d   : > { %v12640_v54 = vld [vmem:[%s17295_s1 + $0x190] sm:$0xff] }
 0x18e   : > { %3080 = vmatpush.bf16.msrb.mxu2 %v12640_v54  ;;  %v12648_v54 = vld [vmem:[%s17295_s1 + $0x1d0] sm:$0xff] }
 0x18f   : > { %v13426_v31 = vpop.f32.mrf.mxu2  ;;  %3169 = vmatpush.bf16.msrb.mxu3 %v12648_v54 }
 0x190   : > { %17346 = vst [vmem:[#allocation17_spill] sm:$0xff] %v13426_v31  ;;  %v1802_v3 = vpop.f32.mrf.mxu0  ;;  %v633_v31 = vpack.c.bf16 %v601_v21, %v601_v21  ;;  %v699_v21 = vpack.c.bf16 %v667_v18, %v667_v18 }
 0x191   : > { %v1892_v20 = vadd.f32 %v1891_v48, %v1802_v3  ;;  %v1893_v23 = vpop.f32.mrf.mxu1  ;;  %v2213_v36 = vpop.f32.mrf.mxu3 }
 0x192   : > { %v857_v32 = vunpack.c.l.b16 %v633_v31  ;;  %v2403_v31 = vld [vmem:[#allocation2 + $0x38] sm:$0xff]  ;;  %v955_v18 = vunpack.c.l.b16 %v699_v21 }
 0x193   : > { %2261 = vmatmul.bf16.gmra.mxu0 %v13428_v11 }
 0x197   : > { %v1980_v8 = vpop.f32.mrf.mxu2 }
 0x198   : > { %v1981_v28 = vadd.f32 %v1980_v8, %v1892_v20  ;;  %v1804_v19 = vpop.f32.mrf.mxu0  ;;  %v666_v8 = vld [vmem:[#allocation2 + $0xc2] sm:$0xff] }
 0x199   : > { %v13434_v48 = vadd.f32 %v1893_v23, %v1804_v19  ;;  %v1896_v42 = vpop.f32.mrf.mxu1  ;;  %v13441_v9 = vpop.f32.mrf.mxu3  ;;  %v12639_v23 = vld [vmem:[%s17295_s1 + $0x188] sm:$0xff]  ;;  %v698_v34 = vpack.c.bf16 %v666_v8, %v666_v8  ;;  %v2434_v19 = vpack.c.bf16 %v2402_v62, %v2402_v62 }
 0x19a   : > { %v13436_v3 = vadd.f32 %v2213_v36, %v1981_v28  ;;  %17349 = vst [vmem:[#allocation20_spill] sm:$0xff] %v13441_v9  ;;  %v13448_v36 = vpack.c.b16 %v857_v32, %v856_v44  ;;  %3081 = vmatpush.bf16.msrb.mxu2 %v12639_v23  ;;  %v602_v32 = vld [vmem:[#allocation2 + $0xc1] sm:$0xff]  ;;  %v603_v44 = vld [vmem:[#allocation2 + $0xc9] sm:$0xff] }
 0x19b   : > { %17347 = vst [vmem:[#allocation18_spill] sm:$0xff] %v13434_v48  ;;  %v954_v8 = vunpack.c.l.b16 %v698_v34  ;;  %v634_v62 = vpack.c.bf16 %v602_v32, %v602_v32  ;;  %v668_v32 = vld [vmem:[#allocation2 + $0xda] sm:$0xff] }
 0x19c   : > { %17348 = vst [vmem:[#allocation19_spill] sm:$0xff] %v13436_v3  ;;  %2355 = vmatmul.bf16.gmra.mxu1 %v977_v55  ;;  %v2435_v55 = vpack.c.bf16 %v2403_v31, %v2403_v31  ;;  %v635_v31 = vpack.c.bf16 %v603_v44, %v603_v44  ;;  %v2405_v44 = vld [vmem:[#allocation2 + $0x50] sm:$0xff] }
 0x19d   : > { %v978_v35 = vpack.c.b16 %v955_v18, %v954_v8 }
 0x19e   : > { %3082 = vmatpush.bf16.msrb.mxu2 %v12638_v12  ;;  %v2627_v23 = vunpack.c.l.b16 %v2435_v55  ;;  %v12646_v12 = vld [vmem:[%s17295_s1 + $0x1c0] sm:$0xff]  ;;  %v859_v55 = vunpack.c.l.b16 %v635_v31 }
 0x19f   : > { %v13443_v20 = vpop.f32.mrf.mxu2 }
 0x1a0   : > { %17350 = vst [vmem:[#allocation21_spill] sm:$0xff] %v13443_v20  ;;  %v1807_v58 = vpop.f32.mrf.mxu0  ;;  %v12647_v20 = vld [vmem:[%s17295_s1 + $0x1c8] sm:$0xff] }
 0x1a1   : > { %v1897_v57 = vadd.f32 %v1896_v42, %v1807_v58  ;;  %v1898_v28 = vpop.f32.mrf.mxu1  ;;  %v2626_v42 = vunpack.c.l.b16 %v2434_v19  ;;  %v2218_v9 = vpop.f32.mrf.mxu3  ;;  %3170 = vmatpush.bf16.msrb.mxu3 %v12647_v20  ;;  %v858_v19 = vunpack.c.l.b16 %v634_v62  ;;  %v669_v20 = vld [vmem:[#allocation2 + $0xe2] sm:$0xff]  ;;  %v604_v62 = vld [vmem:[#allocation2 + $0xd9] sm:$0xff] }
 0x1a3   : > { %2266 = vmatmul.bf16.gmra.mxu0 %v13448_v36  ;;  %v2658_v48 = vpack.c.b16 %v2627_v23, %v2626_v42  ;;  %v2437_v23 = vpack.c.bf16 %v2405_v44, %v2405_v44 }
 0x1a5   : > { %3083 = vmatmul.bf16.vlgmr.msrb.gmra.mxu2 %v2658_v48  ;;  %3171 = vmatpush.bf16.msrb.mxu3 %v12646_v12 }
 0x1a7   : > { %v1985_v58 = vpop.f32.mrf.mxu2 }
 0x1a8   : > { %v1986_v3 = vadd.f32 %v1985_v58, %v1897_v57  ;;  %v1809_v33 = vpop.f32.mrf.mxu0  ;;  %v12693_v57 = vld [vmem:[%s17297_s3 + $0xf8] sm:$0xff]  ;;  %3172 = vmatmul.bf16.vlgmr.msrb.gmra.mxu3 %v13366_v61  ;;  %v605_v61 = vld [vmem:[#allocation2 + $0xe1] sm:$0xff] }
 0x1a9   : > { %v13460_v34 = vadd.f32 %v1898_v28, %v1809_v33  ;;  %v2321_v54 = vpop.f32.mrf.mxu1  ;;  %4675 = vmatpush.bf16.msra.mxu1 %v12693_v57  ;;  %v13470_v33 = vpack.c.b16 %v859_v55, %v858_v19  ;;  %v2404_v28 = vld [vmem:[#allocation2 + $0x48] sm:$0xff]  ;;  %v2629_v55 = vunpack.c.l.b16 %v2437_v23 }
 0x1aa   : > { %v13462_v21 = vadd.f32 %v2218_v9, %v1986_v3  ;;  %v700_v3 = vpack.c.bf16 %v668_v32, %v668_v32  ;;  %v701_v9 = vpack.c.bf16 %v669_v20, %v669_v20  ;;  %v2436_v42 = vpack.c.bf16 %v2404_v28, %v2404_v28 }
 0x1ab   : > { %17351 = vst [vmem:[#allocation22_spill] sm:$0xff] %v13460_v34  ;;  %v637_v32 = vpack.c.bf16 %v605_v61, %v605_v61  ;;  %v670_v34 = vld [vmem:[#allocation2 + $0xf2] sm:$0xff]  ;;  %v2407_v61 = vld [vmem:[#allocation2 + $0x68] sm:$0xff] }
 0x1ac   : > { %2360 = vmatmul.bf16.gmra.mxu1 %v978_v35  ;;  %v12656_v35 = vld [vmem:[%s17295_s1 + $0x210] sm:$0xff]  ;;  %v956_v31 = vunpack.c.l.b16 %v700_v3  ;;  %v957_v12 = vunpack.c.l.b16 %v701_v9  ;;  %v2628_v19 = vunpack.c.l.b16 %v2436_v42  ;;  %v671_v3 = vld [vmem:[#allocation2 + $0xfa] sm:$0xff]  ;;  %v702_v23 = vpack.c.bf16 %v670_v34, %v670_v34 }
 0x1ad   : > { %3258 = vmatpush.bf16.msra.mxu0 %v12656_v35  ;;  %v703_v35 = vpack.c.bf16 %v671_v3, %v671_v3 }
 0x1ae   : > { %v2659_v57 = vpack.c.b16 %v2629_v55, %v2628_v19  ;;  %v606_v55 = vld [vmem:[#allocation2 + $0xf1] sm:$0xff] }
 0x1af   : > { %v638_v34 = vpack.c.bf16 %v606_v55, %v606_v55  ;;  %v2408_v55 = vld [vmem:[#allocation2 + $0x78] sm:$0xff] }
 0x1b0   : > { %v2232_v48 = vpop.f32.mrf.mxu0 }
 0x1b1   : > { %v2233_v8 = vadd.f32 %v2232_v48, %v13195_v2  ;;  %v2323_v18 = vpop.f32.mrf.mxu1  ;;  %v636_v2 = vpack.c.bf16 %v604_v62, %v604_v62  ;;  %v979_v48 = vpack.c.b16 %v957_v12, %v956_v31  ;;  %v2406_v62 = vld [vmem:[#allocation2 + $0x60] sm:$0xff] }
 0x1b2   : > { %v2438_v12 = vpack.c.bf16 %v2406_v62, %v2406_v62 }
 0x1b3   : > { %v13474_v58 = vadd.f32 %v2321_v54, %v2233_v8  ;;  %2271 = vmatmul.bf16.gmra.mxu0 %v13470_v33  ;;  %v860_v8 = vunpack.c.l.b16 %v636_v2  ;;  %v959_v2 = vunpack.c.l.b16 %v703_v35  ;;  %v672_v35 = vld [vmem:[#allocation2 + $0x10a] sm:$0xff] }
 0x1b5   : > { %17352 = vst [vmem:[#allocation23_spill] sm:$0xff] %v13474_v58  ;;  %3088 = vmatmul.bf16.gmra.mxu2 %v2659_v57  ;;  %v861_v58 = vunpack.c.l.b16 %v637_v32  ;;  %v607_v57 = vld [vmem:[#allocation2 + $0xf9] sm:$0xff]  ;;  %v2630_v32 = vunpack.c.l.b16 %v2438_v12 }
 0x1b7   : > { %v13483_v9 = vpack.c.b16 %v861_v58, %v860_v8  ;;  %v958_v58 = vunpack.c.l.b16 %v702_v23  ;;  %v12692_v23 = vld [vmem:[%s17297_s3 + $0xf0] sm:$0xff] }
 0x1b8   : > { %v2234_v20 = vpop.f32.mrf.mxu0  ;;  %3177 = vmatmul.bf16.gmra.mxu3 %v13380_v53  ;;  %4676 = vmatpush.bf16.msra.mxu1 %v12692_v23 }
 0x1b9   : > { %v2235_v54 = vadd.f32 %v2234_v20, %v13197_v16  ;;  %v2326_v28 = vpop.f32.mrf.mxu1  ;;  %v980_v8 = vpack.c.b16 %v959_v2, %v958_v58  ;;  %v2440_v2 = vpack.c.bf16 %v2408_v55, %v2408_v55 }
 0x1bb   : > { %v13481_v44 = vadd.f32 %v2323_v18, %v2235_v54  ;;  %v2439_v18 = vpack.c.bf16 %v2407_v61, %v2407_v61  ;;  %v673_v61 = vld [vmem:[#allocation2 + $0x112] sm:$0xff] }
 0x1bc   : > { %2365 = vmatmul.bf16.gmra.mxu1 %v979_v48  ;;  %v639_v48 = vpack.c.bf16 %v607_v57, %v607_v57 }
 0x1bd   : > { %v2631_v53 = vunpack.c.l.b16 %v2439_v18  ;;  %v704_v18 = vpack.c.bf16 %v672_v35, %v672_v35 }
 0x1be   : > { %v863_v62 = vunpack.c.l.b16 %v639_v48 }
 0x1bf   : > { %v2660_v20 = vpack.c.b16 %v2631_v53, %v2630_v32  ;;  %v960_v48 = vunpack.c.l.b16 %v704_v18  ;;  %v675_v18 = vld [vmem:[#allocation2 + $0x12a] sm:$0xff] }
 0x1c0   : > { %v2237_v42 = vpop.f32.mrf.mxu0 }
 0x1c1   : > { %v2238_v31 = vadd.f32 %v2237_v42, %v13211_v40  ;;  %v2328_v16 = vpop.f32.mrf.mxu1 }
 0x1c3   : > { %v13487_v19 = vadd.f32 %v2326_v28, %v2238_v31  ;;  %2276 = vmatmul.bf16.gmra.mxu0 %v13483_v9  ;;  %v862_v28 = vunpack.c.l.b16 %v638_v34  ;;  %v608_v34 = vld [vmem:[#allocation2 + $0x109] sm:$0xff] }
 0x1c5   : > { %3093 = vmatmul.bf16.gmra.mxu2 %v2660_v20  ;;  %v13496_v31 = vpack.c.b16 %v863_v62, %v862_v28  ;;  %v12655_v20 = vld [vmem:[%s17295_s1 + $0x208] sm:$0xff] }
 0x1c6   : > { %3259 = vmatpush.bf16.msra.mxu0 %v12655_v20  ;;  %v707_v20 = vpack.c.bf16 %v675_v18, %v675_v18 }
 0x1c8   : > { %v2239_v54 = vpop.f32.mrf.mxu0  ;;  %3182 = vmatmul.bf16.gmra.mxu3 %v13397_v41  ;;  %v609_v41 = vld [vmem:[#allocation2 + $0x111] sm:$0xff] }
 0x1c9   : > { %v2240_v40 = vadd.f32 %v2239_v54, %v13220_v56  ;;  %v2331_v3 = vpop.f32.mrf.mxu1  ;;  %v705_v56 = vpack.c.bf16 %v673_v61, %v673_v61  ;;  %v641_v62 = vpack.c.bf16 %v609_v41, %v609_v41  ;;  %v2411_v41 = vld [vmem:[#allocation2 + $0x98] sm:$0xff] }
 0x1cb   : > { %v13491_v42 = vadd.f32 %v2328_v16, %v2240_v40  ;;  %v2409_v16 = vld [vmem:[#allocation2 + $0x80] sm:$0xff]  ;;  %v961_v54 = vunpack.c.l.b16 %v705_v56 }
 0x1cc   : > { %2370 = vmatmul.bf16.gmra.mxu1 %v980_v8  ;;  %v2441_v32 = vpack.c.bf16 %v2409_v16, %v2409_v16  ;;  %v2632_v8 = vunpack.c.l.b16 %v2440_v2  ;;  %v865_v16 = vunpack.c.l.b16 %v641_v62  ;;  %v963_v62 = vunpack.c.l.b16 %v707_v20  ;;  %v676_v20 = vld [vmem:[#allocation2 + $0x13a] sm:$0xff] }
 0x1cd   : > { %v981_v35 = vpack.c.b16 %v961_v54, %v960_v48 }
 0x1ce   : > { %v2633_v40 = vunpack.c.l.b16 %v2441_v32 }
 0x1d0   : > { %v2242_v12 = vpop.f32.mrf.mxu0  ;;  %v2661_v28 = vpack.c.b16 %v2633_v40, %v2632_v8  ;;  %v610_v40 = vld [vmem:[#allocation2 + $0x121] sm:$0xff] }
 0x1d1   : > { %v2243_v57 = vadd.f32 %v2242_v12, %v13233_v14  ;;  %v2333_v58 = vpop.f32.mrf.mxu1  ;;  %v640_v14 = vpack.c.bf16 %v608_v34, %v608_v34  ;;  %v2410_v34 = vld [vmem:[#allocation2 + $0x90] sm:$0xff] }
 0x1d2   : > { %v2442_v54 = vpack.c.bf16 %v2410_v34, %v2410_v34 }
 0x1d3   : > { %v13500_v53 = vadd.f32 %v2331_v3, %v2243_v57  ;;  %2281 = vmatmul.bf16.gmra.mxu0 %v13496_v31  ;;  %v864_v55 = vunpack.c.l.b16 %v640_v14  ;;  %v674_v57 = vld [vmem:[#allocation2 + $0x122] sm:$0xff] }
 0x1d4   : > { %v706_v32 = vpack.c.bf16 %v674_v57, %v674_v57 }
 0x1d5   : > { %3098 = vmatmul.bf16.gmra.mxu2 %v2661_v28  ;;  %v13509_v56 = vpack.c.b16 %v865_v16, %v864_v55  ;;  %v611_v28 = vld [vmem:[#allocation2 + $0x129] sm:$0xff] }
 0x1d6   : > { %v962_v14 = vunpack.c.l.b16 %v706_v32  ;;  %v643_v55 = vpack.c.bf16 %v611_v28, %v611_v28  ;;  %v12691_v32 = vld [vmem:[%s17297_s3 + $0xe8] sm:$0xff] }
 0x1d7   : > { %4677 = vmatpush.bf16.msra.mxu1 %v12691_v32 }
 0x1d8   : > { %v2244_v23 = vpop.f32.mrf.mxu0  ;;  %3187 = vmatmul.bf16.gmra.mxu3 %v13411_v10  ;;  %v982_v57 = vpack.c.b16 %v963_v62, %v962_v14  ;;  %v867_v34 = vunpack.c.l.b16 %v643_v55  ;;  %v613_v55 = vld [vmem:[#allocation2 + $0x141] sm:$0xff] }
 0x1d9   : > { %v2245_v3 = vadd.f32 %v2244_v23, %v13239_v30  ;;  %v2336_v61 = vpop.f32.mrf.mxu1  ;;  %v2634_v23 = vunpack.c.l.b16 %v2442_v54 }
 0x1db   : > { %v13507_v12 = vadd.f32 %v2333_v58, %v2245_v3  ;;  %v2443_v58 = vpack.c.bf16 %v2411_v41, %v2411_v41  ;;  %v642_v3 = vpack.c.bf16 %v610_v40, %v610_v40  ;;  %v677_v41 = vld [vmem:[#allocation2 + $0x142] sm:$0xff] }
 0x1dc   : > { %2375 = vmatmul.bf16.gmra.mxu1 %v981_v35  ;;  %v2412_v40 = vld [vmem:[#allocation2 + $0xa8] sm:$0xff] }
 0x1dd   : > { %v2635_v10 = vunpack.c.l.b16 %v2443_v58  ;;  %v708_v58 = vpack.c.bf16 %v676_v20, %v676_v20  ;;  %v2444_v62 = vpack.c.bf16 %v2412_v40, %v2412_v40 }
 0x1df   : > { %v2662_v35 = vpack.c.b16 %v2635_v10, %v2634_v23  ;;  %v1933_v10 = vadd.f32 %v13277_v37, %v13273_v27  ;;  %v645_v27 = vpack.c.bf16 %v613_v55, %v613_v55 }
 0x1e0   : > { %v2247_v2 = vpop.f32.mrf.mxu0 }
 0x1e1   : > { %v2248_v48 = vadd.f32 %v2247_v2, %v13249_v51  ;;  %v2338_v30 = vpop.f32.mrf.mxu1  ;;  %v869_v40 = vunpack.c.l.b16 %v645_v27 }
 0x1e3   : > { %v13513_v8 = vadd.f32 %v2336_v61, %v2248_v48  ;;  %2286 = vmatmul.bf16.gmra.mxu0 %v13509_v56  ;;  %v866_v61 = vunpack.c.l.b16 %v642_v3  ;;  %v612_v3 = vld [vmem:[#allocation2 + $0x139] sm:$0xff] }
 0x1e4   : > { %v644_v32 = vpack.c.bf16 %v612_v3, %v612_v3 }
 0x1e5   : > { %3103 = vmatmul.bf16.gmra.mxu2 %v2662_v35  ;;  %v13522_v48 = vpack.c.b16 %v867_v34, %v866_v61  ;;  %v2166_v34 = vadd.f32 %v13271_v25, %v1933_v10  ;;  %v2415_v10 = vld [vmem:[#allocation2 + $0xc8] sm:$0xff] }
 0x1e8   : > { %v2249_v16 = vpop.f32.mrf.mxu0  ;;  %3192 = vmatmul.bf16.gmra.mxu3 %v13428_v11  ;;  %v12654_v11 = vld [vmem:[%s17295_s1 + $0x200] sm:$0xff] }
 0x1e9   : > { %v2250_v51 = vadd.f32 %v2249_v16, %v13258_v4  ;;  %v2341_v18 = vpop.f32.mrf.mxu1  ;;  %v709_v4 = vpack.c.bf16 %v677_v41, %v677_v41  ;;  %v964_v16 = vunpack.c.l.b16 %v708_v58  ;;  %3260 = vmatpush.bf16.msra.mxu0 %v12654_v11  ;;  %v679_v58 = vld [vmem:[#allocation2 + $0x15a] sm:$0xff] }
 0x1ea   : > { %v711_v25 = vpack.c.bf16 %v679_v58, %v679_v58 }
 0x1eb   : > { %v13517_v2 = vadd.f32 %v2338_v30, %v2250_v51  ;;  %v2413_v30 = vld [vmem:[#allocation2 + $0xb0] sm:$0xff] }
 0x1ec   : > { %2380 = vmatmul.bf16.gmra.mxu1 %v982_v57  ;;  %v2445_v23 = vpack.c.bf16 %v2413_v30, %v2413_v30  ;;  %v965_v57 = vunpack.c.l.b16 %v709_v4  ;;  %v678_v30 = vld [vmem:[#allocation2 + $0x152] sm:$0xff] }
 0x1ee   : > { %v2637_v51 = vunpack.c.l.b16 %v2445_v23  ;;  %v2414_v23 = vld [vmem:[#allocation2 + $0xc0] sm:$0xff] }
 0x1ef   : > { %v2446_v55 = vpack.c.bf16 %v2414_v23, %v2414_v23 }
 0x1f0   : > { %v2252_v54 = vpop.f32.mrf.mxu0 }
 0x1f1   : > { %v2253_v28 = vadd.f32 %v2252_v54, %v13275_v29  ;;  %v13526_v14 = vpop.f32.mrf.mxu1  ;;  %v2636_v29 = vunpack.c.l.b16 %v2444_v62  ;;  %v868_v54 = vunpack.c.l.b16 %v644_v32  ;;  %v710_v62 = vpack.c.bf16 %v678_v30, %v678_v30 }
 0x1f2   : > { %v2638_v32 = vunpack.c.l.b16 %v2446_v55  ;;  %v2416_v55 = vld [vmem:[#allocation2 + $0xd8] sm:$0xff] }
 0x1f3   : > { %v13530_v35 = vadd.f32 %v2341_v18, %v2253_v28  ;;  %2291 = vmatmul.bf16.gmra.mxu0 %v13522_v48  ;;  %v2663_v61 = vpack.c.b16 %v2637_v51, %v2636_v29  ;;  %v983_v18 = vpack.c.b16 %v965_v57, %v964_v16  ;;  %v13539_v4 = vpack.c.b16 %v869_v40, %v868_v54  ;;  %v614_v51 = vld [vmem:[#allocation2 + $0x151] sm:$0xff] }
 0x1f4   : > { %v2447_v16 = vpack.c.bf16 %v2415_v10, %v2415_v10  ;;  %v1938_v57 = vadd.f32 %v13307_v15, %v13294_v5 }
 0x1f5   : > { %3108 = vmatmul.bf16.gmra.mxu2 %v2663_v61  ;;  %v966_v61 = vunpack.c.l.b16 %v710_v62  ;;  %v680_v62 = vld [vmem:[#allocation2 + $0x16a] sm:$0xff] }
 0x1f6   : > { %v2639_v27 = vunpack.c.l.b16 %v2447_v16  ;;  %v712_v10 = vpack.c.bf16 %v680_v62, %v680_v62  ;;  %v2417_v16 = vld [vmem:[#allocation2 + $0xe0] sm:$0xff] }
 0x1f8   : > { %v2254_v37 = vpop.f32.mrf.mxu0  ;;  %3197 = vmatmul.bf16.gmra.mxu3 %v13448_v36  ;;  %v615_v36 = vld [vmem:[#allocation2 + $0x159] sm:$0xff] }
 0x1f9   : > { %v13537_v20 = vadd.f32 %v2254_v37, %v2166_v34  ;;  %v2346_v41 = vpop.f32.mrf.mxu1  ;;  %v967_v34 = vunpack.c.l.b16 %v711_v25  ;;  %v2664_v37 = vpack.c.b16 %v2639_v27, %v2638_v32  ;;  %v647_v54 = vpack.c.bf16 %v615_v36, %v615_v36  ;;  %v681_v25 = vld [vmem:[#allocation2 + $0x172] sm:$0xff] }
 0x1fa   : > { %v2448_v36 = vpack.c.bf16 %v2416_v55, %v2416_v55 }
 0x1fb   : > { %v984_v30 = vpack.c.b16 %v967_v34, %v966_v61  ;;  %v2449_v61 = vpack.c.bf16 %v2417_v16, %v2417_v16  ;;  %v1943_v34 = vadd.f32 %v13325_v60, %v13321_v49 }
 0x1fc   : > { %2385 = vmatmul.bf16.gmra.mxu1 %v983_v18  ;;  %v646_v18 = vpack.c.bf16 %v614_v51, %v614_v51  ;;  %v2640_v27 = vunpack.c.l.b16 %v2448_v36  ;;  %v1948_v36 = vadd.f32 %v13339_v39, %v13329_v24  ;;  %v13586_v39 = vpop.f32.mrf.mxu3 }
 0x1fe   : > { %v870_v15 = vunpack.c.l.b16 %v646_v18  ;;  %v968_v18 = vunpack.c.l.b16 %v712_v10  ;;  %v2418_v10 = vld [vmem:[#allocation2 + $0xf0] sm:$0xff] }
 0x1ff   : > { %v2450_v16 = vpack.c.bf16 %v2418_v10, %v2418_v10 }
 0x200   : > { %v2257_v28 = vpop.f32.mrf.mxu0 }
 0x201   : > { %v2258_v11 = vadd.f32 %v2257_v28, %v13296_v6  ;;  %v13543_v3 = vpop.f32.mrf.mxu1  ;;  %v2171_v6 = vadd.f32 %v13289_v0, %v1938_v57  ;;  %v12690_v28 = vld [vmem:[%s17297_s3 + $0xe0] sm:$0xff] }
 0x202   : > { %4678 = vmatpush.bf16.msra.mxu1 %v12690_v28 }
 0x203   : > { %v13547_v29 = vadd.f32 %v2346_v41, %v2258_v11  ;;  %2296 = vmatmul.bf16.gmra.mxu0 %v13539_v4  ;;  %v871_v41 = vunpack.c.l.b16 %v647_v54  ;;  %v713_v11 = vpack.c.bf16 %v681_v25, %v681_v25 }
 0x205   : > { %3113 = vmatmul.bf16.gmra.mxu2 %v2664_v37  ;;  %v13556_v23 = vpack.c.b16 %v871_v41, %v870_v15  ;;  %v616_v37 = vld [vmem:[#allocation2 + $0x169] sm:$0xff]  ;;  %v969_v54 = vunpack.c.l.b16 %v713_v11  ;;  %v2419_v11 = vld [vmem:[#allocation2 + $0xf8] sm:$0xff] }
 0x207   : > { %v985_v28 = vpack.c.b16 %v969_v54, %v968_v18 }
 0x208   : > { %v2259_v40 = vpop.f32.mrf.mxu0  ;;  %3202 = vmatmul.bf16.gmra.mxu3 %v13470_v33  ;;  %v2641_v33 = vunpack.c.l.b16 %v2449_v61  ;;  %v13578_v61 = vpop.f32.mrf.mxu2 }
 0x209   : > { %v13551_v58 = vadd.f32 %v2259_v40, %v2171_v6  ;;  %v2351_v5 = vpop.f32.mrf.mxu1  ;;  %v617_v6 = vld [vmem:[#allocation2 + $0x171] sm:$0xff] }
 0x20a   : > { %v2665_v40 = vpack.c.b16 %v2641_v33, %v2640_v27  ;;  %v649_v15 = vpack.c.bf16 %v617_v6, %v617_v6  ;;  %v2642_v27 = vunpack.c.l.b16 %v2450_v16  ;;  %v2530_v33 = vld [vmem:[#allocation2 + $0x32] sm:$0xff]  ;;  %v1953_v16 = vadd.f32 %v13350_v13, %v13346_v1 }
 0x20b   : > { %v2562_v18 = vpack.c.bf16 %v2530_v33, %v2530_v33 }
 0x20c   : > { %2390 = vmatmul.bf16.gmra.mxu1 %v984_v30  ;;  %v648_v30 = vpack.c.bf16 %v616_v37, %v616_v37  ;;  %v2531_v37 = vld [vmem:[#allocation2 + $0x3a] sm:$0xff] }
 0x20d   : > { %v2563_v54 = vpack.c.bf16 %v2531_v37, %v2531_v37  ;;  %v2532_v37 = vld [vmem:[#allocation2 + $0x4a] sm:$0xff] }
 0x20e   : > { %v872_v60 = vunpack.c.l.b16 %v648_v30  ;;  %v2818_v30 = vunpack.c.l.b16 %v2562_v18  ;;  %v2186_v18 = vadd.f32 %v13344_v63, %v1953_v16  ;;  %v2564_v1 = vpack.c.bf16 %v2532_v37, %v2532_v37 }
 0x210   : > { %v2262_v0 = vpop.f32.mrf.mxu0 }
 0x211   : > { %v2263_v57 = vadd.f32 %v2262_v0, %v13323_v50  ;;  %v13560_v51 = vpop.f32.mrf.mxu1  ;;  %v2176_v50 = vadd.f32 %v13319_v47, %v1943_v34 }
 0x213   : > { %v13564_v32 = vadd.f32 %v2351_v5, %v2263_v57  ;;  %2301 = vmatmul.bf16.gmra.mxu0 %v13556_v23  ;;  %v873_v5 = vunpack.c.l.b16 %v649_v15  ;;  %v2451_v57 = vpack.c.bf16 %v2419_v11, %v2419_v11  ;;  %v2819_v15 = vunpack.c.l.b16 %v2563_v54 }
 0x215   : > { %3118 = vmatmul.bf16.gmra.mxu2 %v2665_v40  ;;  %v13570_v25 = vpack.c.b16 %v873_v5, %v872_v60  ;;  %v2420_v60 = vld [vmem:[#allocation2 + $0x108] sm:$0xff]  ;;  %v2421_v5 = vld [vmem:[#allocation2 + $0x110] sm:$0xff] }
 0x216   : > { %v2452_v11 = vpack.c.bf16 %v2420_v60, %v2420_v60 }
 0x218   : > { %v2264_v41 = vpop.f32.mrf.mxu0  ;;  %3207 = vmatmul.bf16.gmra.mxu3 %v13483_v9  ;;  %v2643_v9 = vunpack.c.l.b16 %v2451_v57  ;;  %v2644_v33 = vunpack.c.l.b16 %v2452_v11 }
 0x219   : > { %v13568_v62 = vadd.f32 %v2264_v41, %v2176_v50  ;;  %v2356_v49 = vpop.f32.mrf.mxu1  ;;  %v12689_v41 = vld [vmem:[%s17297_s3 + $0xd8] sm:$0xff] }
 0x21a   : > { %v2666_v6 = vpack.c.b16 %v2643_v9, %v2642_v27  ;;  %4679 = vmatpush.bf16.msra.mxu1 %v12689_v41 }
 0x21c   : > { %2395 = vmatmul.bf16.gmra.mxu1 %v985_v28 }
 0x220   : > { %v2267_v0 = vpop.f32.mrf.mxu0 }
 0x221   : > { %v2268_v47 = vadd.f32 %v2267_v0, %v13331_v26  ;;  %v13574_v55 = vpop.f32.mrf.mxu1  ;;  %v2181_v26 = vadd.f32 %v13327_v22, %v1948_v36 }
 0x223   : > { %v13580_v34 = vadd.f32 %v2356_v49, %v2268_v47  ;;  %2306 = vmatmul.bf16.gmra.mxu0 %v13570_v25  ;;  %v2850_v49 = vpack.c.b16 %v2819_v15, %v2818_v30  ;;  %v2453_v47 = vpack.c.bf16 %v2421_v5, %v2421_v5  ;;  %v2820_v15 = vunpack.c.l.b16 %v2564_v1  ;;  %v2422_v5 = vld [vmem:[#allocation2 + $0x120] sm:$0xff] }
 0x225   : > { %3123 = vmatmul.bf16.gmra.mxu2 %v2666_v6  ;;  %v2533_v6 = vld [vmem:[#allocation2 + $0x52] sm:$0xff] }
 0x226   : > { %v2565_v13 = vpack.c.bf16 %v2533_v6, %v2533_v6  ;;  %v2534_v6 = vld [vmem:[#allocation2 + $0x62] sm:$0xff] }
 0x227   : > { %v2566_v1 = vpack.c.bf16 %v2534_v6, %v2534_v6 }
 0x228   : > { %v2269_v40 = vpop.f32.mrf.mxu0  ;;  %v3084_v28 = vpop.f32.mrf.mxu2  ;;  %3212 = vmatmul.bf16.gmra.mxu3 %v13496_v31  ;;  %v12701_v31 = vld [vmem:[%s17297_s3 + $0x138] sm:$0xff]  ;;  %v2821_v41 = vunpack.c.l.b16 %v2565_v13 }
 0x229   : > { %v13584_v50 = vadd.f32 %v2269_v40, %v2181_v26  ;;  %v2361_v24 = vpop.f32.mrf.mxu1  ;;  %4764 = vmatpush.bf16.msra.mxu2 %v12701_v31 }
 0x22b   : > { %v3173_v57 = vpop.f32.mrf.mxu3 }
 0x22c   : > { %v13599_v27 = vadd.f32 %v3173_v57, %v3084_v28  ;;  %v1958_v57 = vadd.f32 %v13364_v59, %v13354_v45 }
 0x230   : > { %v2272_v22 = vpop.f32.mrf.mxu0  ;;  %v3086_v9 = vpop.f32.mrf.mxu2 }
 0x231   : > { %v2273_v0 = vadd.f32 %v2272_v22, %v13348_v7  ;;  %v13593_v10 = vpop.f32.mrf.mxu1  ;;  %v2645_v7 = vunpack.c.l.b16 %v2453_v47  ;;  %v2851_v22 = vpack.c.b16 %v2821_v41, %v2820_v15  ;;  %v2454_v47 = vpack.c.bf16 %v2422_v5, %v2422_v5  ;;  %v2424_v5 = vld [vmem:[#allocation2 + $0x138] sm:$0xff] }
 0x232   : > { %17353 = vst [vmem:[#allocation24_spill] sm:$0xff] %v13593_v10 }
 0x233   : > { %v13597_v36 = vadd.f32 %v2361_v24, %v2273_v0  ;;  %3261 = vmatmul.bf16.vlgmr.msra.gmra.mxu0 %v2850_v49  ;;  %v2667_v26 = vpack.c.b16 %v2645_v7, %v2644_v33  ;;  %v3175_v30 = vpop.f32.mrf.mxu3  ;;  %v2423_v0 = vld [vmem:[#allocation2 + $0x128] sm:$0xff] }
 0x234   : > { %v13607_v28 = vadd.f32 %v3175_v30, %v3086_v9  ;;  %v2455_v16 = vpack.c.bf16 %v2423_v0, %v2423_v0  ;;  %v2425_v0 = vld [vmem:[#allocation2 + $0x140] sm:$0xff] }
 0x235   : > { %17354 = vst [vmem:[#allocation25_spill] sm:$0xff] %v13597_v36  ;;  %3128 = vmatmul.bf16.gmra.mxu2 %v2667_v26  ;;  %v2535_v26 = vld [vmem:[#allocation2 + $0x6a] sm:$0xff] }
 0x236   : > { %v2647_v37 = vunpack.c.l.b16 %v2455_v16  ;;  %v2567_v13 = vpack.c.bf16 %v2535_v26, %v2535_v26  ;;  %v2456_v16 = vpack.c.bf16 %v2424_v5, %v2424_v5 }
 0x238   : > { %v2274_v54 = vpop.f32.mrf.mxu0  ;;  %v3089_v49 = vpop.f32.mrf.mxu2  ;;  %3217 = vmatmul.bf16.gmra.mxu3 %v13509_v56  ;;  %v2646_v56 = vunpack.c.l.b16 %v2454_v47  ;;  %v2823_v15 = vunpack.c.l.b16 %v2567_v13  ;;  %v2648_v26 = vunpack.c.l.b16 %v2456_v16  ;;  %v17361_v13 = vld [vmem:[#allocation5_spill] sm:$0xff]  ;;  %v2427_v16 = vld [vmem:[#allocation2 + $0x158] sm:$0xff] }
 0x239   : > { %v13605_v40 = vadd.f32 %v2274_v54, %v2186_v18  ;;  %v2366_v24 = vpop.f32.mrf.mxu1 }
 0x23a   : > { %v2668_v18 = vpack.c.b16 %v2647_v37, %v2646_v56 }
 0x23b   : > { %17355 = vst [vmem:[#allocation26_spill] sm:$0xff] %v13605_v40  ;;  %v3178_v31 = vpop.f32.mrf.mxu3 }
 0x23c   : > { %v13617_v9 = vadd.f32 %v3178_v31, %v3089_v49  ;;  %v12688_v49 = vld [vmem:[%s17297_s3 + $0xd0] sm:$0xff]  ;;  %v1963_v31 = vadd.f32 %v13378_v52, %v13374_v17 }
 0x23d   : > { %4680 = vmatpush.bf16.msra.mxu1 %v12688_v49 }
 0x240   : > { %v2277_v60 = vpop.f32.mrf.mxu0  ;;  %v3091_v7 = vpop.f32.mrf.mxu2 }
 0x241   : > { %v2278_v63 = vadd.f32 %v2277_v60, %v13356_v46  ;;  %v13611_v11 = vpop.f32.mrf.mxu1  ;;  %v2191_v46 = vadd.f32 %v13352_v43, %v1958_v57  ;;  %v2457_v57 = vpack.c.bf16 %v2425_v0, %v2425_v0 }
 0x242   : > { %17356 = vst [vmem:[#allocation27_spill] sm:$0xff] %v13611_v11 }
 0x243   : > { %v13615_v33 = vadd.f32 %v2366_v24, %v2278_v63  ;;  %3266 = vmatmul.bf16.gmra.mxu0 %v2851_v22  ;;  %v3180_v59 = vpop.f32.mrf.mxu3  ;;  %v2822_v24 = vunpack.c.l.b16 %v2566_v1 }
 0x244   : > { %v13622_v41 = vadd.f32 %v3180_v59, %v3091_v7 }
 0x245   : > { %17357 = vst [vmem:[#allocation28_spill] sm:$0xff] %v13615_v33  ;;  %3133 = vmatmul.bf16.gmra.mxu2 %v2668_v18  ;;  %v2852_v60 = vpack.c.b16 %v2823_v15, %v2822_v24  ;;  %v2536_v18 = vld [vmem:[#allocation2 + $0x7a] sm:$0xff] }
 0x246   : > { %v2568_v17 = vpack.c.bf16 %v2536_v18, %v2536_v18  ;;  %v17366_v18 = vld [vmem:[#allocation9_spill] sm:$0xff] }
 0x248   : > { %v2279_v54 = vpop.f32.mrf.mxu0  ;;  %v3094_v22 = vpop.f32.mrf.mxu2  ;;  %3222 = vmatmul.bf16.gmra.mxu3 %v13522_v48  ;;  %v12700_v48 = vld [vmem:[%s17297_s3 + $0x130] sm:$0xff]  ;;  %v2824_v49 = vunpack.c.l.b16 %v2568_v17 }
 0x249   : > { %v13620_v30 = vadd.f32 %v2279_v54, %v2191_v46  ;;  %v2371_v45 = vpop.f32.mrf.mxu1  ;;  %v2537_v46 = vld [vmem:[#allocation2 + $0x82] sm:$0xff]  ;;  %4765 = vmatpush.bf16.msra.mxu2 %v12700_v48  ;;  %v2196_v54 = vadd.f32 %v17361_v13, %v1963_v31 }
 0x24a   : > { %v2569_v52 = vpack.c.bf16 %v2537_v46, %v2537_v46 }
 0x24b   : > { %17358 = vst [vmem:[#allocation29_spill] sm:$0xff] %v13620_v30  ;;  %v3183_v7 = vpop.f32.mrf.mxu3 }
 0x24c   : > { %v13635_v37 = vadd.f32 %v3183_v7, %v3094_v22  ;;  %v2825_v22 = vunpack.c.l.b16 %v2569_v52  ;;  %v2538_v52 = vld [vmem:[#allocation2 + $0x92] sm:$0xff] }
 0x24e   : > { %v2853_v5 = vpack.c.b16 %v2825_v22, %v2824_v49  ;;  %v17368_v49 = vld [vmem:[#allocation6_spill] sm:$0xff] }
 0x250   : > { %v2282_v43 = vpop.f32.mrf.mxu0  ;;  %v3096_v6 = vpop.f32.mrf.mxu2 }
 0x251   : > { %v2283_v63 = vadd.f32 %v2282_v43, %v13376_v38  ;;  %v13629_v47 = vpop.f32.mrf.mxu1  ;;  %v2649_v38 = vunpack.c.l.b16 %v2457_v57  ;;  %v17363_v57 = vld [vmem:[#allocation8_spill] sm:$0xff] }
 0x252   : > { %17359 = vst [vmem:[#allocation30_spill] sm:$0xff] %v13629_v47 }
 0x253   : > { %v13633_v56 = vadd.f32 %v2371_v45, %v2283_v63  ;;  %3271 = vmatmul.bf16.gmra.mxu0 %v2852_v60  ;;  %v2669_v1 = vpack.c.b16 %v2649_v38, %v2648_v26  ;;  %v3185_v15 = vpop.f32.mrf.mxu3  ;;  %v2426_v63 = vld [vmem:[#allocation2 + $0x150] sm:$0xff]  ;;  %v2459_v26 = vpack.c.bf16 %v2427_v16, %v2427_v16  ;;  %v17365_v38 = vld [vmem:[#allocation7_spill] sm:$0xff] }
 0x254   : > { %v13643_v60 = vadd.f32 %v3185_v15, %v3096_v6  ;;  %v2458_v48 = vpack.c.bf16 %v2426_v63, %v2426_v63  ;;  %v1968_v46 = vadd.f32 %v17366_v18, %v17365_v38 }
 0x255   : > { %17360 = vst [vmem:[#allocation31_spill] sm:$0xff] %v13633_v56  ;;  %3138 = vmatmul.bf16.gmra.mxu2 %v2669_v1  ;;  %v2651_v17 = vunpack.c.l.b16 %v2459_v26  ;;  %v2495_v56 = vld [vmem:[#allocation2 + $0x189] sm:$0xff] }
 0x256   : > { %v2201_v22 = vadd.f32 %v17368_v49, %v1968_v46 }
 0x258   : > { %v2284_v45 = vpop.f32.mrf.mxu0  ;;  %v3099_v43 = vpop.f32.mrf.mxu2  ;;  %3227 = vmatmul.bf16.gmra.mxu3 %v13539_v4  ;;  %v2650_v4 = vunpack.c.l.b16 %v2458_v48  ;;  %v12687_v48 = vld [vmem:[%s17297_s3 + $0xc8] sm:$0xff] }
 0x259   : > { %v13641_v59 = vadd.f32 %v2284_v45, %v2196_v54  ;;  %v2376_v24 = vpop.f32.mrf.mxu1  ;;  %v2539_v45 = vld [vmem:[#allocation2 + $0x9a] sm:$0xff]  ;;  %4681 = vmatpush.bf16.msra.mxu1 %v12687_v48  ;;  %v2540_v48 = vld [vmem:[#allocation2 + $0xaa] sm:$0xff] }
 0x25a   : > { %v2670_v15 = vpack.c.b16 %v2651_v17, %v2650_v4  ;;  %v2571_v63 = vpack.c.bf16 %v2539_v45, %v2539_v45  ;;  %v2429_v4 = vld [vmem:[#allocation2 + $0x170] sm:$0xff]  ;;  %v17370_v17 = vld [vmem:[#allocation12_spill] sm:$0xff] }
 0x25b   : > { %17362 = vst [vmem:[#allocation5_spill] sm:$0xff] %v13641_v59  ;;  %v3188_v1 = vpop.f32.mrf.mxu3  ;;  %v2494_v59 = vld [vmem:[#allocation2 + $0x181] sm:$0xff] }
 0x25c   : > { %v13653_v6 = vadd.f32 %v3188_v1, %v3099_v43  ;;  %v2428_v1 = vld [vmem:[#allocation2 + $0x168] sm:$0xff] }
 0x260   : > { %v2287_v0 = vpop.f32.mrf.mxu0  ;;  %v3101_v54 = vpop.f32.mrf.mxu2 }
 0x261   : > { %v2288_v31 = vadd.f32 %v2287_v0, %v17363_v57  ;;  %v13647_v7 = vpop.f32.mrf.mxu1  ;;  %v2570_v0 = vpack.c.bf16 %v2538_v52, %v2538_v52 }
 0x262   : > { %17364 = vst [vmem:[#allocation8_spill] sm:$0xff] %v13647_v7 }
 0x263   : > { %v13651_v13 = vadd.f32 %v2376_v24, %v2288_v31  ;;  %3276 = vmatmul.bf16.gmra.mxu0 %v2853_v5  ;;  %v3190_v24 = vpop.f32.mrf.mxu3  ;;  %v2826_v31 = vunpack.c.l.b16 %v2570_v0  ;;  %v2827_v5 = vunpack.c.l.b16 %v2571_v63  ;;  %v17373_v0 = vld [vmem:[#allocation13_spill] sm:$0xff] }
 0x264   : > { %v13658_v43 = vadd.f32 %v3190_v24, %v3101_v54  ;;  %v2461_v54 = vpack.c.bf16 %v2429_v4, %v2429_v4  ;;  %v17375_v4 = vld [vmem:[#allocation10_spill] sm:$0xff] }
 0x265   : > { %17367 = vst [vmem:[#allocation7_spill] sm:$0xff] %v13651_v13  ;;  %3143 = vmatmul.bf16.gmra.mxu2 %v2670_v15  ;;  %v2854_v18 = vpack.c.b16 %v2827_v5, %v2826_v31  ;;  %v2460_v15 = vpack.c.bf16 %v2428_v1, %v2428_v1  ;;  %v2543_v13 = vld [vmem:[#allocation2 + $0xca] sm:$0xff] }
 0x266   : > { %v2653_v5 = vunpack.c.l.b16 %v2461_v54 }
 0x267   : > { %v2652_v31 = vunpack.c.l.b16 %v2460_v15 }
 0x268   : > { %v2289_v16 = vpop.f32.mrf.mxu0  ;;  %v13663_v26 = vpop.f32.mrf.mxu2  ;;  %3232 = vmatmul.bf16.gmra.mxu3 %v13556_v23  ;;  %v12699_v23 = vld [vmem:[%s17297_s3 + $0x128] sm:$0xff] }
 0x269   : > { %v13656_v57 = vadd.f32 %v2289_v16, %v2201_v22  ;;  %v2381_v38 = vpop.f32.mrf.mxu1  ;;  %v17372_v22 = vld [vmem:[#allocation11_spill] sm:$0xff]  ;;  %4766 = vmatpush.bf16.msra.mxu2 %v12699_v23  ;;  %v2671_v1 = vpack.c.b16 %v2653_v5, %v2652_v31  ;;  %v2431_v31 = vld [vmem:[#allocation2 + $0x188] sm:$0xff] }
 0x26a   : > { %v1973_v63 = vadd.f32 %v17373_v0, %v17372_v22  ;;  %v2430_v23 = vld [vmem:[#allocation2 + $0x180] sm:$0xff] }
 0x26b   : > { %17369 = vst [vmem:[#allocation9_spill] sm:$0xff] %v13656_v57  ;;  %v13669_v49 = vpop.f32.mrf.mxu3 }
 0x270   : > { %v2292_v46 = vpop.f32.mrf.mxu0  ;;  %v13678_v24 = vpop.f32.mrf.mxu2 }
 0x271   : > { %v2293_v52 = vadd.f32 %v2292_v46, %v17370_v17  ;;  %v13667_v45 = vpop.f32.mrf.mxu1  ;;  %v2541_v46 = vld [vmem:[#allocation2 + $0xb2] sm:$0xff]  ;;  %v2206_v17 = vadd.f32 %v17375_v4, %v1973_v63  ;;  %v17377_v63 = vld [vmem:[#allocation16_spill] sm:$0xff] }
 0x272   : > { %17371 = vst [vmem:[#allocation6_spill] sm:$0xff] %v13667_v45  ;;  %v2572_v45 = vpack.c.bf16 %v2540_v48, %v2540_v48  ;;  %v2573_v7 = vpack.c.bf16 %v2541_v46, %v2541_v46  ;;  %v2462_v48 = vpack.c.bf16 %v2430_v23, %v2430_v23  ;;  %v2463_v46 = vpack.c.bf16 %v2431_v31, %v2431_v31 }
 0x273   : > { %v13673_v16 = vadd.f32 %v2381_v38, %v2293_v52  ;;  %3281 = vmatmul.bf16.gmra.mxu0 %v2854_v18  ;;  %v13683_v52 = vpop.f32.mrf.mxu3 }
 0x274   : > { %v2828_v0 = vunpack.c.l.b16 %v2572_v45 }
 0x275   : > { %17374 = vst [vmem:[#allocation12_spill] sm:$0xff] %v13673_v16  ;;  %3148 = vmatmul.bf16.gmra.mxu2 %v2671_v1  ;;  %v2829_v16 = vunpack.c.l.b16 %v2573_v7 }
 0x277   : > { %v2855_v15 = vpack.c.b16 %v2829_v16, %v2828_v0  ;;  %v2655_v0 = vunpack.c.l.b16 %v2463_v46 }
 0x278   : > { %v2294_v22 = vpop.f32.mrf.mxu0  ;;  %v13685_v57 = vpop.f32.mrf.mxu2  ;;  %3237 = vmatmul.bf16.gmra.mxu3 %v13570_v25  ;;  %v2654_v25 = vunpack.c.l.b16 %v2462_v48 }
 0x279   : > { %v13681_v38 = vadd.f32 %v2294_v22, %v2206_v17  ;;  %v2386_v18 = vpop.f32.mrf.mxu1  ;;  %v17379_v17 = vld [vmem:[#allocation15_spill] sm:$0xff]  ;;  %v17380_v22 = vld [vmem:[#allocation17_spill] sm:$0xff] }
 0x27a   : > { %v1978_v45 = vadd.f32 %v17380_v22, %v17379_v17  ;;  %v2672_v47 = vpack.c.b16 %v2655_v0, %v2654_v25  ;;  %v17384_v25 = vld [vmem:[#allocation19_spill] sm:$0xff] }
 0x27b   : > { %17376 = vst [vmem:[#allocation11_spill] sm:$0xff] %v13681_v38  ;;  %v13691_v4 = vpop.f32.mrf.mxu3  ;;  %v2542_v38 = vld [vmem:[#allocation2 + $0xc2] sm:$0xff] }
 0x27c   : > { %v2574_v31 = vpack.c.bf16 %v2542_v38, %v2542_v38 }
 0x27e   : > { %v2830_v17 = vunpack.c.l.b16 %v2574_v31 }
 0x280   : > { %v2297_v54 = vpop.f32.mrf.mxu0  ;;  %v13697_v16 = vpop.f32.mrf.mxu2 }
 0x281   : > { %v2298_v5 = vadd.f32 %v2297_v54, %v17377_v63  ;;  %v13689_v1 = vpop.f32.mrf.mxu1  ;;  %v17382_v54 = vld [vmem:[#allocation14_spill] sm:$0xff]  ;;  %v2575_v63 = vpack.c.bf16 %v2543_v13, %v2543_v13 }
 0x282   : > { %17378 = vst [vmem:[#allocation13_spill] sm:$0xff] %v13689_v1  ;;  %v2211_v23 = vadd.f32 %v17382_v54, %v1978_v45  ;;  %v12686_v45 = vld [vmem:[%s17297_s3 + $0xc0] sm:$0xff] }
 0x283   : > { %v13695_v7 = vadd.f32 %v2386_v18, %v2298_v5  ;;  %3286 = vmatmul.bf16.gmra.mxu0 %v2855_v15  ;;  %v2526_v18 = vpack.c.bf16 %v2494_v59, %v2494_v59  ;;  %v2527_v5 = vpack.c.bf16 %v2495_v56, %v2495_v56  ;;  %v13702_v15 = vpop.f32.mrf.mxu3  ;;  %v2831_v48 = vunpack.c.l.b16 %v2575_v63  ;;  %4682 = vmatpush.bf16.msra.mxu1 %v12686_v45  ;;  %v12709_v59 = vld [vmem:[%s17297_s3 + $0x178] sm:$0xff]  ;;  %v12920_v54 = vld [vmem:[#allocation2] sm:$0xff]  ;;  %v12708_v63 = vld [vmem:[%s17297_s3 + $0x170] sm:$0xff] }
 0x284   : > { %4853 = vmatpush.bf16.msra.mxu3 %v12709_v59  ;;  %v2545_v59 = vld [vmem:[#allocation2 + $0xe2] sm:$0xff] }
 0x285   : > { %17381 = vst [vmem:[#allocation10_spill] sm:$0xff] %v13695_v7  ;;  %3153 = vmatmul.bf16.gmra.mxu2 %v2672_v47  ;;  %v2750_v46 = vunpack.c.l.b16 %v2526_v18  ;;  %v2751_v22 = vunpack.c.l.b16 %v2527_v5  ;;  %v2856_v56 = vpack.c.b16 %v2831_v48, %v2830_v17  ;;  %v12698_v18 = vld [vmem:[%s17297_s3 + $0x120] sm:$0xff]  ;;  %v17385_v5 = vld [vmem:[#allocation18_spill] sm:$0xff] }
 0x286   : > { %4767 = vmatpush.bf16.msra.mxu2 %v12698_v18  ;;  %v2497_v18 = vld [vmem:[#allocation2 + $0x1a1] sm:$0xff] }
 0x287   : > { %v2768_v47 = vpack.c.b16 %v2751_v22, %v2750_v46  ;;  %v17386_v46 = vld [vmem:[#allocation21_spill] sm:$0xff]  ;;  %v12706_v7 = vld [vmem:[%s17297_s3 + $0x160] sm:$0xff] }
 0x288   : > { %v2299_v1 = vpop.f32.mrf.mxu0  ;;  %v13707_v38 = vpop.f32.mrf.mxu2  ;;  %v1983_v17 = vadd.f32 %v17386_v46, %v17385_v5  ;;  %4854 = vmatpush.bf16.msra.mxu3 %v12708_v63  ;;  %v2496_v63 = vld [vmem:[#allocation2 + $0x199] sm:$0xff] }
 0x289   : > { %v13700_v11 = vadd.f32 %v2299_v1, %v2211_v23  ;;  %v2391_v13 = vpop.f32.mrf.mxu1  ;;  %3242 = vmatmul.bf16.gmra.mxu3 %v2768_v47  ;;  %v2464_v23 = vpack.c.bf16 %v12920_v54, %v12920_v54  ;;  %v2544_v47 = vld [vmem:[#allocation2 + $0xda] sm:$0xff]  ;;  %v12707_v54 = vld [vmem:[%s17297_s3 + $0x168] sm:$0xff] }
 0x28a   : > { %v2576_v5 = vpack.c.bf16 %v2544_v47, %v2544_v47 }
 0x28b   : > { %17383 = vst [vmem:[#allocation16_spill] sm:$0xff] %v13700_v11  ;;  %v13713_v31 = vpop.f32.mrf.mxu3  ;;  %v2656_v45 = vunpack.c.l.b16 %v2464_v23  ;;  %v2577_v23 = vpack.c.bf16 %v2545_v59, %v2545_v59 }
 0x28c   : > { %4855 = vmatpush.bf16.msra.mxu3 %v12707_v54  ;;  %v2832_v47 = vunpack.c.l.b16 %v2576_v5 }
 0x28d   : > { %v2833_v59 = vunpack.c.l.b16 %v2577_v23  ;;  %v12694_v23 = vld [vmem:[%s17297_s3 + $0x100] sm:$0xff] }
 0x290   : > { %v2302_v1 = vpop.f32.mrf.mxu0  ;;  %v13725_v22 = vpop.f32.mrf.mxu2  ;;  %4856 = vmatpush.bf16.msra.mxu3 %v12706_v7  ;;  %v12704_v7 = vld [vmem:[%s17297_s3 + $0x150] sm:$0xff] }
 0x291   : > { %v2303_v0 = vadd.f32 %v2302_v1, %v17384_v25  ;;  %v13727_v1 = vpack.c.b16 %v2656_v45, %v2656_v45  ;;  %v13729_v25 = vpop.f32.mrf.mxu1 }
 0x292   : > { %17389 = vst [vmem:[#allocation14_spill] sm:$0xff] %v13729_v25  ;;  %v2528_v25 = vpack.c.bf16 %v2496_v63, %v2496_v63  ;;  %v2857_v63 = vpack.c.b16 %v2833_v59, %v2832_v47 }
 0x293   : > { %v13723_v48 = vadd.f32 %v2391_v13, %v2303_v0  ;;  %3291 = vmatmul.bf16.gmra.mxu0 %v2856_v56  ;;  %17388 = vst [vmem:[#allocation17_spill] sm:$0xff] %v13727_v1  ;;  %v12697_v13 = vld [vmem:[%s17297_s3 + $0x118] sm:$0xff]  ;;  %v17390_v56 = vld [vmem:[#allocation20_spill] sm:$0xff]  ;;  %v13741_v11 = vpop.f32.mrf.mxu3 }
 0x294   : > { %v2216_v0 = vadd.f32 %v17390_v56, %v1983_v17  ;;  %4768 = vmatpush.bf16.msra.mxu2 %v12697_v13  ;;  %v12696_v17 = vld [vmem:[%s17297_s3 + $0x110] sm:$0xff]  ;;  %v2752_v54 = vunpack.c.l.b16 %v2528_v25  ;;  %v12705_v13 = vld [vmem:[%s17297_s3 + $0x158] sm:$0xff] }
 0x295   : > { %17387 = vst [vmem:[#allocation15_spill] sm:$0xff] %v13723_v48  ;;  %3158 = vmatmul.bf16.gmra.mxu2 %v13727_v1  ;;  %v2529_v48 = vpack.c.bf16 %v2497_v18, %v2497_v18  ;;  %4857 = vmatpush.bf16.msra.mxu3 %v12705_v13 }
 0x297   : > { %v2753_v56 = vunpack.c.l.b16 %v2529_v48 }
 0x298   : > { %v2304_v46 = vpop.f32.mrf.mxu0  ;;  %v13749_v30 = vpop.f32.mrf.mxu2  ;;  %4769 = vmatpush.bf16.msra.mxu2 %v12696_v17  ;;  %v17392_v17 = vld [vmem:[#allocation22_spill] sm:$0xff] }
 0x299   : > { %v13739_v45 = vadd.f32 %v2304_v46, %v2216_v0  ;;  %v2769_v0 = vpack.c.b16 %v2753_v56, %v2752_v54  ;;  %v12695_v46 = vld [vmem:[%s17297_s3 + $0x108] sm:$0xff]  ;;  %v2396_v5 = vpop.f32.mrf.mxu1  ;;  %v1988_v47 = vadd.f32 %v13578_v61, %v17392_v17  ;;  %v2547_v56 = vld [vmem:[#allocation2 + $0xfa] sm:$0xff]  ;;  %4858 = vmatpush.bf16.msra.mxu3 %v12704_v7 }
 0x29b   : > { %17391 = vst [vmem:[#allocation19_spill] sm:$0xff] %v13739_v45  ;;  %3247 = vmatmul.bf16.gmra.mxu3 %v2769_v0  ;;  %v13758_v25 = vpop.f32.mrf.mxu3  ;;  %v12703_v0 = vld [vmem:[%s17297_s3 + $0x148] sm:$0xff]  ;;  %v2221_v13 = vadd.f32 %v13586_v39, %v1988_v47  ;;  %v12669_v47 = vld [vmem:[%s17297_s3 + $0x38] sm:$0xff] }
 0x29c   : > { %4770 = vmatpush.bf16.msra.mxu2 %v12695_v46  ;;  %5086 = vmatpush.bf16.msrb.mxu0 %v12669_v47 }
 0x29d   : > { %4859 = vmatpush.bf16.msra.mxu3 %v12703_v0  ;;  %v17395_v0 = vld [vmem:[#allocation23_spill] sm:$0xff] }
 0x2a0   : > { %v2307_v18 = vpop.f32.mrf.mxu0  ;;  %v13770_v54 = vpop.f32.mrf.mxu2  ;;  %4771 = vmatpush.bf16.msra.mxu2 %v12694_v23 }
 0x2a1   : > { %v2308_v48 = vadd.f32 %v2307_v18, %v13462_v21  ;;  %v2546_v21 = vld [vmem:[#allocation2 + $0xf2] sm:$0xff]  ;;  %v2579_v18 = vpack.c.bf16 %v2547_v56, %v2547_v56 }
 0x2a2   : > { %v2578_v46 = vpack.c.bf16 %v2546_v21, %v2546_v21  ;;  %v12677_v21 = vld [vmem:[%s17297_s3 + $0x78] sm:$0xff] }
 0x2a3   : > { %v13768_v59 = vadd.f32 %v2396_v5, %v2308_v48  ;;  %3296 = vmatmul.bf16.gmra.mxu0 %v2857_v63  ;;  %v13778_v5 = vpop.f32.mrf.mxu3  ;;  %v12702_v63 = vld [vmem:[%s17297_s3 + $0x140] sm:$0xff]  ;;  %v2835_v7 = vunpack.c.l.b16 %v2579_v18  ;;  %5175 = vmatpush.bf16.msrb.mxu1 %v12677_v21 }
 0x2a4   : > { %v2834_v48 = vunpack.c.l.b16 %v2578_v46  ;;  %4860 = vmatpush.bf16.msra.mxu3 %v12702_v63 }
 0x2a5   : > { %17393 = vst [vmem:[#allocation18_spill] sm:$0xff] %v13768_v59 }
 0x2a6   : > { %v2858_v17 = vpack.c.b16 %v2835_v7, %v2834_v48 }
 0x2a8   : > { %v2309_v45 = vpop.f32.mrf.mxu0  ;;  %v13783_v23 = vpop.f32.mrf.mxu2 }
 0x2a9   : > { %v13776_v61 = vadd.f32 %v2309_v45, %v2221_v13  ;;  %v13789_v45 = vld [vmem:[%s17296_s2] ss:$0 sm:$0xff] }
 0x2ab   : > { %17394 = vst [vmem:[#allocation21_spill] sm:$0xff] %v13776_v61  ;;  %v13797_v56 = vpop.f32.mrf.mxu3 }
 0x2b0   : > { %v3262_v59 = vpop.f32.mrf.mxu0  ;;  %v13800_v46 = vpop.f32.mrf.mxu2 }
 0x2b1   : > { %v3263_v39 = vadd.f32 %v3262_v59, %v13599_v27  ;;  %v2548_v27 = vld [vmem:[#allocation2 + $0x10a] sm:$0xff]  ;;  %v2549_v59 = vld [vmem:[#allocation2 + $0x112] sm:$0xff]  ;;  %17396 = vst [vmem:[#allocation20_spill] sm:$0xff] %v13800_v46 }
 0x2b2   : > { %v2580_v48 = vpack.c.bf16 %v2548_v27, %v2548_v27  ;;  %v2581_v7 = vpack.c.bf16 %v2549_v59, %v2549_v59 }
 0x2b3   : > { %v3342_v13 = vadd.f32 %v3263_v39, %v17395_v0  ;;  %3301 = vmatmul.bf16.gmra.mxu0 %v2858_v17  ;;  %v13805_v17 = vpop.f32.mrf.mxu3 }
 0x2b4   : > { %v2836_v40 = vunpack.c.l.b16 %v2580_v48  ;;  %v2837_v39 = vunpack.c.l.b16 %v2581_v7  ;;  %17397 = vst [vmem:[#allocation22_spill] sm:$0xff] %v13805_v17  ;;  %v2550_v48 = vld [vmem:[#allocation2 + $0x122] sm:$0xff]  ;;  %v2551_v7 = vld [vmem:[#allocation2 + $0x12a] sm:$0xff] }
 0x2b5   : > { %v3378_v18 = vadd.f32 %v13789_v45, %v3342_v13 }
 0x2b6   : > { %v2859_v46 = vpack.c.b16 %v2837_v39, %v2836_v40  ;;  %v2583_v40 = vpack.c.bf16 %v2551_v7, %v2551_v7 }
 0x2b7   : > { %v3410_v63 = vmax.f32 %v3378_v18, 0.0 }
 0x2b8   : > { %v3264_v61 = vpop.f32.mrf.mxu0  ;;  %v13808_v47 = vpop.f32.mrf.mxu2 }
 0x2b9   : > { %3442 = vst [vmem:[#allocation2 + $0x19] sm:$0xff] %v3410_v63  ;;  %v3265_v33 = vadd.f32 %v3264_v61, %v13607_v28  ;;  %v4098_v13 = vpack.c.bf16 %v3410_v63, %v3410_v63 }
 0x2ba   : > { %17398 = vst [vmem:[#allocation23_spill] sm:$0xff] %v13808_v47 }
 0x2bb   : > { %v3343_v10 = vadd.f32 %v3265_v33, %v13481_v44  ;;  %v4322_v33 = vunpack.c.l.b16 %v4098_v13  ;;  %v13813_v63 = vpop.f32.mrf.mxu3 }
 0x2bc   : > { %17399 = vst [vmem:[#allocation32_spill] sm:$0xff] %v13813_v63 }
 0x2bd   : > { %v3379_v21 = vadd.f32 %v13789_v45, %v3343_v10 }
 0x2bf   : > { %v3411_v0 = vmax.f32 %v3379_v21, 0.0  ;;  %v2582_v21 = vpack.c.bf16 %v2550_v48, %v2550_v48 }
 0x2c0   : > { %v3267_v18 = vpop.f32.mrf.mxu0  ;;  %v4002_v44 = vld [vmem:[#allocation2 + $0x18] sm:$0xff] }
 0x2c1   : > { %3443 = vst [vmem:[#allocation2 + $0x21] sm:$0xff] %v3411_v0  ;;  %v3268_v27 = vadd.f32 %v3267_v18, %v13617_v9  ;;  %v4099_v59 = vpack.c.bf16 %v3411_v0, %v3411_v0  ;;  %v4034_v47 = vpack.c.bf16 %v4002_v44, %v4002_v44  ;;  %v2838_v44 = vunpack.c.l.b16 %v2582_v21 }
 0x2c3   : > { %v3344_v28 = vadd.f32 %v3268_v27, %v13487_v19  ;;  %3306 = vmatmul.bf16.gmra.mxu0 %v2859_v46  ;;  %v4323_v61 = vunpack.c.l.b16 %v4099_v59  ;;  %v13815_v46 = vpop.f32.mrf.mxu2 }
 0x2c4   : > { %17400 = vst [vmem:[#allocation33_spill] sm:$0xff] %v13815_v46 }
 0x2c5   : > { %v3380_v10 = vadd.f32 %v13789_v45, %v3344_v28  ;;  %v4354_v17 = vpack.c.b16 %v4323_v61, %v4322_v33  ;;  %v4226_v33 = vunpack.c.l.b16 %v4034_v47  ;;  %v2839_v61 = vunpack.c.l.b16 %v2583_v40  ;;  %v13823_v47 = vpop.f32.mrf.mxu3  ;;  %v12668_v40 = vld [vmem:[%s17297_s3 + $0x30] sm:$0xff] }
 0x2c6   : > { %5087 = vmatpush.bf16.msrb.mxu0 %v12668_v40 }
 0x2c7   : > { %v3412_v39 = vmax.f32 %v3380_v10, 0.0  ;;  %4772 = vmatmul.bf16.vlgmr.msra.gmra.mxu2 %v4354_v17 }
 0x2c8   : > { %v3269_v9 = vpop.f32.mrf.mxu0  ;;  %v4003_v0 = vld [vmem:[#allocation2 + $0x20] sm:$0xff] }
 0x2c9   : > { %v4130_v18 = vld [vmem:[#allocation2 + $0x1a] sm:$0xff]  ;;  %v4131_v19 = vld [vmem:[#allocation2 + $0x22] sm:$0xff]  ;;  %3444 = vst [vmem:[#allocation2 + $0x31] sm:$0xff] %v3412_v39  ;;  %v3270_v13 = vadd.f32 %v3269_v9, %v13622_v41  ;;  %v4035_v27 = vpack.c.bf16 %v4003_v0, %v4003_v0  ;;  %v2860_v41 = vpack.c.b16 %v2839_v61, %v2838_v44  ;;  %v4100_v9 = vpack.c.bf16 %v3412_v39, %v3412_v39 }
 0x2ca   : > { %v4162_v59 = vpack.c.bf16 %v4130_v18, %v4130_v18  ;;  %v4163_v28 = vpack.c.bf16 %v4131_v19, %v4131_v19 }
 0x2cb   : > { %v3345_v48 = vadd.f32 %v3270_v13, %v13491_v42  ;;  %v4227_v7 = vunpack.c.l.b16 %v4035_v27  ;;  %v13832_v18 = vpop.f32.mrf.mxu2  ;;  %v4324_v19 = vunpack.c.l.b16 %v4100_v9  ;;  %v2552_v27 = vld [vmem:[#allocation2 + $0x13a] sm:$0xff] }
 0x2cc   : > { %v4418_v10 = vunpack.c.l.b16 %v4162_v59  ;;  %v4419_v17 = vunpack.c.l.b16 %v4163_v28  ;;  %v2553_v59 = vld [vmem:[#allocation2 + $0x142] sm:$0xff] }
 0x2cd   : > { %v3381_v63 = vadd.f32 %v13789_v45, %v3345_v48  ;;  %v13820_v1 = vpack.c.b16 %v4227_v7, %v4226_v33  ;;  %v2584_v33 = vpack.c.bf16 %v2552_v27, %v2552_v27  ;;  %v2585_v44 = vpack.c.bf16 %v2553_v59, %v2553_v59 }
 0x2ce   : > { %v4450_v36 = vpack.c.b16 %v4419_v17, %v4418_v10 }
 0x2cf   : > { %v3413_v46 = vmax.f32 %v3381_v63, 0.0  ;;  %4683 = vmatmul.bf16.vlgmr.msra.gmra.mxu1 %v13820_v1  ;;  %v12676_v63 = vld [vmem:[%s17297_s3 + $0x70] sm:$0xff]  ;;  %v2841_v40 = vunpack.c.l.b16 %v2585_v44 }
 0x2d0   : > { %4861 = vmatmul.bf16.vlgmr.msra.gmra.mxu3 %v4450_v36  ;;  %v3272_v0 = vpop.f32.mrf.mxu0  ;;  %v4004_v39 = vld [vmem:[#allocation2 + $0x30] sm:$0xff]  ;;  %5176 = vmatpush.bf16.msrb.mxu1 %v12676_v63  ;;  %v13837_v63 = vpop.f32.mrf.mxu3 }
 0x2d1   : > { %3445 = vst [vmem:[#allocation2 + $0x39] sm:$0xff] %v3413_v46  ;;  %v3273_v42 = vadd.f32 %v3272_v0, %v13635_v37  ;;  %v4101_v21 = vpack.c.bf16 %v3413_v46, %v3413_v46  ;;  %v4036_v28 = vpack.c.bf16 %v4004_v39, %v4004_v39 }
 0x2d3   : > { %v3346_v36 = vadd.f32 %v3273_v42, %v13500_v53  ;;  %3311 = vmatmul.bf16.gmra.mxu0 %v2860_v41  ;;  %v4325_v13 = vunpack.c.l.b16 %v4101_v21  ;;  %v4228_v42 = vunpack.c.l.b16 %v4036_v28  ;;  %v2840_v21 = vunpack.c.l.b16 %v2584_v33  ;;  %v13840_v27 = vpop.f32.mrf.mxu2 }
 0x2d5   : > { %v3382_v37 = vadd.f32 %v13789_v45, %v3346_v36  ;;  %v4355_v46 = vpack.c.b16 %v4325_v13, %v4324_v19  ;;  %v2861_v28 = vpack.c.b16 %v2841_v40, %v2840_v21 }
 0x2d7   : > { %v3414_v61 = vmax.f32 %v3382_v37, 0.0  ;;  %4777 = vmatmul.bf16.gmra.mxu2 %v4355_v46 }
 0x2d8   : > { %v3274_v48 = vpop.f32.mrf.mxu0  ;;  %v4005_v7 = vld [vmem:[#allocation2 + $0x38] sm:$0xff] }
 0x2d9   : > { %v4132_v10 = vld [vmem:[#allocation2 + $0x32] sm:$0xff]  ;;  %v4133_v53 = vld [vmem:[#allocation2 + $0x3a] sm:$0xff]  ;;  %3446 = vst [vmem:[#allocation2 + $0x49] sm:$0xff] %v3414_v61  ;;  %v3275_v17 = vadd.f32 %v3274_v48, %v13643_v60  ;;  %v4037_v41 = vpack.c.bf16 %v4005_v7, %v4005_v7  ;;  %v4102_v33 = vpack.c.bf16 %v3414_v61, %v3414_v61 }
 0x2da   : > { %v4164_v9 = vpack.c.bf16 %v4132_v10, %v4132_v10  ;;  %v4165_v0 = vpack.c.bf16 %v4133_v53, %v4133_v53 }
 0x2db   : > { %v3347_v36 = vadd.f32 %v3275_v17, %v13507_v12  ;;  %v4229_v39 = vunpack.c.l.b16 %v4037_v41  ;;  %v4326_v53 = vunpack.c.l.b16 %v4102_v33  ;;  %v2554_v41 = vld [vmem:[#allocation2 + $0x152] sm:$0xff] }
 0x2dc   : > { %v4420_v19 = vunpack.c.l.b16 %v4164_v9  ;;  %v4421_v13 = vunpack.c.l.b16 %v4165_v0  ;;  %v2555_v9 = vld [vmem:[#allocation2 + $0x15a] sm:$0xff]  ;;  %v13848_v0 = vpop.f32.mrf.mxu3  ;;  %v2586_v61 = vpack.c.bf16 %v2554_v41, %v2554_v41  ;;  %v3194_v41 = vadd.f32 %v13669_v49, %v13663_v26  ;;  %v12667_v26 = vld [vmem:[%s17297_s3 + $0x28] sm:$0xff] }
 0x2dd   : > { %v3383_v59 = vadd.f32 %v13789_v45, %v3347_v36  ;;  %v13843_v37 = vpack.c.b16 %v4229_v39, %v4228_v42  ;;  %v2587_v40 = vpack.c.bf16 %v2555_v9, %v2555_v9  ;;  %v13851_v39 = vpop.f32.mrf.mxu2  ;;  %v12675_v49 = vld [vmem:[%s17297_s3 + $0x68] sm:$0xff]  ;;  %5088 = vmatpush.bf16.msrb.mxu0 %v12667_v26 }
 0x2de   : > { %v4451_v60 = vpack.c.b16 %v4421_v13, %v4420_v19  ;;  %5177 = vmatpush.bf16.msrb.mxu1 %v12675_v49 }
 0x2df   : > { %v3415_v46 = vmax.f32 %v3383_v59, 0.0  ;;  %4688 = vmatmul.bf16.gmra.mxu1 %v13843_v37 }
 0x2e0   : > { %4866 = vmatmul.bf16.gmra.mxu3 %v4451_v60  ;;  %v3277_v44 = vpop.f32.mrf.mxu0  ;;  %v4006_v10 = vld [vmem:[#allocation2 + $0x48] sm:$0xff] }
 0x2e1   : > { %3447 = vst [vmem:[#allocation2 + $0x51] sm:$0xff] %v3415_v46  ;;  %v3278_v12 = vadd.f32 %v3277_v44, %v13653_v6  ;;  %v4103_v48 = vpack.c.bf16 %v3415_v46, %v3415_v46  ;;  %v4038_v21 = vpack.c.bf16 %v4006_v10, %v4006_v10 }
 0x2e3   : > { %v3348_v7 = vadd.f32 %v3278_v12, %v13513_v8  ;;  %3316 = vmatmul.bf16.gmra.mxu0 %v2861_v28  ;;  %v4327_v17 = vunpack.c.l.b16 %v4103_v48  ;;  %v4230_v44 = vunpack.c.l.b16 %v4038_v21  ;;  %v2842_v12 = vunpack.c.l.b16 %v2586_v61 }
 0x2e4   : > { %v2843_v48 = vunpack.c.l.b16 %v2587_v40 }
 0x2e5   : > { %v3384_v42 = vadd.f32 %v13789_v45, %v3348_v7  ;;  %v4356_v36 = vpack.c.b16 %v4327_v17, %v4326_v53  ;;  %v13863_v40 = vpop.f32.mrf.mxu2 }
 0x2e6   : > { %v2862_v21 = vpack.c.b16 %v2843_v48, %v2842_v12 }
 0x2e7   : > { %v3416_v6 = vmax.f32 %v3384_v42, 0.0  ;;  %4782 = vmatmul.bf16.gmra.mxu2 %v4356_v36 }
 0x2e8   : > { %v3279_v19 = vpop.f32.mrf.mxu0  ;;  %v4007_v8 = vld [vmem:[#allocation2 + $0x50] sm:$0xff] }
 0x2e9   : > { %v4134_v13 = vld [vmem:[#allocation2 + $0x4a] sm:$0xff]  ;;  %v4135_v59 = vld [vmem:[#allocation2 + $0x52] sm:$0xff]  ;;  %3448 = vst [vmem:[#allocation2 + $0x61] sm:$0xff] %v3416_v6  ;;  %v3280_v60 = vadd.f32 %v3279_v19, %v13658_v43  ;;  %v4039_v46 = vpack.c.bf16 %v4007_v8, %v4007_v8  ;;  %v13860_v43 = vpop.f32.mrf.mxu3  ;;  %v4104_v61 = vpack.c.bf16 %v3416_v6, %v3416_v6 }
 0x2ea   : > { %v4166_v28 = vpack.c.bf16 %v4134_v13, %v4134_v13  ;;  %v4167_v33 = vpack.c.bf16 %v4135_v59, %v4135_v59 }
 0x2eb   : > { %v3349_v7 = vadd.f32 %v3280_v60, %v13517_v2  ;;  %v4231_v10 = vunpack.c.l.b16 %v4039_v46  ;;  %v4328_v46 = vunpack.c.l.b16 %v4104_v61 }
 0x2ec   : > { %v4422_v53 = vunpack.c.l.b16 %v4166_v28  ;;  %v4423_v17 = vunpack.c.l.b16 %v4167_v33  ;;  %v2556_v28 = vld [vmem:[#allocation2 + $0x16a] sm:$0xff]  ;;  %v2557_v33 = vld [vmem:[#allocation2 + $0x172] sm:$0xff] }
 0x2ed   : > { %v3385_v9 = vadd.f32 %v13789_v45, %v3349_v7  ;;  %v13858_v42 = vpack.c.b16 %v4231_v10, %v4230_v44  ;;  %v2588_v7 = vpack.c.bf16 %v2556_v28, %v2556_v28  ;;  %v2589_v10 = vpack.c.bf16 %v2557_v33, %v2557_v33 }
 0x2ee   : > { %v4452_v36 = vpack.c.b16 %v4423_v17, %v4422_v53  ;;  %v3196_v53 = vadd.f32 %v13683_v52, %v13678_v24  ;;  %v13879_v24 = vpop.f32.mrf.mxu2 }
 0x2ef   : > { %v3417_v19 = vmax.f32 %v3385_v9, 0.0  ;;  %4693 = vmatmul.bf16.gmra.mxu1 %v13858_v42  ;;  %v2844_v49 = vunpack.c.l.b16 %v2588_v7  ;;  %v12666_v7 = vld [vmem:[%s17297_s3 + $0x20] sm:$0xff] }
 0x2f0   : > { %4871 = vmatmul.bf16.gmra.mxu3 %v4452_v36  ;;  %v3282_v2 = vpop.f32.mrf.mxu0  ;;  %v4008_v60 = vld [vmem:[#allocation2 + $0x60] sm:$0xff]  ;;  %5089 = vmatpush.bf16.msrb.mxu0 %v12666_v7 }
 0x2f1   : > { %3449 = vst [vmem:[#allocation2 + $0x69] sm:$0xff] %v3417_v19  ;;  %v3283_v8 = vadd.f32 %v3282_v2, %v3194_v41  ;;  %v4105_v13 = vpack.c.bf16 %v3417_v19, %v3417_v19  ;;  %v4040_v48 = vpack.c.bf16 %v4008_v60, %v4008_v60 }
 0x2f3   : > { %v3350_v59 = vadd.f32 %v3283_v8, %v13530_v35  ;;  %3321 = vmatmul.bf16.gmra.mxu0 %v2862_v21  ;;  %v4329_v6 = vunpack.c.l.b16 %v4105_v13  ;;  %v2344_v35 = vadd.f32 %v13526_v14, %v13537_v20  ;;  %v13877_v21 = vpop.f32.mrf.mxu3  ;;  %v4232_v26 = vunpack.c.l.b16 %v4040_v48 }
 0x2f4   : > { %v3199_v20 = vadd.f32 %v13691_v4, %v13685_v57  ;;  %v2558_v4 = vld [vmem:[#allocation2 + $0x182] sm:$0xff] }
 0x2f5   : > { %v3386_v44 = vadd.f32 %v13789_v45, %v3350_v59  ;;  %v4357_v12 = vpack.c.b16 %v4329_v6, %v4328_v46  ;;  %v2845_v59 = vunpack.c.l.b16 %v2589_v10 }
 0x2f7   : > { %v3418_v17 = vmax.f32 %v3386_v44, 0.0  ;;  %4787 = vmatmul.bf16.gmra.mxu2 %v4357_v12  ;;  %v2863_v12 = vpack.c.b16 %v2845_v59, %v2844_v49  ;;  %v2590_v49 = vpack.c.bf16 %v2558_v4, %v2558_v4 }
 0x2f8   : > { %v3284_v41 = vpop.f32.mrf.mxu0  ;;  %v4009_v9 = vld [vmem:[#allocation2 + $0x68] sm:$0xff] }
 0x2f9   : > { %v4136_v36 = vld [vmem:[#allocation2 + $0x62] sm:$0xff]  ;;  %v4137_v19 = vld [vmem:[#allocation2 + $0x6a] sm:$0xff]  ;;  %3450 = vst [vmem:[#allocation2 + $0x79] sm:$0xff] %v3418_v17  ;;  %v3285_v61 = vadd.f32 %v3284_v41, %v3196_v53  ;;  %v4041_v2 = vpack.c.bf16 %v4009_v9, %v4009_v9  ;;  %v4106_v48 = vpack.c.bf16 %v3418_v17, %v3418_v17  ;;  %v12665_v17 = vld [vmem:[%s17297_s3 + $0x18] sm:$0xff] }
 0x2fa   : > { %v4168_v8 = vpack.c.bf16 %v4136_v36, %v4136_v36  ;;  %v4169_v13 = vpack.c.bf16 %v4137_v19, %v4137_v19  ;;  %5090 = vmatpush.bf16.msrb.mxu0 %v12665_v17 }
 0x2fb   : > { %v3351_v52 = vadd.f32 %v3285_v61, %v2344_v35  ;;  %v4233_v60 = vunpack.c.l.b16 %v4041_v2  ;;  %v13890_v57 = vpop.f32.mrf.mxu3  ;;  %v4330_v36 = vunpack.c.l.b16 %v4106_v48  ;;  %v2559_v61 = vld [vmem:[#allocation2 + $0x18a] sm:$0xff]  ;;  %v13896_v2 = vpop.f32.mrf.mxu2 }
 0x2fc   : > { %v4424_v46 = vunpack.c.l.b16 %v4168_v8  ;;  %v4425_v14 = vunpack.c.l.b16 %v4169_v13  ;;  %v2591_v59 = vpack.c.bf16 %v2559_v61, %v2559_v61 }
 0x2fd   : > { %v3387_v6 = vadd.f32 %v13789_v45, %v3351_v52  ;;  %v13884_v28 = vpack.c.b16 %v4233_v60, %v4232_v26  ;;  %v12664_v60 = vld [vmem:[%s17297_s3 + $0x10] sm:$0xff] }
 0x2fe   : > { %v4453_v33 = vpack.c.b16 %v4425_v14, %v4424_v46  ;;  %v2349_v46 = vadd.f32 %v13543_v3, %v13551_v58  ;;  %5091 = vmatpush.bf16.msrb.mxu0 %v12664_v60  ;;  %v12663_v3 = vld [vmem:[%s17297_s3 + $0x8] sm:$0xff] }
 0x2ff   : > { %v3419_v44 = vmax.f32 %v3387_v6, 0.0  ;;  %4698 = vmatmul.bf16.gmra.mxu1 %v13884_v28 }
 0x300   : > { %4876 = vmatmul.bf16.gmra.mxu3 %v4453_v33  ;;  %v3287_v10 = vpop.f32.mrf.mxu0  ;;  %v4010_v9 = vld [vmem:[#allocation2 + $0x78] sm:$0xff] }
 0x301   : > { %3451 = vst [vmem:[#allocation2 + $0x81] sm:$0xff] %v3419_v44  ;;  %v3288_v53 = vadd.f32 %v3287_v10, %v3199_v20  ;;  %v4107_v35 = vpack.c.bf16 %v3419_v44, %v3419_v44  ;;  %v4042_v26 = vpack.c.bf16 %v4010_v9, %v4010_v9  ;;  %v3204_v9 = vadd.f32 %v13713_v31, %v13707_v38 }
 0x302   : > { %5092 = vmatpush.bf16.msrb.mxu0 %v12663_v3 }
 0x303   : > { %v3352_v41 = vadd.f32 %v3288_v53, %v13547_v29  ;;  %3326 = vmatmul.bf16.gmra.mxu0 %v2863_v12  ;;  %v4331_v19 = vunpack.c.l.b16 %v4107_v35  ;;  %v3201_v29 = vadd.f32 %v13702_v15, %v13697_v16  ;;  %v4234_v10 = vunpack.c.l.b16 %v4042_v26  ;;  %v13909_v58 = vpop.f32.mrf.mxu3  ;;  %v13916_v17 = vpop.f32.mrf.mxu2 }
 0x304   : > { %v2846_v16 = vunpack.c.l.b16 %v2590_v49  ;;  %v2847_v15 = vunpack.c.l.b16 %v2591_v59  ;;  %v12662_v49 = vld [vmem:[%s17297_s3] sm:$0xff] }
 0x305   : > { %v3388_v8 = vadd.f32 %v13789_v45, %v3352_v41  ;;  %v4358_v13 = vpack.c.b16 %v4331_v19, %v4330_v36 }
 0x306   : > { %5093 = vmatpush.bf16.msrb.mxu0 %v12662_v49 }
 0x307   : > { %v3420_v52 = vmax.f32 %v3388_v8, 0.0  ;;  %4792 = vmatmul.bf16.gmra.mxu2 %v4358_v13  ;;  %v2864_v13 = vpack.c.b16 %v2847_v15, %v2846_v16  ;;  %v3206_v16 = vadd.f32 %v13741_v11, %v13725_v22 }
 0x308   : > { %v3289_v14 = vpop.f32.mrf.mxu0  ;;  %v4011_v20 = vld [vmem:[#allocation2 + $0x80] sm:$0xff] }
 0x309   : > { %v4138_v6 = vld [vmem:[#allocation2 + $0x7a] sm:$0xff]  ;;  %v4139_v33 = vld [vmem:[#allocation2 + $0x82] sm:$0xff]  ;;  %3452 = vst [vmem:[#allocation2 + $0x91] sm:$0xff] %v3420_v52  ;;  %v3290_v44 = vadd.f32 %v3289_v14, %v3201_v29  ;;  %v4043_v12 = vpack.c.bf16 %v4011_v20, %v4011_v20  ;;  %v4108_v26 = vpack.c.bf16 %v3420_v52, %v3420_v52 }
 0x30a   : > { %v4170_v48 = vpack.c.bf16 %v4138_v6, %v4138_v6  ;;  %v4171_v7 = vpack.c.bf16 %v4139_v33, %v4139_v33  ;;  %v12674_v29 = vld [vmem:[%s17297_s3 + $0x60] sm:$0xff] }
 0x30b   : > { %v3353_v53 = vadd.f32 %v3290_v44, %v2349_v46  ;;  %v4235_v35 = vunpack.c.l.b16 %v4043_v12  ;;  %v4332_v14 = vunpack.c.l.b16 %v4108_v26  ;;  %v2560_v52 = vld [vmem:[#allocation2 + $0x19a] sm:$0xff]  ;;  %v2561_v6 = vld [vmem:[#allocation2 + $0x1a2] sm:$0xff]  ;;  %5178 = vmatpush.bf16.msrb.mxu1 %v12674_v29  ;;  %v13933_v3 = vpop.f32.mrf.mxu2 }
 0x30c   : > { %v4426_v4 = vunpack.c.l.b16 %v4170_v48  ;;  %v4427_v41 = vunpack.c.l.b16 %v4171_v7  ;;  %v13927_v48 = vpop.f32.mrf.mxu3  ;;  %v2592_v7 = vpack.c.bf16 %v2560_v52, %v2560_v52 }
 0x30d   : > { %v3389_v36 = vadd.f32 %v13789_v45, %v3353_v53  ;;  %v13914_v19 = vpack.c.b16 %v4235_v35, %v4234_v10  ;;  %v2593_v10 = vpack.c.bf16 %v2561_v6, %v2561_v6 }
 0x30e   : > { %v4454_v61 = vpack.c.b16 %v4427_v41, %v4426_v4  ;;  %v2848_v26 = vunpack.c.l.b16 %v2592_v7 }
 0x30f   : > { %v3421_v8 = vmax.f32 %v3389_v36, 0.0  ;;  %4703 = vmatmul.bf16.gmra.mxu1 %v13914_v19  ;;  %v2849_v49 = vunpack.c.l.b16 %v2593_v10 }
 0x310   : > { %4881 = vmatmul.bf16.gmra.mxu3 %v4454_v61  ;;  %v3292_v59 = vpop.f32.mrf.mxu0  ;;  %v4012_v46 = vld [vmem:[#allocation2 + $0x90] sm:$0xff] }
 0x311   : > { %3453 = vst [vmem:[#allocation2 + $0x99] sm:$0xff] %v3421_v8  ;;  %v3293_v38 = vadd.f32 %v3292_v59, %v3204_v9  ;;  %v4109_v31 = vpack.c.bf16 %v3421_v8, %v3421_v8  ;;  %v4044_v12 = vpack.c.bf16 %v4012_v46, %v4012_v46  ;;  %v2865_v46 = vpack.c.b16 %v2849_v49, %v2848_v26 }
 0x313   : > { %v3354_v60 = vadd.f32 %v3293_v38, %v13564_v32  ;;  %3331 = vmatmul.bf16.gmra.mxu0 %v2864_v13  ;;  %v4333_v20 = vunpack.c.l.b16 %v4109_v31  ;;  %v2354_v32 = vadd.f32 %v13560_v51, %v13568_v62  ;;  %v4236_v13 = vunpack.c.l.b16 %v4044_v12 }
 0x314   : > { %v3209_v51 = vadd.f32 %v13758_v25, %v13749_v30  ;;  %v13941_v52 = vpop.f32.mrf.mxu3 }
 0x315   : > { %v3390_v33 = vadd.f32 %v13789_v45, %v3354_v60  ;;  %v4359_v44 = vpack.c.b16 %v4333_v20, %v4332_v14 }
 0x317   : > { %v3422_v15 = vmax.f32 %v3390_v33, 0.0  ;;  %4797 = vmatmul.bf16.gmra.mxu2 %v4359_v44  ;;  %v13943_v44 = vpop.f32.mrf.mxu2 }
 0x318   : > { %v3294_v53 = vpop.f32.mrf.mxu0  ;;  %v4013_v35 = vld [vmem:[#allocation2 + $0x98] sm:$0xff] }
 0x319   : > { %v4140_v4 = vld [vmem:[#allocation2 + $0x92] sm:$0xff]  ;;  %v4141_v41 = vld [vmem:[#allocation2 + $0x9a] sm:$0xff]  ;;  %3454 = vst [vmem:[#allocation2 + $0xa9] sm:$0xff] %v3422_v15  ;;  %v3295_v9 = vadd.f32 %v3294_v53, %v3206_v16  ;;  %v4045_v36 = vpack.c.bf16 %v4013_v35, %v4013_v35  ;;  %v4110_v14 = vpack.c.bf16 %v3422_v15, %v3422_v15  ;;  %v3211_v15 = vadd.f32 %v13778_v5, %v13770_v54 }
 0x31a   : > { %v4172_v61 = vpack.c.bf16 %v4140_v4, %v4140_v4  ;;  %v4173_v8 = vpack.c.bf16 %v4141_v41, %v4141_v41  ;;  %v2359_v35 = vadd.f32 %v13574_v55, %v13584_v50  ;;  %v3214_v55 = vadd.f32 %v13797_v56, %v13783_v23  ;;  %v17402_v56 = vld [vmem:[#allocation17_spill] sm:$0xff] }
 0x31b   : > { %v3355_v11 = vadd.f32 %v3295_v9, %v2354_v32  ;;  %v4237_v22 = vunpack.c.l.b16 %v4045_v36  ;;  %v4334_v12 = vunpack.c.l.b16 %v4110_v14 }
 0x31c   : > { %v4428_v59 = vunpack.c.l.b16 %v4172_v61  ;;  %v4429_v38 = vunpack.c.l.b16 %v4173_v8  ;;  %v13951_v49 = vpop.f32.mrf.mxu3 }
 0x31d   : > { %v3391_v62 = vadd.f32 %v13789_v45, %v3355_v11  ;;  %v13938_v31 = vpack.c.b16 %v4237_v22, %v4236_v13 }
 0x31e   : > { %v4455_v29 = vpack.c.b16 %v4429_v38, %v4428_v59 }
 0x31f   : > { %v3423_v60 = vmax.f32 %v3391_v62, 0.0  ;;  %4708 = vmatmul.bf16.gmra.mxu1 %v13938_v31  ;;  %v13953_v59 = vpop.f32.mrf.mxu2 }
 0x320   : > { %4886 = vmatmul.bf16.gmra.mxu3 %v4455_v29  ;;  %v3297_v20 = vpop.f32.mrf.mxu0  ;;  %v4014_v25 = vld [vmem:[#allocation2 + $0xa8] sm:$0xff] }
 0x321   : > { %3455 = vst [vmem:[#allocation2 + $0xb1] sm:$0xff] %v3423_v60  ;;  %v3298_v6 = vadd.f32 %v3297_v20, %v3209_v51  ;;  %v4111_v33 = vpack.c.bf16 %v3423_v60, %v3423_v60  ;;  %v4046_v32 = vpack.c.bf16 %v4014_v25, %v4014_v25  ;;  %v12673_v20 = vld [vmem:[%s17297_s3 + $0x58] sm:$0xff] }
 0x322   : > { %5179 = vmatpush.bf16.msrb.mxu1 %v12673_v20 }
 0x323   : > { %v3356_v30 = vadd.f32 %v3298_v6, %v13580_v34  ;;  %3336 = vmatmul.bf16.gmra.mxu0 %v2865_v46  ;;  %v4335_v7 = vunpack.c.l.b16 %v4111_v33  ;;  %v4238_v26 = vunpack.c.l.b16 %v4046_v32  ;;  %v17401_v6 = vld [vmem:[#allocation25_spill] sm:$0xff] }
 0x325   : > { %v3392_v10 = vadd.f32 %v13789_v45, %v3356_v30  ;;  %v4360_v16 = vpack.c.b16 %v4335_v7, %v4334_v12  ;;  %v13966_v12 = vpop.f32.mrf.mxu3 }
 0x327   : > { %v3424_v53 = vmax.f32 %v3392_v10, 0.0  ;;  %4802 = vmatmul.bf16.gmra.mxu2 %v4360_v16  ;;  %v13969_v32 = vpop.f32.mrf.mxu2 }
 0x328   : > { %v3299_v4 = vpop.f32.mrf.mxu0  ;;  %v4015_v41 = vld [vmem:[#allocation2 + $0xb0] sm:$0xff] }
 0x329   : > { %v4142_v9 = vld [vmem:[#allocation2 + $0xaa] sm:$0xff]  ;;  %v4143_v34 = vld [vmem:[#allocation2 + $0xb2] sm:$0xff]  ;;  %3456 = vst [vmem:[#allocation2 + $0xc1] sm:$0xff] %v3424_v53  ;;  %v3300_v36 = vadd.f32 %v3299_v4, %v3211_v15  ;;  %v4047_v61 = vpack.c.bf16 %v4015_v41, %v4015_v41  ;;  %v4112_v29 = vpack.c.bf16 %v3424_v53, %v3424_v53 }
 0x32a   : > { %v4174_v8 = vpack.c.bf16 %v4142_v9, %v4142_v9  ;;  %v4175_v13 = vpack.c.bf16 %v4143_v34, %v4143_v34  ;;  %v17403_v15 = vld [vmem:[#allocation20_spill] sm:$0xff]  ;;  %v17404_v53 = vld [vmem:[#allocation22_spill] sm:$0xff] }
 0x32b   : > { %v3357_v11 = vadd.f32 %v3300_v36, %v2359_v35  ;;  %v4239_v22 = vunpack.c.l.b16 %v4047_v61  ;;  %v4336_v30 = vunpack.c.l.b16 %v4112_v29  ;;  %v3216_v35 = vadd.f32 %v17404_v53, %v17403_v15  ;;  %v17405_v41 = vld [vmem:[#allocation26_spill] sm:$0xff]  ;;  %v17406_v9 = vld [vmem:[#allocation24_spill] sm:$0xff] }
 0x32c   : > { %v4430_v54 = vunpack.c.l.b16 %v4174_v8  ;;  %v4431_v5 = vunpack.c.l.b16 %v4175_v13  ;;  %v2364_v34 = vadd.f32 %v17406_v9, %v17405_v41  ;;  %v17409_v15 = vld [vmem:[#allocation28_spill] sm:$0xff] }
 0x32d   : > { %v3393_v50 = vadd.f32 %v13789_v45, %v3357_v11  ;;  %v13958_v38 = vpack.c.b16 %v4239_v22, %v4238_v26 }
 0x32e   : > { %v4456_v51 = vpack.c.b16 %v4431_v5, %v4430_v54  ;;  %v12685_v5 = vld [vmem:[%s17297_s3 + $0xb8] sm:$0xff] }
 0x32f   : > { %v3425_v62 = vmax.f32 %v3393_v50, 0.0  ;;  %4713 = vmatmul.bf16.gmra.mxu1 %v13958_v38  ;;  %5264 = vmatpush.bf16.msrb.mxu2 %v12685_v5 }
 0x330   : > { %4891 = vmatmul.bf16.gmra.mxu3 %v4456_v51  ;;  %v3302_v60 = vpop.f32.mrf.mxu0  ;;  %v4016_v33 = vld [vmem:[#allocation2 + $0xc0] sm:$0xff] }
 0x331   : > { %3457 = vst [vmem:[#allocation2 + $0xc9] sm:$0xff] %v3425_v62  ;;  %v3303_v46 = vadd.f32 %v3302_v60, %v3214_v55  ;;  %v4113_v14 = vpack.c.bf16 %v3425_v62, %v3425_v62  ;;  %v4048_v16 = vpack.c.bf16 %v4016_v33, %v4016_v33  ;;  %v17407_v60 = vld [vmem:[#allocation23_spill] sm:$0xff] }
 0x333   : > { %v3358_v23 = vadd.f32 %v3303_v46, %v17401_v6  ;;  %5094 = vmatmul.bf16.vlgmr.msrb.gmra.mxu0 %v17402_v56  ;;  %v4337_v25 = vunpack.c.l.b16 %v4113_v14  ;;  %v4240_v55 = vunpack.c.l.b16 %v4048_v16  ;;  %v17408_v46 = vld [vmem:[#allocation32_spill] sm:$0xff]  ;;  %v13983_v56 = vpop.f32.mrf.mxu3 }
 0x334   : > { %v3219_v14 = vadd.f32 %v17408_v46, %v17407_v60 }
 0x335   : > { %v3394_v7 = vadd.f32 %v13789_v45, %v3358_v23  ;;  %v4361_v10 = vpack.c.b16 %v4337_v25, %v4336_v30 }
 0x337   : > { %v3426_v4 = vmax.f32 %v3394_v7, 0.0  ;;  %4807 = vmatmul.bf16.gmra.mxu2 %v4361_v10  ;;  %v13986_v7 = vpop.f32.mrf.mxu2 }
 0x338   : > { %v3304_v36 = vpop.f32.mrf.mxu0  ;;  %v4017_v61 = vld [vmem:[#allocation2 + $0xc8] sm:$0xff] }
 0x339   : > { %v4144_v8 = vld [vmem:[#allocation2 + $0xc2] sm:$0xff]  ;;  %v4145_v13 = vld [vmem:[#allocation2 + $0xca] sm:$0xff]  ;;  %3458 = vst [vmem:[#allocation2 + $0xd9] sm:$0xff] %v3426_v4  ;;  %v3305_v26 = vadd.f32 %v3304_v36, %v3216_v35  ;;  %v4049_v11 = vpack.c.bf16 %v4017_v61, %v4017_v61  ;;  %v4114_v30 = vpack.c.bf16 %v3426_v4, %v3426_v4 }
 0x33a   : > { %v4176_v22 = vpack.c.bf16 %v4144_v8, %v4144_v8  ;;  %v4177_v54 = vpack.c.bf16 %v4145_v13, %v4145_v13  ;;  %v17410_v4 = vld [vmem:[#allocation33_spill] sm:$0xff] }
 0x33b   : > { %v3359_v50 = vadd.f32 %v3305_v26, %v2364_v34  ;;  %v4241_v51 = vunpack.c.l.b16 %v4049_v11  ;;  %v4338_v41 = vunpack.c.l.b16 %v4114_v30  ;;  %v13990_v34 = vpop.f32.mrf.mxu1  ;;  %v3221_v13 = vadd.f32 %v13823_v47, %v17410_v4  ;;  %v17411_v11 = vld [vmem:[#allocation29_spill] sm:$0xff] }
 0x33c   : > { %v4432_v62 = vunpack.c.l.b16 %v4176_v22  ;;  %v4433_v29 = vunpack.c.l.b16 %v4177_v54  ;;  %v17412_v22 = vld [vmem:[#allocation27_spill] sm:$0xff] }
 0x33d   : > { %v3395_v20 = vadd.f32 %v13789_v45, %v3359_v50  ;;  %v13981_v6 = vpack.c.b16 %v4241_v51, %v4240_v55  ;;  %v2369_v54 = vadd.f32 %v17412_v22, %v17411_v11  ;;  %v13997_v55 = vpop.f32.mrf.mxu3 }
 0x33e   : > { %v4457_v23 = vpack.c.b16 %v4433_v29, %v4432_v62 }
 0x33f   : > { %v3427_v33 = vmax.f32 %v3395_v20, 0.0  ;;  %4718 = vmatmul.bf16.gmra.mxu1 %v13981_v6 }
 0x340   : > { %4896 = vmatmul.bf16.gmra.mxu3 %v4457_v23  ;;  %v3307_v25 = vpop.f32.mrf.mxu0  ;;  %v4018_v35 = vld [vmem:[#allocation2 + $0xd8] sm:$0xff] }
 0x341   : > { %3459 = vst [vmem:[#allocation2 + $0xe1] sm:$0xff] %v3427_v33  ;;  %v3308_v10 = vadd.f32 %v3307_v25, %v3219_v14  ;;  %v4115_v16 = vpack.c.bf16 %v3427_v33, %v3427_v33  ;;  %v4050_v8 = vpack.c.bf16 %v4018_v35, %v4018_v35  ;;  %v3224_v25 = vadd.f32 %v13837_v63, %v13832_v18  ;;  %v12672_v18 = vld [vmem:[%s17297_s3 + $0x50] sm:$0xff] }
 0x342   : > { %5180 = vmatpush.bf16.msrb.mxu1 %v12672_v18 }
 0x343   : > { %v3360_v53 = vadd.f32 %v3308_v10, %v17409_v15  ;;  %5099 = vmatmul.bf16.gmra.mxu0 %v13820_v1  ;;  %v4339_v9 = vunpack.c.l.b16 %v4115_v16  ;;  %v4242_v14 = vunpack.c.l.b16 %v4050_v8 }
 0x345   : > { %v3396_v36 = vadd.f32 %v13789_v45, %v3360_v53  ;;  %v4362_v61 = vpack.c.b16 %v4339_v9, %v4338_v41 }
 0x347   : > { %v3428_v26 = vmax.f32 %v3396_v36, 0.0  ;;  %4812 = vmatmul.bf16.gmra.mxu2 %v4362_v61 }
 0x348   : > { %v3309_v5 = vpop.f32.mrf.mxu0  ;;  %v4019_v1 = vld [vmem:[#allocation2 + $0xe0] sm:$0xff] }
 0x349   : > { %v4146_v50 = vld [vmem:[#allocation2 + $0xda] sm:$0xff]  ;;  %v4147_v51 = vld [vmem:[#allocation2 + $0xe2] sm:$0xff]  ;;  %3460 = vst [vmem:[#allocation2 + $0xf1] sm:$0xff] %v3428_v26  ;;  %v3310_v62 = vadd.f32 %v3309_v5, %v3221_v13  ;;  %v4051_v29 = vpack.c.bf16 %v4019_v1, %v4019_v1  ;;  %v4116_v9 = vpack.c.bf16 %v3428_v26, %v3428_v26 }
 0x34a   : > { %v4178_v60 = vpack.c.bf16 %v4146_v50, %v4146_v50  ;;  %v4179_v46 = vpack.c.bf16 %v4147_v51, %v4147_v51  ;;  %v4773_v20 = vpop.f32.mrf.mxu2  ;;  %v17413_v13 = vld [vmem:[#allocation31_spill] sm:$0xff] }
 0x34b   : > { %v3361_v23 = vadd.f32 %v3310_v62, %v2369_v54  ;;  %v4243_v47 = vunpack.c.l.b16 %v4051_v29  ;;  %v4340_v5 = vunpack.c.l.b16 %v4116_v9 }
 0x34c   : > { %v4434_v33 = vunpack.c.l.b16 %v4178_v60  ;;  %v4435_v30 = vunpack.c.l.b16 %v4179_v46  ;;  %v4684_v10 = vpop.f32.mrf.mxu1  ;;  %v3226_v60 = vadd.f32 %v13848_v0, %v13840_v27 }
 0x34d   : > { %v3397_v16 = vadd.f32 %v13789_v45, %v3361_v23  ;;  %v14002_v15 = vpack.c.b16 %v4243_v47, %v4242_v14  ;;  %v4774_v35 = vadd.f32 %v4773_v20, %v4684_v10  ;;  %v17414_v14 = vld [vmem:[#allocation5_spill] sm:$0xff]  ;;  %v17415_v20 = vld [vmem:[#allocation30_spill] sm:$0xff] }
 0x34e   : > { %v4458_v53 = vpack.c.b16 %v4435_v30, %v4434_v33  ;;  %v2374_v23 = vadd.f32 %v17415_v20, %v17414_v14  ;;  %v17416_v14 = vld [vmem:[#allocation7_spill] sm:$0xff] }
 0x34f   : > { %v3429_v41 = vmax.f32 %v3397_v16, 0.0  ;;  %4723 = vmatmul.bf16.gmra.mxu1 %v14002_v15 }
 0x350   : > { %4901 = vmatmul.bf16.gmra.mxu3 %v4458_v53  ;;  %v3312_v36 = vpop.f32.mrf.mxu0  ;;  %v4020_v54 = vld [vmem:[#allocation2 + $0xf0] sm:$0xff] }
 0x351   : > { %3461 = vst [vmem:[#allocation2 + $0xf9] sm:$0xff] %v3429_v41  ;;  %v3313_v61 = vadd.f32 %v3312_v36, %v3224_v25  ;;  %v4117_v8 = vpack.c.bf16 %v3429_v41, %v3429_v41  ;;  %v4052_v29 = vpack.c.bf16 %v4020_v54, %v4020_v54 }
 0x352   : > { %v4775_v4 = vpop.f32.mrf.mxu2 }
 0x353   : > { %v4862_v63 = vpop.f32.mrf.mxu3  ;;  %v3362_v11 = vadd.f32 %v3313_v61, %v17413_v13  ;;  %5104 = vmatmul.bf16.gmra.mxu0 %v13843_v37  ;;  %v4341_v1 = vunpack.c.l.b16 %v4117_v8  ;;  %v4244_v27 = vunpack.c.l.b16 %v4052_v29 }
 0x354   : > { %v14009_v22 = vadd.f32 %v4862_v63, %v4774_v35  ;;  %v4686_v26 = vpop.f32.mrf.mxu1  ;;  %v12684_v35 = vld [vmem:[%s17297_s3 + $0xb0] sm:$0xff] }
 0x355   : > { %v3398_v50 = vadd.f32 %v13789_v45, %v3362_v11  ;;  %v4776_v51 = vadd.f32 %v4775_v4, %v4686_v26  ;;  %v4363_v62 = vpack.c.b16 %v4341_v1, %v4340_v5  ;;  %5265 = vmatpush.bf16.msrb.mxu2 %v12684_v35  ;;  %v3229_v4 = vadd.f32 %v13860_v43, %v13851_v39 }
 0x357   : > { %v3430_v46 = vmax.f32 %v3398_v50, 0.0  ;;  %4817 = vmatmul.bf16.gmra.mxu2 %v4363_v62 }
 0x358   : > { %v3314_v47 = vpop.f32.mrf.mxu0  ;;  %v4021_v37 = vld [vmem:[#allocation2 + $0xf8] sm:$0xff] }
 0x359   : > { %v4148_v33 = vld [vmem:[#allocation2 + $0xf2] sm:$0xff]  ;;  %v4149_v30 = vld [vmem:[#allocation2 + $0xfa] sm:$0xff]  ;;  %3462 = vst [vmem:[#allocation2 + $0x109] sm:$0xff] %v3430_v46  ;;  %v3315_v25 = vadd.f32 %v3314_v47, %v3226_v60  ;;  %v4053_v10 = vpack.c.bf16 %v4021_v37, %v4021_v37  ;;  %v4118_v26 = vpack.c.bf16 %v3430_v46, %v3430_v46 }
 0x35a   : > { %v4180_v16 = vpack.c.bf16 %v4148_v33, %v4148_v33  ;;  %v4181_v53 = vpack.c.bf16 %v4149_v30, %v4149_v30  ;;  %v4778_v0 = vpop.f32.mrf.mxu2  ;;  %v14035_v46 = vld [vmem:[%s17296_s2] ss:$0 sm:$0xff] }
 0x35b   : > { %v4864_v41 = vpop.f32.mrf.mxu3  ;;  %v3363_v9 = vadd.f32 %v3315_v25, %v2374_v23  ;;  %v4245_v61 = vunpack.c.l.b16 %v4053_v10  ;;  %v4342_v43 = vunpack.c.l.b16 %v4118_v26  ;;  %v3231_v10 = vadd.f32 %v13877_v21, %v13863_v40 }
 0x35c   : > { %v14020_v36 = vadd.f32 %v4864_v41, %v4776_v51  ;;  %v4436_v8 = vunpack.c.l.b16 %v4180_v16  ;;  %v4689_v18 = vpop.f32.mrf.mxu1  ;;  %v4437_v63 = vunpack.c.l.b16 %v4181_v53  ;;  %v17418_v53 = vld [vmem:[#allocation8_spill] sm:$0xff] }
 0x35d   : > { %v3399_v13 = vadd.f32 %v13789_v45, %v3363_v9  ;;  %v14025_v11 = vpack.c.b16 %v4245_v61, %v4244_v27  ;;  %v4779_v54 = vadd.f32 %v4778_v0, %v4689_v18 }
 0x35e   : > { %v4459_v5 = vpack.c.b16 %v4437_v63, %v4436_v8 }
 0x35f   : > { %v3431_v1 = vmax.f32 %v3399_v13, 0.0  ;;  %4728 = vmatmul.bf16.gmra.mxu1 %v14025_v11 }
 0x360   : > { %4906 = vmatmul.bf16.gmra.mxu3 %v4459_v5  ;;  %v3317_v50 = vpop.f32.mrf.mxu0  ;;  %v4022_v45 = vld [vmem:[#allocation2 + $0x108] sm:$0xff] }
 0x361   : > { %3463 = vst [vmem:[#allocation2 + $0x111] sm:$0xff] %v3431_v1  ;;  %v3318_v51 = vadd.f32 %v3317_v50, %v3229_v4  ;;  %v4119_v62 = vpack.c.bf16 %v3431_v1, %v3431_v1  ;;  %v4054_v25 = vpack.c.bf16 %v4022_v45, %v4022_v45 }
 0x362   : > { %v4780_v60 = vpop.f32.mrf.mxu2 }
 0x363   : > { %v4867_v29 = vpop.f32.mrf.mxu3  ;;  %v3364_v20 = vadd.f32 %v3318_v51, %v17416_v14  ;;  %5109 = vmatmul.bf16.gmra.mxu0 %v13858_v42  ;;  %v4343_v23 = vunpack.c.l.b16 %v4119_v62  ;;  %v17417_v42 = vld [vmem:[#allocation9_spill] sm:$0xff]  ;;  %v4246_v13 = vunpack.c.l.b16 %v4054_v25  ;;  %v3234_v51 = vadd.f32 %v13890_v57, %v13879_v24 }
 0x364   : > { %v14029_v39 = vadd.f32 %v4867_v29, %v4779_v54  ;;  %v4691_v47 = vpop.f32.mrf.mxu1  ;;  %v2379_v35 = vadd.f32 %v17418_v53, %v17417_v42 }
 0x365   : > { %v3400_v37 = vadd.f32 %v14035_v46, %v3364_v20  ;;  %v4781_v33 = vadd.f32 %v4780_v60, %v4691_v47  ;;  %v4364_v30 = vpack.c.b16 %v4343_v23, %v4342_v43 }
 0x367   : > { %v3432_v16 = vmax.f32 %v3400_v37, 0.0  ;;  %4822 = vmatmul.bf16.gmra.mxu2 %v4364_v30  ;;  %v12671_v37 = vld [vmem:[%s17297_s3 + $0x48] sm:$0xff] }
 0x368   : > { %v3319_v41 = vpop.f32.mrf.mxu0  ;;  %v4023_v27 = vld [vmem:[#allocation2 + $0x110] sm:$0xff]  ;;  %5181 = vmatpush.bf16.msrb.mxu1 %v12671_v37 }
 0x369   : > { %v4150_v0 = vld [vmem:[#allocation2 + $0x10a] sm:$0xff]  ;;  %v4151_v9 = vld [vmem:[#allocation2 + $0x112] sm:$0xff]  ;;  %3464 = vst [vmem:[#allocation2 + $0x121] sm:$0xff] %v3432_v16  ;;  %v3320_v61 = vadd.f32 %v3319_v41, %v3231_v10  ;;  %v4055_v8 = vpack.c.bf16 %v4023_v27, %v4023_v27  ;;  %v4120_v45 = vpack.c.bf16 %v3432_v16, %v3432_v16 }
 0x36a   : > { %v4182_v18 = vpack.c.bf16 %v4150_v0, %v4150_v0  ;;  %v4183_v63 = vpack.c.bf16 %v4151_v9, %v4151_v9  ;;  %v4783_v54 = vpop.f32.mrf.mxu2  ;;  %v3236_v9 = vadd.f32 %v13909_v58, %v13896_v2 }
 0x36b   : > { %v4869_v4 = vpop.f32.mrf.mxu3  ;;  %v3365_v5 = vadd.f32 %v3320_v61, %v2379_v35  ;;  %v4247_v40 = vunpack.c.l.b16 %v4055_v8  ;;  %v4344_v42 = vunpack.c.l.b16 %v4120_v45  ;;  %v17420_v8 = vld [vmem:[#allocation11_spill] sm:$0xff] }
 0x36c   : > { %v14042_v1 = vadd.f32 %v4869_v4, %v4781_v33  ;;  %v4438_v21 = vunpack.c.l.b16 %v4182_v18  ;;  %v4694_v26 = vpop.f32.mrf.mxu1  ;;  %v4439_v50 = vunpack.c.l.b16 %v4183_v63  ;;  %v17419_v33 = vld [vmem:[#allocation12_spill] sm:$0xff]  ;;  %v17421_v18 = vld [vmem:[#allocation6_spill] sm:$0xff] }
 0x36d   : > { %v3401_v62 = vadd.f32 %v14035_v46, %v3365_v5  ;;  %v14047_v29 = vpack.c.b16 %v4247_v40, %v4246_v13  ;;  %v4784_v60 = vadd.f32 %v4783_v54, %v4694_v26  ;;  %v2384_v63 = vadd.f32 %v17421_v18, %v17420_v8 }
 0x36e   : > { %v4460_v14 = vpack.c.b16 %v4439_v50, %v4438_v21  ;;  %v12683_v50 = vld [vmem:[%s17297_s3 + $0xa8] sm:$0xff] }
 0x36f   : > { %v3433_v20 = vmax.f32 %v3401_v62, 0.0  ;;  %4733 = vmatmul.bf16.gmra.mxu1 %v14047_v29  ;;  %5266 = vmatpush.bf16.msrb.mxu2 %v12683_v50 }
 0x370   : > { %4911 = vmatmul.bf16.gmra.mxu3 %v4460_v14  ;;  %v3322_v43 = vpop.f32.mrf.mxu0  ;;  %v4024_v10 = vld [vmem:[#allocation2 + $0x120] sm:$0xff] }
 0x371   : > { %3465 = vst [vmem:[#allocation2 + $0x129] sm:$0xff] %v3433_v20  ;;  %v3323_v23 = vadd.f32 %v3322_v43, %v3234_v51  ;;  %v4121_v47 = vpack.c.bf16 %v3433_v20, %v3433_v20  ;;  %v4056_v0 = vpack.c.bf16 %v4024_v10, %v4024_v10 }
 0x372   : > { %v4785_v57 = vpop.f32.mrf.mxu2 }
 0x373   : > { %v4872_v24 = vpop.f32.mrf.mxu3  ;;  %v3366_v30 = vadd.f32 %v3323_v23, %v17419_v33  ;;  %5114 = vmatmul.bf16.gmra.mxu0 %v13884_v28  ;;  %v4345_v16 = vunpack.c.l.b16 %v4121_v47  ;;  %v4248_v2 = vunpack.c.l.b16 %v4056_v0  ;;  %v3239_v23 = vadd.f32 %v13927_v48, %v13916_v17 }
 0x374   : > { %v14054_v25 = vadd.f32 %v4872_v24, %v4784_v60  ;;  %v4696_v53 = vpop.f32.mrf.mxu1 }
 0x375   : > { %v3402_v35 = vadd.f32 %v14035_v46, %v3366_v30  ;;  %v4786_v41 = vadd.f32 %v4785_v57, %v4696_v53  ;;  %v4365_v27 = vpack.c.b16 %v4345_v16, %v4344_v42 }
 0x377   : > { %v3434_v61 = vmax.f32 %v3402_v35, 0.0  ;;  %4827 = vmatmul.bf16.gmra.mxu2 %v4365_v27 }
 0x378   : > { %v3324_v4 = vpop.f32.mrf.mxu0  ;;  %v4025_v28 = vld [vmem:[#allocation2 + $0x128] sm:$0xff] }
 0x379   : > { %v4152_v13 = vld [vmem:[#allocation2 + $0x122] sm:$0xff]  ;;  %v4153_v54 = vld [vmem:[#allocation2 + $0x12a] sm:$0xff]  ;;  %3466 = vst [vmem:[#allocation2 + $0x139] sm:$0xff] %v3434_v61  ;;  %v3325_v5 = vadd.f32 %v3324_v4, %v3236_v9  ;;  %v4057_v40 = vpack.c.bf16 %v4025_v28, %v4025_v28  ;;  %v4122_v30 = vpack.c.bf16 %v3434_v61, %v3434_v61  ;;  %v3241_v28 = vadd.f32 %v13941_v52, %v13933_v3 }
 0x37a   : > { %v4184_v21 = vpack.c.bf16 %v4152_v13, %v4152_v13  ;;  %v4185_v26 = vpack.c.bf16 %v4153_v54, %v4153_v54  ;;  %v4788_v58 = vpop.f32.mrf.mxu2  ;;  %v17423_v54 = vld [vmem:[#allocation16_spill] sm:$0xff] }
 0x37b   : > { %v4874_v51 = vpop.f32.mrf.mxu3  ;;  %v3367_v62 = vadd.f32 %v3325_v5, %v2384_v63  ;;  %v4249_v14 = vunpack.c.l.b16 %v4057_v40  ;;  %v4346_v0 = vunpack.c.l.b16 %v4122_v30  ;;  %v17424_v5 = vld [vmem:[#allocation13_spill] sm:$0xff] }
 0x37c   : > { %v14065_v60 = vadd.f32 %v4874_v51, %v4786_v41  ;;  %v4440_v20 = vunpack.c.l.b16 %v4184_v21  ;;  %v4699_v45 = vpop.f32.mrf.mxu1  ;;  %v4441_v43 = vunpack.c.l.b16 %v4185_v26  ;;  %v17422_v41 = vld [vmem:[#allocation10_spill] sm:$0xff]  ;;  %v2389_v40 = vadd.f32 %v17424_v5, %v17423_v54 }
 0x37d   : > { %v3403_v47 = vadd.f32 %v14035_v46, %v3367_v62  ;;  %v14070_v37 = vpack.c.b16 %v4249_v14, %v4248_v2  ;;  %v4789_v24 = vadd.f32 %v4788_v58, %v4699_v45 }
 0x37e   : > { %v4461_v57 = vpack.c.b16 %v4441_v43, %v4440_v20 }
 0x37f   : > { %v3435_v33 = vmax.f32 %v3403_v47, 0.0  ;;  %4738 = vmatmul.bf16.gmra.mxu1 %v14070_v37 }
 0x380   : > { %4916 = vmatmul.bf16.gmra.mxu3 %v4461_v57  ;;  %v3327_v10 = vpop.f32.mrf.mxu0  ;;  %v4026_v48 = vld [vmem:[#allocation2 + $0x138] sm:$0xff]  ;;  %v3244_v57 = vadd.f32 %v13951_v49, %v13943_v44  ;;  %v12670_v44 = vld [vmem:[%s17297_s3 + $0x40] sm:$0xff] }
 0x381   : > { %3467 = vst [vmem:[#allocation2 + $0x141] sm:$0xff] %v3435_v33  ;;  %v3328_v42 = vadd.f32 %v3327_v10, %v3239_v23  ;;  %v4123_v16 = vpack.c.bf16 %v3435_v33, %v3435_v33  ;;  %v4058_v4 = vpack.c.bf16 %v4026_v48, %v4026_v48  ;;  %5182 = vmatpush.bf16.msrb.mxu1 %v12670_v44 }
 0x382   : > { %v4790_v35 = vpop.f32.mrf.mxu2 }
 0x383   : > { %v4877_v53 = vpop.f32.mrf.mxu3  ;;  %v3368_v27 = vadd.f32 %v3328_v42, %v17422_v41  ;;  %5119 = vmatmul.bf16.gmra.mxu0 %v13914_v19  ;;  %v4347_v9 = vunpack.c.l.b16 %v4123_v16  ;;  %v4250_v20 = vunpack.c.l.b16 %v4058_v4 }
 0x384   : > { %v14074_v17 = vadd.f32 %v4877_v53, %v4789_v24  ;;  %v4701_v8 = vpop.f32.mrf.mxu1 }
 0x385   : > { %v3404_v18 = vadd.f32 %v14035_v46, %v3368_v27  ;;  %v4791_v61 = vadd.f32 %v4790_v35, %v4701_v8  ;;  %v4366_v63 = vpack.c.b16 %v4347_v9, %v4346_v0  ;;  %v12717_v35 = vld [vmem:[%s17297_s3 + $0x1b8] sm:$0xff]  ;;  %v17425_v9 = vld [vmem:[#allocation15_spill] sm:$0xff] }
 0x386   : > { %6026 = vmatpush.bf16.msrb.mxu3 %v12717_v35  ;;  %v12680_v35 = vld [vmem:[%s17297_s3 + $0x90] sm:$0xff] }
 0x387   : > { %v3436_v13 = vmax.f32 %v3404_v18, 0.0  ;;  %4832 = vmatmul.bf16.gmra.mxu2 %v4366_v63 }
 0x388   : > { %v3329_v21 = vpop.f32.mrf.mxu0  ;;  %v4027_v26 = vld [vmem:[#allocation2 + $0x140] sm:$0xff] }
 0x389   : > { %v4154_v19 = vld [vmem:[#allocation2 + $0x13a] sm:$0xff]  ;;  %v4155_v50 = vld [vmem:[#allocation2 + $0x142] sm:$0xff]  ;;  %3468 = vst [vmem:[#allocation2 + $0x151] sm:$0xff] %v3436_v13  ;;  %v3330_v51 = vadd.f32 %v3329_v21, %v3241_v28  ;;  %v4059_v2 = vpack.c.bf16 %v4027_v26, %v4027_v26  ;;  %v4124_v53 = vpack.c.bf16 %v3436_v13, %v3436_v13  ;;  %v12716_v28 = vld [vmem:[%s17297_s3 + $0x1b0] sm:$0xff]  ;;  %v3246_v26 = vadd.f32 %v13966_v12, %v13953_v59 }
 0x38a   : > { %v4186_v58 = vpack.c.bf16 %v4154_v19, %v4154_v19  ;;  %v4187_v62 = vpack.c.bf16 %v4155_v50, %v4155_v50  ;;  %v4793_v45 = vpop.f32.mrf.mxu2  ;;  %v12682_v13 = vld [vmem:[%s17297_s3 + $0xa0] sm:$0xff]  ;;  %6027 = vmatpush.bf16.msrb.mxu3 %v12716_v28  ;;  %v12715_v50 = vld [vmem:[%s17297_s3 + $0x1a8] sm:$0xff] }
 0x38b   : > { %v4879_v14 = vpop.f32.mrf.mxu3  ;;  %v3369_v43 = vadd.f32 %v3330_v51, %v2389_v40  ;;  %v4251_v3 = vunpack.c.l.b16 %v4059_v2  ;;  %v4348_v63 = vunpack.c.l.b16 %v4124_v53  ;;  %5267 = vmatpush.bf16.msrb.mxu2 %v12682_v13  ;;  %v12681_v51 = vld [vmem:[%s17297_s3 + $0x98] sm:$0xff]  ;;  %v17426_v2 = vld [vmem:[#allocation19_spill] sm:$0xff] }
 0x38c   : > { %v14082_v23 = vadd.f32 %v4879_v14, %v4791_v61  ;;  %v4442_v52 = vunpack.c.l.b16 %v4186_v58  ;;  %v4704_v47 = vpop.f32.mrf.mxu1  ;;  %v4443_v24 = vunpack.c.l.b16 %v4187_v62  ;;  %v17427_v58 = vld [vmem:[#allocation14_spill] sm:$0xff]  ;;  %v12714_v53 = vld [vmem:[%s17297_s3 + $0x1a0] sm:$0xff] }
 0x38d   : > { %v3405_v33 = vadd.f32 %v14035_v46, %v3369_v43  ;;  %v14087_v30 = vpack.c.b16 %v4251_v3, %v4250_v20  ;;  %v4794_v10 = vadd.f32 %v4793_v45, %v4704_v47  ;;  %v2394_v62 = vadd.f32 %v17427_v58, %v17426_v2 }
 0x38e   : > { %v4462_v42 = vpack.c.b16 %v4443_v24, %v4442_v52  ;;  %6028 = vmatpush.bf16.msrb.mxu3 %v12715_v50  ;;  %v12712_v50 = vld [vmem:[%s17297_s3 + $0x190] sm:$0xff] }
 0x38f   : > { %v3437_v16 = vmax.f32 %v3405_v33, 0.0  ;;  %4743 = vmatmul.bf16.gmra.mxu1 %v14087_v30  ;;  %5268 = vmatpush.bf16.msrb.mxu2 %v12681_v51  ;;  %v12678_v51 = vld [vmem:[%s17297_s3 + $0x80] sm:$0xff] }
 0x390   : > { %4921 = vmatmul.bf16.gmra.mxu3 %v4462_v42  ;;  %v3332_v41 = vpop.f32.mrf.mxu0  ;;  %v4028_v61 = vld [vmem:[#allocation2 + $0x150] sm:$0xff] }
 0x391   : > { %3469 = vst [vmem:[#allocation2 + $0x159] sm:$0xff] %v3437_v16  ;;  %v3333_v27 = vadd.f32 %v3332_v41, %v3244_v57  ;;  %v4125_v48 = vpack.c.bf16 %v3437_v16, %v3437_v16 }
 0x392   : > { %v4795_v0 = vpop.f32.mrf.mxu2  ;;  %6029 = vmatpush.bf16.msrb.mxu3 %v12714_v53 }
 0x393   : > { %v4882_v49 = vpop.f32.mrf.mxu3  ;;  %v3370_v8 = vadd.f32 %v3333_v27, %v17425_v9  ;;  %5124 = vmatmul.bf16.gmra.mxu0 %v13938_v31  ;;  %v4349_v4 = vunpack.c.l.b16 %v4125_v48  ;;  %v4060_v31 = vpack.c.bf16 %v4028_v61, %v4028_v61  ;;  %v3249_v48 = vadd.f32 %v13983_v56, %v13969_v32  ;;  %5269 = vmatpush.bf16.msrb.mxu2 %v12680_v35  ;;  %v12679_v32 = vld [vmem:[%s17297_s3 + $0x88] sm:$0xff] }
 0x394   : > { %v14097_v18 = vadd.f32 %v4882_v49, %v4794_v10  ;;  %v4706_v54 = vpop.f32.mrf.mxu1 }
 0x395   : > { %v3406_v5 = vadd.f32 %v14035_v46, %v3370_v8  ;;  %v4796_v40 = vadd.f32 %v4795_v0, %v4706_v54  ;;  %v4367_v21 = vpack.c.b16 %v4349_v4, %v4348_v63  ;;  %v4252_v24 = vunpack.c.l.b16 %v4060_v31  ;;  %v12713_v63 = vld [vmem:[%s17297_s3 + $0x198] sm:$0xff] }
 0x396   : > { %6030 = vmatpush.bf16.msrb.mxu3 %v12713_v63 }
 0x397   : > { %v3438_v19 = vmax.f32 %v3406_v5, 0.0  ;;  %4837 = vmatmul.bf16.gmra.mxu2 %v4367_v21  ;;  %v17428_v5 = vld [vmem:[#allocation18_spill] sm:$0xff] }
 0x398   : > { %v3334_v14 = vpop.f32.mrf.mxu0  ;;  %v4029_v20 = vld [vmem:[#allocation2 + $0x158] sm:$0xff]  ;;  %5270 = vmatpush.bf16.msrb.mxu2 %v12679_v32 }
 0x399   : > { %v4156_v45 = vld [vmem:[#allocation2 + $0x152] sm:$0xff]  ;;  %v4157_v43 = vld [vmem:[#allocation2 + $0x15a] sm:$0xff]  ;;  %3470 = vst [vmem:[#allocation2 + $0x169] sm:$0xff] %v3438_v19  ;;  %v3335_v3 = vadd.f32 %v3334_v14, %v3246_v26  ;;  %v4061_v59 = vpack.c.bf16 %v4029_v20, %v4029_v20  ;;  %v4126_v61 = vpack.c.bf16 %v3438_v19, %v3438_v19 }
 0x39a   : > { %v4188_v12 = vpack.c.bf16 %v4156_v45, %v4156_v45  ;;  %v4189_v52 = vpack.c.bf16 %v4157_v43, %v4157_v43  ;;  %v4798_v57 = vpop.f32.mrf.mxu2  ;;  %6031 = vmatpush.bf16.msrb.mxu3 %v12712_v50  ;;  %v12711_v43 = vld [vmem:[%s17297_s3 + $0x188] sm:$0xff] }
 0x39b   : > { %v4884_v47 = vpop.f32.mrf.mxu3  ;;  %v3371_v33 = vadd.f32 %v3335_v3, %v2394_v62  ;;  %v4253_v42 = vunpack.c.l.b16 %v4061_v59  ;;  %v4350_v26 = vunpack.c.l.b16 %v4126_v61  ;;  %v17429_v3 = vld [vmem:[#allocation21_spill] sm:$0xff] }
 0x39c   : > { %v14117_v10 = vadd.f32 %v4884_v47, %v4796_v40  ;;  %v4444_v16 = vunpack.c.l.b16 %v4188_v12  ;;  %v4709_v41 = vpop.f32.mrf.mxu1  ;;  %v4445_v27 = vunpack.c.l.b16 %v4189_v52  ;;  %5271 = vmatpush.bf16.msrb.mxu2 %v12678_v51  ;;  %v2399_v59 = vadd.f32 %v13990_v34, %v17429_v3  ;;  %v12710_v34 = vld [vmem:[%s17297_s3 + $0x180] sm:$0xff] }
 0x39d   : > { %v3407_v44 = vadd.f32 %v14035_v46, %v3371_v33  ;;  %v14128_v49 = vpack.c.b16 %v4253_v42, %v4252_v24  ;;  %v4799_v0 = vadd.f32 %v4798_v57, %v4709_v41 }
 0x39e   : > { %v4463_v9 = vpack.c.b16 %v4445_v27, %v4444_v16  ;;  %6032 = vmatpush.bf16.msrb.mxu3 %v12711_v43 }
 0x39f   : > { %v3439_v8 = vmax.f32 %v3407_v44, 0.0  ;;  %4748 = vmatmul.bf16.gmra.mxu1 %v14128_v49 }
 0x3a0   : > { %4926 = vmatmul.bf16.gmra.mxu3 %v4463_v9  ;;  %v3337_v56 = vpop.f32.mrf.mxu0  ;;  %v4030_v31 = vld [vmem:[#allocation2 + $0x168] sm:$0xff]  ;;  %v12725_v9 = vld [vmem:[%s17297_s3 + $0x1f8] sm:$0xff] }
 0x3a1   : > { %3471 = vst [vmem:[#allocation2 + $0x171] sm:$0xff] %v3439_v8  ;;  %v3338_v4 = vadd.f32 %v3337_v56, %v3249_v48  ;;  %v4127_v28 = vpack.c.bf16 %v3439_v8, %v3439_v8  ;;  %v4062_v20 = vpack.c.bf16 %v4030_v31, %v4030_v31  ;;  %6115 = vmatpush.bf16.msra.mxu0 %v12725_v9  ;;  %v3539_v9 = vld [vmem:[#allocation2 + $0x9] sm:$0xff] }
 0x3a2   : > { %v4800_v54 = vpop.f32.mrf.mxu2  ;;  %6033 = vmatpush.bf16.msrb.mxu3 %v12710_v34 }
 0x3a3   : > { %v4887_v13 = vpop.f32.mrf.mxu3  ;;  %v3372_v40 = vadd.f32 %v3338_v4, %v17428_v5  ;;  %5129 = vmatmul.bf16.gmra.mxu0 %v13958_v38  ;;  %v4351_v19 = vunpack.c.l.b16 %v4127_v28  ;;  %v3251_v38 = vadd.f32 %v13997_v55, %v13986_v7  ;;  %v4254_v7 = vunpack.c.l.b16 %v4062_v20  ;;  %v3603_v20 = vld [vmem:[#allocation2 + $0xa] sm:$0xff] }
 0x3a4   : > { %v14138_v21 = vadd.f32 %v4887_v13, %v4799_v0  ;;  %v4711_v2 = vpop.f32.mrf.mxu1  ;;  %v12733_v13 = vld [vmem:[%s17297_s3 + $0x238] sm:$0xff] }
 0x3a5   : > { %v3408_v58 = vadd.f32 %v14035_v46, %v3372_v40  ;;  %v4801_v62 = vadd.f32 %v4800_v54, %v4711_v2  ;;  %v4368_v14 = vpack.c.b16 %v4351_v19, %v4350_v26  ;;  %6204 = vmatpush.bf16.msra.mxu1 %v12733_v13 }
 0x3a7   : > { %v3440_v45 = vmax.f32 %v3408_v58, 0.0  ;;  %4842 = vmatmul.bf16.gmra.mxu2 %v4368_v14  ;;  %v3602_v14 = vld [vmem:[#allocation2 + $0x2] sm:$0xff] }
 0x3a8   : > { %v3339_v12 = vpop.f32.mrf.mxu0  ;;  %v4031_v52 = vld [vmem:[#allocation2 + $0x170] sm:$0xff] }
 0x3a9   : > { %v4158_v47 = vld [vmem:[#allocation2 + $0x16a] sm:$0xff]  ;;  %v4159_v24 = vld [vmem:[#allocation2 + $0x172] sm:$0xff]  ;;  %3472 = vst [vmem:[#allocation2 + $0x181] sm:$0xff] %v3440_v45  ;;  %v3340_v57 = vadd.f32 %v3339_v12, %v3251_v38  ;;  %v4063_v33 = vpack.c.bf16 %v4031_v52, %v4031_v52  ;;  %v4128_v4 = vpack.c.bf16 %v3440_v45, %v3440_v45 }
 0x3aa   : > { %v4190_v42 = vpack.c.bf16 %v4158_v47, %v4158_v47  ;;  %v4191_v16 = vpack.c.bf16 %v4159_v24, %v4159_v24  ;;  %v4803_v55 = vpop.f32.mrf.mxu2 }
 0x3ab   : > { %v4889_v53 = vpop.f32.mrf.mxu3  ;;  %v3373_v35 = vadd.f32 %v3340_v57, %v2399_v59  ;;  %v4255_v27 = vunpack.c.l.b16 %v4063_v33  ;;  %v4352_v19 = vunpack.c.l.b16 %v4128_v4  ;;  %v3634_v57 = vpack.c.bf16 %v3602_v14, %v3602_v14 }
 0x3ac   : > { %v14155_v41 = vadd.f32 %v4889_v53, %v4801_v62  ;;  %v4446_v48 = vunpack.c.l.b16 %v4190_v42  ;;  %v4714_v44 = vpop.f32.mrf.mxu1  ;;  %v4447_v0 = vunpack.c.l.b16 %v4191_v16  ;;  %v3635_v33 = vpack.c.bf16 %v3603_v20, %v3603_v20 }
 0x3ad   : > { %v3409_v8 = vadd.f32 %v14035_v46, %v3373_v35  ;;  %v14164_v61 = vpack.c.b16 %v4255_v27, %v4254_v7  ;;  %v4804_v63 = vadd.f32 %v4803_v55, %v4714_v44 }
 0x3ae   : > { %v4464_v32 = vpack.c.b16 %v4447_v0, %v4446_v48  ;;  %v3891_v34 = vunpack.c.l.b16 %v3635_v33  ;;  %v3538_v0 = vld [vmem:[#allocation2 + $0x1] sm:$0xff] }
 0x3af   : > { %v3441_v56 = vmax.f32 %v3409_v8, 0.0  ;;  %4753 = vmatmul.bf16.gmra.mxu1 %v14164_v61  ;;  %v3570_v4 = vpack.c.bf16 %v3538_v0, %v3538_v0 }
 0x3b0   : > { %4931 = vmatmul.bf16.gmra.mxu3 %v4464_v32  ;;  %v5095_v28 = vpop.f32.mrf.mxu0  ;;  %v4032_v26 = vld [vmem:[#allocation2 + $0x180] sm:$0xff] }
 0x3b1   : > { %3473 = vst [vmem:[#allocation2 + $0x189] sm:$0xff] %v3441_v56  ;;  %v14171_v54 = vadd.f32 %v5095_v28, %v14009_v22  ;;  %v4129_v46 = vpack.c.bf16 %v3441_v56, %v3441_v56  ;;  %v4064_v62 = vpack.c.bf16 %v4032_v26, %v4032_v26  ;;  %v3571_v28 = vpack.c.bf16 %v3539_v9, %v3539_v9  ;;  %v5353_v26 = vld [vmem:[#allocation2 + $0x30] sm:$0xff] }
 0x3b2   : > { %v4805_v40 = vpop.f32.mrf.mxu2 }
 0x3b3   : > { %v4892_v5 = vpop.f32.mrf.mxu3  ;;  %5134 = vmatmul.bf16.gmra.mxu0 %v13981_v6  ;;  %v4353_v50 = vunpack.c.l.b16 %v4129_v46  ;;  %v4256_v47 = vunpack.c.l.b16 %v4064_v62  ;;  %v5354_v46 = vld [vmem:[#allocation2 + $0x38] sm:$0xff] }
 0x3b4   : > { %v14173_v31 = vadd.f32 %v4892_v5, %v4804_v63  ;;  %v4716_v51 = vpop.f32.mrf.mxu1 }
 0x3b5   : > { %v4806_v2 = vadd.f32 %v4805_v40, %v4716_v51  ;;  %v4369_v58 = vpack.c.b16 %v4353_v50, %v4352_v19  ;;  %v5386_v19 = vpack.c.bf16 %v5354_v46, %v5354_v46  ;;  %v3794_v50 = vunpack.c.l.b16 %v3570_v4 }
 0x3b6   : > { %v3795_v51 = vunpack.c.l.b16 %v3571_v28 }
 0x3b7   : > { %4847 = vmatmul.bf16.gmra.mxu2 %v4369_v58  ;;  %v5578_v14 = vunpack.c.l.b16 %v5386_v19  ;;  %v3607_v19 = vld [vmem:[#allocation2 + $0x3a] sm:$0xff] }
 0x3b8   : > { %v5097_v22 = vpop.f32.mrf.mxu0  ;;  %v4033_v38 = vld [vmem:[#allocation2 + $0x188] sm:$0xff] }
 0x3b9   : > { %v4160_v45 = vld [vmem:[#allocation2 + $0x182] sm:$0xff]  ;;  %v4161_v43 = vld [vmem:[#allocation2 + $0x18a] sm:$0xff]  ;;  %v14177_v3 = vadd.f32 %v5097_v22, %v14020_v36  ;;  %v4065_v59 = vpack.c.bf16 %v4033_v38, %v4033_v38  ;;  %v3890_v36 = vunpack.c.l.b16 %v3634_v57 }
 0x3ba   : > { %v4192_v12 = vpack.c.bf16 %v4160_v45, %v4160_v45  ;;  %v4193_v6 = vpack.c.bf16 %v4161_v43, %v4161_v43  ;;  %v4808_v24 = vpop.f32.mrf.mxu2  ;;  %v3605_v22 = vld [vmem:[#allocation2 + $0x22] sm:$0xff]  ;;  %v3826_v45 = vpack.c.b16 %v3795_v51, %v3794_v50  ;;  %v12732_v57 = vld [vmem:[%s17297_s3 + $0x230] sm:$0xff] }
 0x3bb   : > { %v4894_v52 = vpop.f32.mrf.mxu3  ;;  %v4257_v16 = vunpack.c.l.b16 %v4065_v59  ;;  %v3922_v13 = vpack.c.b16 %v3891_v34, %v3890_v36  ;;  %6205 = vmatpush.bf16.msra.mxu1 %v12732_v57  ;;  %v3540_v34 = vld [vmem:[#allocation2 + $0x19] sm:$0xff]  ;;  %v3542_v57 = vld [vmem:[#allocation2 + $0x31] sm:$0xff] }
 0x3bc   : > { %v14179_v42 = vadd.f32 %v4894_v52, %v4806_v2  ;;  %v4448_v53 = vunpack.c.l.b16 %v4192_v12  ;;  %v4449_v7 = vunpack.c.l.b16 %v4193_v6  ;;  %v4719_v55 = vpop.f32.mrf.mxu1  ;;  %v12724_v12 = vld [vmem:[%s17297_s3 + $0x1f0] sm:$0xff] }
 0x3bd   : > { %v4273_v35 = vpack.c.b16 %v4257_v16, %v4256_v47  ;;  %v4809_v48 = vadd.f32 %v4808_v24, %v4719_v55  ;;  %v3637_v47 = vpack.c.bf16 %v3605_v22, %v3605_v22  ;;  %6116 = vmatpush.bf16.msra.mxu0 %v12724_v12 }
 0x3be   : > { %v4465_v27 = vpack.c.b16 %v4449_v7, %v4448_v53 }
 0x3bf   : > { %4758 = vmatmul.bf16.gmra.mxu1 %v4273_v35  ;;  %v3893_v53 = vunpack.c.l.b16 %v3637_v47  ;;  %v3541_v35 = vld [vmem:[#allocation2 + $0x21] sm:$0xff] }
 0x3c0   : > { %4936 = vmatmul.bf16.gmra.mxu3 %v4465_v27  ;;  %v5100_v44 = vpop.f32.mrf.mxu0  ;;  %v3573_v0 = vpack.c.bf16 %v3541_v35, %v3541_v35  ;;  %v5358_v47 = vld [vmem:[#allocation2 + $0x68] sm:$0xff] }
 0x3c1   : > { %v14182_v8 = vadd.f32 %v5100_v44, %v14029_v39  ;;  %v5385_v39 = vpack.c.bf16 %v5353_v26, %v5353_v26  ;;  %v5390_v35 = vpack.c.bf16 %v5358_v47, %v5358_v47 }
 0x3c2   : > { %v4810_v32 = vpop.f32.mrf.mxu2  ;;  %v3797_v46 = vunpack.c.l.b16 %v3573_v0 }
 0x3c3   : > { %v4897_v63 = vpop.f32.mrf.mxu3  ;;  %5139 = vmatmul.bf16.gmra.mxu0 %v14002_v15  ;;  %v3604_v15 = vld [vmem:[#allocation2 + $0x1a] sm:$0xff]  ;;  %v5577_v59 = vunpack.c.l.b16 %v5385_v39  ;;  %v5582_v0 = vunpack.c.l.b16 %v5390_v35 }
 0x3c4   : > { %v14184_v56 = vadd.f32 %v4897_v63, %v4809_v48  ;;  %v4721_v5 = vpop.f32.mrf.mxu1  ;;  %v3636_v52 = vpack.c.bf16 %v3604_v15, %v3604_v15  ;;  %v5356_v48 = vld [vmem:[#allocation2 + $0x50] sm:$0xff]  ;;  %v5355_v63 = vld [vmem:[#allocation2 + $0x48] sm:$0xff]  ;;  %v3639_v15 = vpack.c.bf16 %v3607_v19, %v3607_v19 }
 0x3c5   : > { %v4811_v40 = vadd.f32 %v4810_v32, %v4721_v5  ;;  %v5609_v24 = vpack.c.b16 %v5578_v14, %v5577_v59  ;;  %v5388_v32 = vpack.c.bf16 %v5356_v48, %v5356_v48  ;;  %v5387_v28 = vpack.c.bf16 %v5355_v63, %v5355_v63  ;;  %v3609_v63 = vld [vmem:[#allocation2 + $0x52] sm:$0xff] }
 0x3c6   : > { %v3892_v16 = vunpack.c.l.b16 %v3636_v52  ;;  %v3895_v59 = vunpack.c.l.b16 %v3639_v15  ;;  %v3574_v48 = vpack.c.bf16 %v3542_v57, %v3542_v57  ;;  %v3545_v15 = vld [vmem:[#allocation2 + $0x51] sm:$0xff] }
 0x3c7   : > { %5272 = vmatmul.bf16.vlgmr.msrb.gmra.mxu2 %v3922_v13  ;;  %v5579_v39 = vunpack.c.l.b16 %v5387_v28 }
 0x3c8   : > { %v5102_v2 = vpop.f32.mrf.mxu0  ;;  %v3923_v9 = vpack.c.b16 %v3893_v53, %v3892_v16 }
 0x3c9   : > { %v14188_v58 = vadd.f32 %v5102_v2, %v14042_v1 }
 0x3ca   : > { %v4813_v20 = vpop.f32.mrf.mxu2 }
 0x3cb   : > { %v4899_v62 = vpop.f32.mrf.mxu3 }
 0x3cc   : > { %v14190_v38 = vadd.f32 %v4899_v62, %v4811_v40  ;;  %v4724_v43 = vpop.f32.mrf.mxu1  ;;  %v5580_v40 = vunpack.c.l.b16 %v5388_v32 }
 0x3cd   : > { %v4814_v6 = vadd.f32 %v4813_v20, %v4724_v43 }
 0x3ce   : > { %v5610_v22 = vpack.c.b16 %v5580_v40, %v5579_v39 }
 0x3cf   : > { %5183 = vmatmul.bf16.vlgmr.msrb.gmra.mxu1 %v3826_v45 }
 0x3d0   : > { %6034 = vmatmul.bf16.vlgmr.msrb.gmra.mxu3 %v5609_v24  ;;  %v5105_v1 = vpop.f32.mrf.mxu0 }
 0x3d1   : > { %v14199_v33 = vadd.f32 %v5105_v1, %v14054_v25  ;;  %v3572_v25 = vpack.c.bf16 %v3540_v34, %v3540_v34 }
 0x3d2   : > { %v4815_v55 = vpop.f32.mrf.mxu2 }
 0x3d3   : > { %v4902_v7 = vpop.f32.mrf.mxu3  ;;  %5144 = vmatmul.bf16.gmra.mxu0 %v14025_v11  ;;  %v3606_v11 = vld [vmem:[#allocation2 + $0x32] sm:$0xff]  ;;  %v3796_v51 = vunpack.c.l.b16 %v3572_v25  ;;  %v3798_v25 = vunpack.c.l.b16 %v3574_v48  ;;  %v3610_v48 = vld [vmem:[#allocation2 + $0x62] sm:$0xff] }
 0x3d4   : > { %v14201_v27 = vadd.f32 %v4902_v7, %v4814_v6  ;;  %v4726_v36 = vpop.f32.mrf.mxu1  ;;  %v3638_v20 = vpack.c.bf16 %v3606_v11, %v3606_v11  ;;  %v3543_v6 = vld [vmem:[#allocation2 + $0x39] sm:$0xff]  ;;  %v3641_v11 = vpack.c.bf16 %v3609_v63, %v3609_v63 }
 0x3d5   : > { %v4816_v44 = vadd.f32 %v4815_v55, %v4726_v36  ;;  %v3827_v62 = vpack.c.b16 %v3797_v46, %v3796_v51  ;;  %v3575_v53 = vpack.c.bf16 %v3543_v6, %v3543_v6  ;;  %v5357_v55 = vld [vmem:[#allocation2 + $0x60] sm:$0xff] }
 0x3d6   : > { %v3894_v43 = vunpack.c.l.b16 %v3638_v20  ;;  %v5389_v36 = vpack.c.bf16 %v5357_v55, %v5357_v55 }
 0x3d7   : > { %5277 = vmatmul.bf16.gmra.mxu2 %v3923_v9  ;;  %v3608_v9 = vld [vmem:[#allocation2 + $0x4a] sm:$0xff] }
 0x3d8   : > { %v5107_v4 = vpop.f32.mrf.mxu0  ;;  %v3924_v7 = vpack.c.b16 %v3895_v59, %v3894_v43  ;;  %v5581_v46 = vunpack.c.l.b16 %v5389_v36 }
 0x3d9   : > { %v14205_v13 = vadd.f32 %v5107_v4, %v14065_v60 }
 0x3da   : > { %v4818_v26 = vpop.f32.mrf.mxu2  ;;  %v5611_v19 = vpack.c.b16 %v5582_v0, %v5581_v46 }
 0x3db   : > { %v4904_v5 = vpop.f32.mrf.mxu3 }
 0x3dc   : > { %v14207_v50 = vadd.f32 %v4904_v5, %v4816_v44  ;;  %v4729_v2 = vpop.f32.mrf.mxu1  ;;  %v3799_v44 = vunpack.c.l.b16 %v3575_v53  ;;  %v12723_v5 = vld [vmem:[%s17297_s3 + $0x1e8] sm:$0xff] }
 0x3dd   : > { %v4819_v14 = vadd.f32 %v4818_v26, %v4729_v2  ;;  %6117 = vmatpush.bf16.msra.mxu0 %v12723_v5  ;;  %v12731_v2 = vld [vmem:[%s17297_s3 + $0x228] sm:$0xff] }
 0x3de   : > { %v14223_v40 = vpack.c.b16 %v3799_v44, %v3798_v25  ;;  %6206 = vmatpush.bf16.msra.mxu1 %v12731_v2  ;;  %v3642_v25 = vpack.c.bf16 %v3610_v48, %v3610_v48 }
 0x3df   : > { %5188 = vmatmul.bf16.gmra.mxu1 %v3827_v62 }
 0x3e0   : > { %6039 = vmatmul.bf16.gmra.mxu3 %v5610_v22  ;;  %v5110_v60 = vpop.f32.mrf.mxu0 }
 0x3e1   : > { %v14210_v45 = vadd.f32 %v5110_v60, %v14074_v17  ;;  %v5360_v60 = vld [vmem:[#allocation2 + $0x80] sm:$0xff] }
 0x3e2   : > { %v4820_v12 = vpop.f32.mrf.mxu2  ;;  %v5392_v57 = vpack.c.bf16 %v5360_v60, %v5360_v60 }
 0x3e3   : > { %v4907_v52 = vpop.f32.mrf.mxu3  ;;  %5149 = vmatmul.bf16.gmra.mxu0 %v14047_v29 }
 0x3e4   : > { %v14213_v24 = vadd.f32 %v4907_v52, %v4819_v14  ;;  %v4731_v1 = vpop.f32.mrf.mxu1  ;;  %v3897_v14 = vunpack.c.l.b16 %v3641_v11  ;;  %v3577_v52 = vpack.c.bf16 %v3545_v15, %v3545_v15  ;;  %v5584_v35 = vunpack.c.l.b16 %v5392_v57  ;;  %v12722_v11 = vld [vmem:[%s17297_s3 + $0x1e0] sm:$0xff] }
 0x3e5   : > { %v4821_v16 = vadd.f32 %v4820_v12, %v4731_v1  ;;  %v3544_v12 = vld [vmem:[#allocation2 + $0x49] sm:$0xff]  ;;  %v5359_v1 = vld [vmem:[#allocation2 + $0x78] sm:$0xff]  ;;  %v3546_v15 = vld [vmem:[#allocation2 + $0x61] sm:$0xff]  ;;  %6118 = vmatpush.bf16.msra.mxu0 %v12722_v11 }
 0x3e6   : > { %v5391_v53 = vpack.c.bf16 %v5359_v1, %v5359_v1  ;;  %v3801_v55 = vunpack.c.l.b16 %v3577_v52  ;;  %v3578_v52 = vpack.c.bf16 %v3546_v15, %v3546_v15 }
 0x3e7   : > { %5282 = vmatmul.bf16.gmra.mxu2 %v3924_v7 }
 0x3e8   : > { %v5112_v17 = vpop.f32.mrf.mxu0  ;;  %v3802_v48 = vunpack.c.l.b16 %v3578_v52 }
 0x3e9   : > { %v14216_v34 = vadd.f32 %v5112_v17, %v14082_v23  ;;  %v3640_v23 = vpack.c.bf16 %v3608_v9, %v3608_v9  ;;  %v3611_v17 = vld [vmem:[#allocation2 + $0x6a] sm:$0xff]  ;;  %v5583_v9 = vunpack.c.l.b16 %v5391_v53 }
 0x3ea   : > { %v4823_v29 = vpop.f32.mrf.mxu2 }
 0x3eb   : > { %v4909_v32 = vpop.f32.mrf.mxu3  ;;  %v3896_v62 = vunpack.c.l.b16 %v3640_v23  ;;  %v5612_v46 = vpack.c.b16 %v5584_v35, %v5583_v9  ;;  %v3613_v35 = vld [vmem:[#allocation2 + $0x82] sm:$0xff] }
 0x3ec   : > { %v14218_v4 = vadd.f32 %v4909_v32, %v4821_v16  ;;  %v4734_v28 = vpop.f32.mrf.mxu1 }
 0x3ed   : > { %v4824_v26 = vadd.f32 %v4823_v29, %v4734_v28  ;;  %v3925_v47 = vpack.c.b16 %v3897_v14, %v3896_v62  ;;  %v3643_v28 = vpack.c.bf16 %v3611_v17, %v3611_v17  ;;  %v5362_v62 = vld [vmem:[#allocation2 + $0x98] sm:$0xff] }
 0x3ef   : > { %5193 = vmatmul.bf16.gmra.mxu1 %v14223_v40  ;;  %v3899_v23 = vunpack.c.l.b16 %v3643_v28 }
 0x3f0   : > { %6044 = vmatmul.bf16.gmra.mxu3 %v5611_v19  ;;  %v5115_v51 = vpop.f32.mrf.mxu0 }
 0x3f1   : > { %v14230_v39 = vadd.f32 %v5115_v51, %v14097_v18  ;;  %v3576_v18 = vpack.c.bf16 %v3544_v12, %v3544_v12  ;;  %v3547_v51 = vld [vmem:[#allocation2 + $0x69] sm:$0xff] }
 0x3f2   : > { %v4825_v20 = vpop.f32.mrf.mxu2  ;;  %v3579_v60 = vpack.c.bf16 %v3547_v51, %v3547_v51  ;;  %v5361_v12 = vld [vmem:[#allocation2 + $0x90] sm:$0xff] }
 0x3f3   : > { %v4912_v22 = vpop.f32.mrf.mxu3  ;;  %5154 = vmatmul.bf16.gmra.mxu0 %v14070_v37  ;;  %v3800_v44 = vunpack.c.l.b16 %v3576_v18  ;;  %v5393_v1 = vpack.c.bf16 %v5361_v12, %v5361_v12  ;;  %v12720_v18 = vld [vmem:[%s17297_s3 + $0x1d0] sm:$0xff]  ;;  %v5363_v12 = vld [vmem:[#allocation2 + $0xa8] sm:$0xff] }
 0x3f4   : > { %v14233_v43 = vadd.f32 %v4912_v22, %v4824_v26  ;;  %v4736_v59 = vpop.f32.mrf.mxu1  ;;  %v3898_v26 = vunpack.c.l.b16 %v3642_v25  ;;  %v3803_v57 = vunpack.c.l.b16 %v3579_v60  ;;  %v3645_v25 = vpack.c.bf16 %v3613_v35, %v3613_v35 }
 0x3f5   : > { %v4826_v6 = vadd.f32 %v4825_v20, %v4736_v59  ;;  %v14240_v63 = vpack.c.b16 %v3801_v55, %v3800_v44  ;;  %v3612_v55 = vld [vmem:[#allocation2 + $0x7a] sm:$0xff]  ;;  %v5585_v44 = vunpack.c.l.b16 %v5393_v1  ;;  %v5395_v1 = vpack.c.bf16 %v5363_v12, %v5363_v12 }
 0x3f6   : > { %v3926_v59 = vpack.c.b16 %v3899_v23, %v3898_v26  ;;  %v3901_v11 = vunpack.c.l.b16 %v3645_v25 }
 0x3f7   : > { %5287 = vmatmul.bf16.gmra.mxu2 %v3925_v47 }
 0x3f8   : > { %v5117_v16 = vpop.f32.mrf.mxu0 }
 0x3f9   : > { %v14236_v7 = vadd.f32 %v5117_v16, %v14117_v10 }
 0x3fa   : > { %v4828_v37 = vpop.f32.mrf.mxu2 }
 0x3fb   : > { %v4914_v36 = vpop.f32.mrf.mxu3 }
 0x3fc   : > { %v14238_v0 = vadd.f32 %v4914_v36, %v4826_v6  ;;  %v4739_v29 = vpop.f32.mrf.mxu1  ;;  %v5394_v6 = vpack.c.bf16 %v5362_v62, %v5362_v62 }
 0x3fd   : > { %v4829_v32 = vadd.f32 %v4828_v37, %v4739_v29  ;;  %v14266_v29 = vpack.c.b16 %v3803_v57, %v3802_v48 }
 0x3fe   : > { %v5586_v16 = vunpack.c.l.b16 %v5394_v6 }
 0x3ff   : > { %5198 = vmatmul.bf16.gmra.mxu1 %v14240_v63 }
 0x400   : > { %6049 = vmatmul.bf16.gmra.mxu3 %v5612_v46  ;;  %v5120_v10 = vpop.f32.mrf.mxu0  ;;  %v5613_v28 = vpack.c.b16 %v5586_v16, %v5585_v44  ;;  %v5587_v44 = vunpack.c.l.b16 %v5395_v1 }
 0x401   : > { %v14244_v5 = vadd.f32 %v5120_v10, %v14138_v21  ;;  %v12721_v21 = vld [vmem:[%s17297_s3 + $0x1d8] sm:$0xff]  ;;  %v12730_v10 = vld [vmem:[%s17297_s3 + $0x220] sm:$0xff] }
 0x402   : > { %v4830_v19 = vpop.f32.mrf.mxu2  ;;  %6119 = vmatpush.bf16.msra.mxu0 %v12721_v21  ;;  %6207 = vmatpush.bf16.msra.mxu1 %v12730_v10 }
 0x403   : > { %v4917_v2 = vpop.f32.mrf.mxu3  ;;  %5159 = vmatmul.bf16.gmra.mxu0 %v14087_v30 }
 0x404   : > { %v14250_v14 = vadd.f32 %v4917_v2, %v4829_v32  ;;  %v4741_v20 = vpop.f32.mrf.mxu1  ;;  %v3644_v32 = vpack.c.bf16 %v3612_v55, %v3612_v55  ;;  %v3549_v2 = vld [vmem:[#allocation2 + $0x81] sm:$0xff] }
 0x405   : > { %v4831_v22 = vadd.f32 %v4830_v19, %v4741_v20  ;;  %v12718_v19 = vld [vmem:[%s17297_s3 + $0x1c0] sm:$0xff]  ;;  %v5364_v20 = vld [vmem:[#allocation2 + $0xb0] sm:$0xff]  ;;  %v3581_v60 = vpack.c.bf16 %v3549_v2, %v3549_v2  ;;  %v5366_v2 = vld [vmem:[#allocation2 + $0xc8] sm:$0xff] }
 0x406   : > { %6120 = vmatpush.bf16.msra.mxu0 %v12720_v18  ;;  %v3900_v23 = vunpack.c.l.b16 %v3644_v32  ;;  %v5396_v6 = vpack.c.bf16 %v5364_v20, %v5364_v20  ;;  %v3615_v55 = vld [vmem:[#allocation2 + $0x9a] sm:$0xff]  ;;  %v5398_v12 = vpack.c.bf16 %v5366_v2, %v5366_v2 }
 0x407   : > { %5292 = vmatmul.bf16.gmra.mxu2 %v3926_v59  ;;  %v3805_v18 = vunpack.c.l.b16 %v3581_v60  ;;  %v3647_v25 = vpack.c.bf16 %v3615_v55, %v3615_v55 }
 0x408   : > { %v5122_v47 = vpop.f32.mrf.mxu0  ;;  %v3927_v59 = vpack.c.b16 %v3901_v11, %v3900_v23 }
 0x409   : > { %v14256_v30 = vadd.f32 %v5122_v47, %v14155_v41  ;;  %v12719_v41 = vld [vmem:[%s17297_s3 + $0x1c8] sm:$0xff]  ;;  %v3903_v23 = vunpack.c.l.b16 %v3647_v25 }
 0x40a   : > { %v4833_v53 = vpop.f32.mrf.mxu2  ;;  %6121 = vmatpush.bf16.msra.mxu0 %v12719_v41 }
 0x40b   : > { %v4919_v37 = vpop.f32.mrf.mxu3 }
 0x40c   : > { %v14261_v17 = vadd.f32 %v4919_v37, %v4831_v22  ;;  %v4744_v36 = vpop.f32.mrf.mxu1  ;;  %v3548_v22 = vld [vmem:[#allocation2 + $0x79] sm:$0xff] }
 0x40d   : > { %v4834_v9 = vadd.f32 %v4833_v53, %v4744_v36  ;;  %v3580_v52 = vpack.c.bf16 %v3548_v22, %v3548_v22  ;;  %v3614_v53 = vld [vmem:[#allocation2 + $0x92] sm:$0xff] }
 0x40e   : > { %6122 = vmatpush.bf16.msra.mxu0 %v12718_v19  ;;  %v3646_v32 = vpack.c.bf16 %v3614_v53, %v3614_v53  ;;  %v3551_v19 = vld [vmem:[#allocation2 + $0x99] sm:$0xff] }
 0x40f   : > { %5203 = vmatmul.bf16.gmra.mxu1 %v14266_v29  ;;  %v3804_v37 = vunpack.c.l.b16 %v3580_v52 }
 0x410   : > { %6054 = vmatmul.bf16.gmra.mxu3 %v5613_v28  ;;  %v5125_v46 = vpop.f32.mrf.mxu0  ;;  %v3902_v10 = vunpack.c.l.b16 %v3646_v32 }
 0x411   : > { %v14273_v26 = vadd.f32 %v5125_v46, %v14173_v31  ;;  %v14286_v41 = vpack.c.b16 %v3805_v18, %v3804_v37  ;;  %v5590_v18 = vunpack.c.l.b16 %v5398_v12 }
 0x412   : > { %v4835_v51 = vpop.f32.mrf.mxu2  ;;  %v3928_v60 = vpack.c.b16 %v3903_v23, %v3902_v10 }
 0x413   : > { %v4922_v62 = vpop.f32.mrf.mxu3  ;;  %5164 = vmatmul.bf16.gmra.mxu0 %v14128_v49  ;;  %v5588_v49 = vunpack.c.l.b16 %v5396_v6 }
 0x414   : > { %v14279_v15 = vadd.f32 %v4922_v62, %v4834_v9  ;;  %v4746_v21 = vpop.f32.mrf.mxu1 }
 0x415   : > { %v4836_v31 = vadd.f32 %v4835_v51, %v4746_v21  ;;  %v5614_v28 = vpack.c.b16 %v5588_v49, %v5587_v44  ;;  %v3550_v21 = vld [vmem:[#allocation2 + $0x91] sm:$0xff] }
 0x416   : > { %v3582_v6 = vpack.c.bf16 %v3550_v21, %v3550_v21  ;;  %v3616_v49 = vld [vmem:[#allocation2 + $0xaa] sm:$0xff] }
 0x417   : > { %5297 = vmatmul.bf16.gmra.mxu2 %v3927_v59  ;;  %v5365_v59 = vld [vmem:[#allocation2 + $0xc0] sm:$0xff]  ;;  %v3648_v32 = vpack.c.bf16 %v3616_v49, %v3616_v49 }
 0x418   : > { %v5127_v47 = vpop.f32.mrf.mxu0  ;;  %v5397_v52 = vpack.c.bf16 %v5365_v59, %v5365_v59  ;;  %v3806_v55 = vunpack.c.l.b16 %v3582_v6  ;;  %v5367_v6 = vld [vmem:[#allocation2 + $0xd8] sm:$0xff] }
 0x419   : > { %v14282_v57 = vadd.f32 %v5127_v47, %v14179_v42  ;;  %v3904_v23 = vunpack.c.l.b16 %v3648_v32 }
 0x41a   : > { %v4838_v16 = vpop.f32.mrf.mxu2 }
 0x41b   : > { %v4924_v35 = vpop.f32.mrf.mxu3 }
 0x41c   : > { %v14284_v48 = vadd.f32 %v4924_v35, %v4836_v31  ;;  %v4749_v36 = vpop.f32.mrf.mxu1  ;;  %v3583_v31 = vpack.c.bf16 %v3551_v19, %v3551_v19 }
 0x41d   : > { %v4839_v9 = vadd.f32 %v4838_v16, %v4749_v36  ;;  %v3617_v16 = vld [vmem:[#allocation2 + $0xb2] sm:$0xff]  ;;  %v5589_v36 = vunpack.c.l.b16 %v5397_v52 }
 0x41e   : > { %v3807_v1 = vunpack.c.l.b16 %v3583_v31  ;;  %v3649_v25 = vpack.c.bf16 %v3617_v16, %v3617_v16  ;;  %v3552_v31 = vld [vmem:[#allocation2 + $0xa9] sm:$0xff] }
 0x41f   : > { %5208 = vmatmul.bf16.gmra.mxu1 %v14286_v41  ;;  %v3584_v52 = vpack.c.bf16 %v3552_v31, %v3552_v31 }
 0x420   : > { %6059 = vmatmul.bf16.gmra.mxu3 %v5614_v28  ;;  %v5130_v42 = vpop.f32.mrf.mxu0  ;;  %v14300_v44 = vpack.c.b16 %v3807_v1, %v3806_v55  ;;  %v5615_v28 = vpack.c.b16 %v5590_v18, %v5589_v36  ;;  %v5399_v18 = vpack.c.bf16 %v5367_v6, %v5367_v6  ;;  %v3619_v55 = vld [vmem:[#allocation2 + $0xca] sm:$0xff]  ;;  %v3554_v6 = vld [vmem:[#allocation2 + $0xc1] sm:$0xff] }
 0x421   : > { %v14290_v46 = vadd.f32 %v5130_v42, %v14184_v56  ;;  %v12729_v42 = vld [vmem:[%s17297_s3 + $0x218] sm:$0xff]  ;;  %v3808_v36 = vunpack.c.l.b16 %v3584_v52 }
 0x422   : > { %v4840_v11 = vpop.f32.mrf.mxu2  ;;  %6208 = vmatpush.bf16.msra.mxu1 %v12729_v42 }
 0x423   : > { %v4927_v51 = vpop.f32.mrf.mxu3  ;;  %5169 = vmatmul.bf16.gmra.mxu0 %v14164_v61 }
 0x424   : > { %v14293_v62 = vadd.f32 %v4927_v51, %v4839_v9  ;;  %v4751_v20 = vpop.f32.mrf.mxu1  ;;  %v3553_v51 = vld [vmem:[#allocation2 + $0xb1] sm:$0xff] }
 0x425   : > { %v4841_v22 = vadd.f32 %v4840_v11, %v4751_v20  ;;  %v3905_v11 = vunpack.c.l.b16 %v3649_v25  ;;  %v5368_v20 = vld [vmem:[#allocation2 + $0xe0] sm:$0xff]  ;;  %v3585_v59 = vpack.c.bf16 %v3553_v51, %v3553_v51  ;;  %v5591_v25 = vunpack.c.l.b16 %v5399_v18 }
 0x427   : > { %5302 = vmatmul.bf16.gmra.mxu2 %v3928_v60  ;;  %v3929_v12 = vpack.c.b16 %v3905_v11, %v3904_v23  ;;  %v3651_v23 = vpack.c.bf16 %v3619_v55, %v3619_v55 }
 0x428   : > { %v5132_v56 = vpop.f32.mrf.mxu0 }
 0x429   : > { %v14296_v47 = vadd.f32 %v5132_v56, %v14190_v38  ;;  %v5400_v56 = vpack.c.bf16 %v5368_v20, %v5368_v20 }
 0x42a   : > { %v4843_v61 = vpop.f32.mrf.mxu2 }
 0x42b   : > { %v4929_v53 = vpop.f32.mrf.mxu3  ;;  %v5592_v49 = vunpack.c.l.b16 %v5400_v56 }
 0x42c   : > { %v14298_v35 = vadd.f32 %v4929_v53, %v4841_v22  ;;  %v4754_v37 = vpop.f32.mrf.mxu1  ;;  %v3618_v53 = vld [vmem:[#allocation2 + $0xc2] sm:$0xff] }
 0x42d   : > { %v4844_v9 = vadd.f32 %v4843_v61, %v4754_v37  ;;  %v3809_v61 = vunpack.c.l.b16 %v3585_v59  ;;  %v3650_v42 = vpack.c.bf16 %v3618_v53, %v3618_v53  ;;  %v5616_v11 = vpack.c.b16 %v5592_v49, %v5591_v25 }
 0x42f   : > { %5213 = vmatmul.bf16.gmra.mxu1 %v14300_v44  ;;  %v3906_v51 = vunpack.c.l.b16 %v3650_v42 }
 0x430   : > { %6064 = vmatmul.bf16.gmra.mxu3 %v5615_v28  ;;  %v5135_v38 = vpop.f32.mrf.mxu0  ;;  %v14320_v28 = vpack.c.b16 %v3809_v61, %v3808_v36  ;;  %v3586_v61 = vpack.c.bf16 %v3554_v6, %v3554_v6  ;;  %v3621_v36 = vld [vmem:[#allocation2 + $0xe2] sm:$0xff] }
 0x431   : > { %v14307_v10 = vadd.f32 %v5135_v38, %v14201_v27  ;;  %v12741_v27 = vld [vmem:[%s17299_s5 + $0x38] sm:$0xff] }
 0x432   : > { %v4845_v19 = vpop.f32.mrf.mxu2  ;;  %6614 = vmatpush.bf16.msra.mxu2 %v12741_v27  ;;  %v3810_v25 = vunpack.c.l.b16 %v3586_v61 }
 0x433   : > { %v4932_v2 = vpop.f32.mrf.mxu3  ;;  %6123 = vmatmul.bf16.vlgmr.msra.gmra.mxu0 %v14223_v40 }
 0x434   : > { %v14310_v21 = vadd.f32 %v4932_v2, %v4844_v9  ;;  %v4756_v22 = vpop.f32.mrf.mxu1  ;;  %v3907_v2 = vunpack.c.l.b16 %v3651_v23 }
 0x435   : > { %v4846_v60 = vadd.f32 %v4845_v19, %v4756_v22  ;;  %v3555_v22 = vld [vmem:[#allocation2 + $0xc9] sm:$0xff] }
 0x436   : > { %v3587_v56 = vpack.c.bf16 %v3555_v22, %v3555_v22  ;;  %v3930_v52 = vpack.c.b16 %v3907_v2, %v3906_v51  ;;  %v3653_v2 = vpack.c.bf16 %v3621_v36, %v3621_v36 }
 0x437   : > { %5307 = vmatmul.bf16.gmra.mxu2 %v3929_v12 }
 0x438   : > { %v5137_v1 = vpop.f32.mrf.mxu0  ;;  %v3811_v53 = vunpack.c.l.b16 %v3587_v56  ;;  %v5372_v56 = vld [vmem:[#allocation2 + $0x110] sm:$0xff] }
 0x439   : > { %v14316_v40 = vadd.f32 %v5137_v1, %v14207_v50  ;;  %v5369_v1 = vld [vmem:[#allocation2 + $0xf0] sm:$0xff] }
 0x43a   : > { %v4848_v16 = vpop.f32.mrf.mxu2  ;;  %v5401_v49 = vpack.c.bf16 %v5369_v1, %v5369_v1  ;;  %v3556_v1 = vld [vmem:[#allocation2 + $0xd9] sm:$0xff] }
 0x43b   : > { %v4934_v37 = vpop.f32.mrf.mxu3 }
 0x43c   : > { %v14318_v9 = vadd.f32 %v4934_v37, %v4846_v60  ;;  %v4759_v32 = vpop.f32.mrf.mxu1  ;;  %v5370_v60 = vld [vmem:[#allocation2 + $0xf8] sm:$0xff]  ;;  %v5593_v23 = vunpack.c.l.b16 %v5401_v49  ;;  %v5371_v49 = vld [vmem:[#allocation2 + $0x108] sm:$0xff] }
 0x43d   : > { %v4849_v38 = vadd.f32 %v4848_v16, %v4759_v32  ;;  %v5402_v18 = vpack.c.bf16 %v5370_v60, %v5370_v60  ;;  %v3620_v37 = vld [vmem:[#allocation2 + $0xda] sm:$0xff] }
 0x43e   : > { %v3652_v51 = vpack.c.bf16 %v3620_v37, %v3620_v37  ;;  %v5403_v37 = vpack.c.bf16 %v5371_v49, %v5371_v49 }
 0x43f   : > { %5218 = vmatmul.bf16.gmra.mxu1 %v14320_v28  ;;  %v5594_v55 = vunpack.c.l.b16 %v5402_v18 }
 0x440   : > { %6069 = vmatmul.bf16.gmra.mxu3 %v5616_v11  ;;  %v5140_v50 = vpop.f32.mrf.mxu0 }
 0x441   : > { %v14324_v19 = vadd.f32 %v5140_v50, %v14213_v24  ;;  %v14335_v50 = vpack.c.b16 %v3811_v53, %v3810_v25  ;;  %v5404_v53 = vpack.c.bf16 %v5372_v56, %v5372_v56 }
 0x442   : > { %v4850_v20 = vpop.f32.mrf.mxu2 }
 0x443   : > { %v4937_v31 = vpop.f32.mrf.mxu3  ;;  %6128 = vmatmul.bf16.gmra.mxu0 %v14240_v63 }
 0x444   : > { %v14327_v59 = vadd.f32 %v4937_v31, %v4849_v38  ;;  %v4761_v12 = vpop.f32.mrf.mxu1  ;;  %v12728_v31 = vld [vmem:[%s17297_s3 + $0x210] sm:$0xff] }
 0x445   : > { %v4851_v27 = vadd.f32 %v4850_v20, %v4761_v12  ;;  %v5617_v20 = vpack.c.b16 %v5594_v55, %v5593_v23  ;;  %v3908_v12 = vunpack.c.l.b16 %v3652_v51  ;;  %6209 = vmatpush.bf16.msra.mxu1 %v12728_v31  ;;  %v3623_v23 = vld [vmem:[#allocation2 + $0xfa] sm:$0xff]  ;;  %v5595_v51 = vunpack.c.l.b16 %v5403_v37 }
 0x446   : > { %v3655_v31 = vpack.c.bf16 %v3623_v23, %v3623_v23 }
 0x447   : > { %5312 = vmatmul.bf16.gmra.mxu2 %v3930_v52 }
 0x448   : > { %v5142_v24 = vpop.f32.mrf.mxu0  ;;  %v3911_v56 = vunpack.c.l.b16 %v3655_v31 }
 0x449   : > { %v14330_v16 = vadd.f32 %v5142_v24, %v14218_v4 }
 0x44a   : > { %v5273_v63 = vpop.f32.mrf.mxu2 }
 0x44b   : > { %v4939_v32 = vpop.f32.mrf.mxu3 }
 0x44c   : > { %v14332_v38 = vadd.f32 %v4939_v32, %v4851_v27  ;;  %v5184_v42 = vpop.f32.mrf.mxu1  ;;  %v3557_v27 = vld [vmem:[#allocation2 + $0xe1] sm:$0xff] }
 0x44d   : > { %v5185_v11 = vadd.f32 %v5184_v42, %v14171_v54  ;;  %v3909_v54 = vunpack.c.l.b16 %v3653_v2  ;;  %v3589_v61 = vpack.c.bf16 %v3557_v27, %v3557_v27  ;;  %v3622_v42 = vld [vmem:[#allocation2 + $0xf2] sm:$0xff] }
 0x44f   : > { %5223 = vmatmul.bf16.gmra.mxu1 %v14335_v50  ;;  %v14338_v4 = vadd.f32 %v5273_v63, %v5185_v11  ;;  %v3931_v24 = vpack.c.b16 %v3909_v54, %v3908_v12  ;;  %v3813_v32 = vunpack.c.l.b16 %v3589_v61  ;;  %v3558_v61 = vld [vmem:[#allocation2 + $0xf1] sm:$0xff] }
 0x450   : > { %6074 = vmatmul.bf16.gmra.mxu3 %v5617_v20  ;;  %v5145_v22 = vpop.f32.mrf.mxu0 }
 0x451   : > { %v14344_v60 = vadd.f32 %v5145_v22, %v14233_v43  ;;  %v3588_v43 = vpack.c.bf16 %v3556_v1, %v3556_v1  ;;  %v3654_v22 = vpack.c.bf16 %v3622_v42, %v3622_v42  ;;  %v3559_v1 = vld [vmem:[#allocation2 + $0xf9] sm:$0xff] }
 0x452   : > { %v5275_v6 = vpop.f32.mrf.mxu2  ;;  %v3591_v49 = vpack.c.bf16 %v3559_v1, %v3559_v1 }
 0x453   : > { %6133 = vmatmul.bf16.gmra.mxu0 %v14266_v29  ;;  %v5596_v29 = vunpack.c.l.b16 %v5404_v53  ;;  %v3812_v11 = vunpack.c.l.b16 %v3588_v43  ;;  %v3910_v27 = vunpack.c.l.b16 %v3654_v22  ;;  %v5373_v43 = vld [vmem:[#allocation2 + $0x120] sm:$0xff] }
 0x454   : > { %v5186_v52 = vpop.f32.mrf.mxu1  ;;  %v3815_v42 = vunpack.c.l.b16 %v3591_v49 }
 0x455   : > { %v5187_v18 = vadd.f32 %v5186_v52, %v14177_v3  ;;  %v14354_v20 = vpack.c.b16 %v3813_v32, %v3812_v11  ;;  %v5618_v12 = vpack.c.b16 %v5596_v29, %v5595_v51  ;;  %v3932_v53 = vpack.c.b16 %v3911_v56, %v3910_v27  ;;  %v3624_v11 = vld [vmem:[#allocation2 + $0x10a] sm:$0xff] }
 0x456   : > { %v3590_v32 = vpack.c.bf16 %v3558_v61, %v3558_v61  ;;  %v5405_v29 = vpack.c.bf16 %v5373_v43, %v5373_v43  ;;  %v3561_v61 = vld [vmem:[#allocation2 + $0x111] sm:$0xff] }
 0x457   : > { %v14348_v55 = vadd.f32 %v5275_v6, %v5187_v18  ;;  %5317 = vmatmul.bf16.gmra.mxu2 %v3931_v24 }
 0x458   : > { %v5147_v63 = vpop.f32.mrf.mxu0  ;;  %v3814_v51 = vunpack.c.l.b16 %v3590_v32 }
 0x459   : > { %v14351_v36 = vadd.f32 %v5147_v63, %v14238_v0 }
 0x45a   : > { %v5278_v25 = vpop.f32.mrf.mxu2  ;;  %v14370_v31 = vpack.c.b16 %v3815_v42, %v3814_v51 }
 0x45c   : > { %v5189_v3 = vpop.f32.mrf.mxu1 }
 0x45d   : > { %v5190_v2 = vadd.f32 %v5189_v3, %v14182_v8  ;;  %v5374_v8 = vld [vmem:[#allocation2 + $0x128] sm:$0xff]  ;;  %v3625_v3 = vld [vmem:[#allocation2 + $0x112] sm:$0xff] }
 0x45e   : > { %v5406_v63 = vpack.c.bf16 %v5374_v8, %v5374_v8 }
 0x45f   : > { %5228 = vmatmul.bf16.gmra.mxu1 %v14354_v20  ;;  %v14357_v54 = vadd.f32 %v5278_v25, %v5190_v2  ;;  %v5597_v2 = vunpack.c.l.b16 %v5405_v29 }
 0x460   : > { %6079 = vmatmul.bf16.gmra.mxu3 %v5618_v12  ;;  %v5150_v0 = vpop.f32.mrf.mxu0  ;;  %v3656_v12 = vpack.c.bf16 %v3624_v11, %v3624_v11 }
 0x461   : > { %v14360_v6 = vadd.f32 %v5150_v0, %v14250_v14  ;;  %v3657_v0 = vpack.c.bf16 %v3625_v3, %v3625_v3 }
 0x462   : > { %v5280_v52 = vpop.f32.mrf.mxu2  ;;  %v3912_v8 = vunpack.c.l.b16 %v3656_v12 }
 0x463   : > { %6138 = vmatmul.bf16.gmra.mxu0 %v14286_v41  ;;  %v5598_v41 = vunpack.c.l.b16 %v5406_v63  ;;  %v3593_v63 = vpack.c.bf16 %v3561_v61, %v3561_v61 }
 0x464   : > { %v5191_v18 = vpop.f32.mrf.mxu1 }
 0x465   : > { %v5192_v24 = vadd.f32 %v5191_v18, %v14188_v58  ;;  %v5619_v27 = vpack.c.b16 %v5598_v41, %v5597_v2  ;;  %v3817_v3 = vunpack.c.l.b16 %v3593_v63  ;;  %v3627_v2 = vld [vmem:[#allocation2 + $0x12a] sm:$0xff]  ;;  %v5378_v63 = vld [vmem:[#allocation2 + $0x158] sm:$0xff] }
 0x467   : > { %v14364_v37 = vadd.f32 %v5280_v52, %v5192_v24  ;;  %5322 = vmatmul.bf16.gmra.mxu2 %v3932_v53  ;;  %v12727_v52 = vld [vmem:[%s17297_s3 + $0x208] sm:$0xff]  ;;  %v5376_v24 = vld [vmem:[#allocation2 + $0x140] sm:$0xff] }
 0x468   : > { %v5152_v14 = vpop.f32.mrf.mxu0  ;;  %6210 = vmatpush.bf16.msra.mxu1 %v12727_v52  ;;  %v3560_v53 = vld [vmem:[#allocation2 + $0x109] sm:$0xff]  ;;  %v5408_v29 = vpack.c.bf16 %v5376_v24, %v5376_v24 }
 0x469   : > { %v14367_v25 = vadd.f32 %v5152_v14, %v14261_v17  ;;  %v5375_v14 = vld [vmem:[#allocation2 + $0x138] sm:$0xff]  ;;  %v3592_v41 = vpack.c.bf16 %v3560_v53, %v3560_v53 }
 0x46a   : > { %v5283_v23 = vpop.f32.mrf.mxu2  ;;  %v5407_v11 = vpack.c.bf16 %v5375_v14, %v5375_v14  ;;  %v3562_v14 = vld [vmem:[#allocation2 + $0x121] sm:$0xff] }
 0x46c   : > { %v5194_v58 = vpop.f32.mrf.mxu1 }
 0x46d   : > { %v5195_v22 = vadd.f32 %v5194_v58, %v14199_v33  ;;  %v3913_v33 = vunpack.c.l.b16 %v3657_v0  ;;  %v3626_v58 = vld [vmem:[#allocation2 + $0x122] sm:$0xff]  ;;  %v5599_v0 = vunpack.c.l.b16 %v5407_v11  ;;  %v5410_v11 = vpack.c.bf16 %v5378_v63, %v5378_v63 }
 0x46e   : > { %v3658_v52 = vpack.c.bf16 %v3626_v58, %v3626_v58  ;;  %v12726_v63 = vld [vmem:[%s17297_s3 + $0x200] sm:$0xff] }
 0x46f   : > { %5233 = vmatmul.bf16.gmra.mxu1 %v14370_v31  ;;  %v14373_v56 = vadd.f32 %v5283_v23, %v5195_v22  ;;  %v3933_v32 = vpack.c.b16 %v3913_v33, %v3912_v8  ;;  %v3816_v22 = vunpack.c.l.b16 %v3592_v41  ;;  %v3659_v8 = vpack.c.bf16 %v3627_v2, %v3627_v2  ;;  %v14394_v33 = vpop.f32.mrf.mxu3 }
 0x470   : > { %6084 = vmatmul.bf16.gmra.mxu3 %v5619_v27  ;;  %v5155_v17 = vpop.f32.mrf.mxu0  ;;  %6211 = vmatpush.bf16.msra.mxu1 %v12726_v63 }
 0x471   : > { %v14379_v1 = vadd.f32 %v5155_v17, %v14279_v15  ;;  %v12740_v15 = vld [vmem:[%s17299_s5 + $0x30] sm:$0xff]  ;;  %v14392_v17 = vpack.c.b16 %v3817_v3, %v3816_v22  ;;  %v3915_v53 = vunpack.c.l.b16 %v3659_v8  ;;  %v5602_v22 = vunpack.c.l.b16 %v5410_v11 }
 0x472   : > { %v5285_v18 = vpop.f32.mrf.mxu2  ;;  %6615 = vmatpush.bf16.msra.mxu2 %v12740_v15 }
 0x473   : > { %6143 = vmatmul.bf16.gmra.mxu0 %v14300_v44 }
 0x474   : > { %v5196_v49 = vpop.f32.mrf.mxu1 }
 0x475   : > { %v5197_v43 = vadd.f32 %v5196_v49, %v14205_v13  ;;  %v5600_v13 = vunpack.c.l.b16 %v5408_v29  ;;  %v3914_v49 = vunpack.c.l.b16 %v3658_v52 }
 0x477   : > { %v14386_v42 = vadd.f32 %v5285_v18, %v5197_v43  ;;  %5327 = vmatmul.bf16.gmra.mxu2 %v3933_v32  ;;  %v5620_v18 = vpack.c.b16 %v5600_v13, %v5599_v0  ;;  %v3934_v41 = vpack.c.b16 %v3915_v53, %v3914_v49  ;;  %v3594_v13 = vpack.c.bf16 %v3562_v14, %v3562_v14  ;;  %v3628_v0 = vld [vmem:[#allocation2 + $0x13a] sm:$0xff] }
 0x478   : > { %v5157_v23 = vpop.f32.mrf.mxu0  ;;  %v3660_v49 = vpack.c.bf16 %v3628_v0, %v3628_v0 }
 0x479   : > { %v14389_v44 = vadd.f32 %v5157_v23, %v14284_v48  ;;  %v5377_v23 = vld [vmem:[#allocation2 + $0x150] sm:$0xff] }
 0x47a   : > { %v5288_v51 = vpop.f32.mrf.mxu2  ;;  %v5409_v58 = vpack.c.bf16 %v5377_v23, %v5377_v23  ;;  %v3916_v14 = vunpack.c.l.b16 %v3660_v49  ;;  %v5380_v23 = vld [vmem:[#allocation2 + $0x170] sm:$0xff]  ;;  %v3631_v49 = vld [vmem:[#allocation2 + $0x15a] sm:$0xff] }
 0x47c   : > { %v5199_v12 = vpop.f32.mrf.mxu1  ;;  %v5601_v8 = vunpack.c.l.b16 %v5409_v58 }
 0x47d   : > { %v5200_v27 = vadd.f32 %v5199_v12, %v14210_v45  ;;  %v3563_v45 = vld [vmem:[#allocation2 + $0x129] sm:$0xff] }
 0x47e   : > { %v3595_v29 = vpack.c.bf16 %v3563_v45, %v3563_v45 }
 0x47f   : > { %5238 = vmatmul.bf16.gmra.mxu1 %v14392_v17  ;;  %v14397_v48 = vadd.f32 %v5288_v51, %v5200_v27  ;;  %v3818_v27 = vunpack.c.l.b16 %v3594_v13  ;;  %v3564_v13 = vld [vmem:[#allocation2 + $0x139] sm:$0xff] }
 0x480   : > { %6089 = vmatmul.bf16.gmra.mxu3 %v5620_v18  ;;  %v5160_v61 = vpop.f32.mrf.mxu0 }
 0x481   : > { %v14400_v24 = vadd.f32 %v5160_v61, %v14293_v62  ;;  %v14406_v62 = vpop.f32.mrf.mxu3 }
 0x482   : > { %v5290_v43 = vpop.f32.mrf.mxu2 }
 0x483   : > { %6148 = vmatmul.bf16.gmra.mxu0 %v14320_v28  ;;  %v3819_v28 = vunpack.c.l.b16 %v3595_v29 }
 0x484   : > { %v5201_v32 = vpop.f32.mrf.mxu1 }
 0x485   : > { %v5202_v15 = vadd.f32 %v5201_v32, %v14216_v34  ;;  %v3629_v34 = vld [vmem:[#allocation2 + $0x142] sm:$0xff]  ;;  %v14412_v61 = vpack.c.b16 %v3819_v28, %v3818_v27 }
 0x486   : > { %v3661_v53 = vpack.c.bf16 %v3629_v34, %v3629_v34 }
 0x487   : > { %v14404_v3 = vadd.f32 %v5290_v43, %v5202_v15  ;;  %5332 = vmatmul.bf16.gmra.mxu2 %v3934_v41  ;;  %v5621_v43 = vpack.c.b16 %v5602_v22, %v5601_v8  ;;  %v3565_v41 = vld [vmem:[#allocation2 + $0x141] sm:$0xff]  ;;  %v5412_v22 = vpack.c.bf16 %v5380_v23, %v5380_v23 }
 0x488   : > { %v5162_v51 = vpop.f32.mrf.mxu0  ;;  %v3597_v58 = vpack.c.bf16 %v3565_v41, %v3565_v41  ;;  %v3663_v41 = vpack.c.bf16 %v3631_v49, %v3631_v49 }
 0x489   : > { %v14409_v2 = vadd.f32 %v5162_v51, %v14298_v35  ;;  %v14423_v15 = vpop.f32.mrf.mxu3  ;;  %v5604_v8 = vunpack.c.l.b16 %v5412_v22  ;;  %v3567_v22 = vld [vmem:[#allocation2 + $0x159] sm:$0xff] }
 0x48a   : > { %v5293_v12 = vpop.f32.mrf.mxu2 }
 0x48c   : > { %v5204_v52 = vpop.f32.mrf.mxu1 }
 0x48d   : > { %v5205_v18 = vadd.f32 %v5204_v52, %v14230_v39  ;;  %v3917_v39 = vunpack.c.l.b16 %v3661_v53  ;;  %v3821_v52 = vunpack.c.l.b16 %v3597_v58 }
 0x48f   : > { %5243 = vmatmul.bf16.gmra.mxu1 %v14412_v61  ;;  %v14415_v45 = vadd.f32 %v5293_v12, %v5205_v18  ;;  %v3935_v28 = vpack.c.b16 %v3917_v39, %v3916_v14  ;;  %v3596_v12 = vpack.c.bf16 %v3564_v13, %v3564_v13  ;;  %v3630_v18 = vld [vmem:[#allocation2 + $0x152] sm:$0xff] }
 0x490   : > { %6094 = vmatmul.bf16.gmra.mxu3 %v5621_v43  ;;  %v5165_v35 = vpop.f32.mrf.mxu0  ;;  %v3662_v39 = vpack.c.bf16 %v3630_v18, %v3630_v18 }
 0x491   : > { %v14421_v32 = vadd.f32 %v5165_v35, %v14310_v21  ;;  %v5379_v21 = vld [vmem:[#allocation2 + $0x168] sm:$0xff]  ;;  %v3820_v53 = vunpack.c.l.b16 %v3596_v12  ;;  %v14434_v43 = vpop.f32.mrf.mxu3 }
 0x492   : > { %v14425_v29 = vpop.f32.mrf.mxu2  ;;  %v5411_v34 = vpack.c.bf16 %v5379_v21, %v5379_v21  ;;  %v3918_v58 = vunpack.c.l.b16 %v3662_v39 }
 0x493   : > { %6153 = vmatmul.bf16.gmra.mxu0 %v14335_v50  ;;  %v14437_v14 = vpack.c.b16 %v3821_v52, %v3820_v53  ;;  %v3599_v52 = vpack.c.bf16 %v3567_v22, %v3567_v22 }
 0x494   : > { %v5206_v11 = vpop.f32.mrf.mxu1  ;;  %v5603_v35 = vunpack.c.l.b16 %v5411_v34 }
 0x495   : > { %v14429_v51 = vadd.f32 %v5206_v11, %v14236_v7 }
 0x496   : > { %v5622_v23 = vpack.c.b16 %v5604_v8, %v5603_v35 }
 0x497   : > { %5337 = vmatmul.bf16.gmra.mxu2 %v3935_v28  ;;  %v3919_v28 = vunpack.c.l.b16 %v3663_v41  ;;  %v3632_v41 = vld [vmem:[#allocation2 + $0x16a] sm:$0xff] }
 0x498   : > { %v5167_v0 = vpop.f32.mrf.mxu0 }
 0x499   : > { %v14432_v27 = vadd.f32 %v5167_v0, %v14318_v9  ;;  %v3566_v0 = vld [vmem:[#allocation2 + $0x151] sm:$0xff]  ;;  %v3936_v8 = vpack.c.b16 %v3919_v28, %v3918_v58  ;;  %v14451_v18 = vpop.f32.mrf.mxu3 }
 0x49a   : > { %v5298_v50 = vpop.f32.mrf.mxu2  ;;  %v3598_v49 = vpack.c.bf16 %v3566_v0, %v3566_v0 }
 0x49c   : > { %v5209_v7 = vpop.f32.mrf.mxu1 }
 0x49d   : > { %v5210_v63 = vadd.f32 %v5209_v7, %v14244_v5  ;;  %v5382_v5 = vld [vmem:[#allocation2 + $0x188] sm:$0xff] }
 0x49f   : > { %5248 = vmatmul.bf16.gmra.mxu1 %v14437_v14  ;;  %v14440_v9 = vadd.f32 %v5298_v50, %v5210_v63  ;;  %v5381_v50 = vld [vmem:[#allocation2 + $0x180] sm:$0xff] }
 0x4a0   : > { %6099 = vmatmul.bf16.gmra.mxu3 %v5622_v23  ;;  %v5170_v11 = vpop.f32.mrf.mxu0  ;;  %v5413_v7 = vpack.c.bf16 %v5381_v50, %v5381_v50  ;;  %v3633_v23 = vld [vmem:[#allocation2 + $0x172] sm:$0xff] }
 0x4a1   : > { %v14443_v13 = vadd.f32 %v5170_v11, %v14327_v59  ;;  %v5414_v59 = vpack.c.bf16 %v5382_v5, %v5382_v5  ;;  %v3664_v5 = vpack.c.bf16 %v3632_v41, %v3632_v41  ;;  %v12739_v41 = vld [vmem:[%s17299_s5 + $0x28] sm:$0xff] }
 0x4a2   : > { %v14445_v21 = vpop.f32.mrf.mxu2  ;;  %v5605_v22 = vunpack.c.l.b16 %v5413_v7  ;;  %v3568_v7 = vld [vmem:[#allocation2 + $0x169] sm:$0xff]  ;;  %6616 = vmatpush.bf16.msra.mxu2 %v12739_v41 }
 0x4a3   : > { %17430 = vst [vmem:[#allocation25_spill] sm:$0xff] %v14445_v21  ;;  %6158 = vmatmul.bf16.gmra.mxu0 %v14354_v20  ;;  %v3823_v20 = vunpack.c.l.b16 %v3599_v52  ;;  %v5606_v63 = vunpack.c.l.b16 %v5414_v59  ;;  %v3920_v50 = vunpack.c.l.b16 %v3664_v5 }
 0x4a4   : > { %v5211_v12 = vpop.f32.mrf.mxu1 }
 0x4a5   : > { %v14449_v34 = vadd.f32 %v5211_v12, %v14256_v30  ;;  %v3822_v30 = vunpack.c.l.b16 %v3598_v49  ;;  %v3665_v12 = vpack.c.bf16 %v3633_v23, %v3633_v23  ;;  %v5623_v0 = vpack.c.b16 %v5606_v63, %v5605_v22 }
 0x4a6   : > { %v3600_v23 = vpack.c.bf16 %v3568_v7, %v3568_v7  ;;  %v12737_v7 = vld [vmem:[%s17299_s5 + $0x18] sm:$0xff] }
 0x4a7   : > { %5342 = vmatmul.bf16.gmra.mxu2 %v3936_v8  ;;  %v14457_v28 = vpack.c.b16 %v3823_v20, %v3822_v30  ;;  %v3921_v59 = vunpack.c.l.b16 %v3665_v12  ;;  %6775 = vmatpush.bf16.msra.mxu3 %v12737_v7 }
 0x4a8   : > { %v5172_v53 = vpop.f32.mrf.mxu0 }
 0x4a9   : > { %v14454_v35 = vadd.f32 %v5172_v53, %v14332_v38  ;;  %v14462_v38 = vpop.f32.mrf.mxu3  ;;  %v3569_v53 = vld [vmem:[#allocation2 + $0x171] sm:$0xff] }
 0x4aa   : > { %v5303_v39 = vpop.f32.mrf.mxu2  ;;  %v3601_v63 = vpack.c.bf16 %v3569_v53, %v3569_v53  ;;  %v5481_v53 = vld [vmem:[#allocation2 + $0x32] sm:$0xff] }
 0x4ab   : > { %v5513_v41 = vpack.c.bf16 %v5481_v53, %v5481_v53  ;;  %v5483_v53 = vld [vmem:[#allocation2 + $0x4a] sm:$0xff] }
 0x4ac   : > { %v5214_v11 = vpop.f32.mrf.mxu1 }
 0x4ad   : > { %v5215_v58 = vadd.f32 %v5214_v11, %v14273_v26  ;;  %v3825_v11 = vunpack.c.l.b16 %v3601_v63 }
 0x4af   : > { %5253 = vmatmul.bf16.gmra.mxu1 %v14457_v28  ;;  %v14460_v8 = vadd.f32 %v5303_v39, %v5215_v58  ;;  %v3937_v39 = vpack.c.b16 %v3921_v59, %v3920_v50  ;;  %v3824_v58 = vunpack.c.l.b16 %v3600_v23 }
 0x4b0   : > { %6104 = vmatmul.bf16.gmra.mxu3 %v5623_v0  ;;  %v14464_v52 = vpop.f32.mrf.mxu0 }
 0x4b1   : > { %17431 = vst [vmem:[#allocation17_spill] sm:$0xff] %v14460_v8  ;;  %v14477_v22 = vpop.f32.mrf.mxu3  ;;  %v14480_v12 = vpack.c.b16 %v3825_v11, %v3824_v58 }
 0x4b2   : > { %v14466_v49 = vpop.f32.mrf.mxu2 }
 0x4b3   : > { %17432 = vst [vmem:[#allocation20_spill] sm:$0xff] %v14466_v49  ;;  %6163 = vmatmul.bf16.gmra.mxu0 %v14370_v31 }
 0x4b4   : > { %v5216_v26 = vpop.f32.mrf.mxu1 }
 0x4b5   : > { %v14470_v20 = vadd.f32 %v5216_v26, %v14282_v57  ;;  %v5482_v26 = vld [vmem:[#allocation2 + $0x3a] sm:$0xff] }
 0x4b6   : > { %v5514_v23 = vpack.c.bf16 %v5482_v26, %v5482_v26  ;;  %v5484_v26 = vld [vmem:[#allocation2 + $0x52] sm:$0xff] }
 0x4b7   : > { %17433 = vst [vmem:[#allocation22_spill] sm:$0xff] %v14470_v20  ;;  %5347 = vmatmul.bf16.gmra.mxu2 %v3937_v39 }
 0x4b8   : > { %v14475_v30 = vpop.f32.mrf.mxu0  ;;  %v5770_v58 = vunpack.c.l.b16 %v5514_v23 }
 0x4b9   : > { %v14493_v63 = vpop.f32.mrf.mxu3 }
 0x4ba   : > { %v5308_v31 = vpop.f32.mrf.mxu2 }
 0x4bc   : > { %v5219_v5 = vpop.f32.mrf.mxu1 }
 0x4bd   : > { %v5220_v57 = vadd.f32 %v5219_v5, %v14290_v46 }
 0x4bf   : > { %5258 = vmatmul.bf16.gmra.mxu1 %v14480_v12  ;;  %v14483_v0 = vadd.f32 %v5308_v31, %v5220_v57  ;;  %v5769_v31 = vunpack.c.l.b16 %v5513_v41  ;;  %v5515_v41 = vpack.c.bf16 %v5483_v53, %v5483_v53 }
 0x4c0   : > { %v14485_v50 = vpop.f32.mrf.mxu0 }
 0x4c1   : > { %17434 = vst [vmem:[#allocation26_spill] sm:$0xff] %v14483_v0  ;;  %v14501_v0 = vpop.f32.mrf.mxu3 }
 0x4c2   : > { %v14487_v59 = vpop.f32.mrf.mxu2 }
 0x4c3   : > { %17435 = vst [vmem:[#allocation24_spill] sm:$0xff] %v14487_v59  ;;  %6168 = vmatmul.bf16.gmra.mxu0 %v14392_v17  ;;  %v5801_v59 = vpack.c.b16 %v5770_v58, %v5769_v31 }
 0x4c4   : > { %v5221_v46 = vpop.f32.mrf.mxu1 }
 0x4c5   : > { %v14496_v39 = vadd.f32 %v5221_v46, %v14296_v47 }
 0x4c7   : > { %17436 = vst [vmem:[#allocation23_spill] sm:$0xff] %v14496_v39 }
 0x4c8   : > { %v14498_v11 = vpop.f32.mrf.mxu0 }
 0x4c9   : > { %v14513_v23 = vpop.f32.mrf.mxu3 }
 0x4ca   : > { %v5313_v5 = vpop.f32.mrf.mxu2 }
 0x4cc   : > { %v5224_v57 = vpop.f32.mrf.mxu1 }
 0x4cd   : > { %v5225_v17 = vadd.f32 %v5224_v57, %v14307_v10  ;;  %v5516_v10 = vpack.c.bf16 %v5484_v26, %v5484_v26  ;;  %v5485_v26 = vld [vmem:[#allocation2 + $0x62] sm:$0xff] }
 0x4cf   : > { %6212 = vmatmul.bf16.vlgmr.msra.gmra.mxu1 %v5801_v59  ;;  %v14503_v49 = vadd.f32 %v5313_v5, %v5225_v17  ;;  %v5771_v59 = vunpack.c.l.b16 %v5515_v41  ;;  %v5772_v58 = vunpack.c.l.b16 %v5516_v10 }
 0x4d0   : > { %v14505_v20 = vpop.f32.mrf.mxu0 }
 0x4d1   : > { %17437 = vst [vmem:[#allocation32_spill] sm:$0xff] %v14503_v49 }
 0x4d2   : > { %v14507_v47 = vpop.f32.mrf.mxu2 }
 0x4d3   : > { %17438 = vst [vmem:[#allocation28_spill] sm:$0xff] %v14507_v47  ;;  %6173 = vmatmul.bf16.gmra.mxu0 %v14412_v61  ;;  %v5802_v47 = vpack.c.b16 %v5772_v58, %v5771_v59 }
 0x4d4   : > { %v5226_v7 = vpop.f32.mrf.mxu1 }
 0x4d5   : > { %v14511_v46 = vadd.f32 %v5226_v7, %v14316_v40  ;;  %v14522_v40 = vpop.f32.mrf.mxu3  ;;  %v5486_v7 = vld [vmem:[#allocation2 + $0x6a] sm:$0xff] }
 0x4d7   : > { %17439 = vst [vmem:[#allocation33_spill] sm:$0xff] %v14511_v46  ;;  %v5517_v46 = vpack.c.bf16 %v5485_v26, %v5485_v26  ;;  %v5487_v26 = vld [vmem:[#allocation2 + $0x7a] sm:$0xff] }
 0x4d8   : > { %v14515_v31 = vpop.f32.mrf.mxu0 }
 0x4da   : > { %v5318_v5 = vpop.f32.mrf.mxu2 }
 0x4dc   : > { %v5229_v57 = vpop.f32.mrf.mxu1 }
 0x4dd   : > { %v5230_v17 = vadd.f32 %v5229_v57, %v14324_v19  ;;  %v5518_v19 = vpack.c.bf16 %v5486_v7, %v5486_v7  ;;  %v14532_v57 = vpop.f32.mrf.mxu3  ;;  %v5488_v7 = vld [vmem:[#allocation2 + $0x82] sm:$0xff] }
 0x4df   : > { %6217 = vmatmul.bf16.gmra.mxu1 %v5802_v47  ;;  %v14518_v49 = vadd.f32 %v5318_v5, %v5230_v17  ;;  %v5773_v47 = vunpack.c.l.b16 %v5517_v46  ;;  %v5774_v58 = vunpack.c.l.b16 %v5518_v19  ;;  %v5519_v19 = vpack.c.bf16 %v5487_v26, %v5487_v26 }
 0x4e0   : > { %v14520_v61 = vpop.f32.mrf.mxu0 }
 0x4e1   : > { %17440 = vst [vmem:[#allocation29_spill] sm:$0xff] %v14518_v49  ;;  %v5803_v49 = vpack.c.b16 %v5774_v58, %v5773_v47  ;;  %v5775_v47 = vunpack.c.l.b16 %v5519_v19 }
 0x4e2   : > { %v14524_v53 = vpop.f32.mrf.mxu2 }
 0x4e3   : > { %17441 = vst [vmem:[#allocation27_spill] sm:$0xff] %v14524_v53  ;;  %6178 = vmatmul.bf16.gmra.mxu0 %v14437_v14 }
 0x4e4   : > { %v5231_v41 = vpop.f32.mrf.mxu1 }
 0x4e5   : > { %v14528_v10 = vadd.f32 %v5231_v41, %v14330_v16 }
 0x4e7   : > { %17442 = vst [vmem:[#allocation31_spill] sm:$0xff] %v14528_v10  ;;  %v5520_v10 = vpack.c.bf16 %v5488_v7, %v5488_v7 }
 0x4e8   : > { %v14530_v59 = vpop.f32.mrf.mxu0 }
 0x4e9   : > { %v5776_v58 = vunpack.c.l.b16 %v5520_v10  ;;  %v12736_v10 = vld [vmem:[%s17299_s5 + $0x10] sm:$0xff] }
 0x4ea   : > { %v5323_v5 = vpop.f32.mrf.mxu2  ;;  %6776 = vmatpush.bf16.msra.mxu3 %v12736_v10 }
 0x4ec   : > { %v5234_v17 = vpop.f32.mrf.mxu1 }
 0x4ed   : > { %v5235_v53 = vadd.f32 %v5234_v17, %v14344_v60  ;;  %v12738_v60 = vld [vmem:[%s17299_s5 + $0x20] sm:$0xff] }
 0x4ee   : > { %6617 = vmatpush.bf16.msra.mxu2 %v12738_v60  ;;  %v5490_v60 = vld [vmem:[#allocation2 + $0x9a] sm:$0xff] }
 0x4ef   : > { %6222 = vmatmul.bf16.gmra.mxu1 %v5803_v49  ;;  %v14535_v39 = vadd.f32 %v5323_v5, %v5235_v53  ;;  %v14548_v49 = vpop.f32.mrf.mxu3 }
 0x4f0   : > { %v14537_v14 = vpop.f32.mrf.mxu0  ;;  %17446 = vst [vmem:[#allocation9_spill] sm:$0xff] %v14548_v49 }
 0x4f1   : > { %17443 = vst [vmem:[#allocation5_spill] sm:$0xff] %v14535_v39 }
 0x4f2   : > { %v14539_v16 = vpop.f32.mrf.mxu2 }
 0x4f3   : > { %17444 = vst [vmem:[#allocation30_spill] sm:$0xff] %v14539_v16  ;;  %6183 = vmatmul.bf16.gmra.mxu0 %v14457_v28  ;;  %v5804_v16 = vpack.c.b16 %v5776_v58, %v5775_v47  ;;  %v5522_v47 = vpack.c.bf16 %v5490_v60, %v5490_v60  ;;  %v5446_v58 = vld [vmem:[#allocation2 + $0x189] sm:$0xff] }
 0x4f4   : > { %v5236_v46 = vpop.f32.mrf.mxu1 }
 0x4f5   : > { %v14543_v41 = vadd.f32 %v5236_v46, %v14351_v36 }
 0x4f7   : > { %17445 = vst [vmem:[#allocation7_spill] sm:$0xff] %v14543_v41  ;;  %v14555_v26 = vpop.f32.mrf.mxu3  ;;  %v5489_v41 = vld [vmem:[#allocation2 + $0x92] sm:$0xff] }
 0x4f8   : > { %v14550_v53 = vpop.f32.mrf.mxu0  ;;  %17448 = vst [vmem:[#allocation12_spill] sm:$0xff] %v14555_v26 }
 0x4fa   : > { %v5328_v5 = vpop.f32.mrf.mxu2 }
 0x4fc   : > { %v5239_v17 = vpop.f32.mrf.mxu1 }
 0x4fd   : > { %v5240_v28 = vadd.f32 %v5239_v17, %v14360_v6  ;;  %v5445_v17 = vld [vmem:[#allocation2 + $0x181] sm:$0xff] }
 0x4fe   : > { %v5477_v26 = vpack.c.bf16 %v5445_v17, %v5445_v17 }
 0x4ff   : > { %6227 = vmatmul.bf16.gmra.mxu1 %v5804_v16  ;;  %v14553_v36 = vadd.f32 %v5328_v5, %v5240_v28  ;;  %v5521_v16 = vpack.c.bf16 %v5489_v41, %v5489_v41  ;;  %v14570_v39 = vpop.f32.mrf.mxu3 }
 0x500   : > { %v14557_v7 = vpop.f32.mrf.mxu0  ;;  %17451 = vst [vmem:[#allocation10_spill] sm:$0xff] %v14570_v39  ;;  %v5701_v60 = vunpack.c.l.b16 %v5477_v26 }
 0x501   : > { %17447 = vst [vmem:[#allocation8_spill] sm:$0xff] %v14553_v36  ;;  %v5777_v28 = vunpack.c.l.b16 %v5521_v16  ;;  %v5478_v36 = vpack.c.bf16 %v5446_v58, %v5446_v58  ;;  %v5491_v16 = vld [vmem:[#allocation2 + $0xaa] sm:$0xff] }
 0x502   : > { %v14559_v46 = vpop.f32.mrf.mxu2 }
 0x503   : > { %17449 = vst [vmem:[#allocation11_spill] sm:$0xff] %v14559_v46  ;;  %6188 = vmatmul.bf16.gmra.mxu0 %v14480_v12  ;;  %v5778_v46 = vunpack.c.l.b16 %v5522_v47  ;;  %v5492_v47 = vld [vmem:[#allocation2 + $0xb2] sm:$0xff] }
 0x504   : > { %v5241_v19 = vpop.f32.mrf.mxu1 }
 0x505   : > { %v14566_v6 = vadd.f32 %v5241_v19, %v14367_v25  ;;  %v5805_v21 = vpack.c.b16 %v5778_v46, %v5777_v28  ;;  %v5702_v25 = vunpack.c.l.b16 %v5478_v36 }
 0x507   : > { %17450 = vst [vmem:[#allocation6_spill] sm:$0xff] %v14566_v6  ;;  %v5719_v19 = vpack.c.b16 %v5702_v25, %v5701_v60  ;;  %v14579_v58 = vpop.f32.mrf.mxu3  ;;  %v14587_v25 = vld [vmem:[#allocation2] sm:$0xff] }
 0x508   : > { %v14568_v5 = vpop.f32.mrf.mxu0  ;;  %v5415_v60 = vpack.c.bf16 %v14587_v25, %v14587_v25  ;;  %375 = vst.msk [vmem:[#allocation3] sm:$0xff] %vm374_vm0, %v14587_v25 }
 0x509   : > { %376 = vst.msk [vmem:[#allocation3 + $0x8] sm:$0xff] %vm374_vm0, %v14587_v25 }
 0x50a   : > { %v5333_v12 = vpop.f32.mrf.mxu2  ;;  %377 = vst.msk [vmem:[#allocation3 + $0x10] sm:$0xff] %vm374_vm0, %v14587_v25 }
 0x50b   : > { %379 = vst.msk [vmem:[#allocation3 + $0x198] sm:$0xff] %vm374_vm0, %v14587_v25 }
 0x50c   : > { %v5244_v8 = vpop.f32.mrf.mxu1  ;;  %380 = vst.msk [vmem:[#allocation3 + $0x1a0] sm:$0xff] %vm374_vm0, %v14587_v25 }
 0x50d   : > { %v5245_v49 = vadd.f32 %v5244_v8, %v14379_v1  ;;  %v5523_v1 = vpack.c.bf16 %v5491_v16, %v5491_v16  ;;  %v5524_v8 = vpack.c.bf16 %v5492_v47, %v5492_v47  ;;  %v5607_v16 = vunpack.c.l.b16 %v5415_v60  ;;  %381 = vst.msk [vmem:[#allocation3 + $0x1a8] sm:$0xff] %vm374_vm0, %v14587_v25 }
 0x50e   : > { %384 = vst.msk [vmem:[#allocation3 + $0x18] sm:$0x1] %vm383_vm1, %v14587_v25 }
 0x50f   : > { %6232 = vmatmul.bf16.gmra.mxu1 %v5805_v21  ;;  %v14573_v41 = vadd.f32 %v5333_v12, %v5245_v49  ;;  %v5779_v49 = vunpack.c.l.b16 %v5523_v1  ;;  %v5780_v36 = vunpack.c.l.b16 %v5524_v8  ;;  %v5493_v8 = vld [vmem:[#allocation2 + $0xc2] sm:$0xff]  ;;  %385 = vst.msk [vmem:[#allocation3 + $0x30] sm:$0x1] %vm383_vm1, %v14587_v25 }
 0x510   : > { %v14575_v10 = vpop.f32.mrf.mxu0  ;;  %386 = vst.msk [vmem:[#allocation3 + $0x48] sm:$0x1] %vm383_vm1, %v14587_v25 }
 0x511   : > { %17452 = vst [vmem:[#allocation16_spill] sm:$0xff] %v14573_v41  ;;  %v5806_v12 = vpack.c.b16 %v5780_v36, %v5779_v49  ;;  %v5525_v36 = vpack.c.bf16 %v5493_v8, %v5493_v8  ;;  %v5448_v41 = vld [vmem:[#allocation2 + $0x1a1] sm:$0xff] }
 0x512   : > { %v14577_v6 = vpop.f32.mrf.mxu2  ;;  %387 = vst.msk [vmem:[#allocation3 + $0x60] sm:$0x1] %vm383_vm1, %v14587_v25 }
 0x513   : > { %17453 = vst [vmem:[#allocation13_spill] sm:$0xff] %v14577_v6  ;;  %6193 = vmatmul.bf16.gmra.mxu0 %v5719_v19  ;;  %v14591_v19 = vpop.f32.mrf.mxu3  ;;  %v5494_v6 = vld [vmem:[#allocation2 + $0xca] sm:$0xff] }
 0x514   : > { %v5246_v17 = vpop.f32.mrf.mxu1  ;;  %17455 = vst [vmem:[#allocation19_spill] sm:$0xff] %v14591_v19 }
 0x515   : > { %v14582_v39 = vadd.f32 %v5246_v17, %v14389_v44  ;;  %v5624_v17 = vpack.c.b16 %v5607_v16, %v5607_v16  ;;  %388 = vst.msk [vmem:[#allocation3 + $0x78] sm:$0x1] %vm383_vm1, %v14587_v25 }
 0x516   : > { %389 = vst.msk [vmem:[#allocation3 + $0x90] sm:$0x1] %vm383_vm1, %v14587_v25 }
 0x517   : > { %17454 = vst [vmem:[#allocation15_spill] sm:$0xff] %v14582_v39  ;;  %6109 = vmatmul.bf16.gmra.mxu3 %v5624_v17  ;;  %v5447_v39 = vld [vmem:[#allocation2 + $0x199] sm:$0xff]  ;;  %v12735_v17 = vld [vmem:[%s17299_s5 + $0x8] sm:$0xff] }
 0x518   : > { %v14584_v21 = vpop.f32.mrf.mxu0  ;;  %6777 = vmatpush.bf16.msra.mxu3 %v12735_v17  ;;  %390 = vst.msk [vmem:[#allocation3 + $0xa8] sm:$0x1] %vm383_vm1, %v14587_v25 }
 0x519   : > { %391 = vst.msk [vmem:[#allocation3 + $0xc0] sm:$0x1] %vm383_vm1, %v14587_v25 }
 0x51a   : > { %v5338_v26 = vpop.f32.mrf.mxu2  ;;  %392 = vst.msk [vmem:[#allocation3 + $0xd8] sm:$0x1] %vm383_vm1, %v14587_v25 }
 0x51b   : > { %393 = vst.msk [vmem:[#allocation3 + $0xf0] sm:$0x1] %vm383_vm1, %v14587_v25 }
 0x51c   : > { %v5249_v46 = vpop.f32.mrf.mxu1  ;;  %394 = vst.msk [vmem:[#allocation3 + $0x108] sm:$0x1] %vm383_vm1, %v14587_v25 }
 0x51d   : > { %v5250_v28 = vadd.f32 %v5249_v46, %v14400_v24  ;;  %v5526_v46 = vpack.c.bf16 %v5494_v6, %v5494_v6  ;;  %395 = vst.msk [vmem:[#allocation3 + $0x120] sm:$0x1] %vm383_vm1, %v14587_v25 }
 0x51e   : > { %396 = vst.msk [vmem:[#allocation3 + $0x138] sm:$0x1] %vm383_vm1, %v14587_v25 }
 0x51f   : > { %6237 = vmatmul.bf16.gmra.mxu1 %v5806_v12  ;;  %v14593_v44 = vadd.f32 %v5338_v26, %v5250_v28  ;;  %v5479_v12 = vpack.c.bf16 %v5447_v39, %v5447_v39  ;;  %v5480_v26 = vpack.c.bf16 %v5448_v41, %v5448_v41  ;;  %v14602_v28 = vpop.f32.mrf.mxu3  ;;  %v5782_v19 = vunpack.c.l.b16 %v5526_v46  ;;  %397 = vst.msk [vmem:[#allocation3 + $0x150] sm:$0x1] %vm383_vm1, %v14587_v25 }
 0x520   : > { %v14595_v47 = vpop.f32.mrf.mxu0  ;;  %17459 = vst [vmem:[#allocation34_spill] sm:$0xff] %v14602_v28 }
 0x521   : > { %17456 = vst [vmem:[#allocation14_spill] sm:$0xff] %v14593_v44  ;;  %v5703_v16 = vunpack.c.l.b16 %v5479_v12  ;;  %v5704_v44 = vunpack.c.l.b16 %v5480_v26  ;;  %v5495_v12 = vld [vmem:[#allocation2 + $0xda] sm:$0xff]  ;;  %v5496_v26 = vld [vmem:[#allocation2 + $0xe2] sm:$0xff] }
 0x522   : > { %v14597_v1 = vpop.f32.mrf.mxu2  ;;  %398 = vst.msk [vmem:[#allocation3 + $0x168] sm:$0x1] %vm383_vm1, %v14587_v25 }
 0x523   : > { %17457 = vst [vmem:[#allocation18_spill] sm:$0xff] %v14597_v1  ;;  %v5781_v1 = vunpack.c.l.b16 %v5525_v36  ;;  %v5720_v39 = vpack.c.b16 %v5704_v44, %v5703_v16 }
 0x524   : > { %v5251_v24 = vpop.f32.mrf.mxu1  ;;  %399 = vst.msk [vmem:[#allocation3 + $0x180] sm:$0x1] %vm383_vm1, %v14587_v25 }
 0x525   : > { %v14600_v49 = vadd.f32 %v5251_v24, %v14409_v2  ;;  %v12745_v2 = vld [vmem:[%s17299_s5 + $0x58] sm:$0xff]  ;;  %6198 = vmatmul.bf16.gmra.mxu0 %v5720_v39  ;;  %v5807_v24 = vpack.c.b16 %v5782_v19, %v5781_v1  ;;  %v12744_v19 = vld [vmem:[%s17299_s5 + $0x50] sm:$0xff]  ;;  %400 = vst.msk [vmem:[#allocation3 + $0x29] sm:$0x1] %vm383_vm1, %v14587_v25 }
 0x526   : > { %6993 = vmatpush.bf16.msrb.mxu0 %v12745_v2  ;;  %v5527_v2 = vpack.c.bf16 %v5495_v12, %v5495_v12  ;;  %v6481_v39 = vld [vmem:[#allocation3 + $0x1] sm:$0xff]  ;;  %v12742_v12 = vld [vmem:[%s17299_s5 + $0x40] sm:$0xff]  ;;  %401 = vst.msk [vmem:[#allocation3 + $0x41] sm:$0x1] %vm383_vm1, %v14587_v25 }
 0x527   : > { %17458 = vst [vmem:[#allocation21_spill] sm:$0xff] %v14600_v49  ;;  %v14629_v46 = vpop.f32.mrf.mxu3  ;;  %v12743_v49 = vld [vmem:[%s17299_s5 + $0x48] sm:$0xff] }
 0x528   : > { %v14604_v60 = vpop.f32.mrf.mxu0  ;;  %17461 = vst [vmem:[#allocation36_spill] sm:$0xff] %v14629_v46 }
 0x529   : > { %402 = vst.msk [vmem:[#allocation3 + $0x59] sm:$0x1] %vm383_vm1, %v14587_v25 }
 0x52a   : > { %v5343_v6 = vpop.f32.mrf.mxu2  ;;  %6994 = vmatpush.bf16.msrb.mxu0 %v12744_v19  ;;  %403 = vst.msk [vmem:[#allocation3 + $0x71] sm:$0x1] %vm383_vm1, %v14587_v25 }
 0x52b   : > { %404 = vst.msk [vmem:[#allocation3 + $0x89] sm:$0x1] %vm383_vm1, %v14587_v25 }
 0x52c   : > { %v5254_v41 = vpop.f32.mrf.mxu1  ;;  %405 = vst.msk [vmem:[#allocation3 + $0xa1] sm:$0x1] %vm383_vm1, %v14587_v25 }
 0x52d   : > { %v5255_v8 = vadd.f32 %v5254_v41, %v14421_v32  ;;  %v12734_v32 = vld [vmem:[%s17299_s5] sm:$0xff]  ;;  %406 = vst.msk [vmem:[#allocation3 + $0xb9] sm:$0x1] %vm383_vm1, %v14587_v25 }
 0x52e   : > { %6778 = vmatpush.bf16.msra.mxu3 %v12734_v32  ;;  %v6482_v41 = vld [vmem:[#allocation3 + $0x9] sm:$0xff]  ;;  %6995 = vmatpush.bf16.msrb.mxu0 %v12743_v49  ;;  %407 = vst.msk [vmem:[#allocation3 + $0xd1] sm:$0x1] %vm383_vm1, %v14587_v25 }
 0x52f   : > { %6242 = vmatmul.bf16.gmra.mxu1 %v5807_v24  ;;  %v14623_v44 = vadd.f32 %v5343_v6, %v5255_v8  ;;  %v5528_v6 = vpack.c.bf16 %v5496_v26, %v5496_v26  ;;  %v6425_v8 = vld [vmem:[#allocation3] sm:$0xff]  ;;  %v6513_v24 = vpack.c.bf16 %v6482_v41, %v6481_v39  ;;  %v14652_v26 = vpop.f32.mrf.mxu3  ;;  %v6861_v41 = vld [vmem:[#allocation3 + $0xa] sm:$0xff]  ;;  %408 = vst.msk [vmem:[#allocation3 + $0xe9] sm:$0x1] %vm383_vm1, %v14587_v25 }
 0x530   : > { %v14627_v36 = vpop.f32.mrf.mxu0  ;;  %409 = vst.msk [vmem:[#allocation3 + $0x101] sm:$0x1] %vm383_vm1, %v14587_v25 }
 0x531   : > { %17460 = vst [vmem:[#allocation35_spill] sm:$0xff] %v14623_v44  ;;  %v6426_v44 = vld [vmem:[#allocation3 + $0x8] sm:$0xff]  ;;  %12054 = vmatmul.msk.bf16.vlgmr.msra.gmra.mxu2 %vm374_vm0, %v6513_v24 }
 0x532   : > { %v14637_v16 = vpop.f32.mrf.mxu2  ;;  %v6457_v46 = vpack.c.bf16 %v6426_v44, %v6425_v8  ;;  %6996 = vmatpush.bf16.msrb.mxu0 %v12742_v12  ;;  %v6860_v44 = vld [vmem:[#allocation3 + $0x2] sm:$0xff]  ;;  %410 = vst.msk [vmem:[#allocation3 + $0x119] sm:$0x1] %vm383_vm1, %v14587_v25 }
 0x533   : > { %17462 = vst [vmem:[#allocation37_spill] sm:$0xff] %v14637_v16  ;;  %v6892_v49 = vpack.c.bf16 %v6861_v41, %v6860_v44  ;;  %v5497_v24 = vld [vmem:[#allocation2 + $0xf2] sm:$0xff] }
 0x534   : > { %v5256_v1 = vpop.f32.mrf.mxu1  ;;  %12086 = vmatmul.msk.bf16.vlgmr.msra.gmra.mxu3 %vm374_vm0, %v6457_v46  ;;  %411 = vst.msk [vmem:[#allocation3 + $0x131] sm:$0x1] %vm383_vm1, %v14587_v25 }
 0x535   : > { %v14640_v17 = vadd.f32 %v5256_v1, %v14432_v27  ;;  %v5783_v27 = vunpack.c.l.b16 %v5527_v2  ;;  %v5784_v1 = vunpack.c.l.b16 %v5528_v6  ;;  %v12753_v2 = vld [vmem:[%s17299_s5 + $0x98] sm:$0xff]  ;;  %12126 = vmatmul.msk.bf16.vlgmr.msrb.gmra.mxu0 %vm374_vm0, %v6892_v49  ;;  %412 = vst.msk [vmem:[#allocation3 + $0x149] sm:$0x1] %vm383_vm1, %v14587_v25 }
 0x536   : > { %v12749_v6 = vld [vmem:[%s17299_s5 + $0x78] sm:$0xff]  ;;  %7493 = vmatpush.bf16.msrb.mxu2 %v12753_v2  ;;  %v6125_v2 = vadd.f32 %v14464_v52, %v14394_v33  ;;  %413 = vst.msk [vmem:[#allocation3 + $0x161] sm:$0x1] %vm383_vm1, %v14587_v25 }
 0x537   : > { %17463 = vst [vmem:[#allocation38_spill] sm:$0xff] %v14640_v17  ;;  %v5808_v39 = vpack.c.b16 %v5784_v1, %v5783_v27  ;;  %7243 = vmatpush.bf16.msrb.mxu1 %v12749_v6  ;;  %v5498_v27 = vld [vmem:[#allocation2 + $0xfa] sm:$0xff] }
 0x538   : > { %v14645_v28 = vpop.f32.mrf.mxu0  ;;  %v14708_v6 = vld [vmem:[%s17298_s4] ss:$0 sm:$0xff]  ;;  %414 = vst.msk [vmem:[#allocation3 + $0x179] sm:$0x1] %vm383_vm1, %v14587_v25 }
 0x539   : > { %415 = vst.msk [vmem:[#allocation3 + $0x191] sm:$0x1] %vm383_vm1, %v14587_v25 }
 0x53a   : > { %v5348_v46 = vpop.f32.mrf.mxu2 }
 0x53c   : > { %v5259_v32 = vpop.f32.mrf.mxu1 }
 0x53d   : > { %v5260_v19 = vadd.f32 %v5259_v32, %v14443_v13  ;;  %v5529_v32 = vpack.c.bf16 %v5497_v24, %v5497_v24 }
 0x53f   : > { %6247 = vmatmul.bf16.gmra.mxu1 %v5808_v39  ;;  %v14663_v13 = vadd.f32 %v5348_v46, %v5260_v19  ;;  %v5530_v19 = vpack.c.bf16 %v5498_v27, %v5498_v27  ;;  %v14685_v39 = vpop.f32.mrf.mxu3 }
 0x540   : > { %v14667_v8 = vpop.f32.mrf.mxu0 }
 0x541   : > { %17464 = vst [vmem:[#allocation39_spill] sm:$0xff] %v14663_v13  ;;  %v5786_v41 = vunpack.c.l.b16 %v5530_v19  ;;  %v5500_v19 = vld [vmem:[#allocation2 + $0x112] sm:$0xff] }
 0x544   : > { %v5261_v1 = vpop.f32.mrf.mxu1 }
 0x545   : > { %v14681_v12 = vadd.f32 %v5261_v1, %v14454_v35  ;;  %v5785_v35 = vunpack.c.l.b16 %v5529_v32  ;;  %v5499_v32 = vld [vmem:[#allocation2 + $0x10a] sm:$0xff] }
 0x547   : > { %17465 = vst [vmem:[#allocation40_spill] sm:$0xff] %v14681_v12  ;;  %v5809_v24 = vpack.c.b16 %v5786_v41, %v5785_v35  ;;  %v14717_v52 = vpop.f32.mrf.mxu3 }
 0x548   : > { %v14691_v44 = vpop.f32.mrf.mxu0 }
 0x54c   : > { %v6213_v46 = vpop.f32.mrf.mxu1 }
 0x54d   : > { %v6214_v49 = vadd.f32 %v6213_v46, %v6125_v2  ;;  %v5531_v46 = vpack.c.bf16 %v5499_v32, %v5499_v32 }
 0x54f   : > { %v6293_v33 = vadd.f32 %v6214_v49, %v14338_v4  ;;  %6252 = vmatmul.bf16.gmra.mxu1 %v5809_v24  ;;  %v6127_v4 = vadd.f32 %v14475_v30, %v14406_v62  ;;  %v5532_v49 = vpack.c.bf16 %v5500_v19, %v5500_v19  ;;  %v14747_v32 = vpop.f32.mrf.mxu3 }
 0x550   : > { %v14719_v27 = vpop.f32.mrf.mxu0 }
 0x551   : > { %v6329_v1 = vadd.f32 %v14708_v6, %v6293_v33  ;;  %v5787_v33 = vunpack.c.l.b16 %v5531_v46  ;;  %v5501_v46 = vld [vmem:[#allocation2 + $0x122] sm:$0xff] }
 0x553   : > { %v6361_v35 = vmax.f32 %v6329_v1, 0.0  ;;  %v5788_v1 = vunpack.c.l.b16 %v5532_v49  ;;  %v5502_v49 = vld [vmem:[#allocation2 + $0x12a] sm:$0xff] }
 0x554   : > { %v6215_v41 = vpop.f32.mrf.mxu1  ;;  %v5534_v16 = vpack.c.bf16 %v5502_v49, %v5502_v49 }
 0x555   : > { %6393 = vst.msk [vmem:[#allocation3 + $0x19] sm:$0xff] %vm374_vm0, %v6361_v35  ;;  %v6216_v2 = vadd.f32 %v6215_v41, %v6127_v4  ;;  %v5810_v41 = vpack.c.b16 %v5788_v1, %v5787_v33 }
 0x557   : > { %v6294_v24 = vadd.f32 %v6216_v2, %v14348_v55  ;;  %v6130_v55 = vadd.f32 %v14485_v50, %v14423_v15 }
 0x558   : > { %v14740_v62 = vpop.f32.mrf.mxu0 }
 0x559   : > { %v6330_v30 = vadd.f32 %v14708_v6, %v6294_v24  ;;  %v6132_v24 = vadd.f32 %v14498_v11, %v14434_v43 }
 0x55b   : > { %v6362_v19 = vmax.f32 %v6330_v30, 0.0 }
 0x55c   : > { %v6218_v4 = vpop.f32.mrf.mxu1  ;;  %v6483_v33 = vld [vmem:[#allocation3 + $0x19] sm:$0xff] }
 0x55d   : > { %6394 = vst.msk [vmem:[#allocation3 + $0x21] sm:$0xff] %vm374_vm0, %v6362_v19  ;;  %v6219_v35 = vadd.f32 %v6218_v4, %v6130_v55  ;;  %v6427_v1 = vld [vmem:[#allocation3 + $0x18] sm:$0xff]  ;;  %v14768_v55 = vpop.f32.mrf.mxu3 }
 0x55f   : > { %v6295_v2 = vadd.f32 %v6219_v35, %v14357_v54  ;;  %6257 = vmatmul.bf16.gmra.mxu1 %v5810_v41  ;;  %v5533_v41 = vpack.c.bf16 %v5501_v46, %v5501_v46 }
 0x560   : > { %v14763_v15 = vpop.f32.mrf.mxu0 }
 0x561   : > { %v6331_v50 = vadd.f32 %v14708_v6, %v6295_v2  ;;  %v5789_v46 = vunpack.c.l.b16 %v5533_v41 }
 0x563   : > { %v6363_v30 = vmax.f32 %v6331_v50, 0.0 }
 0x564   : > { %v6220_v19 = vpop.f32.mrf.mxu1  ;;  %v6484_v54 = vld [vmem:[#allocation3 + $0x21] sm:$0xff] }
 0x565   : > { %v6428_v4 = vld [vmem:[#allocation3 + $0x20] sm:$0xff]  ;;  %6395 = vst.msk [vmem:[#allocation3 + $0x31] sm:$0xff] %vm374_vm0, %v6363_v30  ;;  %v6221_v25 = vadd.f32 %v6220_v19, %v6132_v24  ;;  %v6514_v12 = vpack.c.bf16 %v6484_v54, %v6483_v33  ;;  %v5790_v24 = vunpack.c.l.b16 %v5534_v16  ;;  %v6135_v30 = vadd.f32 %v14505_v20, %v14451_v18  ;;  %v14784_v33 = vpop.f32.mrf.mxu3  ;;  %v5503_v54 = vld [vmem:[#allocation2 + $0x13a] sm:$0xff]  ;;  %v5504_v16 = vld [vmem:[#allocation2 + $0x142] sm:$0xff] }
 0x566   : > { %v6862_v35 = vld [vmem:[#allocation3 + $0x1a] sm:$0xff]  ;;  %v14771_v2 = vpack.c.bf16 %v6428_v4, %v6427_v1  ;;  %v6863_v13 = vld [vmem:[#allocation3 + $0x22] sm:$0xff]  ;;  %v6137_v18 = vadd.f32 %v14515_v31, %v14462_v38 }
 0x567   : > { %v6893_v17 = vpack.c.bf16 %v6863_v13, %v6862_v35  ;;  %v6296_v43 = vadd.f32 %v6221_v25, %v14364_v37  ;;  %12055 = vmatmul.msk.bf16.gmra.mxu2 %vm374_vm0, %v6514_v12  ;;  %v5811_v12 = vpack.c.b16 %v5790_v24, %v5789_v46  ;;  %v5535_v46 = vpack.c.bf16 %v5503_v54, %v5503_v54 }
 0x568   : > { %12087 = vmatmul.msk.bf16.gmra.mxu3 %vm374_vm0, %v14771_v2  ;;  %v14778_v11 = vpop.f32.mrf.mxu0 }
 0x569   : > { %12127 = vmatmul.msk.bf16.gmra.mxu0 %vm374_vm0, %v6893_v17  ;;  %v6332_v50 = vadd.f32 %v14708_v6, %v6296_v43 }
 0x56b   : > { %v6364_v49 = vmax.f32 %v6332_v50, 0.0 }
 0x56c   : > { %v6223_v13 = vpop.f32.mrf.mxu1  ;;  %v6485_v4 = vld [vmem:[#allocation3 + $0x31] sm:$0xff] }
 0x56d   : > { %6396 = vst.msk [vmem:[#allocation3 + $0x39] sm:$0xff] %vm374_vm0, %v6364_v49  ;;  %v6224_v37 = vadd.f32 %v6223_v13, %v6135_v30  ;;  %v6429_v35 = vld [vmem:[#allocation3 + $0x30] sm:$0xff]  ;;  %v5536_v13 = vpack.c.bf16 %v5504_v16, %v5504_v16  ;;  %v14799_v38 = vpop.f32.mrf.mxu3  ;;  %v6140_v16 = vadd.f32 %v14520_v61, %v14477_v22  ;;  %v5505_v61 = vld [vmem:[#allocation2 + $0x152] sm:$0xff] }
 0x56f   : > { %v6297_v1 = vadd.f32 %v6224_v37, %v14373_v56  ;;  %6262 = vmatmul.bf16.gmra.mxu1 %v5811_v12 }
 0x570   : > { %v14787_v17 = vpop.f32.mrf.mxu0 }
 0x571   : > { %v6333_v19 = vadd.f32 %v14708_v6, %v6297_v1  ;;  %v5791_v1 = vunpack.c.l.b16 %v5535_v46  ;;  %v6142_v46 = vadd.f32 %v14530_v59, %v14493_v63 }
 0x573   : > { %v6365_v20 = vmax.f32 %v6333_v19, 0.0  ;;  %v5792_v19 = vunpack.c.l.b16 %v5536_v13 }
 0x574   : > { %v6225_v41 = vpop.f32.mrf.mxu1  ;;  %v6486_v25 = vld [vmem:[#allocation3 + $0x39] sm:$0xff] }
 0x575   : > { %v6430_v43 = vld [vmem:[#allocation3 + $0x38] sm:$0xff]  ;;  %6397 = vst.msk [vmem:[#allocation3 + $0x49] sm:$0xff] %vm374_vm0, %v6365_v20  ;;  %v6226_v56 = vadd.f32 %v6225_v41, %v6137_v18  ;;  %v6515_v24 = vpack.c.bf16 %v6486_v25, %v6485_v4  ;;  %v5812_v4 = vpack.c.b16 %v5792_v19, %v5791_v1  ;;  %v12748_v41 = vld [vmem:[%s17299_s5 + $0x70] sm:$0xff]  ;;  %v5537_v1 = vpack.c.bf16 %v5505_v61, %v5505_v61 }
 0x576   : > { %v6864_v50 = vld [vmem:[#allocation3 + $0x32] sm:$0xff]  ;;  %v14793_v30 = vpack.c.bf16 %v6430_v43, %v6429_v35  ;;  %v6865_v49 = vld [vmem:[#allocation3 + $0x3a] sm:$0xff]  ;;  %7244 = vmatpush.bf16.msrb.mxu1 %v12748_v41  ;;  %v14816_v43 = vpop.f32.mrf.mxu3 }
 0x577   : > { %v6894_v37 = vpack.c.bf16 %v6865_v49, %v6864_v50  ;;  %v6298_v12 = vadd.f32 %v6226_v56, %v14386_v42  ;;  %12056 = vmatmul.msk.bf16.gmra.mxu2 %vm374_vm0, %v6515_v24  ;;  %v12752_v35 = vld [vmem:[%s17299_s5 + $0x90] sm:$0xff]  ;;  %v5506_v50 = vld [vmem:[#allocation2 + $0x15a] sm:$0xff] }
 0x578   : > { %12088 = vmatmul.msk.bf16.gmra.mxu3 %vm374_vm0, %v14793_v30  ;;  %v14803_v54 = vpop.f32.mrf.mxu0  ;;  %7494 = vmatpush.bf16.msrb.mxu2 %v12752_v35  ;;  %v5793_v35 = vunpack.c.l.b16 %v5537_v1 }
 0x579   : > { %12128 = vmatmul.msk.bf16.gmra.mxu0 %vm374_vm0, %v6894_v37  ;;  %v6334_v31 = vadd.f32 %v14708_v6, %v6298_v12 }
 0x57b   : > { %v6366_v18 = vmax.f32 %v6334_v31, 0.0 }
 0x57c   : > { %v6228_v42 = vpop.f32.mrf.mxu1  ;;  %v6487_v24 = vld [vmem:[#allocation3 + $0x49] sm:$0xff] }
 0x57d   : > { %6398 = vst.msk [vmem:[#allocation3 + $0x51] sm:$0xff] %vm374_vm0, %v6366_v18  ;;  %v6229_v20 = vadd.f32 %v6228_v42, %v6140_v16  ;;  %v6431_v49 = vld [vmem:[#allocation3 + $0x48] sm:$0xff] }
 0x57e   : > { %v14833_v61 = vpop.f32.mrf.mxu3 }
 0x57f   : > { %v6299_v25 = vadd.f32 %v6229_v20, %v14397_v48  ;;  %6267 = vmatmul.bf16.gmra.mxu1 %v5812_v4  ;;  %v5538_v20 = vpack.c.bf16 %v5506_v50, %v5506_v50 }
 0x580   : > { %v14820_v13 = vpop.f32.mrf.mxu0 }
 0x581   : > { %v6335_v22 = vadd.f32 %v14708_v6, %v6299_v25  ;;  %v5794_v41 = vunpack.c.l.b16 %v5538_v20  ;;  %v6145_v25 = vadd.f32 %v14537_v14, %v14501_v0  ;;  %v6147_v0 = vadd.f32 %v14550_v53, %v14513_v23 }
 0x583   : > { %v6367_v56 = vmax.f32 %v6335_v22, 0.0 }
 0x584   : > { %v6230_v37 = vpop.f32.mrf.mxu1  ;;  %v6488_v12 = vld [vmem:[#allocation3 + $0x51] sm:$0xff] }
 0x585   : > { %v6432_v48 = vld [vmem:[#allocation3 + $0x50] sm:$0xff]  ;;  %6399 = vst.msk [vmem:[#allocation3 + $0x61] sm:$0xff] %vm374_vm0, %v6367_v56  ;;  %v6231_v19 = vadd.f32 %v6230_v37, %v6142_v46  ;;  %v6516_v16 = vpack.c.bf16 %v6488_v12, %v6487_v24  ;;  %v5813_v46 = vpack.c.b16 %v5794_v41, %v5793_v35  ;;  %v5507_v37 = vld [vmem:[#allocation2 + $0x16a] sm:$0xff]  ;;  %v5508_v12 = vld [vmem:[#allocation2 + $0x172] sm:$0xff] }
 0x586   : > { %v6866_v31 = vld [vmem:[#allocation3 + $0x4a] sm:$0xff]  ;;  %v14823_v18 = vpack.c.bf16 %v6432_v48, %v6431_v49  ;;  %v6867_v42 = vld [vmem:[#allocation3 + $0x52] sm:$0xff]  ;;  %v5539_v20 = vpack.c.bf16 %v5507_v37, %v5507_v37  ;;  %v14847_v23 = vpop.f32.mrf.mxu3 }
 0x587   : > { %v6895_v4 = vpack.c.bf16 %v6867_v42, %v6866_v31  ;;  %v6300_v63 = vadd.f32 %v6231_v19, %v14404_v3  ;;  %12057 = vmatmul.msk.bf16.gmra.mxu2 %vm374_vm0, %v6516_v16 }
 0x588   : > { %12089 = vmatmul.msk.bf16.gmra.mxu3 %vm374_vm0, %v14823_v18  ;;  %v14836_v56 = vpop.f32.mrf.mxu0 }
 0x589   : > { %12129 = vmatmul.msk.bf16.gmra.mxu0 %vm374_vm0, %v6895_v4  ;;  %v6336_v59 = vadd.f32 %v14708_v6, %v6300_v63  ;;  %v5540_v4 = vpack.c.bf16 %v5508_v12, %v5508_v12 }
 0x58b   : > { %v6368_v22 = vmax.f32 %v6336_v59, 0.0 }
 0x58c   : > { %v6233_v50 = vpop.f32.mrf.mxu1  ;;  %v6489_v48 = vld [vmem:[#allocation3 + $0x61] sm:$0xff] }
 0x58d   : > { %6400 = vst.msk [vmem:[#allocation3 + $0x69] sm:$0xff] %vm374_vm0, %v6368_v22  ;;  %v6234_v3 = vadd.f32 %v6233_v50, %v6145_v25  ;;  %v6433_v31 = vld [vmem:[#allocation3 + $0x60] sm:$0xff]  ;;  %v5796_v50 = vunpack.c.l.b16 %v5540_v4 }
 0x58f   : > { %v6301_v24 = vadd.f32 %v6234_v3, %v14415_v45  ;;  %6272 = vmatmul.bf16.gmra.mxu1 %v5813_v46  ;;  %v5296_v45 = vadd.f32 %v14425_v29, %v14429_v51  ;;  %v5795_v51 = vunpack.c.l.b16 %v5539_v20  ;;  %v6150_v3 = vadd.f32 %v14557_v7, %v14522_v40 }
 0x590   : > { %v14852_v22 = vpop.f32.mrf.mxu0  ;;  %v6152_v40 = vadd.f32 %v14568_v5, %v14532_v57 }
 0x591   : > { %v6337_v49 = vadd.f32 %v14708_v6, %v6301_v24  ;;  %v5814_v37 = vpack.c.b16 %v5796_v50, %v5795_v51 }
 0x593   : > { %v6369_v14 = vmax.f32 %v6337_v49, 0.0 }
 0x594   : > { %v6235_v1 = vpop.f32.mrf.mxu1  ;;  %v6490_v19 = vld [vmem:[#allocation3 + $0x69] sm:$0xff] }
 0x595   : > { %v6434_v16 = vld [vmem:[#allocation3 + $0x68] sm:$0xff]  ;;  %6401 = vst.msk [vmem:[#allocation3 + $0x79] sm:$0xff] %vm374_vm0, %v6369_v14  ;;  %v6236_v63 = vadd.f32 %v6235_v1, %v6147_v0  ;;  %v6517_v59 = vpack.c.bf16 %v6490_v19, %v6489_v48  ;;  %v14860_v0 = vpop.f32.mrf.mxu3  ;;  %v5509_v48 = vld [vmem:[#allocation2 + $0x182] sm:$0xff] }
 0x596   : > { %v6868_v42 = vld [vmem:[#allocation3 + $0x62] sm:$0xff]  ;;  %v14845_v35 = vpack.c.bf16 %v6434_v16, %v6433_v31  ;;  %v6869_v41 = vld [vmem:[#allocation3 + $0x6a] sm:$0xff]  ;;  %v5510_v31 = vld [vmem:[#allocation2 + $0x18a] sm:$0xff] }
 0x597   : > { %v6896_v53 = vpack.c.bf16 %v6869_v41, %v6868_v42  ;;  %v6302_v25 = vadd.f32 %v6236_v63, %v5296_v45  ;;  %12058 = vmatmul.msk.bf16.gmra.mxu2 %vm374_vm0, %v6517_v59  ;;  %v5542_v63 = vpack.c.bf16 %v5510_v31, %v5510_v31  ;;  %v17466_v59 = vld [vmem:[#allocation25_spill] sm:$0xff] }
 0x598   : > { %12090 = vmatmul.msk.bf16.gmra.mxu3 %vm374_vm0, %v14845_v35  ;;  %v14863_v1 = vpop.f32.mrf.mxu0  ;;  %v5301_v41 = vadd.f32 %v17466_v59, %v14449_v34 }
 0x599   : > { %12130 = vmatmul.msk.bf16.gmra.mxu0 %vm374_vm0, %v6896_v53  ;;  %v6338_v29 = vadd.f32 %v14708_v6, %v6302_v25 }
 0x59b   : > { %v6370_v46 = vmax.f32 %v6338_v29, 0.0 }
 0x59c   : > { %v6238_v24 = vpop.f32.mrf.mxu1  ;;  %v6491_v19 = vld [vmem:[#allocation3 + $0x79] sm:$0xff] }
 0x59d   : > { %6402 = vst.msk [vmem:[#allocation3 + $0x81] sm:$0xff] %vm374_vm0, %v6370_v46  ;;  %v6239_v49 = vadd.f32 %v6238_v24, %v6150_v3  ;;  %v6435_v16 = vld [vmem:[#allocation3 + $0x78] sm:$0xff]  ;;  %v14876_v50 = vpop.f32.mrf.mxu3  ;;  %v5798_v46 = vunpack.c.l.b16 %v5542_v63 }
 0x59f   : > { %v6303_v12 = vadd.f32 %v6239_v49, %v14440_v9  ;;  %6277 = vmatmul.bf16.gmra.mxu1 %v5814_v37  ;;  %v5541_v9 = vpack.c.bf16 %v5509_v48, %v5509_v48  ;;  %v17467_v49 = vld [vmem:[#allocation9_spill] sm:$0xff] }
 0x5a0   : > { %v6155_v37 = vadd.f32 %v14575_v10, %v17467_v49  ;;  %v17469_v10 = vld [vmem:[#allocation12_spill] sm:$0xff] }
 0x5a1   : > { %v6339_v14 = vadd.f32 %v14708_v6, %v6303_v12  ;;  %v5797_v3 = vunpack.c.l.b16 %v5541_v9  ;;  %v14893_v9 = vpop.f32.mrf.mxu2  ;;  %v17471_v49 = vld [vmem:[#allocation20_spill] sm:$0xff] }
 0x5a2   : > { %v14879_v24 = vpop.f32.mrf.mxu0 }
 0x5a3   : > { %v6371_v7 = vmax.f32 %v6339_v14, 0.0  ;;  %v5815_v31 = vpack.c.b16 %v5798_v46, %v5797_v3  ;;  %v17470_v46 = vld [vmem:[#allocation22_spill] sm:$0xff] }
 0x5a4   : > { %v6240_v42 = vpop.f32.mrf.mxu1  ;;  %v6492_v20 = vld [vmem:[#allocation3 + $0x81] sm:$0xff] }
 0x5a5   : > { %v6436_v4 = vld [vmem:[#allocation3 + $0x80] sm:$0xff]  ;;  %6403 = vst.msk [vmem:[#allocation3 + $0x91] sm:$0xff] %vm374_vm0, %v6371_v7  ;;  %v6241_v53 = vadd.f32 %v6240_v42, %v6152_v40  ;;  %v6518_v25 = vpack.c.bf16 %v6492_v20, %v6491_v19  ;;  %v12747_v40 = vld [vmem:[%s17299_s5 + $0x68] sm:$0xff] }
 0x5a6   : > { %v6870_v45 = vld [vmem:[#allocation3 + $0x7a] sm:$0xff]  ;;  %v14870_v29 = vpack.c.bf16 %v6436_v4, %v6435_v16  ;;  %v6871_v51 = vld [vmem:[#allocation3 + $0x82] sm:$0xff]  ;;  %v5511_v16 = vld [vmem:[#allocation2 + $0x19a] sm:$0xff]  ;;  %7245 = vmatpush.bf16.msrb.mxu1 %v12747_v40  ;;  %v14889_v4 = vpop.f32.mrf.mxu3 }
 0x5a7   : > { %v6897_v57 = vpack.c.bf16 %v6871_v51, %v6870_v45  ;;  %v6304_v5 = vadd.f32 %v6241_v53, %v5301_v41  ;;  %12059 = vmatmul.msk.bf16.gmra.mxu2 %vm374_vm0, %v6518_v25  ;;  %v17468_v7 = vld [vmem:[#allocation17_spill] sm:$0xff]  ;;  %v5512_v42 = vld [vmem:[#allocation2 + $0x1a2] sm:$0xff]  ;;  %v6157_v45 = vadd.f32 %v14584_v21, %v17469_v10  ;;  %v5543_v53 = vpack.c.bf16 %v5511_v16, %v5511_v16 }
 0x5a8   : > { %12091 = vmatmul.msk.bf16.gmra.mxu3 %vm374_vm0, %v14870_v29  ;;  %v5544_v25 = vpack.c.bf16 %v5512_v42, %v5512_v42 }
 0x5a9   : > { %12131 = vmatmul.msk.bf16.gmra.mxu0 %vm374_vm0, %v6897_v57  ;;  %v6340_v34 = vadd.f32 %v14708_v6, %v6304_v5 }
 0x5aa   : > { %v14895_v3 = vpop.f32.mrf.mxu0  ;;  %v5800_v16 = vunpack.c.l.b16 %v5544_v25 }
 0x5ab   : > { %v6372_v12 = vmax.f32 %v6340_v34, 0.0 }
 0x5ac   : > { %v6243_v14 = vpop.f32.mrf.mxu1  ;;  %v6493_v59 = vld [vmem:[#allocation3 + $0x91] sm:$0xff] }
 0x5ad   : > { %6404 = vst.msk [vmem:[#allocation3 + $0x99] sm:$0xff] %vm374_vm0, %v6372_v12  ;;  %v6244_v48 = vadd.f32 %v6243_v14, %v6155_v37  ;;  %v6437_v41 = vld [vmem:[#allocation3 + $0x90] sm:$0xff]  ;;  %v5306_v37 = vadd.f32 %v17471_v49, %v17470_v46 }
 0x5af   : > { %v6305_v19 = vadd.f32 %v6244_v48, %v17468_v7  ;;  %6282 = vmatmul.bf16.gmra.mxu1 %v5815_v31  ;;  %v12746_v31 = vld [vmem:[%s17299_s5 + $0x60] sm:$0xff] }
 0x5b0   : > { %7246 = vmatpush.bf16.msrb.mxu1 %v12746_v31 }
 0x5b1   : > { %v6341_v20 = vadd.f32 %v14708_v6, %v6305_v19  ;;  %v5799_v19 = vunpack.c.l.b16 %v5543_v53  ;;  %v12751_v53 = vld [vmem:[%s17299_s5 + $0x88] sm:$0xff] }
 0x5b2   : > { %v6998_v25 = vpop.f32.mrf.mxu0  ;;  %7495 = vmatpush.bf16.msrb.mxu2 %v12751_v53 }
 0x5b3   : > { %v6373_v63 = vmax.f32 %v6341_v20, 0.0  ;;  %v17472_v20 = vld [vmem:[#allocation10_spill] sm:$0xff] }
 0x5b4   : > { %v6245_v51 = vpop.f32.mrf.mxu1  ;;  %v6494_v57 = vld [vmem:[#allocation3 + $0x99] sm:$0xff]  ;;  %v6160_v10 = vadd.f32 %v14595_v47, %v17472_v20 }
 0x5b5   : > { %v6438_v5 = vld [vmem:[#allocation3 + $0x98] sm:$0xff]  ;;  %6405 = vst.msk [vmem:[#allocation3 + $0xa9] sm:$0xff] %vm374_vm0, %v6373_v63  ;;  %v6246_v12 = vadd.f32 %v6245_v51, %v6157_v45  ;;  %v6519_v21 = vpack.c.bf16 %v6494_v57, %v6493_v59  ;;  %v5816_v63 = vpack.c.b16 %v5800_v16, %v5799_v19  ;;  %v6619_v59 = vpop.f32.mrf.mxu2  ;;  %v17474_v16 = vld [vmem:[#allocation23_spill] sm:$0xff] }
 0x5b6   : > { %v6872_v34 = vld [vmem:[#allocation3 + $0x92] sm:$0xff]  ;;  %v14900_v14 = vpack.c.bf16 %v6438_v5, %v6437_v41  ;;  %v6873_v48 = vld [vmem:[#allocation3 + $0x9a] sm:$0xff] }
 0x5b7   : > { %v6898_v40 = vpack.c.bf16 %v6873_v48, %v6872_v34  ;;  %v6306_v7 = vadd.f32 %v6246_v12, %v5306_v37  ;;  %12060 = vmatmul.msk.bf16.gmra.mxu2 %vm374_vm0, %v6519_v21  ;;  %v6780_v51 = vpop.f32.mrf.mxu3  ;;  %v17473_v34 = vld [vmem:[#allocation26_spill] sm:$0xff]  ;;  %v6162_v37 = vadd.f32 %v14604_v60, %v14579_v58 }
 0x5b8   : > { %12092 = vmatmul.msk.bf16.gmra.mxu3 %vm374_vm0, %v14900_v14  ;;  %v6781_v5 = vadd.f32 %v6780_v51, %v6619_v59  ;;  %v12757_v58 = vld [vmem:[%s17299_s5 + $0xb8] sm:$0xff] }
 0x5b9   : > { %12132 = vmatmul.msk.bf16.gmra.mxu0 %vm374_vm0, %v6898_v40  ;;  %v6342_v42 = vadd.f32 %v14708_v6, %v6306_v7  ;;  %7743 = vmatpush.bf16.msrb.mxu3 %v12757_v58 }
 0x5ba   : > { %v14917_v49 = vadd.f32 %v6998_v25, %v6781_v5 }
 0x5bb   : > { %v6374_v45 = vmax.f32 %v6342_v42, 0.0  ;;  %v17475_v42 = vld [vmem:[#allocation24_spill] sm:$0xff] }
 0x5bc   : > { %v6248_v41 = vpop.f32.mrf.mxu1  ;;  %v6495_v21 = vld [vmem:[#allocation3 + $0xa9] sm:$0xff]  ;;  %v5311_v20 = vadd.f32 %v17475_v42, %v17474_v16  ;;  %v17479_v42 = vld [vmem:[#allocation33_spill] sm:$0xff] }
 0x5bd   : > { %6406 = vst.msk [vmem:[#allocation3 + $0xb1] sm:$0xff] %vm374_vm0, %v6374_v45  ;;  %v6249_v57 = vadd.f32 %v6248_v41, %v6160_v10  ;;  %v6439_v48 = vld [vmem:[#allocation3 + $0xa8] sm:$0xff] }
 0x5bf   : > { %v6307_v46 = vadd.f32 %v6249_v57, %v17473_v34  ;;  %6287 = vmatmul.bf16.gmra.mxu1 %v5816_v63  ;;  %v17476_v57 = vld [vmem:[#allocation19_spill] sm:$0xff] }
 0x5c0   : > { %v6165_v5 = vadd.f32 %v14627_v36, %v17476_v57 }
 0x5c1   : > { %v6343_v47 = vadd.f32 %v14708_v6, %v6307_v46  ;;  %v17477_v46 = vld [vmem:[#allocation32_spill] sm:$0xff] }
 0x5c3   : > { %v6375_v12 = vmax.f32 %v6343_v47, 0.0 }
 0x5c4   : > { %v6250_v31 = vpop.f32.mrf.mxu1  ;;  %v6496_v40 = vld [vmem:[#allocation3 + $0xb1] sm:$0xff] }
 0x5c5   : > { %v6440_v7 = vld [vmem:[#allocation3 + $0xb0] sm:$0xff]  ;;  %6407 = vst.msk [vmem:[#allocation3 + $0xc1] sm:$0xff] %vm374_vm0, %v6375_v12  ;;  %v6251_v10 = vadd.f32 %v6250_v31, %v6162_v37  ;;  %v6520_v45 = vpack.c.bf16 %v6496_v40, %v6495_v21  ;;  %v17478_v12 = vld [vmem:[#allocation34_spill] sm:$0xff] }
 0x5c6   : > { %v6874_v19 = vld [vmem:[#allocation3 + $0xaa] sm:$0xff]  ;;  %v14925_v63 = vpack.c.bf16 %v6440_v7, %v6439_v48  ;;  %v6875_v59 = vld [vmem:[#allocation3 + $0xb2] sm:$0xff]  ;;  %v6167_v21 = vadd.f32 %v14645_v28, %v17478_v12  ;;  %v14963_v12 = vpop.f32.mrf.mxu2 }
 0x5c7   : > { %v6899_v60 = vpack.c.bf16 %v6875_v59, %v6874_v19  ;;  %v6308_v41 = vadd.f32 %v6251_v10, %v5311_v20  ;;  %12061 = vmatmul.msk.bf16.gmra.mxu2 %vm374_vm0, %v6520_v45  ;;  %v17480_v20 = vld [vmem:[#allocation28_spill] sm:$0xff] }
 0x5c8   : > { %12093 = vmatmul.msk.bf16.gmra.mxu3 %vm374_vm0, %v14925_v63  ;;  %v5316_v10 = vadd.f32 %v17480_v20, %v17479_v42  ;;  %v17483_v42 = vld [vmem:[#allocation31_spill] sm:$0xff] }
 0x5c9   : > { %12133 = vmatmul.msk.bf16.gmra.mxu0 %vm374_vm0, %v6899_v60  ;;  %v6344_v51 = vadd.f32 %v14708_v6, %v6308_v41  ;;  %v17484_v20 = vld [vmem:[#allocation27_spill] sm:$0xff] }
 0x5cb   : > { %v6376_v53 = vmax.f32 %v6344_v51, 0.0  ;;  %v17481_v51 = vld [vmem:[#allocation36_spill] sm:$0xff] }
 0x5cc   : > { %v6253_v25 = vpop.f32.mrf.mxu1  ;;  %v6497_v31 = vld [vmem:[#allocation3 + $0xc1] sm:$0xff]  ;;  %v6170_v57 = vadd.f32 %v14667_v8, %v17481_v51  ;;  %v6172_v8 = vadd.f32 %v14691_v44, %v14652_v26 }
 0x5cd   : > { %6408 = vst.msk [vmem:[#allocation3 + $0xc9] sm:$0xff] %vm374_vm0, %v6376_v53  ;;  %v6254_v34 = vadd.f32 %v6253_v25, %v6165_v5  ;;  %v6441_v40 = vld [vmem:[#allocation3 + $0xc0] sm:$0xff]  ;;  %v14956_v53 = vpop.f32.mrf.mxu0 }
 0x5cf   : > { %v6309_v47 = vadd.f32 %v6254_v34, %v17477_v46  ;;  %12166 = vmatmul.msk.bf16.vlgmr.msrb.gmra.mxu1 %vm374_vm0, %v14771_v2  ;;  %v17482_v46 = vld [vmem:[#allocation29_spill] sm:$0xff] }
 0x5d1   : > { %v6345_v37 = vadd.f32 %v14708_v6, %v6309_v47 }
 0x5d3   : > { %v6377_v48 = vmax.f32 %v6345_v37, 0.0 }
 0x5d4   : > { %v6255_v7 = vpop.f32.mrf.mxu1  ;;  %v6498_v36 = vld [vmem:[#allocation3 + $0xc9] sm:$0xff] }
 0x5d5   : > { %v6442_v19 = vld [vmem:[#allocation3 + $0xc8] sm:$0xff]  ;;  %6409 = vst.msk [vmem:[#allocation3 + $0xd9] sm:$0xff] %vm374_vm0, %v6377_v48  ;;  %v6256_v45 = vadd.f32 %v6255_v7, %v6167_v21  ;;  %v6521_v59 = vpack.c.bf16 %v6498_v36, %v6497_v31  ;;  %v14965_v21 = vpop.f32.mrf.mxu3 }
 0x5d6   : > { %v6876_v16 = vld [vmem:[#allocation3 + $0xc2] sm:$0xff]  ;;  %v14947_v2 = vpack.c.bf16 %v6442_v19, %v6441_v40  ;;  %v6877_v58 = vld [vmem:[#allocation3 + $0xca] sm:$0xff] }
 0x5d7   : > { %v6900_v60 = vpack.c.bf16 %v6877_v58, %v6876_v16  ;;  %v6310_v41 = vadd.f32 %v6256_v45, %v5316_v10  ;;  %12062 = vmatmul.msk.bf16.gmra.mxu2 %vm374_vm0, %v6521_v59  ;;  %v5321_v10 = vadd.f32 %v17484_v20, %v17483_v42  ;;  %v17486_v42 = vld [vmem:[#allocation7_spill] sm:$0xff]  ;;  %v17487_v20 = vld [vmem:[#allocation30_spill] sm:$0xff] }
 0x5d8   : > { %12094 = vmatmul.msk.bf16.gmra.mxu3 %vm374_vm0, %v14947_v2 }
 0x5d9   : > { %12134 = vmatmul.msk.bf16.gmra.mxu0 %vm374_vm0, %v6900_v60  ;;  %v6346_v28 = vadd.f32 %v14708_v6, %v6310_v41 }
 0x5db   : > { %v6378_v5 = vmax.f32 %v6346_v28, 0.0 }
 0x5dc   : > { %v6258_v25 = vpop.f32.mrf.mxu1  ;;  %v6499_v31 = vld [vmem:[#allocation3 + $0xd9] sm:$0xff] }
 0x5dd   : > { %6410 = vst.msk [vmem:[#allocation3 + $0xe1] sm:$0xff] %vm374_vm0, %v6378_v5  ;;  %v6259_v34 = vadd.f32 %v6258_v25, %v6170_v57  ;;  %v6443_v40 = vld [vmem:[#allocation3 + $0xd8] sm:$0xff]  ;;  %v6175_v57 = vadd.f32 %v14719_v27, %v14685_v39  ;;  %v6177_v39 = vadd.f32 %v14740_v62, %v14717_v52 }
 0x5df   : > { %v6311_v47 = vadd.f32 %v6259_v34, %v17482_v46  ;;  %12167 = vmatmul.msk.bf16.gmra.mxu1 %vm374_vm0, %v14793_v30 }
 0x5e1   : > { %v6347_v37 = vadd.f32 %v14708_v6, %v6311_v47 }
 0x5e3   : > { %v6379_v48 = vmax.f32 %v6347_v37, 0.0 }
 0x5e4   : > { %v6260_v7 = vpop.f32.mrf.mxu1  ;;  %v6500_v36 = vld [vmem:[#allocation3 + $0xe1] sm:$0xff] }
 0x5e5   : > { %v6444_v19 = vld [vmem:[#allocation3 + $0xe0] sm:$0xff]  ;;  %6411 = vst.msk [vmem:[#allocation3 + $0xf1] sm:$0xff] %vm374_vm0, %v6379_v48  ;;  %v6261_v30 = vadd.f32 %v6260_v7, %v6172_v8  ;;  %v6522_v59 = vpack.c.bf16 %v6500_v36, %v6499_v31 }
 0x5e6   : > { %v6878_v16 = vld [vmem:[#allocation3 + $0xda] sm:$0xff]  ;;  %v7003_v45 = vpop.f32.mrf.mxu0  ;;  %v14972_v58 = vpack.c.bf16 %v6444_v19, %v6443_v40  ;;  %v6879_v60 = vld [vmem:[#allocation3 + $0xe2] sm:$0xff] }
 0x5e7   : > { %v6901_v41 = vpack.c.bf16 %v6879_v60, %v6878_v16  ;;  %v6312_v26 = vadd.f32 %v6261_v30, %v5321_v10  ;;  %12063 = vmatmul.msk.bf16.gmra.mxu2 %vm374_vm0, %v6522_v59  ;;  %v17485_v8 = vld [vmem:[#allocation5_spill] sm:$0xff]  ;;  %v5326_v10 = vadd.f32 %v17487_v20, %v17486_v42 }
 0x5e8   : > { %12095 = vmatmul.msk.bf16.gmra.mxu3 %vm374_vm0, %v14972_v58 }
 0x5e9   : > { %12135 = vmatmul.msk.bf16.gmra.mxu0 %vm374_vm0, %v6901_v41  ;;  %v6348_v44 = vadd.f32 %v14708_v6, %v6312_v26 }
 0x5ea   : > { %v6624_v28 = vpop.f32.mrf.mxu2 }
 0x5eb   : > { %v6785_v51 = vpop.f32.mrf.mxu3  ;;  %v6380_v5 = vmax.f32 %v6348_v44, 0.0 }
 0x5ec   : > { %v6786_v25 = vadd.f32 %v6785_v51, %v6624_v28  ;;  %v6263_v34 = vpop.f32.mrf.mxu1  ;;  %v6501_v19 = vld [vmem:[#allocation3 + $0xf1] sm:$0xff] }
 0x5ed   : > { %6412 = vst.msk [vmem:[#allocation3 + $0xf9] sm:$0xff] %vm374_vm0, %v6380_v5  ;;  %v6264_v46 = vadd.f32 %v6263_v34, %v6175_v57  ;;  %v6445_v16 = vld [vmem:[#allocation3 + $0xf0] sm:$0xff]  ;;  %v6180_v34 = vadd.f32 %v14763_v15, %v14747_v32 }
 0x5ee   : > { %v7005_v47 = vpop.f32.mrf.mxu0  ;;  %v14982_v37 = vadd.f32 %v7003_v45, %v6786_v25 }
 0x5ef   : > { %v6313_v48 = vadd.f32 %v6264_v46, %v17485_v8  ;;  %12168 = vmatmul.msk.bf16.gmra.mxu1 %vm374_vm0, %v14823_v18 }
 0x5f1   : > { %v6349_v31 = vadd.f32 %v14708_v6, %v6313_v48 }
 0x5f2   : > { %v6626_v40 = vpop.f32.mrf.mxu2 }
 0x5f3   : > { %v6787_v7 = vpop.f32.mrf.mxu3  ;;  %v6381_v27 = vmax.f32 %v6349_v31, 0.0 }
 0x5f4   : > { %v6788_v36 = vadd.f32 %v6787_v7, %v6626_v40  ;;  %v6265_v30 = vpop.f32.mrf.mxu1  ;;  %v6502_v45 = vld [vmem:[#allocation3 + $0xf9] sm:$0xff]  ;;  %v12750_v40 = vld [vmem:[%s17299_s5 + $0x80] sm:$0xff] }
 0x5f5   : > { %v6446_v59 = vld [vmem:[#allocation3 + $0xf8] sm:$0xff]  ;;  %6413 = vst.msk [vmem:[#allocation3 + $0x109] sm:$0xff] %vm374_vm0, %v6381_v27  ;;  %v6266_v18 = vadd.f32 %v6265_v30, %v6177_v39  ;;  %v6523_v26 = vpack.c.bf16 %v6502_v45, %v6501_v19  ;;  %7496 = vmatpush.bf16.msrb.mxu2 %v12750_v40  ;;  %v6182_v19 = vadd.f32 %v14778_v11, %v14768_v55  ;;  %v17489_v30 = vld [vmem:[#allocation6_spill] sm:$0xff]  ;;  %v17490_v45 = vld [vmem:[#allocation11_spill] sm:$0xff] }
 0x5f6   : > { %v6880_v60 = vld [vmem:[#allocation3 + $0xf2] sm:$0xff]  ;;  %v7008_v41 = vpop.f32.mrf.mxu0  ;;  %v14993_v44 = vpack.c.bf16 %v6446_v59, %v6445_v16  ;;  %v6881_v28 = vld [vmem:[#allocation3 + $0xfa] sm:$0xff]  ;;  %v14995_v52 = vadd.f32 %v7005_v47, %v6788_v36  ;;  %v5331_v59 = vadd.f32 %v17490_v45, %v17489_v30 }
 0x5f7   : > { %v6902_v62 = vpack.c.bf16 %v6881_v28, %v6880_v60  ;;  %v6314_v51 = vadd.f32 %v6266_v18, %v5326_v10  ;;  %12064 = vmatmul.msk.bf16.gmra.mxu2 %vm374_vm0, %v6523_v26  ;;  %v17488_v39 = vld [vmem:[#allocation8_spill] sm:$0xff]  ;;  %v12756_v55 = vld [vmem:[%s17299_s5 + $0xb0] sm:$0xff]  ;;  %v17492_v45 = vld [vmem:[#allocation15_spill] sm:$0xff] }
 0x5f8   : > { %12096 = vmatmul.msk.bf16.gmra.mxu3 %vm374_vm0, %v14993_v44 }
 0x5f9   : > { %12136 = vmatmul.msk.bf16.gmra.mxu0 %vm374_vm0, %v6902_v62  ;;  %v6350_v57 = vadd.f32 %v14708_v6, %v6314_v51  ;;  %7744 = vmatpush.bf16.msrb.mxu3 %v12756_v55 }
 0x5fa   : > { %v6629_v5 = vpop.f32.mrf.mxu2 }
 0x5fb   : > { %v6790_v25 = vpop.f32.mrf.mxu3  ;;  %v6382_v46 = vmax.f32 %v6350_v57, 0.0 }
 0x5fc   : > { %v6791_v8 = vadd.f32 %v6790_v25, %v6629_v5  ;;  %v6268_v47 = vpop.f32.mrf.mxu1  ;;  %v6503_v20 = vld [vmem:[#allocation3 + $0x109] sm:$0xff] }
 0x5fd   : > { %6414 = vst.msk [vmem:[#allocation3 + $0x111] sm:$0xff] %vm374_vm0, %v6382_v46  ;;  %v6269_v48 = vadd.f32 %v6268_v47, %v6180_v34  ;;  %v6447_v10 = vld [vmem:[#allocation3 + $0x108] sm:$0xff]  ;;  %v6185_v47 = vadd.f32 %v14787_v17, %v14784_v33  ;;  %v6187_v33 = vadd.f32 %v14803_v54, %v14799_v38 }
 0x5fe   : > { %v7010_v31 = vpop.f32.mrf.mxu0  ;;  %v15008_v7 = vadd.f32 %v7008_v41, %v6791_v8 }
 0x5ff   : > { %v6315_v27 = vadd.f32 %v6269_v48, %v17488_v39  ;;  %12169 = vmatmul.msk.bf16.gmra.mxu1 %vm374_vm0, %v14845_v35 }
 0x601   : > { %v6351_v32 = vadd.f32 %v14708_v6, %v6315_v27 }
 0x602   : > { %v6631_v15 = vpop.f32.mrf.mxu2 }
 0x603   : > { %v6792_v36 = vpop.f32.mrf.mxu3  ;;  %v6383_v16 = vmax.f32 %v6351_v32, 0.0 }
 0x604   : > { %v6793_v42 = vadd.f32 %v6792_v36, %v6631_v15  ;;  %v6270_v60 = vpop.f32.mrf.mxu1  ;;  %v6504_v18 = vld [vmem:[#allocation3 + $0x111] sm:$0xff] }
 0x605   : > { %v6448_v41 = vld [vmem:[#allocation3 + $0x110] sm:$0xff]  ;;  %6415 = vst.msk [vmem:[#allocation3 + $0x121] sm:$0xff] %vm374_vm0, %v6383_v16  ;;  %v6271_v35 = vadd.f32 %v6270_v60, %v6182_v19  ;;  %v6524_v62 = vpack.c.bf16 %v6504_v18, %v6503_v20  ;;  %v17491_v15 = vld [vmem:[#allocation16_spill] sm:$0xff] }
 0x606   : > { %v6882_v26 = vld [vmem:[#allocation3 + $0x10a] sm:$0xff]  ;;  %v7013_v28 = vpop.f32.mrf.mxu0  ;;  %v15019_v51 = vpack.c.bf16 %v6448_v41, %v6447_v10  ;;  %v6883_v57 = vld [vmem:[#allocation3 + $0x112] sm:$0xff]  ;;  %v15024_v11 = vadd.f32 %v7010_v31, %v6793_v42 }
 0x607   : > { %v6903_v5 = vpack.c.bf16 %v6883_v57, %v6882_v26  ;;  %v6316_v25 = vadd.f32 %v6271_v35, %v5331_v59  ;;  %12065 = vmatmul.msk.bf16.gmra.mxu2 %vm374_vm0, %v6524_v62  ;;  %v17493_v59 = vld [vmem:[#allocation13_spill] sm:$0xff] }
 0x608   : > { %12097 = vmatmul.msk.bf16.gmra.mxu3 %vm374_vm0, %v15019_v51  ;;  %v5336_v60 = vadd.f32 %v17493_v59, %v17492_v45 }
 0x609   : > { %12137 = vmatmul.msk.bf16.gmra.mxu0 %vm374_vm0, %v6903_v5  ;;  %v6352_v34 = vadd.f32 %v14708_v6, %v6316_v25 }
 0x60a   : > { %v6634_v46 = vpop.f32.mrf.mxu2 }
 0x60b   : > { %v6795_v8 = vpop.f32.mrf.mxu3  ;;  %v6384_v48 = vmax.f32 %v6352_v34, 0.0 }
 0x60c   : > { %v6796_v31 = vadd.f32 %v6795_v8, %v6634_v46  ;;  %v6273_v40 = vpop.f32.mrf.mxu1  ;;  %v6505_v10 = vld [vmem:[#allocation3 + $0x121] sm:$0xff]  ;;  %v6190_v8 = vadd.f32 %v14820_v13, %v14816_v43  ;;  %v6192_v43 = vadd.f32 %v14836_v56, %v14833_v61 }
 0x60d   : > { %6416 = vst.msk [vmem:[#allocation3 + $0x129] sm:$0xff] %vm374_vm0, %v6384_v48  ;;  %v6274_v39 = vadd.f32 %v6273_v40, %v6185_v47  ;;  %v6449_v30 = vld [vmem:[#allocation3 + $0x120] sm:$0xff] }
 0x60e   : > { %v7015_v27 = vpop.f32.mrf.mxu0  ;;  %v15034_v32 = vadd.f32 %v7013_v28, %v6796_v31 }
 0x60f   : > { %v6317_v36 = vadd.f32 %v6274_v39, %v17491_v15  ;;  %12170 = vmatmul.msk.bf16.gmra.mxu1 %vm374_vm0, %v14870_v29  ;;  %v17494_v15 = vld [vmem:[#allocation14_spill] sm:$0xff] }
 0x611   : > { %v6353_v19 = vadd.f32 %v14708_v6, %v6317_v36 }
 0x612   : > { %v6636_v16 = vpop.f32.mrf.mxu2 }
 0x613   : > { %v6797_v42 = vpop.f32.mrf.mxu3  ;;  %v6385_v17 = vmax.f32 %v6353_v19, 0.0 }
 0x614   : > { %v6798_v20 = vadd.f32 %v6797_v42, %v6636_v16  ;;  %v6275_v18 = vpop.f32.mrf.mxu1  ;;  %v6506_v41 = vld [vmem:[#allocation3 + $0x129] sm:$0xff] }
 0x615   : > { %v6450_v26 = vld [vmem:[#allocation3 + $0x128] sm:$0xff]  ;;  %6417 = vst.msk [vmem:[#allocation3 + $0x139] sm:$0xff] %vm374_vm0, %v6385_v17  ;;  %v6276_v29 = vadd.f32 %v6275_v18, %v6187_v33  ;;  %v6525_v62 = vpack.c.bf16 %v6506_v41, %v6505_v10  ;;  %v17495_v10 = vld [vmem:[#allocation21_spill] sm:$0xff] }
 0x616   : > { %v6884_v35 = vld [vmem:[#allocation3 + $0x122] sm:$0xff]  ;;  %v7018_v28 = vpop.f32.mrf.mxu0  ;;  %v15045_v57 = vpack.c.bf16 %v6450_v26, %v6449_v30  ;;  %v6885_v55 = vld [vmem:[#allocation3 + $0x12a] sm:$0xff]  ;;  %v15047_v38 = vadd.f32 %v7015_v27, %v6798_v20 }
 0x617   : > { %v6904_v54 = vpack.c.bf16 %v6885_v55, %v6884_v35  ;;  %v6318_v5 = vadd.f32 %v6276_v29, %v5336_v60  ;;  %12066 = vmatmul.msk.bf16.gmra.mxu2 %vm374_vm0, %v6525_v62  ;;  %v17496_v30 = vld [vmem:[#allocation18_spill] sm:$0xff]  ;;  %v15079_v62 = vld [vmem:[%s17298_s4] ss:$0 sm:$0xff] }
 0x618   : > { %12098 = vmatmul.msk.bf16.gmra.mxu3 %vm374_vm0, %v15045_v57  ;;  %v5341_v45 = vadd.f32 %v17496_v30, %v17495_v10 }
 0x619   : > { %12138 = vmatmul.msk.bf16.gmra.mxu0 %vm374_vm0, %v6904_v54  ;;  %v6354_v25 = vadd.f32 %v14708_v6, %v6318_v5 }
 0x61a   : > { %v6639_v34 = vpop.f32.mrf.mxu2 }
 0x61b   : > { %v6800_v46 = vpop.f32.mrf.mxu3  ;;  %v6386_v47 = vmax.f32 %v6354_v25, 0.0  ;;  %v6195_v25 = vadd.f32 %v14852_v22, %v14847_v23  ;;  %v12760_v23 = vld [vmem:[%s17299_s5 + $0xd0] sm:$0xff]  ;;  %v12755_v22 = vld [vmem:[%s17299_s5 + $0xa8] sm:$0xff] }
 0x61c   : > { %v6801_v48 = vadd.f32 %v6800_v46, %v6639_v34  ;;  %v6278_v31 = vpop.f32.mrf.mxu1  ;;  %v6507_v17 = vld [vmem:[#allocation3 + $0x139] sm:$0xff]  ;;  %7745 = vmatpush.bf16.msrb.mxu3 %v12755_v22  ;;  %v6202_v22 = vadd.f32 %v14895_v3, %v14889_v4 }
 0x61d   : > { %6418 = vst.msk [vmem:[#allocation3 + $0x141] sm:$0xff] %vm374_vm0, %v6386_v47  ;;  %v6279_v40 = vadd.f32 %v6278_v31, %v6190_v8  ;;  %v6451_v20 = vld [vmem:[#allocation3 + $0x138] sm:$0xff]  ;;  %v12761_v31 = vld [vmem:[%s17299_s5 + $0xd8] sm:$0xff] }
 0x61e   : > { %v7020_v39 = vpop.f32.mrf.mxu0  ;;  %v15057_v27 = vadd.f32 %v7018_v28, %v6801_v48  ;;  %7994 = vmatpush.bf16.msra.mxu0 %v12761_v31 }
 0x61f   : > { %v6319_v36 = vadd.f32 %v6279_v40, %v17494_v15  ;;  %12171 = vmatmul.msk.bf16.gmra.mxu1 %vm374_vm0, %v14900_v14 }
 0x621   : > { %v6355_v19 = vadd.f32 %v14708_v6, %v6319_v36 }
 0x622   : > { %v6641_v16 = vpop.f32.mrf.mxu2  ;;  %7995 = vmatpush.bf16.msra.mxu0 %v12760_v23 }
 0x623   : > { %v6802_v42 = vpop.f32.mrf.mxu3  ;;  %v6387_v13 = vmax.f32 %v6355_v19, 0.0 }
 0x624   : > { %v6803_v33 = vadd.f32 %v6802_v42, %v6641_v16  ;;  %v6280_v59 = vpop.f32.mrf.mxu1  ;;  %v6508_v60 = vld [vmem:[#allocation3 + $0x141] sm:$0xff]  ;;  %v6197_v42 = vadd.f32 %v14863_v1, %v14860_v0  ;;  %v12759_v1 = vld [vmem:[%s17299_s5 + $0xc8] sm:$0xff] }
 0x625   : > { %v6452_v18 = vld [vmem:[#allocation3 + $0x140] sm:$0xff]  ;;  %6419 = vst.msk [vmem:[#allocation3 + $0x151] sm:$0xff] %vm374_vm0, %v6387_v13  ;;  %v6281_v14 = vadd.f32 %v6280_v59, %v6192_v43  ;;  %v6526_v26 = vpack.c.bf16 %v6508_v60, %v6507_v17  ;;  %v17498_v17 = vld [vmem:[#allocation38_spill] sm:$0xff] }
 0x626   : > { %v6886_v41 = vld [vmem:[#allocation3 + $0x13a] sm:$0xff]  ;;  %v7023_v6 = vpop.f32.mrf.mxu0  ;;  %v15068_v35 = vpack.c.bf16 %v6452_v18, %v6451_v20  ;;  %v6887_v29 = vld [vmem:[#allocation3 + $0x142] sm:$0xff]  ;;  %v15070_v61 = vadd.f32 %v7020_v39, %v6803_v33  ;;  %v17497_v39 = vld [vmem:[#allocation35_spill] sm:$0xff]  ;;  %7996 = vmatpush.bf16.msra.mxu0 %v12759_v1 }
 0x627   : > { %v6905_v56 = vpack.c.bf16 %v6887_v29, %v6886_v41  ;;  %v6320_v28 = vadd.f32 %v6281_v14, %v5341_v45  ;;  %12067 = vmatmul.msk.bf16.gmra.mxu2 %vm374_vm0, %v6526_v26  ;;  %v17499_v20 = vld [vmem:[#allocation37_spill] sm:$0xff]  ;;  %v12754_v26 = vld [vmem:[%s17299_s5 + $0xa0] sm:$0xff] }
 0x628   : > { %12099 = vmatmul.msk.bf16.gmra.mxu3 %vm374_vm0, %v15068_v35  ;;  %v5346_v10 = vadd.f32 %v17499_v20, %v17498_v17 }
 0x629   : > { %12139 = vmatmul.msk.bf16.gmra.mxu0 %vm374_vm0, %v6905_v56  ;;  %v6356_v55 = vadd.f32 %v15079_v62, %v6320_v28  ;;  %7746 = vmatpush.bf16.msrb.mxu3 %v12754_v26 }
 0x62a   : > { %v6644_v54 = vpop.f32.mrf.mxu2 }
 0x62b   : > { %v6805_v5 = vpop.f32.mrf.mxu3  ;;  %v6388_v34 = vmax.f32 %v6356_v55, 0.0  ;;  %v12769_v55 = vld [vmem:[%s17299_s5 + $0x118] sm:$0xff] }
 0x62c   : > { %v6806_v46 = vadd.f32 %v6805_v5, %v6644_v54  ;;  %v6283_v8 = vpop.f32.mrf.mxu1  ;;  %v6453_v33 = vld [vmem:[#allocation3 + $0x150] sm:$0xff]  ;;  %v6200_v54 = vadd.f32 %v14879_v24, %v14876_v50  ;;  %8494 = vmatpush.bf16.msra.mxu2 %v12769_v55 }
 0x62d   : > { %6420 = vst.msk [vmem:[#allocation3 + $0x159] sm:$0xff] %vm374_vm0, %v6388_v34  ;;  %v6284_v47 = vadd.f32 %v6283_v8, %v6195_v25  ;;  %v12758_v25 = vld [vmem:[%s17299_s5 + $0xc0] sm:$0xff] }
 0x62e   : > { %v7025_v48 = vpop.f32.mrf.mxu0  ;;  %v15088_v40 = vadd.f32 %v7023_v6, %v6806_v46  ;;  %7997 = vmatpush.bf16.msra.mxu0 %v12758_v25 }
 0x62f   : > { %v6321_v15 = vadd.f32 %v6284_v47, %v17497_v39  ;;  %12172 = vmatmul.msk.bf16.gmra.mxu1 %vm374_vm0, %v14925_v63  ;;  %v6509_v63 = vld [vmem:[#allocation3 + $0x151] sm:$0xff] }
 0x631   : > { %v6357_v36 = vadd.f32 %v15079_v62, %v6321_v15  ;;  %v17500_v15 = vld [vmem:[#allocation39_spill] sm:$0xff] }
 0x632   : > { %v6646_v19 = vpop.f32.mrf.mxu2 }
 0x633   : > { %v6807_v16 = vpop.f32.mrf.mxu3  ;;  %v6389_v43 = vmax.f32 %v6357_v36, 0.0 }
 0x634   : > { %v6808_v13 = vadd.f32 %v6807_v16, %v6646_v19  ;;  %v6285_v30 = vpop.f32.mrf.mxu1  ;;  %v6510_v45 = vld [vmem:[#allocation3 + $0x159] sm:$0xff] }
 0x635   : > { %v6454_v59 = vld [vmem:[#allocation3 + $0x158] sm:$0xff]  ;;  %6421 = vst.msk [vmem:[#allocation3 + $0x169] sm:$0xff] %vm374_vm0, %v6389_v43  ;;  %v6286_v18 = vadd.f32 %v6285_v30, %v6197_v42  ;;  %v6527_v14 = vpack.c.bf16 %v6510_v45, %v6509_v63 }
 0x636   : > { %v6888_v60 = vld [vmem:[#allocation3 + $0x152] sm:$0xff]  ;;  %v7028_v41 = vpop.f32.mrf.mxu0  ;;  %v15105_v6 = vpack.c.bf16 %v6454_v59, %v6453_v33  ;;  %v6889_v0 = vld [vmem:[#allocation3 + $0x15a] sm:$0xff]  ;;  %v15113_v29 = vadd.f32 %v7025_v48, %v6808_v13  ;;  %v12765_v48 = vld [vmem:[%s17299_s5 + $0xf8] sm:$0xff] }
 0x637   : > { %v6906_v56 = vpack.c.bf16 %v6889_v0, %v6888_v60  ;;  %v6322_v28 = vadd.f32 %v6286_v18, %v5346_v10  ;;  %12068 = vmatmul.msk.bf16.gmra.mxu2 %vm374_vm0, %v6527_v14  ;;  %8244 = vmatpush.bf16.msra.mxu1 %v12765_v48  ;;  %v17501_v33 = vld [vmem:[#allocation40_spill] sm:$0xff] }
 0x638   : > { %12100 = vmatmul.msk.bf16.gmra.mxu3 %vm374_vm0, %v15105_v6  ;;  %v5351_v17 = vadd.f32 %v14893_v9, %v17501_v33  ;;  %v7862_v48 = vld [vmem:[#allocation3 + $0x38] sm:$0xff] }
 0x639   : > { %12140 = vmatmul.msk.bf16.gmra.mxu0 %vm374_vm0, %v6906_v56  ;;  %v6358_v5 = vadd.f32 %v15079_v62, %v6322_v28 }
 0x63a   : > { %v6649_v34 = vpop.f32.mrf.mxu2 }
 0x63b   : > { %v6810_v46 = vpop.f32.mrf.mxu3  ;;  %v6390_v8 = vmax.f32 %v6358_v5, 0.0 }
 0x63c   : > { %v6811_v47 = vadd.f32 %v6810_v46, %v6649_v34  ;;  %v6288_v31 = vpop.f32.mrf.mxu1  ;;  %v6511_v13 = vld [vmem:[#allocation3 + $0x169] sm:$0xff]  ;;  %v7361_v46 = vld [vmem:[#allocation3 + $0x21] sm:$0xff] }
 0x63d   : > { %6422 = vst.msk [vmem:[#allocation3 + $0x171] sm:$0xff] %vm374_vm0, %v6390_v8  ;;  %v6289_v50 = vadd.f32 %v6288_v31, %v6200_v54  ;;  %v6455_v63 = vld [vmem:[#allocation3 + $0x168] sm:$0xff] }
 0x63e   : > { %v7030_v24 = vpop.f32.mrf.mxu0  ;;  %v15132_v39 = vadd.f32 %v7028_v41, %v6811_v47  ;;  %v7611_v8 = vld [vmem:[#allocation3 + $0x22] sm:$0xff] }
 0x63f   : > { %v6323_v23 = vadd.f32 %v6289_v50, %v17500_v15  ;;  %12173 = vmatmul.msk.bf16.gmra.mxu1 %vm374_vm0, %v14947_v2  ;;  %v7360_v50 = vld [vmem:[#allocation3 + $0x19] sm:$0xff] }
 0x640   : > { %v7392_v15 = vpack.c.bf16 %v7361_v46, %v7360_v50  ;;  %v7615_v50 = vld [vmem:[#allocation3 + $0x52] sm:$0xff] }
 0x641   : > { %v6359_v36 = vadd.f32 %v15079_v62, %v6323_v23 }
 0x642   : > { %v6651_v19 = vpop.f32.mrf.mxu2 }
 0x643   : > { %v6812_v16 = vpop.f32.mrf.mxu3  ;;  %v6391_v42 = vmax.f32 %v6359_v36, 0.0 }
 0x644   : > { %v6813_v43 = vadd.f32 %v6812_v16, %v6651_v19  ;;  %v6290_v20 = vpop.f32.mrf.mxu1  ;;  %v6512_v10 = vld [vmem:[#allocation3 + $0x171] sm:$0xff] }
 0x645   : > { %v6456_v30 = vld [vmem:[#allocation3 + $0x170] sm:$0xff]  ;;  %6423 = vst.msk [vmem:[#allocation3 + $0x181] sm:$0xff] %vm374_vm0, %v6391_v42  ;;  %v6291_v2 = vadd.f32 %v6290_v20, %v6202_v22  ;;  %v6528_v4 = vpack.c.bf16 %v6512_v10, %v6511_v13  ;;  %v7363_v10 = vld [vmem:[#allocation3 + $0x39] sm:$0xff] }
 0x646   : > { %v6890_v45 = vld [vmem:[#allocation3 + $0x16a] sm:$0xff]  ;;  %v7033_v59 = vpop.f32.mrf.mxu0  ;;  %v15143_v3 = vpack.c.bf16 %v6456_v30, %v6455_v63  ;;  %v6891_v60 = vld [vmem:[#allocation3 + $0x172] sm:$0xff]  ;;  %v15145_v18 = vadd.f32 %v7030_v24, %v6813_v43 }
 0x647   : > { %v6907_v41 = vpack.c.bf16 %v6891_v60, %v6890_v45  ;;  %v6324_v14 = vadd.f32 %v6291_v2, %v5351_v17  ;;  %12069 = vmatmul.msk.bf16.gmra.mxu2 %vm374_vm0, %v6528_v4  ;;  %v7612_v30 = vld [vmem:[#allocation3 + $0x32] sm:$0xff]  ;;  %v7613_v45 = vld [vmem:[#allocation3 + $0x3a] sm:$0xff] }
 0x648   : > { %12101 = vmatmul.msk.bf16.gmra.mxu3 %vm374_vm0, %v15143_v3  ;;  %v7362_v60 = vld [vmem:[#allocation3 + $0x31] sm:$0xff] }
 0x649   : > { %12141 = vmatmul.msk.bf16.gmra.mxu0 %vm374_vm0, %v6907_v41  ;;  %v6360_v9 = vadd.f32 %v15079_v62, %v6324_v14  ;;  %v7610_v62 = vld [vmem:[#allocation3 + $0x1a] sm:$0xff] }
 0x64a   : > { %v6654_v0 = vpop.f32.mrf.mxu2  ;;  %v7642_v23 = vpack.c.bf16 %v7611_v8, %v7610_v62 }
 0x64b   : > { %v6815_v1 = vpop.f32.mrf.mxu3  ;;  %v6392_v26 = vmax.f32 %v6360_v9, 0.0  ;;  %v15179_v9 = vpack.c.bf16 %v7613_v45, %v7612_v30 }
 0x64c   : > { %v6816_v56 = vadd.f32 %v6815_v1, %v6654_v0  ;;  %v7248_v28 = vpop.f32.mrf.mxu1  ;;  %v7863_v0 = vld [vmem:[#allocation3 + $0x48] sm:$0xff] }
 0x64d   : > { %6424 = vst.msk [vmem:[#allocation3 + $0x189] sm:$0xff] %vm374_vm0, %v6392_v26  ;;  %v15154_v54 = vadd.f32 %v7248_v28, %v14917_v49  ;;  %v7861_v49 = vld [vmem:[#allocation3 + $0x30] sm:$0xff] }
 0x64e   : > { %v7035_v55 = vpop.f32.mrf.mxu0  ;;  %v15156_v5 = vadd.f32 %v7033_v59, %v6816_v56  ;;  %v7893_v36 = vpack.c.bf16 %v7862_v48, %v7861_v49  ;;  %v7864_v59 = vld [vmem:[#allocation3 + $0x50] sm:$0xff] }
 0x64f   : > { %12174 = vmatmul.msk.bf16.gmra.mxu1 %vm374_vm0, %v14972_v58  ;;  %v7894_v26 = vpack.c.bf16 %v7864_v59, %v7863_v0  ;;  %v7614_v48 = vld [vmem:[#allocation3 + $0x4a] sm:$0xff]  ;;  %v7616_v0 = vld [vmem:[#allocation3 + $0x62] sm:$0xff] }
 0x650   : > { %v7364_v49 = vld [vmem:[#allocation3 + $0x49] sm:$0xff] }
 0x652   : > { %v6656_v25 = vpop.f32.mrf.mxu2 }
 0x653   : > { %v6817_v34 = vpop.f32.mrf.mxu3 }
 0x654   : > { %v6818_v47 = vadd.f32 %v6817_v34, %v6656_v25  ;;  %v15160_v31 = vpop.f32.mrf.mxu1 }
 0x656   : > { %v7038_v24 = vpop.f32.mrf.mxu0  ;;  %v15162_v22 = vadd.f32 %v7035_v55, %v6818_v47  ;;  %v7365_v47 = vld [vmem:[#allocation3 + $0x51] sm:$0xff] }
 0x657   : > { %12206 = vmatmul.msk.bf16.vlgmr.msrb.gmra.mxu2 %vm374_vm0, %v7392_v15  ;;  %v7866_v15 = vld [vmem:[#allocation3 + $0x68] sm:$0xff] }
 0x658   : > { %12246 = vmatmul.msk.bf16.vlgmr.msrb.gmra.mxu3 %vm374_vm0, %v7642_v23 }
 0x659   : > { %12286 = vmatmul.msk.bf16.vlgmr.msra.gmra.mxu0 %vm374_vm0, %v7893_v36 }
 0x65a   : > { %v6659_v19 = vpop.f32.mrf.mxu2 }
 0x65b   : > { %v6820_v16 = vpop.f32.mrf.mxu3 }
 0x65c   : > { %v6821_v42 = vadd.f32 %v6820_v16, %v6659_v19  ;;  %v7253_v43 = vpop.f32.mrf.mxu1  ;;  %v15200_v16 = vpack.c.bf16 %v7615_v50, %v7614_v48 }
 0x65d   : > { %v15168_v63 = vadd.f32 %v7253_v43, %v14982_v37  ;;  %v15177_v37 = vpack.c.bf16 %v7363_v10, %v7362_v60  ;;  %v12764_v10 = vld [vmem:[%s17299_s5 + $0xf0] sm:$0xff] }
 0x65e   : > { %v7040_v13 = vpop.f32.mrf.mxu0  ;;  %v15170_v33 = vadd.f32 %v7038_v24, %v6821_v42  ;;  %17502 = vst [vmem:[#allocation25_spill] sm:$0xff] %v15200_v16  ;;  %v7865_v42 = vld [vmem:[#allocation3 + $0x60] sm:$0xff]  ;;  %8245 = vmatpush.bf16.msra.mxu1 %v12764_v10 }
 0x65f   : > { %12175 = vmatmul.msk.bf16.gmra.mxu1 %vm374_vm0, %v14993_v44 }
 0x662   : > { %v6661_v17 = vpop.f32.mrf.mxu2 }
 0x663   : > { %v6822_v20 = vpop.f32.mrf.mxu3 }
 0x664   : > { %v6823_v2 = vadd.f32 %v6822_v20, %v6661_v17  ;;  %v7255_v4 = vpop.f32.mrf.mxu1 }
 0x665   : > { %v15175_v14 = vadd.f32 %v7255_v4, %v14995_v52 }
 0x666   : > { %v7043_v41 = vpop.f32.mrf.mxu0  ;;  %v15181_v1 = vadd.f32 %v7040_v13, %v6823_v2 }
 0x667   : > { %12207 = vmatmul.msk.bf16.gmra.mxu2 %vm374_vm0, %v15177_v37 }
 0x668   : > { %12247 = vmatmul.msk.bf16.gmra.mxu3 %vm374_vm0, %v15179_v9 }
 0x669   : > { %12287 = vmatmul.msk.bf16.gmra.mxu0 %vm374_vm0, %v7894_v26  ;;  %v7617_v26 = vld [vmem:[#allocation3 + $0x6a] sm:$0xff] }
 0x66a   : > { %v6664_v56 = vpop.f32.mrf.mxu2 }
 0x66b   : > { %v6825_v28 = vpop.f32.mrf.mxu3 }
 0x66c   : > { %v6826_v52 = vadd.f32 %v6825_v28, %v6664_v56  ;;  %v7258_v55 = vpop.f32.mrf.mxu1  ;;  %v7868_v28 = vld [vmem:[#allocation3 + $0x80] sm:$0xff] }
 0x66d   : > { %v15189_v34 = vadd.f32 %v7258_v55, %v15008_v7  ;;  %v15198_v7 = vpack.c.bf16 %v7365_v47, %v7364_v49  ;;  %v7366_v55 = vld [vmem:[#allocation3 + $0x61] sm:$0xff]  ;;  %v7867_v47 = vld [vmem:[#allocation3 + $0x78] sm:$0xff] }
 0x66e   : > { %v7045_v25 = vpop.f32.mrf.mxu0  ;;  %v15191_v46 = vadd.f32 %v7043_v41, %v6826_v52  ;;  %v7367_v41 = vld [vmem:[#allocation3 + $0x69] sm:$0xff]  ;;  %v7896_v50 = vpack.c.bf16 %v7868_v28, %v7867_v47 }
 0x66f   : > { %12176 = vmatmul.msk.bf16.gmra.mxu1 %vm374_vm0, %v15019_v51  ;;  %v7895_v51 = vpack.c.bf16 %v7866_v15, %v7865_v42 }
 0x672   : > { %v6666_v62 = vpop.f32.mrf.mxu2 }
 0x673   : > { %v6827_v8 = vpop.f32.mrf.mxu3 }
 0x674   : > { %v6828_v24 = vadd.f32 %v6827_v8, %v6666_v62  ;;  %v7260_v23 = vpop.f32.mrf.mxu1  ;;  %v15227_v8 = vpack.c.bf16 %v7617_v26, %v7616_v0  ;;  %v7869_v26 = vld [vmem:[#allocation3 + $0x90] sm:$0xff] }
 0x675   : > { %v15196_v19 = vadd.f32 %v7260_v23, %v15024_v11  ;;  %v12768_v11 = vld [vmem:[%s17299_s5 + $0x110] sm:$0xff] }
 0x676   : > { %v7048_v36 = vpop.f32.mrf.mxu0  ;;  %v15202_v43 = vadd.f32 %v7045_v25, %v6828_v24  ;;  %8495 = vmatpush.bf16.msra.mxu2 %v12768_v11  ;;  %17503 = vst [vmem:[#allocation9_spill] sm:$0xff] %v15227_v8 }
 0x677   : > { %12208 = vmatmul.msk.bf16.gmra.mxu2 %vm374_vm0, %v15198_v7 }
 0x678   : > { %12248 = vmatmul.msk.bf16.gmra.mxu3 %vm374_vm0, %v15200_v16 }
 0x679   : > { %12288 = vmatmul.msk.bf16.gmra.mxu0 %vm374_vm0, %v7895_v51 }
 0x67a   : > { %v6669_v13 = vpop.f32.mrf.mxu2 }
 0x67b   : > { %v6830_v17 = vpop.f32.mrf.mxu3 }
 0x67c   : > { %v6831_v20 = vadd.f32 %v6830_v17, %v6669_v13  ;;  %v7263_v30 = vpop.f32.mrf.mxu1  ;;  %v7369_v13 = vld [vmem:[#allocation3 + $0x81] sm:$0xff] }
 0x67d   : > { %v15216_v2 = vadd.f32 %v7263_v30, %v15034_v32  ;;  %v15225_v32 = vpack.c.bf16 %v7367_v41, %v7366_v55  ;;  %v7618_v17 = vld [vmem:[#allocation3 + $0x7a] sm:$0xff] }
 0x67e   : > { %v7050_v45 = vpop.f32.mrf.mxu0  ;;  %v15218_v59 = vadd.f32 %v7048_v36, %v6831_v20  ;;  %v7619_v20 = vld [vmem:[#allocation3 + $0x82] sm:$0xff]  ;;  %v7870_v30 = vld [vmem:[#allocation3 + $0x98] sm:$0xff] }
 0x67f   : > { %12177 = vmatmul.msk.bf16.gmra.mxu1 %vm374_vm0, %v15045_v57  ;;  %v15248_v0 = vpack.c.bf16 %v7619_v20, %v7618_v17  ;;  %v7897_v28 = vpack.c.bf16 %v7870_v30, %v7869_v26  ;;  %v7370_v20 = vld [vmem:[#allocation3 + $0x91] sm:$0xff] }
 0x681   : > { %17504 = vst [vmem:[#allocation17_spill] sm:$0xff] %v15248_v0 }
 0x682   : > { %v6671_v4 = vpop.f32.mrf.mxu2 }
 0x683   : > { %v6832_v60 = vpop.f32.mrf.mxu3 }
 0x684   : > { %v6833_v56 = vadd.f32 %v6832_v60, %v6671_v4  ;;  %v7265_v52 = vpop.f32.mrf.mxu1  ;;  %v7368_v4 = vld [vmem:[#allocation3 + $0x79] sm:$0xff] }
 0x685   : > { %v15223_v62 = vadd.f32 %v7265_v52, %v15047_v38 }
 0x686   : > { %v7053_v25 = vpop.f32.mrf.mxu0  ;;  %v15229_v48 = vadd.f32 %v7050_v45, %v6833_v56 }
 0x687   : > { %12209 = vmatmul.msk.bf16.gmra.mxu2 %vm374_vm0, %v15225_v32 }
 0x688   : > { %12249 = vmatmul.msk.bf16.gmra.mxu3 %vm374_vm0, %v15227_v8 }
 0x689   : > { %12289 = vmatmul.msk.bf16.gmra.mxu0 %vm374_vm0, %v7896_v50 }
 0x68a   : > { %v6674_v24 = vpop.f32.mrf.mxu2 }
 0x68b   : > { %v6835_v15 = vpop.f32.mrf.mxu3 }
 0x68c   : > { %v6836_v38 = vadd.f32 %v6835_v15, %v6674_v24  ;;  %v7268_v23 = vpop.f32.mrf.mxu1 }
 0x68d   : > { %v15237_v36 = vadd.f32 %v7268_v23, %v15057_v27  ;;  %v15246_v27 = vpack.c.bf16 %v7369_v13, %v7368_v4  ;;  %v7371_v23 = vld [vmem:[#allocation3 + $0x99] sm:$0xff]  ;;  %v7872_v13 = vld [vmem:[#allocation3 + $0xb0] sm:$0xff]  ;;  %v7871_v4 = vld [vmem:[#allocation3 + $0xa8] sm:$0xff] }
 0x68e   : > { %v7055_v49 = vpop.f32.mrf.mxu0  ;;  %v15239_v42 = vadd.f32 %v7053_v25, %v6836_v38  ;;  %v7898_v26 = vpack.c.bf16 %v7872_v13, %v7871_v4  ;;  %v7623_v13 = vld [vmem:[#allocation3 + $0xb2] sm:$0xff] }
 0x68f   : > { %12178 = vmatmul.msk.bf16.gmra.mxu1 %vm374_vm0, %v15068_v35 }
 0x692   : > { %v6676_v51 = vpop.f32.mrf.mxu2 }
 0x693   : > { %v6837_v11 = vpop.f32.mrf.mxu3 }
 0x694   : > { %v6838_v10 = vadd.f32 %v6837_v11, %v6676_v51  ;;  %v7270_v45 = vpop.f32.mrf.mxu1  ;;  %v7621_v51 = vld [vmem:[#allocation3 + $0x9a] sm:$0xff] }
 0x695   : > { %v15244_v41 = vadd.f32 %v7270_v45, %v15070_v61 }
 0x696   : > { %v7058_v60 = vpop.f32.mrf.mxu0  ;;  %v15250_v56 = vadd.f32 %v7055_v49, %v6838_v10  ;;  %v7620_v49 = vld [vmem:[#allocation3 + $0x92] sm:$0xff] }
 0x697   : > { %12210 = vmatmul.msk.bf16.gmra.mxu2 %vm374_vm0, %v15246_v27  ;;  %v15269_v45 = vpack.c.bf16 %v7621_v51, %v7620_v49  ;;  %v7373_v51 = vld [vmem:[#allocation3 + $0xb1] sm:$0xff] }
 0x698   : > { %12250 = vmatmul.msk.bf16.gmra.mxu3 %vm374_vm0, %v15248_v0 }
 0x699   : > { %12290 = vmatmul.msk.bf16.gmra.mxu0 %vm374_vm0, %v7897_v28  ;;  %17505 = vst [vmem:[#allocation12_spill] sm:$0xff] %v15269_v45 }
 0x69a   : > { %v6679_v52 = vpop.f32.mrf.mxu2 }
 0x69b   : > { %v6840_v55 = vpop.f32.mrf.mxu3 }
 0x69c   : > { %v6841_v61 = vadd.f32 %v6840_v55, %v6679_v52  ;;  %v7273_v25 = vpop.f32.mrf.mxu1 }
 0x69d   : > { %v15258_v50 = vadd.f32 %v7273_v25, %v15088_v40  ;;  %v15267_v40 = vpack.c.bf16 %v7371_v23, %v7370_v20  ;;  %v7874_v20 = vld [vmem:[#allocation3 + $0xc8] sm:$0xff] }
 0x69e   : > { %v7060_v47 = vpop.f32.mrf.mxu0  ;;  %v15260_v24 = vadd.f32 %v7058_v60, %v6841_v61 }
 0x69f   : > { %12179 = vmatmul.msk.bf16.gmra.mxu1 %vm374_vm0, %v15105_v6 }
 0x6a2   : > { %v6681_v15 = vpop.f32.mrf.mxu2 }
 0x6a3   : > { %v6842_v38 = vpop.f32.mrf.mxu3 }
 0x6a4   : > { %v6843_v11 = vadd.f32 %v6842_v38, %v6681_v15  ;;  %v7275_v17 = vpop.f32.mrf.mxu1  ;;  %v12762_v15 = vld [vmem:[%s17299_s5 + $0xe0] sm:$0xff] }
 0x6a5   : > { %v15265_v30 = vadd.f32 %v7275_v17, %v15113_v29  ;;  %v12763_v29 = vld [vmem:[%s17299_s5 + $0xe8] sm:$0xff] }
 0x6a6   : > { %v7063_v10 = vpop.f32.mrf.mxu0  ;;  %v15271_v60 = vadd.f32 %v7060_v47, %v6843_v11  ;;  %8246 = vmatpush.bf16.msra.mxu1 %v12763_v29  ;;  %v7622_v11 = vld [vmem:[#allocation3 + $0xaa] sm:$0xff] }
 0x6a7   : > { %12211 = vmatmul.msk.bf16.gmra.mxu2 %vm374_vm0, %v15267_v40 }
 0x6a8   : > { %12251 = vmatmul.msk.bf16.gmra.mxu3 %vm374_vm0, %v15269_v45  ;;  %v7625_v45 = vld [vmem:[#allocation3 + $0xca] sm:$0xff] }
 0x6a9   : > { %12291 = vmatmul.msk.bf16.gmra.mxu0 %vm374_vm0, %v7898_v26 }
 0x6aa   : > { %v6684_v28 = vpop.f32.mrf.mxu2  ;;  %8247 = vmatpush.bf16.msra.mxu1 %v12762_v15 }
 0x6ab   : > { %v6845_v52 = vpop.f32.mrf.mxu3 }
 0x6ac   : > { %v6846_v55 = vadd.f32 %v6845_v52, %v6684_v28  ;;  %v7278_v61 = vpop.f32.mrf.mxu1  ;;  %v7873_v52 = vld [vmem:[#allocation3 + $0xc0] sm:$0xff] }
 0x6ad   : > { %v15282_v47 = vadd.f32 %v7278_v61, %v15132_v39  ;;  %v7372_v39 = vld [vmem:[#allocation3 + $0xa9] sm:$0xff]  ;;  %v7899_v61 = vpack.c.bf16 %v7874_v20, %v7873_v52 }
 0x6ae   : > { %v7065_v25 = vpop.f32.mrf.mxu0  ;;  %v15287_v38 = vadd.f32 %v7063_v10, %v6846_v55  ;;  %v15294_v28 = vpack.c.bf16 %v7373_v51, %v7372_v39  ;;  %v15296_v10 = vpack.c.bf16 %v7623_v13, %v7622_v11  ;;  %v7140_v11 = vld [vmem:[#allocation3 + $0x180] sm:$0xff] }
 0x6af   : > { %12180 = vmatmul.msk.bf16.gmra.mxu1 %vm374_vm0, %v15143_v3 }
 0x6b0   : > { %17506 = vst [vmem:[#allocation22_spill] sm:$0xff] %v15296_v10 }
 0x6b2   : > { %v6686_v23 = vpop.f32.mrf.mxu2 }
 0x6b3   : > { %v6847_v49 = vpop.f32.mrf.mxu3 }
 0x6b4   : > { %v6848_v17 = vadd.f32 %v6847_v49, %v6686_v23  ;;  %v7280_v4 = vpop.f32.mrf.mxu1  ;;  %v7141_v49 = vld [vmem:[#allocation3 + $0x188] sm:$0xff] }
 0x6b5   : > { %v15292_v29 = vadd.f32 %v7280_v4, %v15145_v18  ;;  %v12767_v18 = vld [vmem:[%s17299_s5 + $0x108] sm:$0xff]  ;;  %v15311_v20 = vpack.c.bf16 %v7141_v49, %v7140_v11 }
 0x6b6   : > { %v7068_v26 = vpop.f32.mrf.mxu0  ;;  %v15298_v55 = vadd.f32 %v7065_v25, %v6848_v17  ;;  %8496 = vmatpush.bf16.msra.mxu2 %v12767_v18 }
 0x6b7   : > { %12212 = vmatmul.msk.bf16.gmra.mxu2 %vm374_vm0, %v15294_v28 }
 0x6b8   : > { %12252 = vmatmul.msk.bf16.gmra.mxu3 %vm374_vm0, %v15296_v10  ;;  %v7624_v10 = vld [vmem:[#allocation3 + $0xc2] sm:$0xff] }
 0x6b9   : > { %12292 = vmatmul.msk.bf16.gmra.mxu0 %vm374_vm0, %v7899_v61  ;;  %v7375_v61 = vld [vmem:[#allocation3 + $0xc9] sm:$0xff]  ;;  %v15322_v49 = vpack.c.bf16 %v7625_v45, %v7624_v10 }
 0x6ba   : > { %v6689_v15 = vpop.f32.mrf.mxu2 }
 0x6bb   : > { %v6850_v23 = vpop.f32.mrf.mxu3  ;;  %17507 = vst [vmem:[#allocation20_spill] sm:$0xff] %v15322_v49 }
 0x6bc   : > { %v6851_v51 = vadd.f32 %v6850_v23, %v6689_v15  ;;  %v7283_v25 = vpop.f32.mrf.mxu1  ;;  %v7374_v23 = vld [vmem:[#allocation3 + $0xc1] sm:$0xff] }
 0x6bd   : > { %v15309_v17 = vadd.f32 %v7283_v25, %v15156_v5  ;;  %v15320_v5 = vpack.c.bf16 %v7375_v61, %v7374_v23 }
 0x6be   : > { %v7070_v13 = vpop.f32.mrf.mxu0  ;;  %v15313_v4 = vadd.f32 %v7068_v26, %v6851_v51  ;;  %v12384_v26 = vld [vmem:[%s17301_s7 + $0x14] sm:$0xf] }
 0x6bf   : > { %12181 = vmatmul.msk.bf16.gmra.mxu1 %vm374_vm0, %v15311_v20  ;;  %v8819_v25 = vunpack.c.l.b16 %v12384_v26  ;;  %v7626_v26 = vld [vmem:[#allocation3 + $0xda] sm:$0xff] }
 0x6c2   : > { %v6691_v39 = vpop.f32.mrf.mxu2 }
 0x6c3   : > { %v6852_v52 = vpop.f32.mrf.mxu3 }
 0x6c4   : > { %v6853_v18 = vadd.f32 %v6852_v52, %v6691_v39  ;;  %v7285_v15 = vpop.f32.mrf.mxu1 }
 0x6c5   : > { %v15318_v8 = vadd.f32 %v7285_v15, %v15162_v22  ;;  %v8821_v22 = vpack.c.b16 %v8819_v25, %v8819_v25  ;;  %v7627_v25 = vld [vmem:[#allocation3 + $0xe2] sm:$0xff] }
 0x6c6   : > { %v7073_v0 = vpop.f32.mrf.mxu0  ;;  %v15327_v51 = vadd.f32 %v7070_v13, %v6853_v18 }
 0x6c7   : > { %12213 = vmatmul.msk.bf16.gmra.mxu2 %vm374_vm0, %v15320_v5  ;;  %v8873_v11 = vsel %vm8871_vm2, %v8821_v22, 0  ;;  %v7376_v22 = vld [vmem:[#allocation3 + $0xd9] sm:$0xff] }
 0x6c8   : > { %12253 = vmatmul.msk.bf16.gmra.mxu3 %vm374_vm0, %v15322_v49 }
 0x6c9   : > { %12293 = vmatmul.msk.bf16.gmra.mxu0 %vm374_vm0, %v14972_v58  ;;  %8881 = vmatpush.bf16.msra.mxu3 %v8873_v11  ;;  %v7377_v58 = vld [vmem:[#allocation3 + $0xe1] sm:$0xff] }
 0x6ca   : > { %v6694_v45 = vpop.f32.mrf.mxu2  ;;  %v15346_v11 = vpack.c.bf16 %v7377_v58, %v7376_v22 }
 0x6cb   : > { %v6855_v10 = vpop.f32.mrf.mxu3 }
 0x6cc   : > { %v6856_v39 = vadd.f32 %v6855_v10, %v6694_v45  ;;  %v7288_v13 = vpop.f32.mrf.mxu1 }
 0x6cd   : > { %v15337_v61 = vadd.f32 %v7288_v13, %v15170_v33  ;;  %v15348_v33 = vpack.c.bf16 %v7627_v25, %v7626_v26 }
 0x6ce   : > { %v7075_v52 = vpop.f32.mrf.mxu0  ;;  %v15339_v18 = vadd.f32 %v7073_v0, %v6856_v39 }
 0x6cf   : > { %12326 = vmatmul.msk.bf16.vlgmr.msra.gmra.mxu1 %vm374_vm0, %v15177_v37 }
 0x6d2   : > { %v6696_v15 = vpop.f32.mrf.mxu2 }
 0x6d3   : > { %v6857_v23 = vpop.f32.mrf.mxu3 }
 0x6d4   : > { %v6858_v49 = vadd.f32 %v6857_v23, %v6696_v15  ;;  %v7290_v16 = vpop.f32.mrf.mxu1 }
 0x6d5   : > { %v15344_v45 = vadd.f32 %v7290_v16, %v15181_v1  ;;  %v6783_v1 = vadd.f32 %v14965_v21, %v14963_v12  ;;  %v7379_v12 = vld [vmem:[#allocation3 + $0xf9] sm:$0xff] }
 0x6d6   : > { %v7999_v10 = vpop.f32.mrf.mxu0  ;;  %v15350_v0 = vadd.f32 %v7075_v52, %v6858_v49  ;;  %v7628_v21 = vld [vmem:[#allocation3 + $0xf2] sm:$0xff] }
 0x6d7   : > { %12214 = vmatmul.msk.bf16.gmra.mxu2 %vm374_vm0, %v15346_v11  ;;  %v7079_v23 = vadd.f32 %v14956_v53, %v6783_v1 }
 0x6d8   : > { %12254 = vmatmul.msk.bf16.gmra.mxu3 %vm374_vm0, %v15348_v33 }
 0x6d9   : > { %12294 = vmatmul.msk.bf16.gmra.mxu0 %vm374_vm0, %v14993_v44  ;;  %v7329_v44 = vadd.f32 %v15160_v31, %v7079_v23 }
 0x6da   : > { %v7498_v37 = vpop.f32.mrf.mxu2 }
 0x6db   : > { %v7748_v39 = vpop.f32.mrf.mxu3  ;;  %v7578_v16 = vadd.f32 %v7498_v37, %v15154_v54  ;;  %v7629_v54 = vld [vmem:[#allocation3 + $0xfa] sm:$0xff]  ;;  %v7880_v37 = vld [vmem:[#allocation3 + $0x110] sm:$0xff] }
 0x6dc   : > { %v7293_v13 = vpop.f32.mrf.mxu1 }
 0x6dd   : > { %v7828_v15 = vadd.f32 %v7748_v39, %v7578_v16  ;;  %v15362_v49 = vadd.f32 %v7293_v13, %v15191_v46  ;;  %v7378_v46 = vld [vmem:[#allocation3 + $0xf1] sm:$0xff] }
 0x6de   : > { %v8001_v52 = vpop.f32.mrf.mxu0  ;;  %v15373_v1 = vpack.c.bf16 %v7379_v12, %v7378_v46  ;;  %v7631_v46 = vld [vmem:[#allocation3 + $0x112] sm:$0xff] }
 0x6df   : > { %12327 = vmatmul.msk.bf16.gmra.mxu1 %vm374_vm0, %v15198_v7  ;;  %v15367_v58 = vadd.f32 %v7999_v10, %v7828_v15  ;;  %v15375_v7 = vpack.c.bf16 %v7629_v54, %v7628_v21  ;;  %v7879_v10 = vld [vmem:[#allocation3 + $0x108] sm:$0xff] }
 0x6e0   : > { %v7902_v31 = vpack.c.bf16 %v7880_v37, %v7879_v10  ;;  %v7381_v37 = vld [vmem:[#allocation3 + $0x111] sm:$0xff] }
 0x6e2   : > { %v7500_v26 = vpop.f32.mrf.mxu2 }
 0x6e3   : > { %v7750_v25 = vpop.f32.mrf.mxu3  ;;  %v7579_v22 = vadd.f32 %v7500_v26, %v7329_v44 }
 0x6e4   : > { %v7295_v39 = vpop.f32.mrf.mxu1 }
 0x6e5   : > { %v7829_v16 = vadd.f32 %v7750_v25, %v7579_v22  ;;  %v15371_v13 = vadd.f32 %v7295_v39, %v15202_v43  ;;  %v7630_v39 = vld [vmem:[#allocation3 + $0x10a] sm:$0xff] }
 0x6e6   : > { %v8004_v53 = vpop.f32.mrf.mxu0 }
 0x6e7   : > { %12215 = vmatmul.msk.bf16.gmra.mxu2 %vm374_vm0, %v15373_v1  ;;  %v15381_v15 = vadd.f32 %v8001_v52, %v7829_v16 }
 0x6e8   : > { %12255 = vmatmul.msk.bf16.gmra.mxu3 %vm374_vm0, %v15375_v7 }
 0x6e9   : > { %12295 = vmatmul.msk.bf16.gmra.mxu0 %vm374_vm0, %v7902_v31 }
 0x6ea   : > { %v7503_v23 = vpop.f32.mrf.mxu2 }
 0x6eb   : > { %v7753_v43 = vpop.f32.mrf.mxu3  ;;  %v7580_v44 = vadd.f32 %v7503_v23, %v15168_v63  ;;  %v7380_v63 = vld [vmem:[#allocation3 + $0x109] sm:$0xff] }
 0x6ec   : > { %v7298_v26 = vpop.f32.mrf.mxu1 }
 0x6ed   : > { %v7830_v25 = vadd.f32 %v7753_v43, %v7580_v44  ;;  %v15386_v12 = vadd.f32 %v7298_v26, %v15218_v59  ;;  %v15396_v43 = vpack.c.bf16 %v7381_v37, %v7380_v63  ;;  %v15398_v44 = vpack.c.bf16 %v7631_v46, %v7630_v39  ;;  %v7383_v46 = vld [vmem:[#allocation3 + $0x129] sm:$0xff] }
 0x6ee   : > { %v8006_v21 = vpop.f32.mrf.mxu0 }
 0x6ef   : > { %12328 = vmatmul.msk.bf16.gmra.mxu1 %vm374_vm0, %v15225_v32  ;;  %v15390_v54 = vadd.f32 %v8004_v53, %v7830_v25 }
 0x6f2   : > { %v7505_v22 = vpop.f32.mrf.mxu2 }
 0x6f3   : > { %v7755_v52 = vpop.f32.mrf.mxu3  ;;  %v7581_v16 = vadd.f32 %v7505_v22, %v15175_v14  ;;  %v12766_v14 = vld [vmem:[%s17299_s5 + $0x100] sm:$0xff] }
 0x6f4   : > { %v7300_v10 = vpop.f32.mrf.mxu1  ;;  %8497 = vmatpush.bf16.msra.mxu2 %v12766_v14 }
 0x6f5   : > { %v7831_v31 = vadd.f32 %v7755_v52, %v7581_v16  ;;  %v15394_v23 = vadd.f32 %v7300_v10, %v15229_v48  ;;  %v7632_v16 = vld [vmem:[#allocation3 + $0x122] sm:$0xff]  ;;  %v7633_v10 = vld [vmem:[#allocation3 + $0x12a] sm:$0xff] }
 0x6f6   : > { %v8009_v59 = vpop.f32.mrf.mxu0 }
 0x6f7   : > { %12216 = vmatmul.msk.bf16.gmra.mxu2 %vm374_vm0, %v15396_v43  ;;  %v15404_v32 = vadd.f32 %v8006_v21, %v7831_v31 }
 0x6f8   : > { %12256 = vmatmul.msk.bf16.gmra.mxu3 %vm374_vm0, %v15398_v44 }
 0x6f9   : > { %12296 = vmatmul.msk.bf16.gmra.mxu0 %vm374_vm0, %v15045_v57 }
 0x6fa   : > { %v7508_v48 = vpop.f32.mrf.mxu2 }
 0x6fb   : > { %v7758_v53 = vpop.f32.mrf.mxu3  ;;  %v7582_v26 = vadd.f32 %v7508_v48, %v15189_v34  ;;  %v7382_v34 = vld [vmem:[#allocation3 + $0x121] sm:$0xff] }
 0x6fc   : > { %v7303_v25 = vpop.f32.mrf.mxu1 }
 0x6fd   : > { %v7832_v22 = vadd.f32 %v7758_v53, %v7582_v26  ;;  %v15413_v52 = vadd.f32 %v7303_v25, %v15239_v42  ;;  %v15423_v42 = vpack.c.bf16 %v7383_v46, %v7382_v34  ;;  %v15425_v53 = vpack.c.bf16 %v7633_v10, %v7632_v16  ;;  %v7385_v16 = vld [vmem:[#allocation3 + $0x141] sm:$0xff] }
 0x6fe   : > { %v8011_v37 = vpop.f32.mrf.mxu0  ;;  %v7634_v10 = vld [vmem:[#allocation3 + $0x13a] sm:$0xff] }
 0x6ff   : > { %12329 = vmatmul.msk.bf16.gmra.mxu1 %vm374_vm0, %v15246_v27  ;;  %v15417_v21 = vadd.f32 %v8009_v59, %v7832_v22 }
 0x702   : > { %v7510_v57 = vpop.f32.mrf.mxu2 }
 0x703   : > { %v7760_v39 = vpop.f32.mrf.mxu3  ;;  %v7583_v63 = vadd.f32 %v7510_v57, %v15196_v19 }
 0x704   : > { %v7305_v31 = vpop.f32.mrf.mxu1 }
 0x705   : > { %v7833_v14 = vadd.f32 %v7760_v39, %v7583_v63  ;;  %v15421_v48 = vadd.f32 %v7305_v31, %v15250_v56 }
 0x706   : > { %v8014_v19 = vpop.f32.mrf.mxu0 }
 0x707   : > { %12217 = vmatmul.msk.bf16.gmra.mxu2 %vm374_vm0, %v15423_v42  ;;  %v15431_v27 = vadd.f32 %v8011_v37, %v7833_v14 }
 0x708   : > { %12257 = vmatmul.msk.bf16.gmra.mxu3 %vm374_vm0, %v15425_v53 }
 0x709   : > { %12297 = vmatmul.msk.bf16.gmra.mxu0 %vm374_vm0, %v15068_v35  ;;  %v7635_v35 = vld [vmem:[#allocation3 + $0x142] sm:$0xff] }
 0x70a   : > { %v7513_v59 = vpop.f32.mrf.mxu2 }
 0x70b   : > { %v7763_v26 = vpop.f32.mrf.mxu3  ;;  %v7584_v56 = vadd.f32 %v7513_v59, %v15216_v2  ;;  %v7384_v2 = vld [vmem:[#allocation3 + $0x139] sm:$0xff] }
 0x70c   : > { %v7308_v25 = vpop.f32.mrf.mxu1 }
 0x70d   : > { %v7834_v22 = vadd.f32 %v7763_v26, %v7584_v56  ;;  %v15437_v57 = vadd.f32 %v7308_v25, %v15260_v24  ;;  %v15447_v24 = vpack.c.bf16 %v7385_v16, %v7384_v2  ;;  %v15449_v26 = vpack.c.bf16 %v7635_v35, %v7634_v10  ;;  %v7387_v35 = vld [vmem:[#allocation3 + $0x159] sm:$0xff] }
 0x70e   : > { %v8016_v31 = vpop.f32.mrf.mxu0 }
 0x70f   : > { %12330 = vmatmul.msk.bf16.gmra.mxu1 %vm374_vm0, %v15267_v40  ;;  %v15441_v39 = vadd.f32 %v8014_v19, %v7834_v22 }
 0x712   : > { %v7515_v37 = vpop.f32.mrf.mxu2 }
 0x713   : > { %v7765_v46 = vpop.f32.mrf.mxu3  ;;  %v7585_v63 = vadd.f32 %v7515_v37, %v15223_v62 }
 0x714   : > { %v7310_v34 = vpop.f32.mrf.mxu1 }
 0x715   : > { %v7835_v14 = vadd.f32 %v7765_v46, %v7585_v63  ;;  %v15445_v59 = vadd.f32 %v7310_v34, %v15271_v60  ;;  %v7637_v63 = vld [vmem:[#allocation3 + $0x15a] sm:$0xff]  ;;  %v7386_v34 = vld [vmem:[#allocation3 + $0x151] sm:$0xff] }
 0x716   : > { %v8019_v37 = vpop.f32.mrf.mxu0  ;;  %v15475_v2 = vpack.c.bf16 %v7387_v35, %v7386_v34  ;;  %v7639_v35 = vld [vmem:[#allocation3 + $0x172] sm:$0xff] }
 0x717   : > { %12218 = vmatmul.msk.bf16.gmra.mxu2 %vm374_vm0, %v15447_v24  ;;  %v15455_v40 = vadd.f32 %v8016_v31, %v7835_v14 }
 0x718   : > { %12258 = vmatmul.msk.bf16.gmra.mxu3 %vm374_vm0, %v15449_v26 }
 0x719   : > { %12298 = vmatmul.msk.bf16.gmra.mxu0 %vm374_vm0, %v15105_v6  ;;  %v7636_v6 = vld [vmem:[#allocation3 + $0x152] sm:$0xff] }
 0x71a   : > { %v7518_v62 = vpop.f32.mrf.mxu2  ;;  %v15477_v14 = vpack.c.bf16 %v7637_v63, %v7636_v6 }
 0x71b   : > { %v7768_v19 = vpop.f32.mrf.mxu3  ;;  %v7586_v60 = vadd.f32 %v7518_v62, %v15237_v36 }
 0x71c   : > { %v7313_v56 = vpop.f32.mrf.mxu1 }
 0x71d   : > { %v7836_v25 = vadd.f32 %v7768_v19, %v7586_v60  ;;  %v15461_v22 = vadd.f32 %v7313_v56, %v15287_v38 }
 0x71f   : > { %12331 = vmatmul.msk.bf16.gmra.mxu1 %vm374_vm0, %v15294_v28  ;;  %v15465_v46 = vadd.f32 %v8019_v37, %v7836_v25  ;;  %v7389_v37 = vld [vmem:[#allocation3 + $0x171] sm:$0xff] }
 0x722   : > { %v7520_v16 = vpop.f32.mrf.mxu2 }
 0x723   : > { %v15467_v10 = vpop.f32.mrf.mxu3  ;;  %v15470_v31 = vadd.f32 %v7520_v16, %v15244_v41  ;;  %v7638_v16 = vld [vmem:[#allocation3 + $0x16a] sm:$0xff] }
 0x724   : > { %v7315_v36 = vpop.f32.mrf.mxu1 }
 0x725   : > { %v15473_v38 = vadd.f32 %v7315_v36, %v15298_v55 }
 0x727   : > { %12219 = vmatmul.msk.bf16.gmra.mxu2 %vm374_vm0, %v15475_v2 }
 0x728   : > { %12259 = vmatmul.msk.bf16.gmra.mxu3 %vm374_vm0, %v15477_v14 }
 0x729   : > { %12299 = vmatmul.msk.bf16.gmra.mxu0 %vm374_vm0, %v15143_v3 }
 0x72a   : > { %v7523_v41 = vpop.f32.mrf.mxu2 }
 0x72b   : > { %v7773_v28 = vpop.f32.mrf.mxu3  ;;  %v7588_v62 = vadd.f32 %v7523_v41, %v15258_v50  ;;  %v7388_v50 = vld [vmem:[#allocation3 + $0x169] sm:$0xff] }
 0x72c   : > { %v7318_v19 = vpop.f32.mrf.mxu1  ;;  %v15501_v36 = vpack.c.bf16 %v7389_v37, %v7388_v50  ;;  %v7390_v50 = vld [vmem:[#allocation3 + $0x181] sm:$0xff] }
 0x72d   : > { %v15486_v55 = vadd.f32 %v7773_v28, %v7588_v62  ;;  %v15489_v60 = vadd.f32 %v7318_v19, %v15313_v4  ;;  %v15503_v4 = vpack.c.bf16 %v7639_v35, %v7638_v16  ;;  %v7891_v62 = vld [vmem:[#allocation3 + $0x198] sm:$0xff]  ;;  %v7892_v19 = vld [vmem:[#allocation3 + $0x1a0] sm:$0xff]  ;;  %v7391_v16 = vld [vmem:[#allocation3 + $0x189] sm:$0xff] }
 0x72e   : > { %v7641_v35 = vld [vmem:[#allocation3 + $0x18a] sm:$0xff] }
 0x72f   : > { %12332 = vmatmul.msk.bf16.gmra.mxu1 %vm374_vm0, %v15320_v5 }
 0x732   : > { %v7525_v56 = vpop.f32.mrf.mxu2 }
 0x733   : > { %v15493_v25 = vpop.f32.mrf.mxu3  ;;  %v15496_v3 = vadd.f32 %v7525_v56, %v15265_v30 }
 0x734   : > { %v7320_v6 = vpop.f32.mrf.mxu1 }
 0x735   : > { %v15499_v63 = vadd.f32 %v7320_v6, %v15327_v51 }
 0x737   : > { %12220 = vmatmul.msk.bf16.gmra.mxu2 %vm374_vm0, %v15501_v36 }
 0x738   : > { %12260 = vmatmul.msk.bf16.gmra.mxu3 %vm374_vm0, %v15503_v4 }
 0x739   : > { %12300 = vmatmul.msk.bf16.gmra.mxu0 %vm374_vm0, %v15311_v20  ;;  %v7640_v20 = vld [vmem:[#allocation3 + $0x182] sm:$0xff] }
 0x73a   : > { %v7528_v30 = vpop.f32.mrf.mxu2 }
 0x73b   : > { %v7778_v5 = vpop.f32.mrf.mxu3  ;;  %v7590_v34 = vadd.f32 %v7528_v30, %v15282_v47  ;;  %v7908_v30 = vpack.c.bf16 %v7892_v19, %v7891_v62 }
 0x73c   : > { %v7323_v41 = vpop.f32.mrf.mxu1 }
 0x73d   : > { %v15512_v51 = vadd.f32 %v7778_v5, %v7590_v34  ;;  %v15515_v28 = vadd.f32 %v7323_v41, %v15339_v18  ;;  %v15527_v5 = vpack.c.bf16 %v7391_v16, %v7390_v50  ;;  %v12771_v34 = vld [vmem:[%s17301_s7 + $0xc] sm:$0xff] }
 0x73e   : > { %8882 = vmatpush.bf16.msra.mxu3 %v12771_v34 }
 0x73f   : > { %12333 = vmatmul.msk.bf16.gmra.mxu1 %vm374_vm0, %v15346_v11  ;;  %v15529_v11 = vpack.c.bf16 %v7641_v35, %v7640_v20 }
 0x742   : > { %v7530_v56 = vpop.f32.mrf.mxu2 }
 0x743   : > { %v15519_v37 = vpop.f32.mrf.mxu3  ;;  %v15522_v6 = vadd.f32 %v7530_v56, %v15292_v29 }
 0x744   : > { %v7325_v47 = vpop.f32.mrf.mxu1 }
 0x745   : > { %v15525_v18 = vadd.f32 %v7325_v47, %v15350_v0 }
 0x747   : > { %12221 = vmatmul.msk.bf16.gmra.mxu2 %vm374_vm0, %v15527_v5 }
 0x748   : > { %12261 = vmatmul.msk.bf16.gmra.mxu3 %vm374_vm0, %v15529_v11 }
 0x749   : > { %12301 = vmatmul.msk.bf16.gmra.mxu0 %vm374_vm0, %v7908_v30 }
 0x74a   : > { %v7533_v29 = vpop.f32.mrf.mxu2 }
 0x74b   : > { %v7783_v0 = vpop.f32.mrf.mxu3  ;;  %v7592_v41 = vadd.f32 %v7533_v29, %v15309_v17 }
 0x74c   : > { %v8249_v62 = vpop.f32.mrf.mxu1 }
 0x74d   : > { %v15540_v19 = vadd.f32 %v7783_v0, %v7592_v41  ;;  %v15543_v56 = vadd.f32 %v8249_v62, %v15367_v58  ;;  %v17508_v62 = vld [vmem:[#allocation25_spill] sm:$0xff] }
 0x74f   : > { %12334 = vmatmul.msk.bf16.gmra.mxu1 %vm374_vm0, %v15373_v1 }
 0x752   : > { %v7535_v16 = vpop.f32.mrf.mxu2 }
 0x753   : > { %v15547_v20 = vpop.f32.mrf.mxu3  ;;  %v15550_v35 = vadd.f32 %v7535_v16, %v15318_v8 }
 0x754   : > { %v8251_v47 = vpop.f32.mrf.mxu1 }
 0x755   : > { %v15553_v50 = vadd.f32 %v8251_v47, %v15381_v15 }
 0x757   : > { %12366 = vmatmul.msk.bf16.vlgmr.msra.gmra.mxu2 %vm374_vm0, %v15179_v9 }
 0x75a   : > { %v7538_v17 = vpop.f32.mrf.mxu2 }
 0x75b   : > { %v7788_v30 = vpop.f32.mrf.mxu3  ;;  %v7594_v58 = vadd.f32 %v7538_v17, %v15337_v61  ;;  %v8021_v61 = vpop.f32.mrf.mxu0 }
 0x75c   : > { %v8254_v34 = vpop.f32.mrf.mxu1 }
 0x75d   : > { %v15558_v29 = vadd.f32 %v7788_v30, %v7594_v58  ;;  %v15561_v1 = vadd.f32 %v8254_v34, %v15390_v54 }
 0x75f   : > { %12335 = vmatmul.msk.bf16.gmra.mxu1 %vm374_vm0, %v15396_v43 }
 0x762   : > { %v7540_v8 = vpop.f32.mrf.mxu2 }
 0x763   : > { %v15565_v0 = vpop.f32.mrf.mxu3  ;;  %v15568_v15 = vadd.f32 %v7540_v8, %v15344_v45  ;;  %v15583_v45 = vpop.f32.mrf.mxu0 }
 0x764   : > { %v8256_v9 = vpop.f32.mrf.mxu1 }
 0x765   : > { %v15571_v41 = vadd.f32 %v8256_v9, %v15404_v32  ;;  %v17511_v9 = vld [vmem:[#allocation9_spill] sm:$0xff] }
 0x767   : > { %12367 = vmatmul.msk.bf16.gmra.mxu2 %vm374_vm0, %v17508_v62 }
 0x76a   : > { %v7543_v16 = vpop.f32.mrf.mxu2 }
 0x76b   : > { %v7793_v54 = vpop.f32.mrf.mxu3  ;;  %v7596_v47 = vadd.f32 %v7543_v16, %v15362_v49  ;;  %v15595_v16 = vpop.f32.mrf.mxu0 }
 0x76c   : > { %v8259_v17 = vpop.f32.mrf.mxu1 }
 0x76d   : > { %v15576_v43 = vadd.f32 %v7793_v54, %v7596_v47  ;;  %v15579_v30 = vadd.f32 %v8259_v17, %v15417_v21 }
 0x76f   : > { %12336 = vmatmul.msk.bf16.gmra.mxu1 %vm374_vm0, %v15423_v42 }
 0x772   : > { %v7545_v32 = vpop.f32.mrf.mxu2 }
 0x773   : > { %v15585_v58 = vpop.f32.mrf.mxu3  ;;  %v15588_v34 = vadd.f32 %v7545_v32, %v15371_v13 }
 0x774   : > { %17509 = vst [vmem:[#allocation10_spill] sm:$0xff] %v15585_v58  ;;  %v8261_v8 = vpop.f32.mrf.mxu1 }
 0x775   : > { %17510 = vst [vmem:[#allocation26_spill] sm:$0xff] %v15588_v34  ;;  %v15591_v49 = vadd.f32 %v8261_v8, %v15431_v27 }
 0x777   : > { %12368 = vmatmul.msk.bf16.gmra.mxu2 %vm374_vm0, %v17511_v9  ;;  %v15610_v9 = vpop.f32.mrf.mxu0 }
 0x77a   : > { %v7548_v21 = vpop.f32.mrf.mxu2 }
 0x77b   : > { %v7798_v62 = vpop.f32.mrf.mxu3  ;;  %v7598_v42 = vadd.f32 %v7548_v21, %v15386_v12  ;;  %v17515_v21 = vld [vmem:[#allocation17_spill] sm:$0xff] }
 0x77c   : > { %v8264_v54 = vpop.f32.mrf.mxu1 }
 0x77d   : > { %v15598_v47 = vadd.f32 %v7798_v62, %v7598_v42  ;;  %v15601_v17 = vadd.f32 %v8264_v54, %v15441_v39 }
 0x77f   : > { %17512 = vst [vmem:[#allocation23_spill] sm:$0xff] %v15598_v47  ;;  %12337 = vmatmul.msk.bf16.gmra.mxu1 %vm374_vm0, %v15447_v24 }
 0x782   : > { %v7550_v13 = vpop.f32.mrf.mxu2 }
 0x783   : > { %v15605_v27 = vpop.f32.mrf.mxu3  ;;  %v15608_v32 = vadd.f32 %v7550_v13, %v15394_v23  ;;  %v7837_v23 = vadd.f32 %v15467_v10, %v15470_v31  ;;  %v15625_v13 = vpop.f32.mrf.mxu0 }
 0x784   : > { %17513 = vst [vmem:[#allocation24_spill] sm:$0xff] %v15605_v27  ;;  %v8266_v8 = vpop.f32.mrf.mxu1 }
 0x785   : > { %17514 = vst [vmem:[#allocation19_spill] sm:$0xff] %v15608_v32  ;;  %v15613_v12 = vadd.f32 %v8266_v8, %v15455_v40 }
 0x787   : > { %12369 = vmatmul.msk.bf16.gmra.mxu2 %vm374_vm0, %v17515_v21 }
 0x78a   : > { %v7553_v39 = vpop.f32.mrf.mxu2 }
 0x78b   : > { %v7803_v62 = vpop.f32.mrf.mxu3  ;;  %v7600_v42 = vadd.f32 %v7553_v39, %v15413_v52  ;;  %v8088_v52 = vadd.f32 %v8021_v61, %v7837_v23 }
 0x78c   : > { %v8269_v24 = vpop.f32.mrf.mxu1 }
 0x78d   : > { %v15618_v54 = vadd.f32 %v7803_v62, %v7600_v42  ;;  %v15621_v27 = vadd.f32 %v8269_v24, %v15465_v46  ;;  %v17519_v46 = vld [vmem:[#allocation12_spill] sm:$0xff]  ;;  %v15638_v42 = vpop.f32.mrf.mxu0 }
 0x78f   : > { %17516 = vst [vmem:[#allocation32_spill] sm:$0xff] %v15618_v54  ;;  %12338 = vmatmul.msk.bf16.gmra.mxu1 %vm374_vm0, %v15475_v2 }
 0x792   : > { %v7555_v40 = vpop.f32.mrf.mxu2 }
 0x793   : > { %v15629_v8 = vpop.f32.mrf.mxu3  ;;  %v15632_v21 = vadd.f32 %v7555_v40, %v15421_v48 }
 0x794   : > { %17517 = vst [vmem:[#allocation34_spill] sm:$0xff] %v15629_v8  ;;  %v8271_v39 = vpop.f32.mrf.mxu1 }
 0x795   : > { %17518 = vst [vmem:[#allocation33_spill] sm:$0xff] %v15632_v21  ;;  %v15634_v62 = vadd.f32 %v8271_v39, %v8088_v52  ;;  %v15649_v23 = vpop.f32.mrf.mxu0  ;;  %v17523_v39 = vld [vmem:[#allocation22_spill] sm:$0xff] }
 0x797   : > { %12370 = vmatmul.msk.bf16.gmra.mxu2 %vm374_vm0, %v17519_v46 }
 0x79a   : > { %v7558_v10 = vpop.f32.mrf.mxu2 }
 0x79b   : > { %v7808_v31 = vpop.f32.mrf.mxu3  ;;  %v7602_v24 = vadd.f32 %v7558_v10, %v15437_v57 }
 0x79c   : > { %v15641_v2 = vpop.f32.mrf.mxu1 }
 0x79d   : > { %v15643_v54 = vadd.f32 %v7808_v31, %v7602_v24 }
 0x79f   : > { %17520 = vst [vmem:[#allocation28_spill] sm:$0xff] %v15643_v54  ;;  %12339 = vmatmul.msk.bf16.gmra.mxu1 %vm374_vm0, %v15501_v36  ;;  %v15661_v36 = vpop.f32.mrf.mxu0  ;;  %v12427_v54 = vld [vmem:[%s17301_s7 + $0x20] sm:$0xf] }
 0x7a0   : > { %v9170_v21 = vunpack.c.l.b16 %v12427_v54  ;;  %v12770_v54 = vld [vmem:[%s17301_s7] sm:$0xff] }
 0x7a2   : > { %v7560_v48 = vpop.f32.mrf.mxu2  ;;  %v9172_v58 = vpack.c.b16 %v9170_v21, %v9170_v21 }
 0x7a3   : > { %v15647_v61 = vpop.f32.mrf.mxu3  ;;  %v15652_v40 = vadd.f32 %v7560_v48, %v15445_v59 }
 0x7a4   : > { %17521 = vst [vmem:[#allocation36_spill] sm:$0xff] %v15647_v61  ;;  %v15654_v52 = vpop.f32.mrf.mxu1 }
 0x7a5   : > { %17522 = vst [vmem:[#allocation29_spill] sm:$0xff] %v15652_v40 }
 0x7a7   : > { %12371 = vmatmul.msk.bf16.gmra.mxu2 %vm374_vm0, %v17523_v39  ;;  %v15674_v40 = vpop.f32.mrf.mxu0 }
 0x7aa   : > { %v7563_v57 = vpop.f32.mrf.mxu2 }
 0x7ab   : > { %v7813_v46 = vpop.f32.mrf.mxu3  ;;  %v7604_v10 = vadd.f32 %v7563_v57, %v15461_v22  ;;  %v17527_v22 = vld [vmem:[#allocation20_spill] sm:$0xff] }
 0x7ac   : > { %v15659_v31 = vpop.f32.mrf.mxu1  ;;  %v8141_v57 = vld [vmem:[#allocation3 + $0x199] sm:$0xff] }
 0x7ad   : > { %v15663_v24 = vadd.f32 %v7813_v46, %v7604_v10  ;;  %v8142_v46 = vld [vmem:[#allocation3 + $0x1a1] sm:$0xff]  ;;  %v15678_v10 = vld [vmem:[#allocation2] sm:$0xff] }
 0x7ae   : > { %417 = vst.msk [vmem:[#allocation4] sm:$0xff] %vm416_vm3, %v15678_v10 }
 0x7af   : > { %17524 = vst [vmem:[#allocation31_spill] sm:$0xff] %v15663_v24  ;;  %12340 = vmatmul.msk.bf16.gmra.mxu1 %vm374_vm0, %v15527_v5 }
 0x7b0   : > { %418 = vst.msk [vmem:[#allocation4 + $0x8] sm:$0xff] %vm416_vm3, %v15678_v10 }
 0x7b1   : > { %419 = vst.msk [vmem:[#allocation4 + $0x10] sm:$0xff] %vm416_vm3, %v15678_v10 }
 0x7b2   : > { %v7565_v59 = vpop.f32.mrf.mxu2  ;;  %421 = vst.msk [vmem:[#allocation4 + $0x198] sm:$0xff] %vm416_vm3, %v15678_v10 }
 0x7b3   : > { %v15667_v48 = vpop.f32.mrf.mxu3  ;;  %v15670_v61 = vadd.f32 %v7565_v59, %v15473_v38  ;;  %422 = vst.msk [vmem:[#allocation4 + $0x1a0] sm:$0xff] %vm416_vm3, %v15678_v10 }
 0x7b4   : > { %17525 = vst [vmem:[#allocation27_spill] sm:$0xff] %v15667_v48  ;;  %v15672_v39 = vpop.f32.mrf.mxu1  ;;  %v8158_v48 = vpack.c.bf16 %v8142_v46, %v8141_v57  ;;  %v15701_v46 = vpop.f32.mrf.mxu0 }
 0x7b5   : > { %17526 = vst [vmem:[#allocation5_spill] sm:$0xff] %v15670_v61 }
 0x7b6   : > { %423 = vst.msk [vmem:[#allocation4 + $0x1a8] sm:$0xff] %vm416_vm3, %v15678_v10 }
 0x7b7   : > { %12372 = vmatmul.msk.bf16.gmra.mxu2 %vm374_vm0, %v17527_v22  ;;  %426 = vst.msk [vmem:[#allocation4 + $0x18] sm:$0x1] %vm425_vm4, %v15678_v10 }
 0x7b8   : > { %v8763_v24 = vld [vmem:[#allocation4 + $0x9] sm:$0xff]  ;;  %427 = vst.msk [vmem:[#allocation4 + $0x30] sm:$0x1] %vm425_vm4, %v15678_v10 }
 0x7b9   : > { %428 = vst.msk [vmem:[#allocation4 + $0x48] sm:$0x1] %vm425_vm4, %v15678_v10 }
 0x7ba   : > { %v7568_v38 = vpop.f32.mrf.mxu2  ;;  %429 = vst.msk [vmem:[#allocation4 + $0x60] sm:$0x1] %vm425_vm4, %v15678_v10 }
 0x7bb   : > { %v7818_v5 = vpop.f32.mrf.mxu3  ;;  %v7606_v59 = vadd.f32 %v7568_v38, %v15489_v60  ;;  %v8761_v60 = vld [vmem:[%s17301_s7 + $0x8] sm:$0xf]  ;;  %430 = vst.msk [vmem:[#allocation4 + $0x78] sm:$0x1] %vm425_vm4, %v15678_v10 }
 0x7bc   : > { %v15689_v22 = vpop.f32.mrf.mxu1  ;;  %v8969_v57 = vunpack.c.l.b16 %v8761_v60  ;;  %v8762_v38 = vld [vmem:[#allocation4 + $0x1] sm:$0xff]  ;;  %v12450_v60 = vld [vmem:[%s17301_s7 + $0x2c] sm:$0xf]  ;;  %431 = vst.msk [vmem:[#allocation4 + $0x90] sm:$0x1] %vm425_vm4, %v15678_v10 }
 0x7bd   : > { %v15693_v61 = vadd.f32 %v7818_v5, %v7606_v59  ;;  %v8794_v8 = vpack.c.bf16 %v8763_v24, %v8762_v38  ;;  %v9403_v34 = vunpack.c.l.b16 %v12450_v60  ;;  %v8711_v24 = vld [vmem:[#allocation4] sm:$0xff]  ;;  %432 = vst.msk [vmem:[#allocation4 + $0xa8] sm:$0x1] %vm425_vm4, %v15678_v10 }
 0x7be   : > { %433 = vst.msk [vmem:[#allocation4 + $0xc0] sm:$0x1] %vm425_vm4, %v15678_v10 }
 0x7bf   : > { %17528 = vst [vmem:[#allocation7_spill] sm:$0xff] %v15693_v61  ;;  %12341 = vmatmul.msk.bf16.gmra.mxu1 %vm374_vm0, %v8158_v48  ;;  %v8971_v61 = vpack.c.b16 %v8969_v57, %v8969_v57  ;;  %12389 = vmatmul.msk.bf16.vlgmr.msra.gmra.mxu3 %vm416_vm3, %v8794_v8  ;;  %v9223_v57 = vsel %vm8871_vm2, %v9172_v58, 0  ;;  %v9405_v38 = vpack.c.b16 %v9403_v34, %v9403_v34  ;;  %v12772_v8 = vld [vmem:[%s17301_s7 + $0x18] sm:$0xff] }
 0x7c0   : > { %9231 = vmatpush.bf16.msrb.mxu1 %v9223_v57  ;;  %v12473_v58 = vld [vmem:[%s17301_s7 + $0x38] sm:$0xf]  ;;  %434 = vst.msk [vmem:[#allocation4 + $0xd8] sm:$0x1] %vm425_vm4, %v15678_v10 }
 0x7c1   : > { %v9022_v47 = vsel %vm8871_vm2, %v8971_v61, 0  ;;  %v9113_v61 = vld [vmem:[#allocation4 + $0x2] sm:$0xff]  ;;  %v9636_v60 = vunpack.c.l.b16 %v12473_v58  ;;  %435 = vst.msk [vmem:[#allocation4 + $0xf0] sm:$0x1] %vm425_vm4, %v15678_v10 }
 0x7c2   : > { %v7570_v5 = vpop.f32.mrf.mxu2  ;;  %9030 = vmatpush.bf16.msrb.mxu0 %v9022_v47  ;;  %v9456_v47 = vsel %vm8871_vm2, %v9405_v38, 0  ;;  %436 = vst.msk [vmem:[#allocation4 + $0x108] sm:$0x1] %vm425_vm4, %v15678_v10 }
 0x7c3   : > { %v15706_v59 = vpop.f32.mrf.mxu3  ;;  %v15709_v48 = vadd.f32 %v7570_v5, %v15499_v63  ;;  %v8712_v63 = vld [vmem:[#allocation4 + $0x8] sm:$0xff]  ;;  %9464 = vmatpush.bf16.msrb.mxu2 %v9456_v47  ;;  %437 = vst.msk [vmem:[#allocation4 + $0x120] sm:$0x1] %vm425_vm4, %v15678_v10 }
 0x7c4   : > { %17529 = vst [vmem:[#allocation30_spill] sm:$0xff] %v15706_v59  ;;  %v15714_v32 = vpop.f32.mrf.mxu1  ;;  %v8743_v21 = vpack.c.bf16 %v8712_v63, %v8711_v24  ;;  %v9114_v5 = vld [vmem:[#allocation4 + $0xa] sm:$0xff]  ;;  %v15731_v59 = vpop.f32.mrf.mxu0  ;;  %9232 = vmatpush.bf16.msrb.mxu1 %v12772_v8 }
 0x7c5   : > { %17530 = vst [vmem:[#allocation8_spill] sm:$0xff] %v15709_v48  ;;  %v9145_v57 = vpack.c.bf16 %v9114_v5, %v9113_v61 }
 0x7c6   : > { %9031 = vmatpush.bf16.msrb.mxu0 %v12770_v54  ;;  %v9638_v54 = vpack.c.b16 %v9636_v60, %v9636_v60  ;;  %438 = vst.msk [vmem:[#allocation4 + $0x138] sm:$0x1] %vm425_vm4, %v15678_v10 }
 0x7c7   : > { %12373 = vmatmul.msk.bf16.gmra.mxu2 %vm374_vm0, %v15348_v33  ;;  %439 = vst.msk [vmem:[#allocation4 + $0x150] sm:$0x1] %vm425_vm4, %v15678_v10 }
 0x7c8   : > { %v9689_v47 = vsel %vm8871_vm2, %v9638_v54, 0  ;;  %440 = vst.msk [vmem:[#allocation4 + $0x168] sm:$0x1] %vm425_vm4, %v15678_v10 }
 0x7c9   : > { %12409 = vmatmul.msk.bf16.vlgmr.msrb.gmra.mxu0 %vm416_vm3, %v8743_v21  ;;  %9697 = vmatpush.bf16.msrb.mxu3 %v9689_v47  ;;  %441 = vst.msk [vmem:[#allocation4 + $0x180] sm:$0x1] %vm425_vm4, %v15678_v10 }
 0x7ca   : > { %v7573_v34 = vpop.f32.mrf.mxu2  ;;  %442 = vst.msk [vmem:[#allocation4 + $0x29] sm:$0x1] %vm425_vm4, %v15678_v10 }
 0x7cb   : > { %v7608_v33 = vadd.f32 %v7573_v34, %v15515_v28  ;;  %v7823_v24 = vpop.f32.mrf.mxu3  ;;  %443 = vst.msk [vmem:[#allocation4 + $0x41] sm:$0x1] %vm425_vm4, %v15678_v10 }
 0x7cc   : > { %v15734_v63 = vpop.f32.mrf.mxu1  ;;  %v15764_v61 = vpop.f32.mrf.mxu0  ;;  %444 = vst.msk [vmem:[#allocation4 + $0x59] sm:$0x1] %vm425_vm4, %v15678_v10 }
 0x7cd   : > { %v15739_v38 = vadd.f32 %v7823_v24, %v7608_v33  ;;  %445 = vst.msk [vmem:[#allocation4 + $0x71] sm:$0x1] %vm425_vm4, %v15678_v10 }
 0x7ce   : > { %446 = vst.msk [vmem:[#allocation4 + $0x89] sm:$0x1] %vm425_vm4, %v15678_v10 }
 0x7cf   : > { %17531 = vst [vmem:[#allocation6_spill] sm:$0xff] %v15739_v38  ;;  %12432 = vmatmul.msk.bf16.vlgmr.msrb.gmra.mxu1 %vm416_vm3, %v9145_v57 }
 0x7d0   : > { %447 = vst.msk [vmem:[#allocation4 + $0xa1] sm:$0x1] %vm425_vm4, %v15678_v10 }
 0x7d1   : > { %448 = vst.msk [vmem:[#allocation4 + $0xb9] sm:$0x1] %vm425_vm4, %v15678_v10 }
 0x7d2   : > { %v7575_v28 = vpop.f32.mrf.mxu2  ;;  %449 = vst.msk [vmem:[#allocation4 + $0xd1] sm:$0x1] %vm425_vm4, %v15678_v10 }
 0x7d3   : > { %v15756_v8 = vadd.f32 %v7575_v28, %v15525_v18  ;;  %v15779_v18 = vld [vmem:[%s17300_s6] ss:$0 sm:$0xff]  ;;  %450 = vst.msk [vmem:[#allocation4 + $0xe9] sm:$0x1] %vm425_vm4, %v15678_v10 }
 0x7d4   : > { %v15760_v21 = vpop.f32.mrf.mxu1  ;;  %v15797_v60 = vpop.f32.mrf.mxu0  ;;  %451 = vst.msk [vmem:[#allocation4 + $0x101] sm:$0x1] %vm425_vm4, %v15678_v10 }
 0x7d5   : > { %17532 = vst [vmem:[#allocation11_spill] sm:$0xff] %v15756_v8 }
 0x7d6   : > { %452 = vst.msk [vmem:[#allocation4 + $0x119] sm:$0x1] %vm425_vm4, %v15678_v10 }
 0x7d7   : > { %12374 = vmatmul.msk.bf16.gmra.mxu2 %vm374_vm0, %v15375_v7  ;;  %453 = vst.msk [vmem:[#allocation4 + $0x131] sm:$0x1] %vm425_vm4, %v15678_v10 }
 0x7d8   : > { %454 = vst.msk [vmem:[#allocation4 + $0x149] sm:$0x1] %vm425_vm4, %v15678_v10 }
 0x7d9   : > { %455 = vst.msk [vmem:[#allocation4 + $0x161] sm:$0x1] %vm425_vm4, %v15678_v10 }
 0x7da   : > { %v8499_v5 = vpop.f32.mrf.mxu2  ;;  %456 = vst.msk [vmem:[#allocation4 + $0x179] sm:$0x1] %vm425_vm4, %v15678_v10 }
 0x7db   : > { %v8579_v7 = vadd.f32 %v8499_v5, %v15543_v56  ;;  %457 = vst.msk [vmem:[#allocation4 + $0x191] sm:$0x1] %vm425_vm4, %v15678_v10 }
 0x7dc   : > { %v15788_v58 = vpop.f32.mrf.mxu1 }
 0x7dd   : > { %v8615_v34 = vadd.f32 %v15779_v18, %v8579_v7 }
 0x7df   : > { %v8647_v33 = vmax.f32 %v8615_v34, 0.0 }
 0x7e1   : > { %8679 = vst.msk [vmem:[#allocation4 + $0x19] sm:$0xff] %vm416_vm3, %v8647_v33 }
 0x7e2   : > { %v8501_v56 = vpop.f32.mrf.mxu2 }
 0x7e3   : > { %v8580_v57 = vadd.f32 %v8501_v56, %v15553_v50  ;;  %v15824_v50 = vpop.f32.mrf.mxu0 }
 0x7e4   : > { %v15809_v24 = vpop.f32.mrf.mxu1  ;;  %17533 = vst [vmem:[#allocation16_spill] sm:$0xff] %v15824_v50 }
 0x7e5   : > { %v8616_v54 = vadd.f32 %v15779_v18, %v8580_v57 }
 0x7e7   : > { %v8648_v47 = vmax.f32 %v8616_v54, 0.0  ;;  %12375 = vmatmul.msk.bf16.gmra.mxu2 %vm374_vm0, %v15398_v44 }
 0x7e8   : > { %v8764_v33 = vld [vmem:[#allocation4 + $0x19] sm:$0xff] }
 0x7e9   : > { %8680 = vst.msk [vmem:[#allocation4 + $0x21] sm:$0xff] %vm416_vm3, %v8648_v47  ;;  %v8713_v56 = vld [vmem:[#allocation4 + $0x18] sm:$0xff] }
 0x7ea   : > { %v8504_v28 = vpop.f32.mrf.mxu2 }
 0x7eb   : > { %v8581_v5 = vadd.f32 %v8504_v28, %v15561_v1  ;;  %v15844_v50 = vpop.f32.mrf.mxu0 }
 0x7ec   : > { %v15832_v44 = vpop.f32.mrf.mxu1  ;;  %17535 = vst [vmem:[#allocation13_spill] sm:$0xff] %v15844_v50 }
 0x7ed   : > { %v8617_v7 = vadd.f32 %v15779_v18, %v8581_v5 }
 0x7ef   : > { %v8649_v34 = vmax.f32 %v8617_v7, 0.0 }
 0x7f0   : > { %v8765_v57 = vld [vmem:[#allocation4 + $0x21] sm:$0xff] }
 0x7f1   : > { %v8714_v54 = vld [vmem:[#allocation4 + $0x20] sm:$0xff]  ;;  %8681 = vst.msk [vmem:[#allocation4 + $0x31] sm:$0xff] %vm416_vm3, %v8649_v34  ;;  %v8795_v1 = vpack.c.bf16 %v8765_v57, %v8764_v33 }
 0x7f2   : > { %v9115_v47 = vld [vmem:[#allocation4 + $0x1a] sm:$0xff]  ;;  %v15840_v28 = vpack.c.bf16 %v8714_v54, %v8713_v56  ;;  %v9116_v8 = vld [vmem:[#allocation4 + $0x22] sm:$0xff]  ;;  %v8506_v38 = vpop.f32.mrf.mxu2 }
 0x7f3   : > { %v15842_v48 = vpack.c.bf16 %v9116_v8, %v9115_v47  ;;  %v8582_v5 = vadd.f32 %v8506_v38, %v15571_v41  ;;  %12390 = vmatmul.msk.bf16.gmra.mxu3 %vm416_vm3, %v8795_v1  ;;  %v15861_v33 = vpop.f32.mrf.mxu0 }
 0x7f4   : > { %12410 = vmatmul.msk.bf16.gmra.mxu0 %vm416_vm3, %v15840_v28  ;;  %v15852_v10 = vpop.f32.mrf.mxu1  ;;  %17536 = vst [vmem:[#allocation14_spill] sm:$0xff] %v15861_v33 }
 0x7f5   : > { %17534 = vst [vmem:[#allocation15_spill] sm:$0xff] %v15842_v48  ;;  %12433 = vmatmul.msk.bf16.gmra.mxu1 %vm416_vm3, %v15842_v48  ;;  %v8618_v7 = vadd.f32 %v15779_v18, %v8582_v5 }
 0x7f7   : > { %v8650_v34 = vmax.f32 %v8618_v7, 0.0  ;;  %12376 = vmatmul.msk.bf16.gmra.mxu2 %vm374_vm0, %v15425_v53 }
 0x7f8   : > { %v8766_v54 = vld [vmem:[#allocation4 + $0x31] sm:$0xff] }
 0x7f9   : > { %8682 = vst.msk [vmem:[#allocation4 + $0x39] sm:$0xff] %vm416_vm3, %v8650_v34  ;;  %v8715_v47 = vld [vmem:[#allocation4 + $0x30] sm:$0xff] }
 0x7fa   : > { %v8509_v8 = vpop.f32.mrf.mxu2 }
 0x7fb   : > { %v8583_v41 = vadd.f32 %v8509_v8, %v15579_v30 }
 0x7fc   : > { %v15859_v38 = vpop.f32.mrf.mxu1 }
 0x7fd   : > { %v8619_v56 = vadd.f32 %v15779_v18, %v8583_v41 }
 0x7ff   : > { %v8651_v57 = vmax.f32 %v8619_v56, 0.0 }
 0x800   : > { %v8767_v1 = vld [vmem:[#allocation4 + $0x39] sm:$0xff] }
 0x801   : > { %v8716_v5 = vld [vmem:[#allocation4 + $0x38] sm:$0xff]  ;;  %8683 = vst.msk [vmem:[#allocation4 + $0x49] sm:$0xff] %vm416_vm3, %v8651_v57  ;;  %v8796_v53 = vpack.c.bf16 %v8767_v1, %v8766_v54  ;;  %v15875_v57 = vpop.f32.mrf.mxu0 }
 0x802   : > { %v9117_v7 = vld [vmem:[#allocation4 + $0x32] sm:$0xff]  ;;  %v15865_v48 = vpack.c.bf16 %v8716_v5, %v8715_v47  ;;  %v9118_v34 = vld [vmem:[#allocation4 + $0x3a] sm:$0xff]  ;;  %v8511_v50 = vpop.f32.mrf.mxu2  ;;  %17537 = vst [vmem:[#allocation21_spill] sm:$0xff] %v15875_v57 }
 0x803   : > { %v9147_v30 = vpack.c.bf16 %v9118_v34, %v9117_v7  ;;  %v8584_v8 = vadd.f32 %v8511_v50, %v15591_v49  ;;  %12391 = vmatmul.msk.bf16.gmra.mxu3 %vm416_vm3, %v8796_v53 }
 0x804   : > { %12411 = vmatmul.msk.bf16.gmra.mxu0 %vm416_vm3, %v15865_v48  ;;  %v15872_v41 = vpop.f32.mrf.mxu1 }
 0x805   : > { %12434 = vmatmul.msk.bf16.gmra.mxu1 %vm416_vm3, %v9147_v30  ;;  %v8620_v56 = vadd.f32 %v15779_v18, %v8584_v8 }
 0x807   : > { %v8652_v54 = vmax.f32 %v8620_v56, 0.0  ;;  %12377 = vmatmul.msk.bf16.gmra.mxu2 %vm374_vm0, %v15449_v26 }
 0x808   : > { %v8768_v7 = vld [vmem:[#allocation4 + $0x49] sm:$0xff] }
 0x809   : > { %8684 = vst.msk [vmem:[#allocation4 + $0x51] sm:$0xff] %vm416_vm3, %v8652_v54  ;;  %v8717_v53 = vld [vmem:[#allocation4 + $0x48] sm:$0xff]  ;;  %v15884_v57 = vpop.f32.mrf.mxu0 }
 0x80a   : > { %v8514_v49 = vpop.f32.mrf.mxu2  ;;  %17538 = vst [vmem:[#allocation18_spill] sm:$0xff] %v15884_v57 }
 0x80b   : > { %v8585_v50 = vadd.f32 %v8514_v49, %v15601_v17 }
 0x80c   : > { %v15881_v47 = vpop.f32.mrf.mxu1 }
 0x80d   : > { %v8621_v1 = vadd.f32 %v15779_v18, %v8585_v50 }
 0x80f   : > { %v8653_v5 = vmax.f32 %v8621_v1, 0.0 }
 0x810   : > { %v8769_v34 = vld [vmem:[#allocation4 + $0x51] sm:$0xff] }
 0x811   : > { %v8718_v30 = vld [vmem:[#allocation4 + $0x50] sm:$0xff]  ;;  %8685 = vst.msk [vmem:[#allocation4 + $0x61] sm:$0xff] %vm416_vm3, %v8653_v5  ;;  %v8797_v26 = vpack.c.bf16 %v8769_v34, %v8768_v7 }
 0x812   : > { %v9119_v8 = vld [vmem:[#allocation4 + $0x4a] sm:$0xff]  ;;  %v15887_v56 = vpack.c.bf16 %v8718_v30, %v8717_v53  ;;  %v9120_v54 = vld [vmem:[#allocation4 + $0x52] sm:$0xff]  ;;  %v8516_v33 = vpop.f32.mrf.mxu2 }
 0x813   : > { %v15889_v17 = vpack.c.bf16 %v9120_v54, %v9119_v8  ;;  %v8586_v49 = vadd.f32 %v8516_v33, %v15613_v12  ;;  %12392 = vmatmul.msk.bf16.gmra.mxu3 %vm416_vm3, %v8797_v26  ;;  %v15903_v12 = vpop.f32.mrf.mxu0 }
 0x814   : > { %12412 = vmatmul.msk.bf16.gmra.mxu0 %vm416_vm3, %v15887_v56  ;;  %v15897_v50 = vpop.f32.mrf.mxu1  ;;  %17540 = vst [vmem:[#allocation38_spill] sm:$0xff] %v15903_v12 }
 0x815   : > { %17539 = vst [vmem:[#allocation35_spill] sm:$0xff] %v15889_v17  ;;  %12435 = vmatmul.msk.bf16.gmra.mxu1 %vm416_vm3, %v15889_v17  ;;  %v8622_v1 = vadd.f32 %v15779_v18, %v8586_v49 }
 0x817   : > { %v8654_v5 = vmax.f32 %v8622_v1, 0.0  ;;  %12378 = vmatmul.msk.bf16.gmra.mxu2 %vm374_vm0, %v15477_v14 }
 0x818   : > { %v8770_v8 = vld [vmem:[#allocation4 + $0x61] sm:$0xff] }
 0x819   : > { %8686 = vst.msk [vmem:[#allocation4 + $0x69] sm:$0xff] %vm416_vm3, %v8654_v5  ;;  %v8719_v26 = vld [vmem:[#allocation4 + $0x60] sm:$0xff] }
 0x81a   : > { %v8519_v7 = vpop.f32.mrf.mxu2 }
 0x81b   : > { %v8587_v33 = vadd.f32 %v8519_v7, %v15621_v27 }
 0x81c   : > { %v15906_v53 = vpop.f32.mrf.mxu1 }
 0x81d   : > { %v8623_v34 = vadd.f32 %v15779_v18, %v8587_v33  ;;  %v15922_v33 = vpop.f32.mrf.mxu0 }
 0x81f   : > { %v8655_v30 = vmax.f32 %v8623_v34, 0.0 }
 0x820   : > { %v8771_v54 = vld [vmem:[#allocation4 + $0x69] sm:$0xff] }
 0x821   : > { %v8720_v49 = vld [vmem:[#allocation4 + $0x68] sm:$0xff]  ;;  %8687 = vst.msk [vmem:[#allocation4 + $0x79] sm:$0xff] %vm416_vm3, %v8655_v30  ;;  %v8798_v14 = vpack.c.bf16 %v8771_v54, %v8770_v8  ;;  %v8089_v30 = vadd.f32 %v15583_v45, %v15486_v55 }
 0x822   : > { %v9121_v1 = vld [vmem:[#allocation4 + $0x62] sm:$0xff]  ;;  %v15910_v17 = vpack.c.bf16 %v8720_v49, %v8719_v26  ;;  %v9122_v5 = vld [vmem:[#allocation4 + $0x6a] sm:$0xff]  ;;  %v8521_v57 = vpop.f32.mrf.mxu2  ;;  %v7839_v26 = vadd.f32 %v15493_v25, %v15496_v3 }
 0x823   : > { %v15912_v12 = vpack.c.bf16 %v9122_v5, %v9121_v1  ;;  %v8588_v27 = vadd.f32 %v8521_v57, %v15634_v62  ;;  %12393 = vmatmul.msk.bf16.gmra.mxu3 %vm416_vm3, %v8798_v14  ;;  %v8339_v62 = vadd.f32 %v15641_v2, %v8089_v30 }
 0x824   : > { %12413 = vmatmul.msk.bf16.gmra.mxu0 %vm416_vm3, %v15910_v17  ;;  %v15920_v7 = vpop.f32.mrf.mxu1  ;;  %v8090_v14 = vadd.f32 %v15595_v16, %v7839_v26 }
 0x825   : > { %12436 = vmatmul.msk.bf16.gmra.mxu1 %vm416_vm3, %v15912_v12  ;;  %v8624_v34 = vadd.f32 %v15779_v18, %v8588_v27  ;;  %v15937_v55 = vpop.f32.mrf.mxu0 }
 0x826   : > { %v8340_v30 = vadd.f32 %v15654_v52, %v8090_v14 }
 0x827   : > { %v8656_v8 = vmax.f32 %v8624_v34, 0.0  ;;  %12379 = vmatmul.msk.bf16.gmra.mxu2 %vm374_vm0, %v15503_v4 }
 0x828   : > { %v8772_v5 = vld [vmem:[#allocation4 + $0x79] sm:$0xff] }
 0x829   : > { %8688 = vst.msk [vmem:[#allocation4 + $0x81] sm:$0xff] %vm416_vm3, %v8656_v8  ;;  %v8721_v4 = vld [vmem:[#allocation4 + $0x78] sm:$0xff] }
 0x82a   : > { %v8524_v57 = vpop.f32.mrf.mxu2 }
 0x82b   : > { %v8589_v54 = vadd.f32 %v8524_v57, %v8339_v62 }
 0x82c   : > { %v15933_v49 = vpop.f32.mrf.mxu1 }
 0x82d   : > { %v8625_v1 = vadd.f32 %v15779_v18, %v8589_v54  ;;  %v8091_v54 = vadd.f32 %v15610_v9, %v15512_v51 }
 0x82f   : > { %v8657_v45 = vmax.f32 %v8625_v1, 0.0  ;;  %v15958_v1 = vpop.f32.mrf.mxu0 }
 0x830   : > { %v8773_v27 = vld [vmem:[#allocation4 + $0x81] sm:$0xff] }
 0x831   : > { %v8722_v2 = vld [vmem:[#allocation4 + $0x80] sm:$0xff]  ;;  %8689 = vst.msk [vmem:[#allocation4 + $0x91] sm:$0xff] %vm416_vm3, %v8657_v45  ;;  %v15941_v25 = vpack.c.bf16 %v8773_v27, %v8772_v5  ;;  %v8341_v45 = vadd.f32 %v15659_v31, %v8091_v54  ;;  %v7841_v27 = vadd.f32 %v15519_v37, %v15522_v6 }
 0x832   : > { %v9123_v34 = vld [vmem:[#allocation4 + $0x7a] sm:$0xff]  ;;  %v15943_v3 = vpack.c.bf16 %v8722_v2, %v8721_v4  ;;  %v9124_v8 = vld [vmem:[#allocation4 + $0x82] sm:$0xff]  ;;  %v8526_v62 = vpop.f32.mrf.mxu2 }
 0x833   : > { %v15945_v57 = vpack.c.bf16 %v9124_v8, %v9123_v34  ;;  %v8590_v16 = vadd.f32 %v8526_v62, %v8340_v30  ;;  %12394 = vmatmul.msk.bf16.gmra.mxu3 %vm416_vm3, %v15941_v25  ;;  %v12773_v5 = vld [vmem:[%s17301_s7 + $0x24] sm:$0xff]  ;;  %v8392_v62 = vld [vmem:[#allocation3 + $0x1a2] sm:$0xff] }
 0x834   : > { %12414 = vmatmul.msk.bf16.gmra.mxu0 %vm416_vm3, %v15943_v3  ;;  %v15953_v52 = vpop.f32.mrf.mxu1  ;;  %9465 = vmatpush.bf16.msrb.mxu2 %v12773_v5  ;;  %v8391_v34 = vld [vmem:[#allocation3 + $0x19a] sm:$0xff] }
 0x835   : > { %17541 = vst [vmem:[#allocation37_spill] sm:$0xff] %v15945_v57  ;;  %12437 = vmatmul.msk.bf16.gmra.mxu1 %vm416_vm3, %v15945_v57  ;;  %v8626_v26 = vadd.f32 %v15779_v18, %v8590_v16  ;;  %v15974_v57 = vpop.f32.mrf.mxu3 }
 0x837   : > { %v8658_v14 = vmax.f32 %v8626_v26, 0.0  ;;  %12380 = vmatmul.msk.bf16.gmra.mxu2 %vm374_vm0, %v15529_v11  ;;  %v8092_v11 = vadd.f32 %v15625_v13, %v7841_v27  ;;  %v15976_v37 = vpop.f32.mrf.mxu0 }
 0x838   : > { %v8774_v30 = vld [vmem:[#allocation4 + $0x91] sm:$0xff] }
 0x839   : > { %8690 = vst.msk [vmem:[#allocation4 + $0x99] sm:$0xff] %vm416_vm3, %v8658_v14  ;;  %v8723_v8 = vld [vmem:[#allocation4 + $0x90] sm:$0xff]  ;;  %v8342_v14 = vadd.f32 %v15672_v39, %v8092_v11  ;;  %v8408_v39 = vpack.c.bf16 %v8392_v62, %v8391_v34  ;;  %v8093_v11 = vadd.f32 %v15638_v42, %v15540_v19 }
 0x83a   : > { %v8529_v4 = vpop.f32.mrf.mxu2  ;;  %v12774_v34 = vld [vmem:[%s17301_s7 + $0x30] sm:$0xff] }
 0x83b   : > { %v8591_v2 = vadd.f32 %v8529_v4, %v8341_v45  ;;  %9698 = vmatpush.bf16.msrb.mxu3 %v12774_v34 }
 0x83c   : > { %v15969_v51 = vpop.f32.mrf.mxu1 }
 0x83d   : > { %v8627_v9 = vadd.f32 %v15779_v18, %v8591_v2 }
 0x83f   : > { %v8659_v31 = vmax.f32 %v8627_v9, 0.0 }
 0x840   : > { %v8775_v16 = vld [vmem:[#allocation4 + $0x99] sm:$0xff] }
 0x841   : > { %v8724_v26 = vld [vmem:[#allocation4 + $0x98] sm:$0xff]  ;;  %8691 = vst.msk [vmem:[#allocation4 + $0xa9] sm:$0xff] %vm416_vm3, %v8659_v31  ;;  %v15979_v6 = vpack.c.bf16 %v8775_v16, %v8774_v30  ;;  %v8343_v30 = vadd.f32 %v15689_v22, %v8093_v11 }
 0x842   : > { %v9125_v54 = vld [vmem:[#allocation4 + $0x92] sm:$0xff]  ;;  %v15981_v45 = vpack.c.bf16 %v8724_v26, %v8723_v8  ;;  %v9126_v13 = vld [vmem:[#allocation4 + $0x9a] sm:$0xff]  ;;  %v8531_v5 = vpop.f32.mrf.mxu2  ;;  %v8884_v8 = vpop.f32.mrf.mxu3 }
 0x843   : > { %v15983_v4 = vpack.c.bf16 %v9126_v13, %v9125_v54  ;;  %v8592_v27 = vadd.f32 %v8531_v5, %v8342_v14  ;;  %12395 = vmatmul.msk.bf16.gmra.mxu3 %vm416_vm3, %v15979_v6  ;;  %v7843_v54 = vadd.f32 %v15547_v20, %v15550_v35 }
 0x844   : > { %12415 = vmatmul.msk.bf16.gmra.mxu0 %vm416_vm3, %v15981_v45  ;;  %v15991_v2 = vpop.f32.mrf.mxu1 }
 0x845   : > { %12438 = vmatmul.msk.bf16.gmra.mxu1 %vm416_vm3, %v15983_v4  ;;  %v8628_v9 = vadd.f32 %v15779_v18, %v8592_v27  ;;  %v8094_v22 = vadd.f32 %v15649_v23, %v7843_v54  ;;  %v8095_v23 = vadd.f32 %v15661_v36, %v15558_v29 }
 0x846   : > { %v9033_v16 = vpop.f32.mrf.mxu0 }
 0x847   : > { %v8660_v31 = vmax.f32 %v8628_v9, 0.0  ;;  %12381 = vmatmul.msk.bf16.gmra.mxu2 %vm374_vm0, %v8408_v39  ;;  %v9034_v26 = vadd.f32 %v9033_v16, %v8884_v8  ;;  %v8344_v8 = vadd.f32 %v15714_v32, %v8094_v22  ;;  %v8345_v54 = vadd.f32 %v15734_v63, %v8095_v23 }
 0x848   : > { %v8776_v27 = vld [vmem:[#allocation4 + $0xa9] sm:$0xff] }
 0x849   : > { %8692 = vst.msk [vmem:[#allocation4 + $0xb1] sm:$0xff] %vm416_vm3, %v8660_v31  ;;  %v8725_v39 = vld [vmem:[#allocation4 + $0xa8] sm:$0xff] }
 0x84a   : > { %v8534_v62 = vpop.f32.mrf.mxu2 }
 0x84b   : > { %v8593_v14 = vadd.f32 %v8534_v62, %v8343_v30 }
 0x84c   : > { %v9234_v19 = vpop.f32.mrf.mxu1 }
 0x84d   : > { %v8629_v42 = vadd.f32 %v15779_v18, %v8593_v14  ;;  %v16005_v13 = vadd.f32 %v9234_v19, %v9034_v26  ;;  %v7845_v19 = vadd.f32 %v15565_v0, %v15568_v15 }
 0x84f   : > { %v8661_v5 = vmax.f32 %v8629_v42, 0.0 }
 0x850   : > { %v8777_v9 = vld [vmem:[#allocation4 + $0xb1] sm:$0xff] }
 0x851   : > { %v8726_v11 = vld [vmem:[#allocation4 + $0xb0] sm:$0xff]  ;;  %8693 = vst.msk [vmem:[#allocation4 + $0xc1] sm:$0xff] %vm416_vm3, %v8661_v5  ;;  %v16010_v20 = vpack.c.bf16 %v8777_v9, %v8776_v27  ;;  %v8096_v5 = vadd.f32 %v15674_v40, %v7845_v19 }
 0x852   : > { %v9127_v31 = vld [vmem:[#allocation4 + $0xaa] sm:$0xff]  ;;  %v16012_v35 = vpack.c.bf16 %v8726_v11, %v8725_v39  ;;  %v9128_v30 = vld [vmem:[#allocation4 + $0xb2] sm:$0xff]  ;;  %v8536_v16 = vpop.f32.mrf.mxu2 }
 0x853   : > { %v16014_v34 = vpack.c.bf16 %v9128_v30, %v9127_v31  ;;  %v8594_v62 = vadd.f32 %v8536_v16, %v8344_v8  ;;  %12396 = vmatmul.msk.bf16.gmra.mxu3 %vm416_vm3, %v16010_v20 }
 0x854   : > { %12416 = vmatmul.msk.bf16.gmra.mxu0 %vm416_vm3, %v16012_v35 }
 0x855   : > { %12439 = vmatmul.msk.bf16.gmra.mxu1 %vm416_vm3, %v16014_v34  ;;  %v8630_v32 = vadd.f32 %v15779_v18, %v8594_v62  ;;  %v16052_v62 = vpop.f32.mrf.mxu1 }
 0x856   : > { %17542 = vst [vmem:[#allocation39_spill] sm:$0xff] %v16052_v62 }
 0x857   : > { %v8662_v26 = vmax.f32 %v8630_v32, 0.0  ;;  %12455 = vmatmul.msk.bf16.vlgmr.msrb.gmra.mxu2 %vm416_vm3, %v15840_v28  ;;  %v8346_v28 = vadd.f32 %v15760_v21, %v8096_v5  ;;  %v8097_v21 = vadd.f32 %v15701_v46, %v15576_v43  ;;  %v16054_v32 = vpop.f32.mrf.mxu0  ;;  %v16061_v43 = vpop.f32.mrf.mxu3 }
 0x858   : > { %v8778_v39 = vld [vmem:[#allocation4 + $0xc1] sm:$0xff] }
 0x859   : > { %8694 = vst.msk [vmem:[#allocation4 + $0xc9] sm:$0xff] %vm416_vm3, %v8662_v26  ;;  %v8727_v29 = vld [vmem:[#allocation4 + $0xc0] sm:$0xff]  ;;  %v8347_v23 = vadd.f32 %v15788_v58, %v8097_v21 }
 0x85a   : > { %v8539_v14 = vpop.f32.mrf.mxu2 }
 0x85b   : > { %v8595_v42 = vadd.f32 %v8539_v14, %v8345_v54  ;;  %v17543_v54 = vld [vmem:[#allocation26_spill] sm:$0xff] }
 0x85c   : > { %v17544_v14 = vld [vmem:[#allocation10_spill] sm:$0xff] }
 0x85d   : > { %v8631_v22 = vadd.f32 %v15779_v18, %v8595_v42  ;;  %v7847_v19 = vadd.f32 %v17544_v14, %v17543_v54 }
 0x85f   : > { %v8663_v27 = vmax.f32 %v8631_v22, 0.0  ;;  %v8098_v46 = vadd.f32 %v15731_v59, %v7847_v19 }
 0x860   : > { %v8779_v36 = vld [vmem:[#allocation4 + $0xc9] sm:$0xff] }
 0x861   : > { %v8728_v9 = vld [vmem:[#allocation4 + $0xc8] sm:$0xff]  ;;  %8695 = vst.msk [vmem:[#allocation4 + $0xd9] sm:$0xff] %vm416_vm3, %v8663_v27  ;;  %v16035_v63 = vpack.c.bf16 %v8779_v36, %v8778_v39 }
 0x862   : > { %v9129_v11 = vld [vmem:[#allocation4 + $0xc2] sm:$0xff]  ;;  %v16037_v31 = vpack.c.bf16 %v8728_v9, %v8727_v29  ;;  %v9130_v0 = vld [vmem:[#allocation4 + $0xca] sm:$0xff]  ;;  %v8541_v15 = vpop.f32.mrf.mxu2 }
 0x863   : > { %v16039_v8 = vpack.c.bf16 %v9130_v0, %v9129_v11  ;;  %v8596_v30 = vadd.f32 %v8541_v15, %v8346_v28  ;;  %12397 = vmatmul.msk.bf16.gmra.mxu3 %vm416_vm3, %v16035_v63  ;;  %v8348_v11 = vadd.f32 %v15809_v24, %v8098_v46 }
 0x864   : > { %12417 = vmatmul.msk.bf16.gmra.mxu0 %vm416_vm3, %v16037_v31 }
 0x865   : > { %12440 = vmatmul.msk.bf16.gmra.mxu1 %vm416_vm3, %v16039_v8  ;;  %v8632_v40 = vadd.f32 %v15779_v18, %v8596_v30 }
 0x867   : > { %v8664_v16 = vmax.f32 %v8632_v40, 0.0  ;;  %12456 = vmatmul.msk.bf16.gmra.mxu2 %vm416_vm3, %v15865_v48 }
 0x868   : > { %v8780_v27 = vld [vmem:[#allocation4 + $0xd9] sm:$0xff] }
 0x869   : > { %8696 = vst.msk [vmem:[#allocation4 + $0xe1] sm:$0xff] %vm416_vm3, %v8664_v16  ;;  %v8729_v39 = vld [vmem:[#allocation4 + $0xd8] sm:$0xff] }
 0x86a   : > { %v8544_v26 = vpop.f32.mrf.mxu2 }
 0x86b   : > { %v8597_v42 = vadd.f32 %v8544_v26, %v8347_v23  ;;  %v17545_v23 = vld [vmem:[#allocation23_spill] sm:$0xff] }
 0x86c   : > { %v8099_v26 = vadd.f32 %v15764_v61, %v17545_v23 }
 0x86d   : > { %v8633_v22 = vadd.f32 %v15779_v18, %v8597_v42 }
 0x86e   : > { %v8349_v42 = vadd.f32 %v15832_v44, %v8099_v26 }
 0x86f   : > { %v8665_v5 = vmax.f32 %v8633_v22, 0.0 }
 0x870   : > { %v8781_v36 = vld [vmem:[#allocation4 + $0xe1] sm:$0xff] }
 0x871   : > { %v9038_v29 = vpop.f32.mrf.mxu0  ;;  %v8730_v9 = vld [vmem:[#allocation4 + $0xe0] sm:$0xff]  ;;  %8697 = vst.msk [vmem:[#allocation4 + $0xf1] sm:$0xff] %vm416_vm3, %v8665_v5  ;;  %v16066_v0 = vpack.c.bf16 %v8781_v36, %v8780_v27 }
 0x872   : > { %v9131_v58 = vld [vmem:[#allocation4 + $0xda] sm:$0xff]  ;;  %v9239_v28 = vpop.f32.mrf.mxu1  ;;  %v16068_v15 = vpack.c.bf16 %v8730_v9, %v8729_v39  ;;  %v9132_v30 = vld [vmem:[#allocation4 + $0xe2] sm:$0xff]  ;;  %v8546_v40 = vpop.f32.mrf.mxu2 }
 0x873   : > { %v16070_v21 = vpack.c.bf16 %v9132_v30, %v9131_v58  ;;  %v8598_v59 = vadd.f32 %v8546_v40, %v8348_v11  ;;  %12398 = vmatmul.msk.bf16.gmra.mxu3 %vm416_vm3, %v16066_v0  ;;  %v17546_v27 = vld [vmem:[#allocation19_spill] sm:$0xff]  ;;  %v17547_v39 = vld [vmem:[#allocation24_spill] sm:$0xff] }
 0x874   : > { %12418 = vmatmul.msk.bf16.gmra.mxu0 %vm416_vm3, %v16068_v15  ;;  %v7849_v36 = vadd.f32 %v17547_v39, %v17546_v27 }
 0x875   : > { %12441 = vmatmul.msk.bf16.gmra.mxu1 %vm416_vm3, %v16070_v21  ;;  %v8634_v24 = vadd.f32 %v15779_v18, %v8598_v59 }
 0x876   : > { %v8889_v16 = vpop.f32.mrf.mxu3 }
 0x877   : > { %v8666_v54 = vmax.f32 %v8634_v24, 0.0  ;;  %v9039_v14 = vadd.f32 %v9038_v29, %v8889_v16  ;;  %12457 = vmatmul.msk.bf16.gmra.mxu2 %vm416_vm3, %v15887_v56  ;;  %v8100_v29 = vadd.f32 %v15797_v60, %v7849_v36  ;;  %v17550_v36 = vld [vmem:[#allocation32_spill] sm:$0xff] }
 0x878   : > { %v8782_v40 = vld [vmem:[#allocation4 + $0xf1] sm:$0xff] }
 0x879   : > { %v9040_v19 = vpop.f32.mrf.mxu0  ;;  %8698 = vst.msk [vmem:[#allocation4 + $0xf9] sm:$0xff] %vm416_vm3, %v8666_v54  ;;  %v16085_v46 = vadd.f32 %v9239_v28, %v9039_v14  ;;  %v8731_v59 = vld [vmem:[#allocation4 + $0xf0] sm:$0xff]  ;;  %v8350_v28 = vadd.f32 %v15852_v10, %v8100_v29 }
 0x87a   : > { %v9241_v22 = vpop.f32.mrf.mxu1  ;;  %v8549_v5 = vpop.f32.mrf.mxu2 }
 0x87b   : > { %v8599_v9 = vadd.f32 %v8549_v5, %v8349_v42 }
 0x87d   : > { %v8635_v61 = vadd.f32 %v15779_v18, %v8599_v9  ;;  %v17551_v9 = vld [vmem:[#allocation16_spill] sm:$0xff] }
 0x87e   : > { %v8891_v58 = vpop.f32.mrf.mxu3 }
 0x87f   : > { %v8667_v11 = vmax.f32 %v8635_v61, 0.0  ;;  %v9041_v30 = vadd.f32 %v9040_v19, %v8891_v58 }
 0x880   : > { %v8783_v24 = vld [vmem:[#allocation4 + $0xf9] sm:$0xff] }
 0x881   : > { %v9043_v44 = vpop.f32.mrf.mxu0  ;;  %v8732_v16 = vld [vmem:[#allocation4 + $0xf8] sm:$0xff]  ;;  %8699 = vst.msk [vmem:[#allocation4 + $0x109] sm:$0xff] %vm416_vm3, %v8667_v11  ;;  %v16093_v54 = vpack.c.bf16 %v8783_v24, %v8782_v40  ;;  %v16097_v5 = vadd.f32 %v9241_v22, %v9041_v30  ;;  %v8101_v22 = vadd.f32 %v17551_v9, %v17550_v36  ;;  %v17552_v24 = vld [vmem:[#allocation33_spill] sm:$0xff] }
 0x882   : > { %v9133_v23 = vld [vmem:[#allocation4 + $0xf2] sm:$0xff]  ;;  %v9244_v26 = vpop.f32.mrf.mxu1  ;;  %v16095_v14 = vpack.c.bf16 %v8732_v16, %v8731_v59  ;;  %v9134_v42 = vld [vmem:[#allocation4 + $0xfa] sm:$0xff]  ;;  %v8551_v60 = vpop.f32.mrf.mxu2 }
 0x883   : > { %17548 = vst [vmem:[#allocation40_spill] sm:$0xff] %v16093_v54  ;;  %v16099_v19 = vpack.c.bf16 %v9134_v42, %v9133_v23  ;;  %v8600_v27 = vadd.f32 %v8551_v60, %v8350_v28  ;;  %12399 = vmatmul.msk.bf16.gmra.mxu3 %vm416_vm3, %v16093_v54  ;;  %v8351_v11 = vadd.f32 %v15859_v38, %v8101_v22  ;;  %v17553_v16 = vld [vmem:[#allocation34_spill] sm:$0xff] }
 0x884   : > { %12419 = vmatmul.msk.bf16.gmra.mxu0 %vm416_vm3, %v16095_v14  ;;  %v7851_v23 = vadd.f32 %v17553_v16, %v17552_v24 }
 0x885   : > { %17549 = vst [vmem:[#allocation25_spill] sm:$0xff] %v16099_v19  ;;  %12442 = vmatmul.msk.bf16.gmra.mxu1 %vm416_vm3, %v16099_v19  ;;  %v8636_v10 = vadd.f32 %v15779_v18, %v8600_v27 }
 0x886   : > { %v8894_v39 = vpop.f32.mrf.mxu3 }
 0x887   : > { %v8668_v61 = vmax.f32 %v8636_v10, 0.0  ;;  %v9044_v58 = vadd.f32 %v9043_v44, %v8894_v39  ;;  %12458 = vmatmul.msk.bf16.gmra.mxu2 %vm416_vm3, %v15910_v17  ;;  %v17554_v44 = vld [vmem:[#allocation13_spill] sm:$0xff] }
 0x888   : > { %v8102_v27 = vadd.f32 %v17554_v44, %v7851_v23  ;;  %v8784_v36 = vld [vmem:[#allocation4 + $0x109] sm:$0xff]  ;;  %v17558_v44 = vld [vmem:[#allocation14_spill] sm:$0xff] }
 0x889   : > { %v9045_v29 = vpop.f32.mrf.mxu0  ;;  %8700 = vst.msk [vmem:[#allocation4 + $0x111] sm:$0xff] %vm416_vm3, %v8668_v61  ;;  %v16114_v40 = vadd.f32 %v9244_v26, %v9044_v58  ;;  %v8733_v9 = vld [vmem:[#allocation4 + $0x108] sm:$0xff] }
 0x88a   : > { %v9246_v30 = vpop.f32.mrf.mxu1  ;;  %v8554_v59 = vpop.f32.mrf.mxu2  ;;  %v8352_v26 = vadd.f32 %v15872_v41, %v8102_v27 }
 0x88b   : > { %v8601_v28 = vadd.f32 %v8554_v59, %v8351_v11 }
 0x88d   : > { %v8637_v42 = vadd.f32 %v15779_v18, %v8601_v28 }
 0x88e   : > { %v8896_v60 = vpop.f32.mrf.mxu3 }
 0x88f   : > { %v8669_v10 = vmax.f32 %v8637_v42, 0.0  ;;  %v9046_v39 = vadd.f32 %v9045_v29, %v8896_v60  ;;  %v17557_v60 = vld [vmem:[#allocation28_spill] sm:$0xff] }
 0x890   : > { %v8785_v22 = vld [vmem:[#allocation4 + $0x111] sm:$0xff] }
 0x891   : > { %v9048_v38 = vpop.f32.mrf.mxu0  ;;  %v8734_v61 = vld [vmem:[#allocation4 + $0x110] sm:$0xff]  ;;  %8701 = vst.msk [vmem:[#allocation4 + $0x121] sm:$0xff] %vm416_vm3, %v8669_v10  ;;  %v16122_v24 = vpack.c.bf16 %v8785_v22, %v8784_v36  ;;  %v16126_v16 = vadd.f32 %v9246_v30, %v9046_v39  ;;  %v8103_v30 = vadd.f32 %v17558_v44, %v17557_v60 }
 0x892   : > { %v9135_v19 = vld [vmem:[#allocation4 + $0x10a] sm:$0xff]  ;;  %v9249_v58 = vpop.f32.mrf.mxu1  ;;  %v16124_v11 = vpack.c.bf16 %v8734_v61, %v8733_v9  ;;  %v9136_v59 = vld [vmem:[#allocation4 + $0x112] sm:$0xff]  ;;  %v8556_v23 = vpop.f32.mrf.mxu2 }
 0x893   : > { %17555 = vst [vmem:[#allocation9_spill] sm:$0xff] %v16122_v24  ;;  %v16128_v29 = vpack.c.bf16 %v9136_v59, %v9135_v19  ;;  %v8602_v28 = vadd.f32 %v8556_v23, %v8352_v26  ;;  %12400 = vmatmul.msk.bf16.gmra.mxu3 %vm416_vm3, %v16122_v24  ;;  %v8353_v39 = vadd.f32 %v15881_v47, %v8103_v30  ;;  %v17559_v61 = vld [vmem:[#allocation29_spill] sm:$0xff]  ;;  %v17560_v26 = vld [vmem:[#allocation36_spill] sm:$0xff] }
 0x894   : > { %12420 = vmatmul.msk.bf16.gmra.mxu0 %vm416_vm3, %v16124_v11  ;;  %v7853_v59 = vadd.f32 %v17560_v26, %v17559_v61 }
 0x895   : > { %17556 = vst [vmem:[#allocation17_spill] sm:$0xff] %v16128_v29  ;;  %12443 = vmatmul.msk.bf16.gmra.mxu1 %vm416_vm3, %v16128_v29  ;;  %v8638_v41 = vadd.f32 %v15779_v18, %v8602_v28 }
 0x896   : > { %v8899_v42 = vpop.f32.mrf.mxu3 }
 0x897   : > { %v8670_v27 = vmax.f32 %v8638_v41, 0.0  ;;  %v9049_v10 = vadd.f32 %v9048_v38, %v8899_v42  ;;  %12459 = vmatmul.msk.bf16.gmra.mxu2 %vm416_vm3, %v15943_v3  ;;  %v17561_v38 = vld [vmem:[#allocation21_spill] sm:$0xff] }
 0x898   : > { %v8104_v42 = vadd.f32 %v17561_v38, %v7853_v59  ;;  %v8786_v29 = vld [vmem:[#allocation4 + $0x121] sm:$0xff] }
 0x899   : > { %v9050_v19 = vpop.f32.mrf.mxu0  ;;  %8702 = vst.msk [vmem:[#allocation4 + $0x129] sm:$0xff] %vm416_vm3, %v8670_v27  ;;  %v16143_v9 = vadd.f32 %v9249_v58, %v9049_v10  ;;  %v8735_v24 = vld [vmem:[#allocation4 + $0x120] sm:$0xff] }
 0x89a   : > { %v9251_v36 = vpop.f32.mrf.mxu1  ;;  %v8559_v22 = vpop.f32.mrf.mxu2  ;;  %v8354_v58 = vadd.f32 %v15897_v50, %v8104_v42 }
 0x89b   : > { %v8603_v23 = vadd.f32 %v8559_v22, %v8353_v39 }
 0x89d   : > { %v8639_v28 = vadd.f32 %v15779_v18, %v8603_v23 }
 0x89e   : > { %v8901_v41 = vpop.f32.mrf.mxu3 }
 0x89f   : > { %v8671_v60 = vmax.f32 %v8639_v28, 0.0  ;;  %v9051_v44 = vadd.f32 %v9050_v19, %v8901_v41  ;;  %v17565_v28 = vld [vmem:[#allocation18_spill] sm:$0xff] }
 0x8a0   : > { %v8787_v30 = vld [vmem:[#allocation4 + $0x129] sm:$0xff] }
 0x8a1   : > { %v9053_v47 = vpop.f32.mrf.mxu0  ;;  %v8736_v27 = vld [vmem:[#allocation4 + $0x128] sm:$0xff]  ;;  %8703 = vst.msk [vmem:[#allocation4 + $0x139] sm:$0xff] %vm416_vm3, %v8671_v60  ;;  %v16151_v61 = vpack.c.bf16 %v8787_v30, %v8786_v29  ;;  %v16155_v26 = vadd.f32 %v9251_v36, %v9051_v44  ;;  %v17564_v29 = vld [vmem:[#allocation31_spill] sm:$0xff] }
 0x8a2   : > { %v9137_v54 = vld [vmem:[#allocation4 + $0x122] sm:$0xff]  ;;  %v9254_v10 = vpop.f32.mrf.mxu1  ;;  %v16153_v39 = vpack.c.bf16 %v8736_v27, %v8735_v24  ;;  %v9138_v22 = vld [vmem:[#allocation4 + $0x12a] sm:$0xff]  ;;  %v8561_v59 = vpop.f32.mrf.mxu2  ;;  %v8105_v36 = vadd.f32 %v17565_v28, %v17564_v29 }
 0x8a3   : > { %17562 = vst [vmem:[#allocation12_spill] sm:$0xff] %v16151_v61  ;;  %v16157_v19 = vpack.c.bf16 %v9138_v22, %v9137_v54  ;;  %v8604_v23 = vadd.f32 %v8561_v59, %v8354_v58  ;;  %12401 = vmatmul.msk.bf16.gmra.mxu3 %vm416_vm3, %v16151_v61  ;;  %v17566_v27 = vld [vmem:[#allocation5_spill] sm:$0xff]  ;;  %v17567_v58 = vld [vmem:[#allocation27_spill] sm:$0xff] }
 0x8a4   : > { %12421 = vmatmul.msk.bf16.gmra.mxu0 %vm416_vm3, %v16153_v39  ;;  %v8355_v42 = vadd.f32 %v15906_v53, %v8105_v36  ;;  %v7855_v22 = vadd.f32 %v17567_v58, %v17566_v27 }
 0x8a5   : > { %17563 = vst [vmem:[#allocation22_spill] sm:$0xff] %v16157_v19  ;;  %12444 = vmatmul.msk.bf16.gmra.mxu1 %vm416_vm3, %v16157_v19  ;;  %v8640_v50 = vadd.f32 %v15779_v18, %v8604_v23 }
 0x8a6   : > { %v8904_v24 = vpop.f32.mrf.mxu3 }
 0x8a7   : > { %v8672_v41 = vmax.f32 %v8640_v50, 0.0  ;;  %v9054_v38 = vadd.f32 %v9053_v47, %v8904_v24  ;;  %12460 = vmatmul.msk.bf16.gmra.mxu2 %vm416_vm3, %v15981_v45  ;;  %v17568_v47 = vld [vmem:[#allocation38_spill] sm:$0xff] }
 0x8a8   : > { %v8106_v24 = vadd.f32 %v17568_v47, %v7855_v22  ;;  %v8788_v19 = vld [vmem:[#allocation4 + $0x139] sm:$0xff] }
 0x8a9   : > { %v9055_v54 = vpop.f32.mrf.mxu0  ;;  %8704 = vst.msk [vmem:[#allocation4 + $0x141] sm:$0xff] %vm416_vm3, %v8672_v41  ;;  %v16172_v44 = vadd.f32 %v9254_v10, %v9054_v38  ;;  %v8737_v61 = vld [vmem:[#allocation4 + $0x138] sm:$0xff] }
 0x8aa   : > { %v9256_v60 = vpop.f32.mrf.mxu1  ;;  %v8564_v30 = vpop.f32.mrf.mxu2  ;;  %v8356_v10 = vadd.f32 %v15920_v7, %v8106_v24 }
 0x8ab   : > { %v8605_v59 = vadd.f32 %v8564_v30, %v8355_v42 }
 0x8ad   : > { %v8641_v23 = vadd.f32 %v15779_v18, %v8605_v59 }
 0x8ae   : > { %v8906_v50 = vpop.f32.mrf.mxu3 }
 0x8af   : > { %v8673_v29 = vmax.f32 %v8641_v23, 0.0  ;;  %v9056_v28 = vadd.f32 %v9055_v54, %v8906_v50 }
 0x8b0   : > { %v8789_v36 = vld [vmem:[#allocation4 + $0x141] sm:$0xff] }
 0x8b1   : > { %v9058_v53 = vpop.f32.mrf.mxu0  ;;  %v8738_v41 = vld [vmem:[#allocation4 + $0x140] sm:$0xff]  ;;  %8705 = vst.msk [vmem:[#allocation4 + $0x151] sm:$0xff] %vm416_vm3, %v8673_v29  ;;  %v16180_v27 = vpack.c.bf16 %v8789_v36, %v8788_v19  ;;  %v16184_v58 = vadd.f32 %v9256_v60, %v9056_v28  ;;  %v17572_v28 = vld [vmem:[#allocation8_spill] sm:$0xff]  ;;  %v17573_v36 = vld [vmem:[#allocation30_spill] sm:$0xff] }
 0x8b2   : > { %v9139_v62 = vld [vmem:[#allocation4 + $0x13a] sm:$0xff]  ;;  %v9259_v38 = vpop.f32.mrf.mxu1  ;;  %v16182_v42 = vpack.c.bf16 %v8738_v41, %v8737_v61  ;;  %v9140_v30 = vld [vmem:[#allocation4 + $0x142] sm:$0xff]  ;;  %v8566_v22 = vpop.f32.mrf.mxu2  ;;  %v7857_v41 = vadd.f32 %v17573_v36, %v17572_v28 }
 0x8b3   : > { %17569 = vst [vmem:[#allocation20_spill] sm:$0xff] %v16180_v27  ;;  %v16186_v54 = vpack.c.bf16 %v9140_v30, %v9139_v62  ;;  %v8606_v59 = vadd.f32 %v8566_v22, %v8356_v10  ;;  %12402 = vmatmul.msk.bf16.gmra.mxu3 %vm416_vm3, %v16180_v27  ;;  %v17571_v19 = vld [vmem:[#allocation7_spill] sm:$0xff] }
 0x8b4   : > { %12422 = vmatmul.msk.bf16.gmra.mxu0 %vm416_vm3, %v16182_v42  ;;  %v8107_v60 = vadd.f32 %v15922_v33, %v17571_v19  ;;  %v12496_v33 = vld [vmem:[%s17301_s7 + $0x44] sm:$0xf] }
 0x8b5   : > { %17570 = vst [vmem:[#allocation26_spill] sm:$0xff] %v16186_v54  ;;  %12445 = vmatmul.msk.bf16.gmra.mxu1 %vm416_vm3, %v16186_v54  ;;  %v8642_v7 = vadd.f32 %v15779_v18, %v8606_v59  ;;  %v9869_v22 = vunpack.c.l.b16 %v12496_v33 }
 0x8b6   : > { %v8909_v61 = vpop.f32.mrf.mxu3  ;;  %v8357_v47 = vadd.f32 %v15933_v49, %v8107_v60 }
 0x8b7   : > { %v8674_v23 = vmax.f32 %v8642_v7, 0.0  ;;  %v9059_v50 = vadd.f32 %v9058_v53, %v8909_v61  ;;  %12461 = vmatmul.msk.bf16.gmra.mxu2 %vm416_vm3, %v16012_v35  ;;  %v12519_v53 = vld [vmem:[%s17301_s7 + $0x50] sm:$0xf]  ;;  %v9871_v61 = vpack.c.b16 %v9869_v22, %v9869_v22  ;;  %v12776_v22 = vld [vmem:[%s17301_s7 + $0x48] sm:$0xff] }
 0x8b8   : > { %v10103_v49 = vunpack.c.l.b16 %v12519_v53 }
 0x8b9   : > { %v9060_v62 = vpop.f32.mrf.mxu0  ;;  %8706 = vst.msk [vmem:[#allocation4 + $0x159] sm:$0xff] %vm416_vm3, %v8674_v23  ;;  %v16201_v29 = vadd.f32 %v9259_v38, %v9059_v50  ;;  %v8108_v38 = vadd.f32 %v15937_v55, %v7857_v41  ;;  %v8790_v50 = vld [vmem:[#allocation4 + $0x151] sm:$0xff]  ;;  %v9922_v33 = vsel %vm8871_vm2, %v9871_v61, 0 }
 0x8ba   : > { %v9261_v24 = vpop.f32.mrf.mxu1  ;;  %v8569_v10 = vpop.f32.mrf.mxu2  ;;  %v10105_v19 = vpack.c.b16 %v10103_v49, %v10103_v49  ;;  %9930 = vmatpush.bf16.msra.mxu0 %v9922_v33 }
 0x8bb   : > { %v8607_v30 = vadd.f32 %v8569_v10, %v8357_v47  ;;  %v8739_v47 = vld [vmem:[#allocation4 + $0x150] sm:$0xff]  ;;  %v8358_v28 = vadd.f32 %v15953_v52, %v8108_v38  ;;  %v12775_v52 = vld [vmem:[%s17301_s7 + $0x3c] sm:$0xff] }
 0x8bc   : > { %v10156_v53 = vsel %vm8871_vm2, %v10105_v19, 0 }
 0x8bd   : > { %v8643_v59 = vadd.f32 %v15779_v18, %v8607_v30  ;;  %10164 = vmatpush.bf16.msra.mxu1 %v10156_v53 }
 0x8be   : > { %v8911_v7 = vpop.f32.mrf.mxu3  ;;  %9931 = vmatpush.bf16.msra.mxu0 %v12775_v52 }
 0x8bf   : > { %v8675_v60 = vmax.f32 %v8643_v59, 0.0  ;;  %v9061_v23 = vadd.f32 %v9060_v62, %v8911_v7 }
 0x8c0   : > { %v8791_v10 = vld [vmem:[#allocation4 + $0x159] sm:$0xff] }
 0x8c1   : > { %v9063_v36 = vpop.f32.mrf.mxu0  ;;  %v8740_v54 = vld [vmem:[#allocation4 + $0x158] sm:$0xff]  ;;  %8707 = vst.msk [vmem:[#allocation4 + $0x169] sm:$0xff] %vm416_vm3, %v8675_v60  ;;  %v16217_v41 = vpack.c.bf16 %v8791_v10, %v8790_v50  ;;  %v16227_v49 = vadd.f32 %v9261_v24, %v9061_v23  ;;  %10165 = vmatpush.bf16.msra.mxu1 %v12776_v22 }
 0x8c2   : > { %v9141_v27 = vld [vmem:[#allocation4 + $0x152] sm:$0xff]  ;;  %v9264_v55 = vpop.f32.mrf.mxu1  ;;  %v16219_v30 = vpack.c.bf16 %v8740_v54, %v8739_v47  ;;  %v9142_v62 = vld [vmem:[#allocation4 + $0x15a] sm:$0xff]  ;;  %v8571_v59 = vpop.f32.mrf.mxu2 }
 0x8c3   : > { %v16229_v38 = vpack.c.bf16 %v9142_v62, %v9141_v27  ;;  %v12542_v54 = vld [vmem:[%s17301_s7 + $0x5c] sm:$0xf]  ;;  %v8608_v7 = vadd.f32 %v8571_v59, %v8358_v28  ;;  %12403 = vmatmul.msk.bf16.gmra.mxu3 %vm416_vm3, %v16217_v41  ;;  %v12565_v27 = vld [vmem:[%s17301_s7 + $0x68] sm:$0xf] }
 0x8c4   : > { %12423 = vmatmul.msk.bf16.gmra.mxu0 %vm416_vm3, %v16219_v30  ;;  %v10336_v61 = vunpack.c.l.b16 %v12542_v54  ;;  %v10569_v60 = vunpack.c.l.b16 %v12565_v27  ;;  %v17574_v23 = vld [vmem:[#allocation6_spill] sm:$0xff] }
 0x8c5   : > { %12446 = vmatmul.msk.bf16.gmra.mxu1 %vm416_vm3, %v16229_v38  ;;  %v8644_v24 = vadd.f32 %v15779_v18, %v8608_v7  ;;  %v8109_v50 = vadd.f32 %v15958_v1, %v17574_v23 }
 0x8c6   : > { %v10338_v19 = vpack.c.b16 %v10336_v61, %v10336_v61  ;;  %v8914_v47 = vpop.f32.mrf.mxu3  ;;  %v10571_v53 = vpack.c.b16 %v10569_v60, %v10569_v60  ;;  %v12925_v61 = vld [vmem:[%s17300_s6] ss:$0 sm:$0xff] }
 0x8c7   : > { %v8676_v28 = vmax.f32 %v8644_v24, 0.0  ;;  %v9064_v10 = vadd.f32 %v9063_v36, %v8914_v47  ;;  %12462 = vmatmul.msk.bf16.gmra.mxu2 %vm416_vm3, %v16037_v31  ;;  %v8359_v18 = vadd.f32 %v15969_v51, %v8109_v50  ;;  %v17575_v36 = vld [vmem:[#allocation11_spill] sm:$0xff] }
 0x8c8   : > { %v10389_v33 = vsel %vm8871_vm2, %v10338_v19, 0  ;;  %v10622_v22 = vsel %vm8871_vm2, %v10571_v53, 0  ;;  %v7859_v54 = vadd.f32 %v15974_v57, %v17575_v36  ;;  %v8792_v23 = vld [vmem:[#allocation4 + $0x169] sm:$0xff] }
 0x8c9   : > { %v9065_v62 = vpop.f32.mrf.mxu0  ;;  %10397 = vmatpush.bf16.msra.mxu2 %v10389_v33  ;;  %8708 = vst.msk [vmem:[#allocation4 + $0x171] sm:$0xff] %vm416_vm3, %v8676_v28  ;;  %v16252_v59 = vadd.f32 %v9264_v55, %v9064_v10  ;;  %10630 = vmatpush.bf16.msra.mxu3 %v10622_v22  ;;  %v8741_v50 = vld [vmem:[#allocation4 + $0x168] sm:$0xff] }
 0x8ca   : > { %v9266_v52 = vpop.f32.mrf.mxu1  ;;  %v8574_v1 = vpop.f32.mrf.mxu2  ;;  %v8110_v51 = vadd.f32 %v15976_v37, %v7859_v54 }
 0x8cb   : > { %v8609_v7 = vadd.f32 %v8574_v1, %v8359_v18 }
 0x8cc   : > { %v8360_v33 = vadd.f32 %v15991_v2, %v8110_v51 }
 0x8cd   : > { %v8645_v27 = vadd.f32 %v12925_v61, %v8609_v7 }
 0x8ce   : > { %v8916_v24 = vpop.f32.mrf.mxu3 }
 0x8cf   : > { %v8677_v19 = vmax.f32 %v8645_v27, 0.0  ;;  %v9066_v60 = vadd.f32 %v9065_v62, %v8916_v24 }
 0x8d0   : > { %v8793_v47 = vld [vmem:[#allocation4 + $0x171] sm:$0xff] }
 0x8d1   : > { %v9068_v55 = vpop.f32.mrf.mxu0  ;;  %v8742_v28 = vld [vmem:[#allocation4 + $0x170] sm:$0xff]  ;;  %8709 = vst.msk [vmem:[#allocation4 + $0x181] sm:$0xff] %vm416_vm3, %v8677_v19  ;;  %v16262_v53 = vpack.c.bf16 %v8793_v47, %v8792_v23  ;;  %v16266_v1 = vadd.f32 %v9266_v52, %v9066_v60 }
 0x8d2   : > { %v9143_v10 = vld [vmem:[#allocation4 + $0x16a] sm:$0xff]  ;;  %v9269_v57 = vpop.f32.mrf.mxu1  ;;  %v16264_v18 = vpack.c.bf16 %v8742_v28, %v8741_v50  ;;  %v9144_v22 = vld [vmem:[#allocation4 + $0x172] sm:$0xff]  ;;  %v8576_v37 = vpop.f32.mrf.mxu2  ;;  %v9580_v50 = vld [vmem:[#allocation4 + $0x21] sm:$0xff] }
 0x8d3   : > { %17576 = vst [vmem:[#allocation10_spill] sm:$0xff] %v16262_v53  ;;  %v16268_v62 = vpack.c.bf16 %v9144_v22, %v9143_v10  ;;  %v8610_v36 = vadd.f32 %v8576_v37, %v8360_v33  ;;  %12404 = vmatmul.msk.bf16.gmra.mxu3 %vm416_vm3, %v16262_v53  ;;  %v9579_v28 = vld [vmem:[#allocation4 + $0x19] sm:$0xff] }
 0x8d4   : > { %12424 = vmatmul.msk.bf16.gmra.mxu0 %vm416_vm3, %v16264_v18  ;;  %v17578_v37 = vld [vmem:[#allocation15_spill] sm:$0xff] }
 0x8d5   : > { %17577 = vst [vmem:[#allocation23_spill] sm:$0xff] %v16268_v62  ;;  %12447 = vmatmul.msk.bf16.gmra.mxu1 %vm416_vm3, %v16268_v62  ;;  %v8646_v2 = vadd.f32 %v12925_v61, %v8610_v36 }
 0x8d6   : > { %v8919_v54 = vpop.f32.mrf.mxu3 }
 0x8d7   : > { %v8678_v7 = vmax.f32 %v8646_v2, 0.0  ;;  %v9069_v27 = vadd.f32 %v9068_v55, %v8919_v54  ;;  %12463 = vmatmul.msk.bf16.gmra.mxu2 %vm416_vm3, %v16068_v15  ;;  %v9611_v55 = vpack.c.bf16 %v9580_v50, %v9579_v28 }
 0x8d9   : > { %v9070_v52 = vpop.f32.mrf.mxu0  ;;  %8710 = vst.msk [vmem:[#allocation4 + $0x189] sm:$0xff] %vm416_vm3, %v8678_v7  ;;  %v16279_v51 = vadd.f32 %v9269_v57, %v9069_v27 }
 0x8da   : > { %v9271_v24 = vpop.f32.mrf.mxu1  ;;  %v9467_v19 = vpop.f32.mrf.mxu2 }
 0x8db   : > { %v16282_v60 = vadd.f32 %v9467_v19, %v16005_v13  ;;  %v9814_v19 = vld [vmem:[#allocation4 + $0x32] sm:$0xff] }
 0x8de   : > { %v8921_v23 = vpop.f32.mrf.mxu3 }
 0x8df   : > { %v9071_v47 = vadd.f32 %v9070_v52, %v8921_v23  ;;  %v9815_v23 = vld [vmem:[#allocation4 + $0x3a] sm:$0xff] }
 0x8e1   : > { %v9073_v61 = vpop.f32.mrf.mxu0  ;;  %v16284_v33 = vadd.f32 %v9271_v24, %v9071_v47  ;;  %v9582_v24 = vld [vmem:[#allocation4 + $0x39] sm:$0xff] }
 0x8e2   : > { %v9274_v10 = vpop.f32.mrf.mxu1  ;;  %v16286_v22 = vpop.f32.mrf.mxu2 }
 0x8e3   : > { %12478 = vmatmul.msk.bf16.vlgmr.msrb.gmra.mxu3 %vm416_vm3, %v9611_v55  ;;  %v16302_v55 = vpack.c.bf16 %v9815_v23, %v9814_v19  ;;  %v9584_v19 = vld [vmem:[#allocation4 + $0x51] sm:$0xff] }
 0x8e4   : > { %12501 = vmatmul.msk.bf16.vlgmr.msra.gmra.mxu0 %vm416_vm3, %v17578_v37 }
 0x8e5   : > { %12524 = vmatmul.msk.bf16.vlgmr.msra.gmra.mxu1 %vm416_vm3, %v15865_v48  ;;  %v9581_v48 = vld [vmem:[#allocation4 + $0x31] sm:$0xff]  ;;  %17579 = vst [vmem:[#allocation19_spill] sm:$0xff] %v16302_v55 }
 0x8e6   : > { %v8924_v13 = vpop.f32.mrf.mxu3 }
 0x8e7   : > { %v9074_v57 = vadd.f32 %v9073_v61, %v8924_v13  ;;  %12464 = vmatmul.msk.bf16.gmra.mxu2 %vm416_vm3, %v16095_v14  ;;  %v16300_v61 = vpack.c.bf16 %v9582_v24, %v9581_v48  ;;  %v9583_v48 = vld [vmem:[#allocation4 + $0x49] sm:$0xff] }
 0x8e9   : > { %v9075_v36 = vpop.f32.mrf.mxu0  ;;  %v16295_v54 = vadd.f32 %v9274_v10, %v9074_v57 }
 0x8ea   : > { %v9276_v2 = vpop.f32.mrf.mxu1  ;;  %v9472_v7 = vpop.f32.mrf.mxu2 }
 0x8eb   : > { %v16298_v27 = vadd.f32 %v9472_v7, %v16085_v46 }
 0x8ee   : > { %v8926_v52 = vpop.f32.mrf.mxu3 }
 0x8ef   : > { %v9076_v50 = vadd.f32 %v9075_v36, %v8926_v52 }
 0x8f1   : > { %v9078_v47 = vpop.f32.mrf.mxu0  ;;  %v16304_v37 = vadd.f32 %v9276_v2, %v9076_v50 }
 0x8f2   : > { %v9279_v28 = vpop.f32.mrf.mxu1  ;;  %v9474_v10 = vpop.f32.mrf.mxu2 }
 0x8f3   : > { %v16307_v13 = vadd.f32 %v9474_v10, %v16097_v5  ;;  %12479 = vmatmul.msk.bf16.gmra.mxu3 %vm416_vm3, %v16300_v61 }
 0x8f4   : > { %12502 = vmatmul.msk.bf16.gmra.mxu0 %vm416_vm3, %v16302_v55 }
 0x8f5   : > { %12525 = vmatmul.msk.bf16.gmra.mxu1 %vm416_vm3, %v15887_v56  ;;  %v16322_v56 = vpack.c.bf16 %v9584_v19, %v9583_v48 }
 0x8f6   : > { %v8929_v46 = vpop.f32.mrf.mxu3 }
 0x8f7   : > { %v9079_v57 = vadd.f32 %v9078_v47, %v8929_v46  ;;  %12465 = vmatmul.msk.bf16.gmra.mxu2 %vm416_vm3, %v16124_v11 }
 0x8f9   : > { %v9080_v36 = vpop.f32.mrf.mxu0  ;;  %v16317_v7 = vadd.f32 %v9279_v28, %v9079_v57  ;;  %v17580_v28 = vld [vmem:[#allocation35_spill] sm:$0xff] }
 0x8fa   : > { %v9281_v2 = vpop.f32.mrf.mxu1  ;;  %v9477_v5 = vpop.f32.mrf.mxu2 }
 0x8fb   : > { %v16320_v52 = vadd.f32 %v9477_v5, %v16114_v40 }
 0x8fe   : > { %v8931_v24 = vpop.f32.mrf.mxu3 }
 0x8ff   : > { %v9081_v23 = vadd.f32 %v9080_v36, %v8931_v24 }
 0x901   : > { %v9083_v50 = vpop.f32.mrf.mxu0  ;;  %v16324_v47 = vadd.f32 %v9281_v2, %v9081_v23  ;;  %v9586_v23 = vld [vmem:[#allocation4 + $0x69] sm:$0xff] }
 0x902   : > { %v9284_v10 = vpop.f32.mrf.mxu1  ;;  %v9479_v46 = vpop.f32.mrf.mxu2 }
 0x903   : > { %v16327_v55 = vadd.f32 %v9479_v46, %v16126_v16  ;;  %12480 = vmatmul.msk.bf16.gmra.mxu3 %vm416_vm3, %v16322_v56 }
 0x904   : > { %12503 = vmatmul.msk.bf16.gmra.mxu0 %vm416_vm3, %v17580_v28  ;;  %v9585_v28 = vld [vmem:[#allocation4 + $0x61] sm:$0xff] }
 0x905   : > { %12526 = vmatmul.msk.bf16.gmra.mxu1 %vm416_vm3, %v15910_v17  ;;  %v16342_v17 = vpack.c.bf16 %v9586_v23, %v9585_v28 }
 0x906   : > { %v8934_v40 = vpop.f32.mrf.mxu3 }
 0x907   : > { %v9084_v57 = vadd.f32 %v9083_v50, %v8934_v40  ;;  %12466 = vmatmul.msk.bf16.gmra.mxu2 %vm416_vm3, %v16153_v39 }
 0x909   : > { %v9085_v36 = vpop.f32.mrf.mxu0  ;;  %v16337_v5 = vadd.f32 %v9284_v10, %v9084_v57 }
 0x90a   : > { %v9286_v2 = vpop.f32.mrf.mxu1  ;;  %v9482_v16 = vpop.f32.mrf.mxu2 }
 0x90b   : > { %v16340_v24 = vadd.f32 %v9482_v16, %v16143_v9 }
 0x90e   : > { %v8936_v19 = vpop.f32.mrf.mxu3 }
 0x90f   : > { %v9086_v48 = vadd.f32 %v9085_v36, %v8936_v19 }
 0x911   : > { %v9088_v46 = vpop.f32.mrf.mxu0  ;;  %v16344_v50 = vadd.f32 %v9286_v2, %v9086_v48 }
 0x912   : > { %v9289_v62 = vpop.f32.mrf.mxu1  ;;  %v9484_v40 = vpop.f32.mrf.mxu2 }
 0x913   : > { %v16347_v53 = vadd.f32 %v9484_v40, %v16155_v26  ;;  %12481 = vmatmul.msk.bf16.gmra.mxu3 %vm416_vm3, %v16342_v17  ;;  %v17581_v40 = vld [vmem:[#allocation37_spill] sm:$0xff] }
 0x914   : > { %12504 = vmatmul.msk.bf16.gmra.mxu0 %vm416_vm3, %v15912_v12 }
 0x915   : > { %12527 = vmatmul.msk.bf16.gmra.mxu1 %vm416_vm3, %v15943_v3 }
 0x916   : > { %v8939_v9 = vpop.f32.mrf.mxu3 }
 0x917   : > { %v9089_v10 = vadd.f32 %v9088_v46, %v8939_v9  ;;  %12467 = vmatmul.msk.bf16.gmra.mxu2 %vm416_vm3, %v16182_v42 }
 0x919   : > { %v9090_v57 = vpop.f32.mrf.mxu0  ;;  %v16357_v2 = vadd.f32 %v9289_v62, %v9089_v10 }
 0x91a   : > { %v9291_v36 = vpop.f32.mrf.mxu1  ;;  %v9487_v26 = vpop.f32.mrf.mxu2 }
 0x91b   : > { %v16360_v16 = vadd.f32 %v9487_v26, %v16172_v44 }
 0x91e   : > { %v8941_v19 = vpop.f32.mrf.mxu3 }
 0x91f   : > { %v9091_v23 = vadd.f32 %v9090_v57, %v8941_v19 }
 0x921   : > { %v9093_v48 = vpop.f32.mrf.mxu0  ;;  %v16362_v28 = vadd.f32 %v9291_v36, %v9091_v23 }
 0x922   : > { %v9294_v12 = vpop.f32.mrf.mxu1  ;;  %v9489_v3 = vpop.f32.mrf.mxu2 }
 0x923   : > { %v16365_v46 = vadd.f32 %v9489_v3, %v16184_v58  ;;  %12482 = vmatmul.msk.bf16.gmra.mxu3 %vm416_vm3, %v15941_v25 }
 0x924   : > { %12505 = vmatmul.msk.bf16.gmra.mxu0 %vm416_vm3, %v17581_v40 }
 0x925   : > { %12528 = vmatmul.msk.bf16.gmra.mxu1 %vm416_vm3, %v15981_v45 }
 0x926   : > { %v8944_v44 = vpop.f32.mrf.mxu3 }
 0x927   : > { %v9094_v62 = vadd.f32 %v9093_v48, %v8944_v44  ;;  %12468 = vmatmul.msk.bf16.gmra.mxu2 %vm416_vm3, %v16219_v30 }
 0x929   : > { %v9095_v9 = vpop.f32.mrf.mxu0  ;;  %v16375_v57 = vadd.f32 %v9294_v12, %v9094_v62 }
 0x92a   : > { %v9296_v10 = vpop.f32.mrf.mxu1  ;;  %v9492_v58 = vpop.f32.mrf.mxu2 }
 0x92b   : > { %v16378_v36 = vadd.f32 %v9492_v58, %v16201_v29  ;;  %v12777_v29 = vld [vmem:[%s17301_s7 + $0x54] sm:$0xff] }
 0x92c   : > { %10398 = vmatpush.bf16.msra.mxu2 %v12777_v29 }
 0x92e   : > { %v8946_v25 = vpop.f32.mrf.mxu3 }
 0x92f   : > { %v9096_v26 = vadd.f32 %v9095_v9, %v8946_v25 }
 0x931   : > { %v9098_v19 = vpop.f32.mrf.mxu0  ;;  %v16380_v3 = vadd.f32 %v9296_v10, %v9096_v26 }
 0x932   : > { %v9299_v23 = vpop.f32.mrf.mxu1  ;;  %v9494_v45 = vpop.f32.mrf.mxu2 }
 0x933   : > { %v16383_v48 = vadd.f32 %v9494_v45, %v16227_v49  ;;  %12483 = vmatmul.msk.bf16.gmra.mxu3 %vm416_vm3, %v15979_v6  ;;  %v9377_v45 = vld [vmem:[#allocation4 + $0x188] sm:$0xff] }
 0x934   : > { %12506 = vmatmul.msk.bf16.gmra.mxu0 %vm416_vm3, %v15983_v4 }
 0x935   : > { %12529 = vmatmul.msk.bf16.gmra.mxu1 %vm416_vm3, %v16012_v35 }
 0x936   : > { %v8949_v12 = vpop.f32.mrf.mxu3 }
 0x937   : > { %v9099_v40 = vadd.f32 %v9098_v19, %v8949_v12  ;;  %12469 = vmatmul.msk.bf16.gmra.mxu2 %vm416_vm3, %v16264_v18 }
 0x939   : > { %v9100_v49 = vpop.f32.mrf.mxu0  ;;  %v16396_v62 = vadd.f32 %v9299_v23, %v9099_v40  ;;  %v12778_v23 = vld [vmem:[%s17301_s7 + $0x60] sm:$0xff] }
 0x93a   : > { %v9301_v44 = vpop.f32.mrf.mxu1  ;;  %v9497_v6 = vpop.f32.mrf.mxu2  ;;  %10631 = vmatpush.bf16.msra.mxu3 %v12778_v23 }
 0x93b   : > { %v16399_v4 = vadd.f32 %v9497_v6, %v16252_v59  ;;  %v9376_v59 = vld [vmem:[#allocation4 + $0x180] sm:$0xff] }
 0x93c   : > { %v16415_v29 = vpack.c.bf16 %v9377_v45, %v9376_v59 }
 0x93e   : > { %v8951_v9 = vpop.f32.mrf.mxu3 }
 0x93f   : > { %v9101_v35 = vadd.f32 %v9100_v49, %v8951_v9 }
 0x941   : > { %v9103_v10 = vpop.f32.mrf.mxu0  ;;  %v16401_v25 = vadd.f32 %v9301_v44, %v9101_v35 }
 0x942   : > { %v9304_v58 = vpop.f32.mrf.mxu1  ;;  %v9499_v26 = vpop.f32.mrf.mxu2 }
 0x943   : > { %v16404_v19 = vadd.f32 %v9499_v26, %v16266_v1  ;;  %12484 = vmatmul.msk.bf16.gmra.mxu3 %vm416_vm3, %v16010_v20 }
 0x944   : > { %12507 = vmatmul.msk.bf16.gmra.mxu0 %vm416_vm3, %v16014_v34 }
 0x945   : > { %12530 = vmatmul.msk.bf16.gmra.mxu1 %vm416_vm3, %v16037_v31 }
 0x946   : > { %v8954_v12 = vpop.f32.mrf.mxu3 }
 0x947   : > { %v9104_v1 = vadd.f32 %v9103_v10, %v8954_v12  ;;  %12470 = vmatmul.msk.bf16.gmra.mxu2 %vm416_vm3, %v16415_v29 }
 0x949   : > { %v9105_v20 = vpop.f32.mrf.mxu0  ;;  %v16419_v49 = vadd.f32 %v9304_v58, %v9104_v1 }
 0x94a   : > { %v9306_v40 = vpop.f32.mrf.mxu1  ;;  %v9502_v34 = vpop.f32.mrf.mxu2 }
 0x94b   : > { %v16422_v31 = vadd.f32 %v9502_v34, %v16279_v51 }
 0x94e   : > { %v8956_v44 = vpop.f32.mrf.mxu3 }
 0x94f   : > { %v9106_v6 = vadd.f32 %v9105_v20, %v8956_v44 }
 0x951   : > { %v9108_v9 = vpop.f32.mrf.mxu0  ;;  %v16424_v26 = vadd.f32 %v9306_v40, %v9106_v6 }
 0x952   : > { %v9309_v35 = vpop.f32.mrf.mxu1  ;;  %v9504_v45 = vpop.f32.mrf.mxu2 }
 0x953   : > { %v16427_v10 = vadd.f32 %v9504_v45, %v16284_v33  ;;  %12485 = vmatmul.msk.bf16.gmra.mxu3 %vm416_vm3, %v16035_v63 }
 0x954   : > { %12508 = vmatmul.msk.bf16.gmra.mxu0 %vm416_vm3, %v16039_v8 }
 0x955   : > { %12531 = vmatmul.msk.bf16.gmra.mxu1 %vm416_vm3, %v16068_v15 }
 0x956   : > { %v8959_v51 = vpop.f32.mrf.mxu3 }
 0x957   : > { %v9109_v58 = vadd.f32 %v9108_v9, %v8959_v51  ;;  %12547 = vmatmul.msk.bf16.vlgmr.msra.gmra.mxu2 %vm416_vm3, %v16300_v61  ;;  %v9036_v61 = vadd.f32 %v16054_v32, %v16061_v43 }
 0x959   : > { %v9110_v59 = vpop.f32.mrf.mxu0  ;;  %v16437_v12 = vadd.f32 %v9309_v35, %v9109_v58 }
 0x95a   : > { %v9311_v23 = vpop.f32.mrf.mxu1  ;;  %v9507_v33 = vpop.f32.mrf.mxu2 }
 0x95b   : > { %v16440_v1 = vadd.f32 %v9507_v33, %v16295_v54 }
 0x95e   : > { %v8961_v63 = vpop.f32.mrf.mxu3 }
 0x95f   : > { %v9111_v20 = vadd.f32 %v9110_v59, %v8961_v63  ;;  %v17583_v63 = vld [vmem:[#allocation40_spill] sm:$0xff] }
 0x961   : > { %v9933_v40 = vpop.f32.mrf.mxu0  ;;  %v16442_v34 = vadd.f32 %v9311_v23, %v9111_v20  ;;  %v17584_v20 = vld [vmem:[#allocation25_spill] sm:$0xff] }
 0x962   : > { %v10167_v8 = vpop.f32.mrf.mxu1  ;;  %v9509_v15 = vpop.f32.mrf.mxu2 }
 0x963   : > { %v16445_v44 = vadd.f32 %v9509_v15, %v16304_v37  ;;  %12486 = vmatmul.msk.bf16.gmra.mxu3 %vm416_vm3, %v16066_v0  ;;  %v17582_v0 = vld [vmem:[#allocation39_spill] sm:$0xff] }
 0x964   : > { %12509 = vmatmul.msk.bf16.gmra.mxu0 %vm416_vm3, %v16070_v21  ;;  %v9315_v51 = vadd.f32 %v17582_v0, %v9036_v61  ;;  %v10286_v0 = vld [vmem:[#allocation4 + $0x81] sm:$0xff] }
 0x965   : > { %12532 = vmatmul.msk.bf16.gmra.mxu1 %vm416_vm3, %v16095_v14 }
 0x966   : > { %v9700_v54 = vpop.f32.mrf.mxu3  ;;  %v9548_v14 = vadd.f32 %v16286_v22, %v9315_v51  ;;  %v17586_v51 = vld [vmem:[#allocation17_spill] sm:$0xff] }
 0x967   : > { %v9780_v6 = vadd.f32 %v9700_v54, %v16282_v60  ;;  %12548 = vmatmul.msk.bf16.gmra.mxu2 %vm416_vm3, %v16322_v56 }
 0x969   : > { %v9935_v37 = vpop.f32.mrf.mxu0  ;;  %v10013_v9 = vadd.f32 %v9933_v40, %v9780_v6 }
 0x96a   : > { %v10169_v35 = vpop.f32.mrf.mxu1  ;;  %v9512_v45 = vpop.f32.mrf.mxu2 }
 0x96b   : > { %v16460_v21 = vadd.f32 %v9512_v45, %v16317_v7  ;;  %v16462_v58 = vadd.f32 %v10167_v8, %v10013_v9 }
 0x96e   : > { %v9702_v59 = vpop.f32.mrf.mxu3 }
 0x96f   : > { %v9781_v32 = vadd.f32 %v9702_v59, %v9548_v14 }
 0x971   : > { %v9938_v43 = vpop.f32.mrf.mxu0  ;;  %v10014_v60 = vadd.f32 %v9935_v37, %v9781_v32 }
 0x972   : > { %v10172_v23 = vpop.f32.mrf.mxu1  ;;  %v9514_v33 = vpop.f32.mrf.mxu2 }
 0x973   : > { %v16466_v56 = vadd.f32 %v9514_v33, %v16324_v47  ;;  %12487 = vmatmul.msk.bf16.gmra.mxu3 %vm416_vm3, %v17583_v63  ;;  %v16472_v7 = vadd.f32 %v10169_v35, %v10014_v60 }
 0x974   : > { %12510 = vmatmul.msk.bf16.gmra.mxu0 %vm416_vm3, %v17584_v20 }
 0x975   : > { %12533 = vmatmul.msk.bf16.gmra.mxu1 %vm416_vm3, %v16124_v11 }
 0x976   : > { %v9705_v22 = vpop.f32.mrf.mxu3 }
 0x977   : > { %v9782_v40 = vadd.f32 %v9705_v22, %v16298_v27  ;;  %12549 = vmatmul.msk.bf16.gmra.mxu2 %vm416_vm3, %v16342_v17  ;;  %v17585_v17 = vld [vmem:[#allocation9_spill] sm:$0xff] }
 0x979   : > { %v9940_v8 = vpop.f32.mrf.mxu0  ;;  %v10015_v47 = vadd.f32 %v9938_v43, %v9782_v40 }
 0x97a   : > { %v10174_v15 = vpop.f32.mrf.mxu1  ;;  %v9517_v54 = vpop.f32.mrf.mxu2 }
 0x97b   : > { %v16480_v61 = vadd.f32 %v9517_v54, %v16337_v5  ;;  %v16482_v6 = vadd.f32 %v10172_v23, %v10015_v47  ;;  %v10288_v47 = vld [vmem:[#allocation4 + $0x99] sm:$0xff] }
 0x97c   : > { %v17588_v54 = vld [vmem:[#allocation22_spill] sm:$0xff] }
 0x97e   : > { %v9707_v37 = vpop.f32.mrf.mxu3 }
 0x97f   : > { %v9783_v9 = vadd.f32 %v9707_v37, %v16307_v13  ;;  %v10285_v13 = vld [vmem:[#allocation4 + $0x79] sm:$0xff]  ;;  %v10287_v37 = vld [vmem:[#allocation4 + $0x91] sm:$0xff] }
 0x980   : > { %v10314_v59 = vpack.c.bf16 %v10286_v0, %v10285_v13 }
 0x981   : > { %v10016_v35 = vadd.f32 %v9940_v8, %v9783_v9  ;;  %v9943_v11 = vpop.f32.mrf.mxu0  ;;  %v10315_v9 = vpack.c.bf16 %v10288_v47, %v10287_v37 }
 0x982   : > { %v9519_v45 = vpop.f32.mrf.mxu2  ;;  %v10177_v14 = vpop.f32.mrf.mxu1 }
 0x983   : > { %v16486_v27 = vadd.f32 %v9519_v45, %v16344_v50  ;;  %12488 = vmatmul.msk.bf16.gmra.mxu3 %vm416_vm3, %v17585_v17  ;;  %v16492_v5 = vadd.f32 %v10174_v15, %v10016_v35 }
 0x984   : > { %12511 = vmatmul.msk.bf16.gmra.mxu0 %vm416_vm3, %v17586_v51 }
 0x985   : > { %12534 = vmatmul.msk.bf16.gmra.mxu1 %vm416_vm3, %v16153_v39 }
 0x986   : > { %v9710_v32 = vpop.f32.mrf.mxu3 }
 0x987   : > { %v9784_v43 = vadd.f32 %v9710_v32, %v16320_v52  ;;  %12550 = vmatmul.msk.bf16.gmra.mxu2 %vm416_vm3, %v10314_v59  ;;  %v17587_v52 = vld [vmem:[#allocation12_spill] sm:$0xff] }
 0x989   : > { %v10017_v50 = vadd.f32 %v9943_v11, %v9784_v43  ;;  %v9945_v63 = vpop.f32.mrf.mxu0 }
 0x98a   : > { %v9522_v60 = vpop.f32.mrf.mxu2  ;;  %v10179_v20 = vpop.f32.mrf.mxu1 }
 0x98b   : > { %v16499_v23 = vadd.f32 %v9522_v60, %v16357_v2  ;;  %v16501_v33 = vadd.f32 %v10177_v14, %v10017_v50  ;;  %v10290_v50 = vld [vmem:[#allocation4 + $0xb1] sm:$0xff]  ;;  %v17589_v60 = vld [vmem:[#allocation20_spill] sm:$0xff] }
 0x98e   : > { %v9712_v22 = vpop.f32.mrf.mxu3 }
 0x98f   : > { %v9785_v40 = vadd.f32 %v9712_v22, %v16327_v55 }
 0x991   : > { %v10018_v39 = vadd.f32 %v9945_v63, %v9785_v40  ;;  %v9948_v55 = vpop.f32.mrf.mxu0  ;;  %v17590_v63 = vld [vmem:[#allocation26_spill] sm:$0xff] }
 0x992   : > { %v9524_v8 = vpop.f32.mrf.mxu2 }
 0x993   : > { %v16505_v15 = vadd.f32 %v9524_v8, %v16362_v28  ;;  %12489 = vmatmul.msk.bf16.gmra.mxu3 %vm416_vm3, %v17587_v52  ;;  %v16511_v2 = vadd.f32 %v10179_v20, %v10018_v39  ;;  %v10182_v28 = vpop.f32.mrf.mxu1 }
 0x994   : > { %12512 = vmatmul.msk.bf16.gmra.mxu0 %vm416_vm3, %v17588_v54  ;;  %v10292_v54 = vld [vmem:[#allocation4 + $0xc9] sm:$0xff] }
 0x995   : > { %12535 = vmatmul.msk.bf16.gmra.mxu1 %vm416_vm3, %v16182_v42 }
 0x996   : > { %v9715_v35 = vpop.f32.mrf.mxu3 }
 0x997   : > { %v9786_v11 = vadd.f32 %v9715_v35, %v16340_v24  ;;  %12551 = vmatmul.msk.bf16.gmra.mxu2 %vm416_vm3, %v10315_v9  ;;  %v10294_v35 = vld [vmem:[#allocation4 + $0xe1] sm:$0xff] }
 0x999   : > { %v10019_v45 = vadd.f32 %v9948_v55, %v9786_v11  ;;  %v9950_v42 = vpop.f32.mrf.mxu0  ;;  %v17591_v11 = vld [vmem:[#allocation10_spill] sm:$0xff] }
 0x99a   : > { %v9527_v0 = vpop.f32.mrf.mxu2 }
 0x99b   : > { %v16518_v17 = vadd.f32 %v9527_v0, %v16375_v57  ;;  %v16520_v51 = vadd.f32 %v10182_v28, %v10019_v45  ;;  %v10184_v32 = vpop.f32.mrf.mxu1 }
 0x99e   : > { %v9717_v14 = vpop.f32.mrf.mxu3 }
 0x99f   : > { %v9787_v13 = vadd.f32 %v9717_v14, %v16347_v53  ;;  %v10289_v53 = vld [vmem:[#allocation4 + $0xa9] sm:$0xff]  ;;  %v10076_v14 = vld [vmem:[#allocation4 + $0x198] sm:$0xff] }
 0x9a0   : > { %v10316_v20 = vpack.c.bf16 %v10290_v50, %v10289_v53  ;;  %v9609_v50 = vld [vmem:[#allocation4 + $0x181] sm:$0xff] }
 0x9a1   : > { %v10020_v59 = vadd.f32 %v9950_v42, %v9787_v13  ;;  %v10077_v13 = vld [vmem:[#allocation4 + $0x1a0] sm:$0xff] }
 0x9a2   : > { %v9529_v43 = vpop.f32.mrf.mxu2 }
 0x9a3   : > { %v16524_v24 = vadd.f32 %v9529_v43, %v16380_v3  ;;  %12490 = vmatmul.msk.bf16.gmra.mxu3 %vm416_vm3, %v17589_v60  ;;  %v16530_v57 = vadd.f32 %v10184_v32, %v10020_v59  ;;  %v9610_v59 = vld [vmem:[#allocation4 + $0x189] sm:$0xff]  ;;  %v10093_v60 = vpack.c.bf16 %v10077_v13, %v10076_v14 }
 0x9a4   : > { %12513 = vmatmul.msk.bf16.gmra.mxu0 %vm416_vm3, %v17590_v63  ;;  %v9842_v32 = vld [vmem:[#allocation4 + $0x182] sm:$0xff]  ;;  %v9843_v43 = vld [vmem:[#allocation4 + $0x18a] sm:$0xff]  ;;  %v16582_v63 = vpack.c.bf16 %v9610_v59, %v9609_v50 }
 0x9a5   : > { %12536 = vmatmul.msk.bf16.gmra.mxu1 %vm416_vm3, %v16219_v30  ;;  %v10300_v14 = vld [vmem:[#allocation4 + $0x129] sm:$0xff] }
 0x9a6   : > { %v9720_v22 = vpop.f32.mrf.mxu3  ;;  %v10516_v50 = vld [vmem:[#allocation4 + $0x62] sm:$0xff] }
 0x9a7   : > { %v16535_v40 = vadd.f32 %v9720_v22, %v16360_v16  ;;  %12552 = vmatmul.msk.bf16.gmra.mxu2 %vm416_vm3, %v10316_v20  ;;  %v10291_v16 = vld [vmem:[#allocation4 + $0xc1] sm:$0xff]  ;;  %v10296_v20 = vld [vmem:[#allocation4 + $0xf9] sm:$0xff]  ;;  %v10295_v22 = vld [vmem:[#allocation4 + $0xf1] sm:$0xff] }
 0x9aa   : > { %v9532_v3 = vpop.f32.mrf.mxu2 }
 0x9ab   : > { %v16539_v39 = vadd.f32 %v9532_v3, %v16396_v62  ;;  %v10317_v62 = vpack.c.bf16 %v10292_v54, %v10291_v16 }
 0x9ae   : > { %v9722_v8 = vpop.f32.mrf.mxu3 }
 0x9af   : > { %v16542_v47 = vadd.f32 %v9722_v8, %v16365_v46 }
 0x9b2   : > { %v9534_v52 = vpop.f32.mrf.mxu2 }
 0x9b3   : > { %v16545_v30 = vadd.f32 %v9534_v52, %v16401_v25  ;;  %12491 = vmatmul.msk.bf16.gmra.mxu3 %vm416_vm3, %v16217_v41 }
 0x9b4   : > { %12514 = vmatmul.msk.bf16.gmra.mxu0 %vm416_vm3, %v16229_v38 }
 0x9b5   : > { %12537 = vmatmul.msk.bf16.gmra.mxu1 %vm416_vm3, %v16264_v18 }
 0x9b6   : > { %v9725_v37 = vpop.f32.mrf.mxu3 }
 0x9b7   : > { %v16554_v46 = vadd.f32 %v9725_v37, %v16378_v36  ;;  %12553 = vmatmul.msk.bf16.gmra.mxu2 %vm416_vm3, %v10317_v62  ;;  %v17592_v36 = vld [vmem:[#allocation23_spill] sm:$0xff]  ;;  %v10298_v37 = vld [vmem:[#allocation4 + $0x111] sm:$0xff] }
 0x9ba   : > { %v9537_v9 = vpop.f32.mrf.mxu2 }
 0x9bb   : > { %v16558_v25 = vadd.f32 %v9537_v9, %v16419_v49  ;;  %v10293_v49 = vld [vmem:[#allocation4 + $0xd9] sm:$0xff] }
 0x9bc   : > { %v10318_v28 = vpack.c.bf16 %v10294_v35, %v10293_v49  ;;  %v10514_v49 = vld [vmem:[#allocation4 + $0x4a] sm:$0xff] }
 0x9be   : > { %v9727_v55 = vpop.f32.mrf.mxu3 }
 0x9bf   : > { %v16561_v41 = vadd.f32 %v9727_v55, %v16383_v48  ;;  %v17593_v55 = vld [vmem:[#allocation19_spill] sm:$0xff] }
 0x9c2   : > { %v9539_v38 = vpop.f32.mrf.mxu2 }
 0x9c3   : > { %v16564_v18 = vadd.f32 %v9539_v38, %v16424_v26  ;;  %12492 = vmatmul.msk.bf16.gmra.mxu3 %vm416_vm3, %v17591_v11 }
 0x9c4   : > { %12515 = vmatmul.msk.bf16.gmra.mxu0 %vm416_vm3, %v17592_v36 }
 0x9c5   : > { %12538 = vmatmul.msk.bf16.gmra.mxu1 %vm416_vm3, %v16415_v29 }
 0x9c6   : > { %v9730_v45 = vpop.f32.mrf.mxu3 }
 0x9c7   : > { %v16573_v48 = vadd.f32 %v9730_v45, %v16399_v4  ;;  %12554 = vmatmul.msk.bf16.gmra.mxu2 %vm416_vm3, %v10318_v28  ;;  %v16584_v4 = vpack.c.bf16 %v9843_v43, %v9842_v32  ;;  %v10515_v28 = vld [vmem:[#allocation4 + $0x52] sm:$0xff] }
 0x9c8   : > { %v10545_v45 = vpack.c.bf16 %v10515_v28, %v10514_v49 }
 0x9ca   : > { %v9542_v0 = vpop.f32.mrf.mxu2 }
 0x9cb   : > { %v16577_v26 = vadd.f32 %v9542_v0, %v16437_v12 }
 0x9ce   : > { %v9732_v42 = vpop.f32.mrf.mxu3 }
 0x9cf   : > { %v16580_v29 = vadd.f32 %v9732_v42, %v16404_v19  ;;  %v10319_v19 = vpack.c.bf16 %v10296_v20, %v10295_v22  ;;  %v10302_v22 = vld [vmem:[#allocation4 + $0x141] sm:$0xff] }
 0x9d2   : > { %v9544_v53 = vpop.f32.mrf.mxu2 }
 0x9d3   : > { %v16587_v12 = vadd.f32 %v9544_v53, %v16442_v34  ;;  %12493 = vmatmul.msk.bf16.gmra.mxu3 %vm416_vm3, %v16582_v63 }
 0x9d4   : > { %12516 = vmatmul.msk.bf16.gmra.mxu0 %vm416_vm3, %v16584_v4 }
 0x9d5   : > { %12539 = vmatmul.msk.bf16.gmra.mxu1 %vm416_vm3, %v10093_v60  ;;  %v10517_v60 = vld [vmem:[#allocation4 + $0x6a] sm:$0xff] }
 0x9d6   : > { %v9735_v3 = vpop.f32.mrf.mxu3  ;;  %v10546_v53 = vpack.c.bf16 %v10517_v60, %v10516_v50  ;;  %v10523_v50 = vld [vmem:[#allocation4 + $0xb2] sm:$0xff] }
 0x9d7   : > { %v16595_v8 = vadd.f32 %v9735_v3, %v16422_v31  ;;  %12555 = vmatmul.msk.bf16.gmra.mxu2 %vm416_vm3, %v10319_v19  ;;  %v10297_v31 = vld [vmem:[#allocation4 + $0x109] sm:$0xff] }
 0x9d8   : > { %v10320_v38 = vpack.c.bf16 %v10298_v37, %v10297_v31  ;;  %v10518_v37 = vld [vmem:[#allocation4 + $0x7a] sm:$0xff] }
 0x9da   : > { %v10400_v52 = vpop.f32.mrf.mxu2 }
 0x9db   : > { %v16599_v34 = vadd.f32 %v10400_v52, %v16462_v58 }
 0x9de   : > { %v9737_v54 = vpop.f32.mrf.mxu3 }
 0x9df   : > { %v16602_v16 = vadd.f32 %v9737_v54, %v16427_v10 }
 0x9e2   : > { %v10402_v62 = vpop.f32.mrf.mxu2 }
 0x9e3   : > { %v16605_v9 = vadd.f32 %v10402_v62, %v16472_v7  ;;  %12570 = vmatmul.msk.bf16.vlgmr.msra.gmra.mxu3 %vm416_vm3, %v17593_v55  ;;  %v10519_v55 = vld [vmem:[#allocation4 + $0x82] sm:$0xff] }
 0x9e4   : > { %v10547_v31 = vpack.c.bf16 %v10519_v55, %v10518_v37 }
 0x9e6   : > { %v9740_v35 = vpop.f32.mrf.mxu3 }
 0x9e7   : > { %v16610_v11 = vadd.f32 %v9740_v35, %v16440_v1  ;;  %12556 = vmatmul.msk.bf16.gmra.mxu2 %vm416_vm3, %v10320_v38  ;;  %v10299_v1 = vld [vmem:[#allocation4 + $0x121] sm:$0xff]  ;;  %v10304_v35 = vld [vmem:[#allocation4 + $0x159] sm:$0xff] }
 0x9e8   : > { %v10321_v42 = vpack.c.bf16 %v10300_v14, %v10299_v1  ;;  %v10306_v1 = vld [vmem:[#allocation4 + $0x171] sm:$0xff] }
 0x9ea   : > { %v10405_v58 = vpop.f32.mrf.mxu2 }
 0x9eb   : > { %v16614_v10 = vadd.f32 %v10405_v58, %v16482_v6 }
 0x9ee   : > { %v9742_v36 = vpop.f32.mrf.mxu3 }
 0x9ef   : > { %v16617_v7 = vadd.f32 %v9742_v36, %v16445_v44 }
 0x9f2   : > { %v10407_v0 = vpop.f32.mrf.mxu2 }
 0x9f3   : > { %v16620_v13 = vadd.f32 %v10407_v0, %v16492_v5  ;;  %12571 = vmatmul.msk.bf16.gmra.mxu3 %vm416_vm3, %v10545_v45  ;;  %v10520_v45 = vld [vmem:[#allocation4 + $0x92] sm:$0xff] }
 0x9f6   : > { %v9745_v59 = vpop.f32.mrf.mxu3 }
 0x9f7   : > { %v16624_v6 = vadd.f32 %v9745_v59, %v16460_v21  ;;  %12557 = vmatmul.msk.bf16.gmra.mxu2 %vm416_vm3, %v10321_v42  ;;  %v10301_v21 = vld [vmem:[#allocation4 + $0x139] sm:$0xff] }
 0x9f8   : > { %v10322_v3 = vpack.c.bf16 %v10302_v22, %v10301_v21  ;;  %v10524_v22 = vld [vmem:[#allocation4 + $0xc2] sm:$0xff]  ;;  %v10525_v21 = vld [vmem:[#allocation4 + $0xca] sm:$0xff] }
 0x9fa   : > { %v10410_v32 = vpop.f32.mrf.mxu2 }
 0x9fb   : > { %v16628_v44 = vadd.f32 %v10410_v32, %v16501_v33 }
 0x9fe   : > { %v9747_v43 = vpop.f32.mrf.mxu3 }
 0x9ff   : > { %v16631_v5 = vadd.f32 %v9747_v43, %v16466_v56  ;;  %v10522_v43 = vld [vmem:[#allocation4 + $0xaa] sm:$0xff] }
 0xa02   : > { %v10412_v20 = vpop.f32.mrf.mxu2 }
 0xa03   : > { %v16634_v19 = vadd.f32 %v10412_v20, %v16511_v2  ;;  %12572 = vmatmul.msk.bf16.gmra.mxu3 %vm416_vm3, %v10546_v53 }
 0xa06   : > { %v9750_v52 = vpop.f32.mrf.mxu3 }
 0xa07   : > { %v16638_v33 = vadd.f32 %v9750_v52, %v16480_v61  ;;  %12558 = vmatmul.msk.bf16.gmra.mxu2 %vm416_vm3, %v10322_v3  ;;  %v10303_v61 = vld [vmem:[#allocation4 + $0x151] sm:$0xff]  ;;  %v10309_v52 = vld [vmem:[#allocation4 + $0x199] sm:$0xff] }
 0xa08   : > { %v10323_v36 = vpack.c.bf16 %v10304_v35, %v10303_v61 }
 0xa0a   : > { %v10415_v54 = vpop.f32.mrf.mxu2 }
 0xa0b   : > { %v16642_v56 = vadd.f32 %v10415_v54, %v16520_v51  ;;  %v10310_v54 = vld [vmem:[#allocation4 + $0x1a1] sm:$0xff] }
 0xa0e   : > { %v9752_v62 = vpop.f32.mrf.mxu3 }
 0xa0f   : > { %v16645_v2 = vadd.f32 %v9752_v62, %v16486_v27  ;;  %v10521_v27 = vld [vmem:[#allocation4 + $0x9a] sm:$0xff]  ;;  %v10326_v62 = vpack.c.bf16 %v10310_v54, %v10309_v52 }
 0xa10   : > { %v10548_v14 = vpack.c.bf16 %v10521_v27, %v10520_v45 }
 0xa12   : > { %v10417_v38 = vpop.f32.mrf.mxu2 }
 0xa13   : > { %v16648_v58 = vadd.f32 %v10417_v38, %v16530_v57  ;;  %12573 = vmatmul.msk.bf16.gmra.mxu3 %vm416_vm3, %v10547_v31  ;;  %v10305_v57 = vld [vmem:[#allocation4 + $0x169] sm:$0xff] }
 0xa14   : > { %v10324_v42 = vpack.c.bf16 %v10306_v1, %v10305_v57  ;;  %v10527_v31 = vld [vmem:[#allocation4 + $0xe2] sm:$0xff] }
 0xa16   : > { %v9755_v49 = vpop.f32.mrf.mxu3 }
 0xa17   : > { %v16652_v51 = vadd.f32 %v9755_v49, %v16499_v23  ;;  %12559 = vmatmul.msk.bf16.gmra.mxu2 %vm416_vm3, %v10323_v36  ;;  %v10528_v49 = vld [vmem:[#allocation4 + $0xf2] sm:$0xff] }
 0xa1e   : > { %v9757_v28 = vpop.f32.mrf.mxu3 }
 0xa1f   : > { %v16656_v0 = vadd.f32 %v9757_v28, %v16505_v15  ;;  %v10549_v15 = vpack.c.bf16 %v10523_v50, %v10522_v43  ;;  %v10529_v28 = vld [vmem:[#allocation4 + $0xfa] sm:$0xff]  ;;  %v9953_v43 = vpop.f32.mrf.mxu0 }
 0xa20   : > { %v10552_v45 = vpack.c.bf16 %v10529_v28, %v10528_v49 }
 0xa23   : > { %12574 = vmatmul.msk.bf16.gmra.mxu3 %vm416_vm3, %v10548_v14 }
 0xa26   : > { %v9760_v59 = vpop.f32.mrf.mxu3 }
 0xa27   : > { %v16660_v32 = vadd.f32 %v9760_v59, %v16518_v17  ;;  %12560 = vmatmul.msk.bf16.gmra.mxu2 %vm416_vm3, %v10324_v42  ;;  %v10530_v42 = vld [vmem:[#allocation4 + $0x10a] sm:$0xff]  ;;  %v10531_v59 = vld [vmem:[#allocation4 + $0x112] sm:$0xff]  ;;  %v16721_v54 = vpop.f32.mrf.mxu0 }
 0xa28   : > { %v10553_v50 = vpack.c.bf16 %v10531_v59, %v10530_v42 }
 0xa2e   : > { %v9762_v23 = vpop.f32.mrf.mxu3 }
 0xa2f   : > { %v16664_v60 = vadd.f32 %v9762_v23, %v16524_v24  ;;  %v10550_v24 = vpack.c.bf16 %v10525_v21, %v10524_v22  ;;  %v9958_v28 = vpop.f32.mrf.mxu0 }
 0xa33   : > { %12575 = vmatmul.msk.bf16.gmra.mxu3 %vm416_vm3, %v10549_v15  ;;  %v16708_v15 = vpop.f32.mrf.mxu1 }
 0xa36   : > { %v9765_v53 = vpop.f32.mrf.mxu3 }
 0xa37   : > { %v16668_v20 = vadd.f32 %v9765_v53, %v16539_v39  ;;  %12561 = vmatmul.msk.bf16.gmra.mxu2 %vm416_vm3, %v16582_v63  ;;  %v10526_v63 = vld [vmem:[#allocation4 + $0xda] sm:$0xff] }
 0xa3e   : > { %v9767_v17 = vpop.f32.mrf.mxu3 }
 0xa3f   : > { %v16673_v3 = vadd.f32 %v9767_v17, %v16545_v30  ;;  %v10551_v30 = vpack.c.bf16 %v10527_v31, %v10526_v63  ;;  %v16712_v17 = vpop.f32.mrf.mxu2  ;;  %v10532_v31 = vld [vmem:[#allocation4 + $0x122] sm:$0xff] }
 0xa43   : > { %12576 = vmatmul.msk.bf16.gmra.mxu3 %vm416_vm3, %v10550_v24 }
 0xa46   : > { %v9770_v37 = vpop.f32.mrf.mxu3 }
 0xa47   : > { %v16677_v55 = vadd.f32 %v9770_v37, %v16558_v25  ;;  %12562 = vmatmul.msk.bf16.gmra.mxu2 %vm416_vm3, %v10326_v62  ;;  %v16724_v62 = vpop.f32.mrf.mxu1 }
 0xa4e   : > { %v9772_v39 = vpop.f32.mrf.mxu3 }
 0xa4f   : > { %v16681_v38 = vadd.f32 %v9772_v39, %v16564_v18  ;;  %v16694_v18 = vld [vmem:[%s17302_s8] ss:$0 sm:$0xff]  ;;  %v16729_v39 = vpop.f32.mrf.mxu2 }
 0xa53   : > { %12577 = vmatmul.msk.bf16.gmra.mxu3 %vm416_vm3, %v10551_v30  ;;  %v10533_v30 = vld [vmem:[#allocation4 + $0x12a] sm:$0xff] }
 0xa56   : > { %v9775_v35 = vpop.f32.mrf.mxu3 }
 0xa57   : > { %v16685_v61 = vadd.f32 %v9775_v35, %v16577_v26  ;;  %v10554_v35 = vpack.c.bf16 %v10533_v30, %v10532_v31 }
 0xa5e   : > { %v9777_v36 = vpop.f32.mrf.mxu3 }
 0xa5f   : > { %v16688_v25 = vadd.f32 %v9777_v36, %v16587_v12 }
 0xa63   : > { %12578 = vmatmul.msk.bf16.gmra.mxu3 %vm416_vm3, %v10552_v45 }
 0xa66   : > { %v10633_v27 = vpop.f32.mrf.mxu3 }
 0xa67   : > { %v10713_v14 = vadd.f32 %v10633_v27, %v16599_v34 }
 0xa69   : > { %v16698_v26 = vadd.f32 %v16694_v18, %v10713_v14  ;;  %v16740_v14 = vpop.f32.mrf.mxu1 }
 0xa6b   : > { %v10781_v1 = vmax.f32 %v16698_v26, 0.0 }
 0xa6d   : > { %v10814_v12 = vsel %vm10813_vm5, %v10781_v1, -inf }
 0xa6e   : > { %v10635_v57 = vpop.f32.mrf.mxu3  ;;  %10815 = vmax.xlane.f32.xlu0 %v10814_v12 }
 0xa6f   : > { %v10714_v23 = vadd.f32 %v10635_v57, %v16605_v9 }
 0xa71   : > { %v16706_v34 = vadd.f32 %v16694_v18, %v10714_v23  ;;  %v16752_v23 = vpop.f32.mrf.mxu0 }
 0xa73   : > { %12579 = vmatmul.msk.bf16.gmra.mxu3 %vm416_vm3, %v10553_v50  ;;  %v10782_v53 = vmax.f32 %v16706_v34, 0.0 }
 0xa75   : > { %v10817_v22 = vsel %vm10813_vm5, %v10782_v53, -inf }
 0xa76   : > { %v10638_v21 = vpop.f32.mrf.mxu3  ;;  %10818 = vmax.xlane.f32.xlu0 %v10817_v22  ;;  %v10534_v22 = vld [vmem:[#allocation4 + $0x13a] sm:$0xff] }
 0xa77   : > { %v10715_v9 = vadd.f32 %v10638_v21, %v16614_v10  ;;  %v10535_v21 = vld [vmem:[#allocation4 + $0x142] sm:$0xff] }
 0xa79   : > { %v16719_v52 = vadd.f32 %v16694_v18, %v10715_v9 }
 0xa7b   : > { %v10783_v24 = vmax.f32 %v16719_v52, 0.0 }
 0xa7d   : > { %v10820_v37 = vsel %vm10813_vm5, %v10783_v24, -inf }
 0xa7e   : > { %v10640_v63 = vpop.f32.mrf.mxu3  ;;  %10821 = vmax.xlane.f32.xlu1 %v10820_v37  ;;  %v10555_v37 = vpack.c.bf16 %v10535_v21, %v10534_v22 }
 0xa7f   : > { %v10716_v10 = vadd.f32 %v10640_v63, %v16620_v13  ;;  %v16743_v13 = vpop.f32.mrf.mxu2 }
 0xa81   : > { %v16733_v36 = vadd.f32 %v16694_v18, %v10716_v10 }
 0xa83   : > { %12580 = vmatmul.msk.bf16.gmra.mxu3 %vm416_vm3, %v10554_v35  ;;  %v17327_v49 = vmax.f32 %v16733_v36, 0.0 }
 0xa85   : > { %v10823_v45 = vsel %vm10813_vm5, %v17327_v49, -inf }
 0xa86   : > { %v10643_v27 = vpop.f32.mrf.mxu3  ;;  %10824 = vmax.xlane.f32.xlu1 %v10823_v45  ;;  %v9963_v45 = vpop.f32.mrf.mxu0 }
 0xa87   : > { %v10717_v12 = vadd.f32 %v10643_v27, %v16628_v44  ;;  %v16755_v44 = vpop.f32.mrf.mxu1  ;;  %v16760_v31 = vpop.f32.mrf.mxu2 }
 0xa89   : > { %v16746_v57 = vadd.f32 %v16694_v18, %v10717_v12 }
 0xa8b   : > { %v17326_v42 = vmax.f32 %v16746_v57, 0.0 }
 0xa8d   : > { %v10826_v59 = vsel %vm10813_vm5, %v17326_v42, -inf }
 0xa8e   : > { %v10645_v50 = vpop.f32.mrf.mxu3  ;;  %10827 = vmax.xlane.f32.xlu2 %v10826_v59 }
 0xa8f   : > { %v10718_v9 = vadd.f32 %v10645_v50, %v16634_v19  ;;  %v16771_v12 = vpop.f32.mrf.mxu1  ;;  %v16774_v50 = vpop.f32.mrf.mxu2 }
 0xa91   : > { %v16758_v63 = vadd.f32 %v16694_v18, %v10718_v9  ;;  %v10536_v9 = vld [vmem:[#allocation4 + $0x152] sm:$0xff] }
 0xa93   : > { %12581 = vmatmul.msk.bf16.gmra.mxu3 %vm416_vm3, %v10555_v37  ;;  %v17325_v30 = vmax.f32 %v16758_v63, 0.0  ;;  %v10537_v37 = vld [vmem:[#allocation4 + $0x15a] sm:$0xff] }
 0xa95   : > { %v10829_v10 = vsel %vm10813_vm5, %v17325_v30, -inf  ;;  %v9965_v30 = vpop.f32.mrf.mxu0 }
 0xa96   : > { %v10648_v35 = vpop.f32.mrf.mxu3  ;;  %10830 = vmax.xlane.f32.xlu2 %v10829_v10 }
 0xa97   : > { %v10719_v19 = vadd.f32 %v10648_v35, %v16642_v56  ;;  %v10021_v56 = vadd.f32 %v9953_v43, %v16535_v40  ;;  %v10556_v35 = vpack.c.bf16 %v10537_v37, %v10536_v9  ;;  %v10432_v43 = vpop.f32.mrf.mxu2 }
 0xa99   : > { %v16769_v27 = vadd.f32 %v16694_v18, %v10719_v19  ;;  %v10255_v42 = vadd.f32 %v16708_v15, %v10021_v56 }
 0xa9b   : > { %v17328_v59 = vmax.f32 %v16769_v27, 0.0 }
 0xa9d   : > { %v10832_v22 = vsel %vm10813_vm5, %v17328_v59, -inf  ;;  %v10199_v59 = vpop.f32.mrf.mxu1 }
 0xa9e   : > { %v10650_v21 = vpop.f32.mrf.mxu3  ;;  %10833 = vmax.xlane.f32.xlu0 %v10832_v22  ;;  %v10488_v22 = vadd.f32 %v16712_v17, %v10255_v42 }
 0xa9f   : > { %v10720_v10 = vadd.f32 %v10650_v21, %v16648_v58  ;;  %v10022_v21 = vadd.f32 %v16721_v54, %v16542_v47  ;;  %v10023_v47 = vadd.f32 %v9958_v28, %v16554_v46 }
 0xaa1   : > { %v16782_v19 = vadd.f32 %v16694_v18, %v10720_v10  ;;  %v10256_v37 = vadd.f32 %v16724_v62, %v10022_v21  ;;  %v9968_v10 = vpop.f32.mrf.mxu0 }
 0xaa3   : > { %12582 = vmatmul.msk.bf16.gmra.mxu3 %vm416_vm3, %v10556_v35  ;;  %v17329_v49 = vmax.f32 %v16782_v19, 0.0  ;;  %v10489_v17 = vadd.f32 %v16729_v39, %v10256_v37 }
 0xaa5   : > { %v10835_v40 = vsel %vm10813_vm5, %v17329_v49, -inf  ;;  %v10539_v49 = vld [vmem:[#allocation4 + $0x172] sm:$0xff]  ;;  %v10202_v54 = vpop.f32.mrf.mxu1 }
 0xaa6   : > { %v10653_v58 = vpop.f32.mrf.mxu3  ;;  %10836 = vmax.xlane.f32.xlu1 %v10835_v40  ;;  %v10538_v40 = vld [vmem:[#allocation4 + $0x16a] sm:$0xff] }
 0xaa7   : > { %v10721_v9 = vadd.f32 %v10653_v58, %v10488_v22  ;;  %v10435_v58 = vpop.f32.mrf.mxu2  ;;  %v10557_v21 = vpack.c.bf16 %v10539_v49, %v10538_v40 }
 0xaa9   : > { %v16794_v15 = vadd.f32 %v16694_v18, %v10721_v9  ;;  %v10257_v9 = vadd.f32 %v16740_v14, %v10023_v47  ;;  %v9970_v46 = vpop.f32.mrf.mxu0 }
 0xaab   : > { %v10789_v56 = vmax.f32 %v16794_v15, 0.0  ;;  %v10490_v37 = vadd.f32 %v16743_v13, %v10257_v9 }
 0xaad   : > { %v10838_v42 = vsel %vm10813_vm5, %v10789_v56, -inf  ;;  %v10204_v49 = vpop.f32.mrf.mxu1 }
 0xaae   : > { %v10655_v35 = vpop.f32.mrf.mxu3  ;;  %10839 = vmax.xlane.f32.xlu2 %v10838_v42 }
 0xaaf   : > { %v10722_v22 = vadd.f32 %v10655_v35, %v10489_v17  ;;  %v10024_v17 = vadd.f32 %v16752_v23, %v16561_v41  ;;  %v10437_v40 = vpop.f32.mrf.mxu2  ;;  %v10025_v41 = vadd.f32 %v9963_v45, %v16573_v48 }
 0xab1   : > { %v16804_v62 = vadd.f32 %v16694_v18, %v10722_v22  ;;  %v10258_v47 = vadd.f32 %v16755_v44, %v10024_v17  ;;  %v10259_v44 = vadd.f32 %v16771_v12, %v10025_v41  ;;  %v10542_v41 = vld [vmem:[#allocation4 + $0x19a] sm:$0xff] }
 0xab3   : > { %12583 = vmatmul.msk.bf16.gmra.mxu3 %vm416_vm3, %v10557_v21  ;;  %v10790_v39 = vmax.f32 %v16804_v62, 0.0  ;;  %v10491_v22 = vadd.f32 %v16760_v31, %v10258_v47  ;;  %v10026_v47 = vadd.f32 %v9965_v30, %v16580_v29  ;;  %v10027_v29 = vadd.f32 %v9968_v10, %v16595_v8 }
 0xab4   : > { %v10028_v8 = vadd.f32 %v9970_v46, %v16602_v16 }
 0xab5   : > { %v10841_v42 = vsel %vm10813_vm5, %v10790_v39, -inf }
 0xab6   : > { %v10658_v28 = vpop.f32.mrf.mxu3  ;;  %10842 = vmax.xlane.f32.xlu0 %v10841_v42 }
 0xab7   : > { %v10723_v35 = vadd.f32 %v10658_v28, %v10490_v37  ;;  %v9973_v37 = vpop.f32.mrf.mxu0  ;;  %v10207_v28 = vpop.f32.mrf.mxu1 }
 0xab8   : > { %v10440_v17 = vpop.f32.mrf.mxu2 }
 0xab9   : > { %v16816_v14 = vadd.f32 %v16694_v18, %v10723_v35  ;;  %v10492_v35 = vadd.f32 %v16774_v50, %v10259_v44 }
 0xabb   : > { %v17330_v13 = vmax.f32 %v16816_v14, 0.0 }
 0xabd   : > { %v10844_v21 = vsel %vm10813_vm5, %v17330_v13, -inf }
 0xabe   : > { %v10660_v9 = vpop.f32.mrf.mxu3  ;;  %10845 = vmax.xlane.f32.xlu1 %v10844_v21 }
 0xabf   : > { %v10724_v23 = vadd.f32 %v10660_v9, %v10491_v22  ;;  %v9975_v12 = vpop.f32.mrf.mxu0  ;;  %v10260_v9 = vadd.f32 %v10199_v59, %v10026_v47  ;;  %v10209_v13 = vpop.f32.mrf.mxu1  ;;  %v10261_v59 = vadd.f32 %v10202_v54, %v10027_v29  ;;  %v10262_v54 = vadd.f32 %v10204_v49, %v10028_v8 }
 0xac1   : > { %v16826_v42 = vadd.f32 %v16694_v18, %v10724_v23  ;;  %v10543_v23 = vld [vmem:[#allocation4 + $0x1a2] sm:$0xff]  ;;  %v10493_v50 = vadd.f32 %v10432_v43, %v10260_v9 }
 0xac3   : > { %12584 = vmatmul.msk.bf16.gmra.mxu3 %vm416_vm3, %v16584_v4  ;;  %v17331_v31 = vmax.f32 %v16826_v42, 0.0 }
 0xac5   : > { %v10847_v48 = vsel %vm10813_vm5, %v17331_v31, -inf  ;;  %v10442_v31 = vpop.f32.mrf.mxu2 }
 0xac6   : > { %v10663_v45 = vpop.f32.mrf.mxu3  ;;  %10848 = vmax.xlane.f32.xlu2 %v10847_v48 }
 0xac7   : > { %v10725_v22 = vadd.f32 %v10663_v45, %v10492_v35  ;;  %v10559_v35 = vpack.c.bf16 %v10543_v23, %v10542_v41  ;;  %v9978_v43 = vpop.f32.mrf.mxu0  ;;  %v10212_v10 = vpop.f32.mrf.mxu1 }
 0xac8   : > { %v10031_v34 = vadd.f32 %v9978_v43, %v16624_v6 }
 0xac9   : > { %v16838_v21 = vadd.f32 %v16694_v18, %v10725_v22  ;;  %v10494_v22 = vadd.f32 %v10435_v58, %v10261_v59 }
 0xacb   : > { %v17332_v4 = vmax.f32 %v16838_v21, 0.0 }
 0xacd   : > { %v10850_v44 = vsel %vm10813_vm5, %v17332_v4, -inf  ;;  %v10445_v23 = vpop.f32.mrf.mxu2 }
 0xace   : > { %v10665_v48 = vpop.f32.mrf.mxu3  ;;  %10851 = vmax.xlane.f32.xlu0 %v10850_v44 }
 0xacf   : > { %v10726_v30 = vadd.f32 %v10665_v48, %v10493_v50  ;;  %v10495_v48 = vadd.f32 %v10437_v40, %v10262_v54  ;;  %v9980_v29 = vpop.f32.mrf.mxu0  ;;  %v10214_v46 = vpop.f32.mrf.mxu1 }
 0xad0   : > { %v10032_v52 = vadd.f32 %v9980_v29, %v16631_v5 }
 0xad1   : > { %v16846_v45 = vadd.f32 %v16694_v18, %v10726_v30 }
 0xad3   : > { %12585 = vmatmul.msk.bf16.gmra.mxu3 %vm416_vm3, %v10559_v35  ;;  %v10794_v47 = vmax.f32 %v16846_v45, 0.0  ;;  %v10029_v35 = vadd.f32 %v9973_v37, %v16610_v11  ;;  %v10030_v37 = vadd.f32 %v9975_v12, %v16617_v7 }
 0xad5   : > { %v10853_v9 = vsel %vm10813_vm5, %v10794_v47, -inf  ;;  %v10263_v40 = vadd.f32 %v10207_v28, %v10029_v35 }
 0xad6   : > { %v10668_v4 = vpop.f32.mrf.mxu3  ;;  %10854 = vmax.xlane.f32.xlu1 %v10853_v9 }
 0xad7   : > { %v10727_v41 = vadd.f32 %v10668_v4, %v10494_v22  ;;  %v10447_v22 = vpop.f32.mrf.mxu2  ;;  %v10217_v28 = vpop.f32.mrf.mxu1 }
 0xad9   : > { %v16855_v50 = vadd.f32 %v16694_v18, %v10727_v41  ;;  %v10496_v41 = vadd.f32 %v10440_v17, %v10263_v40  ;;  %v10264_v17 = vadd.f32 %v10209_v13, %v10030_v37 }
 0xadb   : > { %v10795_v44 = vmax.f32 %v16855_v50, 0.0  ;;  %v10497_v40 = vadd.f32 %v10442_v31, %v10264_v17 }
 0xadd   : > { %v10856_v58 = vsel %vm10813_vm5, %v10795_v44, -inf }
 0xade   : > { %v10670_v30 = vpop.f32.mrf.mxu3  ;;  %10857 = vmax.xlane.f32.xlu2 %v10856_v58  ;;  %v9983_v58 = vpop.f32.mrf.mxu0 }
 0xadf   : > { %v10728_v16 = vadd.f32 %v10670_v30, %v10495_v48 }
 0xae1   : > { %v16863_v4 = vadd.f32 %v16694_v18, %v10728_v16  ;;  %v10816_v59 = vpop.xlane.xlu0 %10815 }
 0xae2   : > { %v10910_v49 = vsub.f32 %v10781_v1, %v10816_v59  ;;  %v10450_v59 = vpop.f32.mrf.mxu2 }
 0xae3   : > { %v10796_v9 = vmax.f32 %v16863_v4, 0.0 }
 0xae4   : > { %v10942_v8 = vmul.f32 1.442695, %v10910_v49 }
 0xae5   : > { %v10859_v54 = vsel %vm10813_vm5, %v10796_v9, -inf }
 0xae6   : > { %12792 = vpow2.f32 %v10942_v8  ;;  %v10673_v11 = vpop.f32.mrf.mxu3  ;;  %10860 = vmax.xlane.f32.xlu0 %v10859_v54  ;;  %v9985_v54 = vpop.f32.mrf.mxu0 }
 0xae7   : > { %v10729_v48 = vadd.f32 %v10673_v11, %v10496_v41  ;;  %v10265_v11 = vadd.f32 %v10212_v10, %v10031_v34 }
 0xae9   : > { %v16873_v30 = vadd.f32 %v16694_v18, %v10729_v48  ;;  %v10819_v26 = vpop.xlane.xlu0 %10818  ;;  %v10498_v17 = vadd.f32 %v10445_v23, %v10265_v11  ;;  %v17594_v23 = vmax.f32 %v16733_v36, 0.0  ;;  %v10033_v36 = vadd.f32 %v9983_v58, %v16638_v33 }
 0xaea   : > { %v10911_v1 = vsub.f32 %v10782_v53, %v10819_v26 }
 0xaeb   : > { %v10797_v35 = vmax.f32 %v16873_v30, 0.0 }
 0xaec   : > { %v16878_v16 = vpop.eup %12792  ;;  %v10944_v49 = vmul.f32 1.442695, %v10911_v1  ;;  %v10219_v1 = vpop.f32.mrf.mxu1 }
 0xaed   : > { %v10862_v7 = vsel %vm10813_vm5, %v10797_v35, -inf  ;;  %v11006_v12 = vsel %vm10813_vm5, %v16878_v16, 0.0 }
 0xaee   : > { %12794 = vpow2.f32 %v10944_v49  ;;  %v10675_v8 = vpop.f32.mrf.mxu3  ;;  %10863 = vmax.xlane.f32.xlu1 %v10862_v7  ;;  %11007 = vadd.xlane.f32.xlu2 %v11006_v12  ;;  %v10452_v49 = vpop.f32.mrf.mxu2 }
 0xaef   : > { %v10730_v53 = vadd.f32 %v10675_v8, %v10497_v40  ;;  %v10266_v8 = vadd.f32 %v10214_v46, %v10032_v52 }
 0xaf1   : > { %v16887_v13 = vadd.f32 %v16694_v18, %v10730_v53  ;;  %v10822_v41 = vpop.xlane.xlu1 %10821  ;;  %v10499_v11 = vadd.f32 %v10447_v22, %v10266_v8 }
 0xaf2   : > { %v10912_v31 = vsub.f32 %v10783_v24, %v10822_v41  ;;  %v9988_v41 = vpop.f32.mrf.mxu0 }
 0xaf3   : > { %v10798_v37 = vmax.f32 %v16887_v13, 0.0 }
 0xaf4   : > { %v16892_v48 = vpop.eup %12794  ;;  %v10946_v26 = vmul.f32 1.442695, %v10912_v31  ;;  %v10222_v46 = vpop.f32.mrf.mxu1 }
 0xaf5   : > { %v11009_v6 = vsel %vm10813_vm5, %v16892_v48, 0.0  ;;  %v10865_v43 = vsel %vm10813_vm5, %v10798_v37, -inf }
 0xaf6   : > { %12796 = vpow2.f32 %v10946_v26  ;;  %v10678_v40 = vpop.f32.mrf.mxu3  ;;  %11010 = vadd.xlane.f32.xlu0 %v11009_v6  ;;  %10866 = vmax.xlane.f32.xlu2 %v10865_v43  ;;  %v10455_v6 = vpop.f32.mrf.mxu2 }
 0xaf7   : > { %v10731_v24 = vadd.f32 %v10678_v40, %v10498_v17  ;;  %v17595_v40 = vmax.f32 %v16746_v57, 0.0  ;;  %v10034_v57 = vadd.f32 %v9985_v54, %v16645_v2 }
 0xaf9   : > { %v16901_v10 = vadd.f32 %v16694_v18, %v10731_v24  ;;  %v10825_v7 = vpop.xlane.xlu1 %10824  ;;  %v10267_v24 = vadd.f32 %v10217_v28, %v10033_v36  ;;  %v17596_v36 = vmax.f32 %v16758_v63, 0.0  ;;  %v10035_v63 = vadd.f32 %v9988_v41, %v16652_v51 }
 0xafa   : > { %v10913_v12 = vsub.f32 %v17594_v23, %v10825_v7 }
 0xafb   : > { %v10799_v34 = vmax.f32 %v16901_v10, 0.0  ;;  %v10500_v8 = vadd.f32 %v10450_v59, %v10267_v24 }
 0xafc   : > { %v16906_v53 = vpop.eup %12796  ;;  %v10948_v31 = vmul.f32 1.442695, %v10913_v12 }
 0xafd   : > { %v11012_v26 = vsel %vm10813_vm5, %v16906_v53, 0.0  ;;  %v10868_v5 = vsel %vm10813_vm5, %v10799_v34, -inf }
 0xafe   : > { %12798 = vpow2.f32 %v10948_v31  ;;  %v10680_v29 = vpop.f32.mrf.mxu3  ;;  %11013 = vadd.xlane.f32.xlu1 %v11012_v26  ;;  %10869 = vmax.xlane.f32.xlu0 %v10868_v5  ;;  %v9990_v31 = vpop.f32.mrf.mxu0 }
 0xaff   : > { %v10732_v17 = vadd.f32 %v10680_v29, %v10499_v11  ;;  %v10224_v26 = vpop.f32.mrf.mxu1  ;;  %v10457_v29 = vpop.f32.mrf.mxu2 }
 0xb01   : > { %v16915_v43 = vadd.f32 %v16694_v18, %v10732_v17  ;;  %v10828_v22 = vpop.xlane.xlu2 %10827 }
 0xb02   : > { %v10914_v52 = vsub.f32 %v17595_v40, %v10828_v22  ;;  %v10268_v22 = vadd.f32 %v10219_v1, %v10034_v57 }
 0xb03   : > { %v10800_v7 = vmax.f32 %v16915_v43, 0.0 }
 0xb04   : > { %v16920_v23 = vpop.eup %12798  ;;  %v10950_v12 = vmul.f32 1.442695, %v10914_v52 }
 0xb05   : > { %v10871_v33 = vsel %vm10813_vm5, %v10800_v7, -inf  ;;  %v11015_v58 = vsel %vm10813_vm5, %v16920_v23, 0.0 }
 0xb06   : > { %12800 = vpow2.f32 %v10950_v12  ;;  %v10683_v11 = vpop.f32.mrf.mxu3  ;;  %10872 = vmax.xlane.f32.xlu1 %v10871_v33  ;;  %11016 = vadd.xlane.f32.xlu2 %v11015_v58  ;;  %v10501_v12 = vadd.f32 %v10452_v49, %v10268_v22  ;;  %v9993_v33 = vpop.f32.mrf.mxu0  ;;  %v17597_v49 = vmax.f32 %v16769_v27, 0.0  ;;  %v10036_v27 = vadd.f32 %v9990_v31, %v16656_v0 }
 0xb07   : > { %v10733_v28 = vadd.f32 %v10683_v11, %v10500_v8  ;;  %v10460_v22 = vpop.f32.mrf.mxu2 }
 0xb09   : > { %v16929_v5 = vadd.f32 %v16694_v18, %v10733_v28  ;;  %v10831_v59 = vpop.xlane.xlu2 %10830  ;;  %v10227_v28 = vpop.f32.mrf.mxu1 }
 0xb0a   : > { %v10915_v17 = vsub.f32 %v17596_v36, %v10831_v59  ;;  %v10269_v59 = vadd.f32 %v10222_v46, %v10035_v63 }
 0xb0b   : > { %v10801_v40 = vmax.f32 %v16929_v5, 0.0 }
 0xb0c   : > { %v16934_v52 = vpop.eup %12800  ;;  %v10952_v24 = vmul.f32 1.442695, %v10915_v17 }
 0xb0d   : > { %v11018_v2 = vsel %vm10813_vm5, %v16934_v52, 0.0  ;;  %v10874_v54 = vsel %vm10813_vm5, %v10801_v40, -inf }
 0xb0e   : > { %12802 = vpow2.f32 %v10952_v24  ;;  %v10685_v8 = vpop.f32.mrf.mxu3  ;;  %11019 = vadd.xlane.f32.xlu0 %v11018_v2  ;;  %10875 = vmax.xlane.f32.xlu2 %v10874_v54  ;;  %v10502_v2 = vadd.f32 %v10455_v6, %v10269_v59  ;;  %v9995_v63 = vpop.f32.mrf.mxu0  ;;  %v17598_v6 = vmax.f32 %v16782_v19, 0.0  ;;  %v10037_v19 = vadd.f32 %v9993_v33, %v16660_v32 }
 0xb0f   : > { %v10734_v1 = vadd.f32 %v10685_v8, %v10501_v12  ;;  %v10038_v15 = vadd.f32 %v9995_v63, %v16664_v60 }
 0xb11   : > { %v16943_v58 = vadd.f32 %v16694_v18, %v10734_v1  ;;  %v10834_v11 = vpop.xlane.xlu0 %10833 }
 0xb12   : > { %v10916_v57 = vsub.f32 %v17597_v49, %v10834_v11  ;;  %v10270_v11 = vadd.f32 %v10224_v26, %v10036_v27 }
 0xb13   : > { %v10802_v36 = vmax.f32 %v16943_v58, 0.0 }
 0xb14   : > { %v16948_v17 = vpop.eup %12802  ;;  %v10954_v24 = vmul.f32 1.442695, %v10916_v57 }
 0xb15   : > { %v11021_v51 = vsel %vm10813_vm5, %v16948_v17, 0.0  ;;  %v10877_v41 = vsel %vm10813_vm5, %v10802_v36, -inf }
 0xb16   : > { %12804 = vpow2.f32 %v10954_v24  ;;  %v10688_v12 = vpop.f32.mrf.mxu3  ;;  %11022 = vadd.xlane.f32.xlu1 %v11021_v51  ;;  %10878 = vmax.xlane.f32.xlu0 %v10877_v41  ;;  %v10229_v24 = vpop.f32.mrf.mxu1  ;;  %v10503_v51 = vadd.f32 %v10457_v29, %v10270_v11 }
 0xb17   : > { %v10735_v46 = vadd.f32 %v10688_v12, %v10502_v2  ;;  %v10462_v2 = vpop.f32.mrf.mxu2 }
 0xb19   : > { %v16957_v54 = vadd.f32 %v16694_v18, %v10735_v46  ;;  %v10837_v8 = vpop.xlane.xlu1 %10836  ;;  %v10271_v46 = vadd.f32 %v10227_v28, %v10037_v19  ;;  %v10272_v19 = vadd.f32 %v10229_v24, %v10038_v15 }
 0xb1a   : > { %v10917_v1 = vsub.f32 %v17598_v6, %v10837_v8 }
 0xb1b   : > { %v10803_v49 = vmax.f32 %v16957_v54, 0.0 }
 0xb1c   : > { %v16962_v57 = vpop.eup %12804  ;;  %v10956_v59 = vmul.f32 1.442695, %v10917_v1  ;;  %v9998_v1 = vpop.f32.mrf.mxu0 }
 0xb1d   : > { %v10880_v0 = vsel %vm10813_vm5, %v10803_v49, -inf  ;;  %v11024_v31 = vsel %vm10813_vm5, %v16962_v57, 0.0  ;;  %v10039_v62 = vadd.f32 %v9998_v1, %v16668_v20 }
 0xb1e   : > { %12806 = vpow2.f32 %v10956_v59  ;;  %v10690_v41 = vpop.f32.mrf.mxu3  ;;  %10881 = vmax.xlane.f32.xlu1 %v10880_v0  ;;  %11025 = vadd.xlane.f32.xlu2 %v11024_v31  ;;  %v10504_v59 = vadd.f32 %v10460_v22, %v10271_v46  ;;  %v10505_v46 = vadd.f32 %v10462_v2, %v10272_v19 }
 0xb1f   : > { %v10736_v26 = vadd.f32 %v10690_v41, %v10503_v51  ;;  %v10465_v51 = vpop.f32.mrf.mxu2 }
 0xb21   : > { %v16971_v12 = vadd.f32 %v16694_v18, %v10736_v26  ;;  %v10840_v27 = vpop.xlane.xlu2 %10839 }
 0xb22   : > { %v10918_v29 = vsub.f32 %v10789_v56, %v10840_v27  ;;  %v10232_v56 = vpop.f32.mrf.mxu1 }
 0xb23   : > { %v10804_v8 = vmax.f32 %v16971_v12, 0.0 }
 0xb24   : > { %v16976_v6 = vpop.eup %12806  ;;  %v10958_v11 = vmul.f32 1.442695, %v10918_v29 }
 0xb25   : > { %v11027_v0 = vsel %vm10813_vm5, %v16976_v6, 0.0  ;;  %v10883_v32 = vsel %vm10813_vm5, %v10804_v8, -inf }
 0xb26   : > { %12808 = vpow2.f32 %v10958_v11  ;;  %v10693_v33 = vpop.f32.mrf.mxu3  ;;  %11028 = vadd.xlane.f32.xlu0 %v11027_v0  ;;  %10884 = vmax.xlane.f32.xlu2 %v10883_v32  ;;  %v10000_v11 = vpop.f32.mrf.mxu0 }
 0xb27   : > { %v10737_v28 = vadd.f32 %v10693_v33, %v10504_v59  ;;  %v10467_v32 = vpop.f32.mrf.mxu2  ;;  %v17599_v33 = vmax.f32 %v16816_v14, 0.0  ;;  %v10040_v14 = vadd.f32 %v10000_v11, %v16673_v3 }
 0xb29   : > { %v16985_v31 = vadd.f32 %v16694_v18, %v10737_v28  ;;  %v10843_v22 = vpop.xlane.xlu0 %10842  ;;  %v10273_v28 = vadd.f32 %v10232_v56, %v10039_v62 }
 0xb2a   : > { %v10919_v41 = vsub.f32 %v10790_v39, %v10843_v22  ;;  %v10234_v24 = vpop.f32.mrf.mxu1 }
 0xb2b   : > { %v10805_v26 = vmax.f32 %v16985_v31, 0.0 }
 0xb2c   : > { %v16990_v27 = vpop.eup %12808  ;;  %v10960_v29 = vmul.f32 1.442695, %v10919_v41 }
 0xb2d   : > { %v10886_v60 = vsel %vm10813_vm5, %v10805_v26, -inf  ;;  %v11030_v63 = vsel %vm10813_vm5, %v16990_v27, 0.0 }
 0xb2e   : > { %12810 = vpow2.f32 %v10960_v29  ;;  %v10695_v59 = vpop.f32.mrf.mxu3  ;;  %10887 = vmax.xlane.f32.xlu0 %v10886_v60  ;;  %11031 = vadd.xlane.f32.xlu1 %v11030_v63  ;;  %v10506_v29 = vadd.f32 %v10465_v51, %v10273_v28  ;;  %v10003_v60 = vpop.f32.mrf.mxu0  ;;  %v10274_v51 = vadd.f32 %v10234_v24, %v10040_v14 }
 0xb2f   : > { %v10738_v39 = vadd.f32 %v10695_v59, %v10505_v46  ;;  %v10041_v28 = vadd.f32 %v10003_v60, %v16677_v55 }
 0xb31   : > { %v16999_v0 = vadd.f32 %v16694_v18, %v10738_v39  ;;  %v10846_v2 = vpop.xlane.xlu1 %10845 }
 0xb32   : > { %v10920_v15 = vsub.f32 %v17599_v33, %v10846_v2  ;;  %v10237_v59 = vpop.f32.mrf.mxu1  ;;  %v10470_v2 = vpop.f32.mrf.mxu2  ;;  %v10507_v33 = vadd.f32 %v10467_v32, %v10274_v51 }
 0xb33   : > { %v10806_v22 = vmax.f32 %v16999_v0, 0.0 }
 0xb34   : > { %v17004_v41 = vpop.eup %12810  ;;  %v10962_v19 = vmul.f32 1.442695, %v10920_v15 }
 0xb35   : > { %v11033_v20 = vsel %vm10813_vm5, %v17004_v41, 0.0  ;;  %v10889_v1 = vsel %vm10813_vm5, %v10806_v22, -inf }
 0xb36   : > { %12812 = vpow2.f32 %v10962_v19  ;;  %v10698_v46 = vpop.f32.mrf.mxu3  ;;  %11034 = vadd.xlane.f32.xlu2 %v11033_v20  ;;  %10890 = vmax.xlane.f32.xlu1 %v10889_v1  ;;  %v10275_v20 = vadd.f32 %v10237_v59, %v10041_v28 }
 0xb37   : > { %v10739_v56 = vadd.f32 %v10698_v46, %v10506_v29  ;;  %v10005_v29 = vpop.f32.mrf.mxu0 }
 0xb38   : > { %v10508_v46 = vadd.f32 %v10470_v2, %v10275_v20  ;;  %v17600_v2 = vmax.f32 %v16838_v21, 0.0 }
 0xb39   : > { %v17013_v63 = vadd.f32 %v16694_v18, %v10739_v56 }
 0xb3a   : > { %v10239_v1 = vpop.f32.mrf.mxu1  ;;  %v10472_v56 = vpop.f32.mrf.mxu2 }
 0xb3b   : > { %v10807_v62 = vmax.f32 %v17013_v63, 0.0 }
 0xb3c   : > { %v17016_v39 = vpop.eup %12812 }
 0xb3d   : > { %v11036_v15 = vsel %vm10813_vm5, %v17016_v39, 0.0  ;;  %v10892_v3 = vsel %vm10813_vm5, %v10807_v62, -inf }
 0xb3e   : > { %v10700_v11 = vpop.f32.mrf.mxu3  ;;  %11037 = vadd.xlane.f32.xlu0 %v11036_v15  ;;  %10893 = vmax.xlane.f32.xlu2 %v10892_v3  ;;  %v10042_v15 = vadd.f32 %v10005_v29, %v16681_v38 }
 0xb3f   : > { %v10740_v19 = vadd.f32 %v10700_v11, %v10507_v33  ;;  %v10008_v11 = vpop.f32.mrf.mxu0 }
 0xb40   : > { %v10276_v3 = vadd.f32 %v10239_v1, %v10042_v15  ;;  %v10043_v38 = vadd.f32 %v10008_v11, %v16685_v61  ;;  %v10849_v1 = vpop.xlane.xlu2 %10848 }
 0xb41   : > { %v17025_v24 = vadd.f32 %v16694_v18, %v10740_v19  ;;  %v10852_v60 = vpop.xlane.xlu0 %10851 }
 0xb42   : > { %v10922_v28 = vsub.f32 %v17600_v2, %v10852_v60  ;;  %v10509_v19 = vadd.f32 %v10472_v56, %v10276_v3 }
 0xb43   : > { %v17333_v32 = vmax.f32 %v17025_v24, 0.0 }
 0xb45   : > { %v10895_v14 = vsel %vm10813_vm5, %v17333_v32, -inf }
 0xb46   : > { %v10703_v51 = vpop.f32.mrf.mxu3  ;;  %10896 = vmax.xlane.f32.xlu0 %v10895_v14  ;;  %v10242_v14 = vpop.f32.mrf.mxu1 }
 0xb47   : > { %v10741_v55 = vadd.f32 %v10703_v51, %v10508_v46  ;;  %v10475_v46 = vpop.f32.mrf.mxu2  ;;  %v10966_v51 = vmul.f32 1.442695, %v10922_v28  ;;  %v10277_v21 = vadd.f32 %v10242_v14, %v10043_v38 }
 0xb49   : > { %v17033_v33 = vadd.f32 %v16694_v18, %v10741_v55  ;;  %v10855_v15 = vpop.xlane.xlu1 %10854  ;;  %12814 = vpow2.f32 %v10966_v51  ;;  %v10510_v3 = vadd.f32 %v10475_v46, %v10277_v21  ;;  %v17601_v21 = vmax.f32 %v16826_v42, 0.0 }
 0xb4a   : > { %v10923_v60 = vsub.f32 %v10794_v47, %v10855_v15 }
 0xb4b   : > { %v10809_v59 = vmax.f32 %v17033_v33, 0.0 }
 0xb4d   : > { %v10898_v20 = vsel %vm10813_vm5, %v10809_v59, -inf }
 0xb4e   : > { %v10705_v32 = vpop.f32.mrf.mxu3  ;;  %10899 = vmax.xlane.f32.xlu1 %v10898_v20  ;;  %v10968_v20 = vmul.f32 1.442695, %v10923_v60 }
 0xb4f   : > { %v10742_v29 = vadd.f32 %v10705_v32, %v10509_v19  ;;  %v10010_v32 = vpop.f32.mrf.mxu0  ;;  %v10244_v19 = vpop.f32.mrf.mxu1 }
 0xb50   : > { %v10044_v2 = vadd.f32 %v10010_v32, %v16688_v25  ;;  %v17055_v45 = vpop.eup %12814  ;;  %v10477_v47 = vpop.f32.mrf.mxu2  ;;  %v10921_v25 = vsub.f32 %v17601_v21, %v10849_v1  ;;  %12816 = vpow2.f32 %v10968_v20 }
 0xb51   : > { %v17043_v55 = vadd.f32 %v16694_v18, %v10742_v29  ;;  %v10858_v14 = vpop.xlane.xlu2 %10857  ;;  %v11042_v32 = vsel %vm10813_vm5, %v17055_v45, 0.0 }
 0xb52   : > { %v10278_v51 = vadd.f32 %v10244_v19, %v10044_v2 }
 0xb53   : > { %v10810_v56 = vmax.f32 %v17043_v55, 0.0 }
 0xb54   : > { %v10511_v60 = vadd.f32 %v10477_v47, %v10278_v51 }
 0xb55   : > { %v10901_v61 = vsel %vm10813_vm5, %v10810_v56, -inf }
 0xb56   : > { %v10708_v11 = vpop.f32.mrf.mxu3  ;;  %10902 = vmax.xlane.f32.xlu2 %v10901_v61 }
 0xb57   : > { %v10743_v28 = vadd.f32 %v10708_v11, %v10510_v3 }
 0xb59   : > { %v17053_v38 = vadd.f32 %v16694_v18, %v10743_v28  ;;  %v10861_v29 = vpop.xlane.xlu0 %10860  ;;  %v17070_v28 = vpop.eup %12816 }
 0xb5a   : > { %v10925_v46 = vsub.f32 %v10796_v9, %v10861_v29  ;;  %v10964_v9 = vmul.f32 1.442695, %v10921_v25 }
 0xb5b   : > { %v10811_v15 = vmax.f32 %v17053_v38, 0.0 }
 0xb5c   : > { %v10972_v3 = vmul.f32 1.442695, %v10925_v46  ;;  %v10924_v46 = vsub.f32 %v10795_v44, %v10858_v14 }
 0xb5d   : > { %v10904_v61 = vsel %vm10813_vm5, %v10811_v15, -inf }
 0xb5e   : > { %12818 = vpow2.f32 %v10972_v3  ;;  %v10710_v11 = vpop.f32.mrf.mxu3  ;;  %10905 = vmax.xlane.f32.xlu0 %v10904_v61  ;;  %11043 = vadd.xlane.f32.xlu2 %v11042_v32  ;;  %v10970_v50 = vmul.f32 1.442695, %v10924_v46 }
 0xb5f   : > { %v10744_v4 = vadd.f32 %v10710_v11, %v10511_v60 }
 0xb61   : > { %v17068_v2 = vadd.f32 %v16694_v18, %v10744_v4  ;;  %v10864_v42 = vpop.xlane.xlu1 %10863  ;;  %v11008_v1 = vpop.xlane.xlu2 %11007  ;;  %v11045_v18 = vsel %vm10813_vm5, %v17070_v28, 0.0 }
 0xb62   : > { %v10926_v19 = vsub.f32 %v10797_v35, %v10864_v42  ;;  %12820 = vrcp.f32 %v11008_v1 }
 0xb63   : > { %v10812_v20 = vmax.f32 %v17068_v2, 0.0  ;;  %12822 = vpow2.f32 %v10964_v9 }
 0xb64   : > { %v17075_v29 = vpop.eup %12818  ;;  %v10974_v47 = vmul.f32 1.442695, %v10926_v19 }
 0xb65   : > { %v11051_v51 = vsel %vm10813_vm5, %v17075_v29, 0.0  ;;  %v10907_v30 = vsel %vm10813_vm5, %v10812_v20, -inf }
 0xb66   : > { %12824 = vpow2.f32 %v10974_v47  ;;  %11046 = vadd.xlane.f32.xlu0 %v11045_v18  ;;  %11052 = vadd.xlane.f32.xlu2 %v11051_v51 }
 0xb67   : > { %10908 = vmax.xlane.f32.xlu1 %v10907_v30 }
 0xb68   : > { %v12821_v35 = vpop.eup %12820 }
 0xb69   : > { %v11134_v44 = vmul.f32 %v12821_v35, %v16878_v16  ;;  %v11011_v14 = vpop.xlane.xlu0 %11010  ;;  %v17094_v21 = vpop.eup %12822 }
 0xb6a   : > { %12826 = vrcp.f32 %v11011_v14  ;;  %v10867_v25 = vpop.xlane.xlu2 %10866  ;;  %v11039_v16 = vsel %vm10813_vm5, %v17094_v21, 0.0 }
 0xb6b   : > { %11166 = vst.msk [vmem:[%s17091_s14] sm:$0xff] %vm10813_vm5, %v11134_v44  ;;  %12828 = vpow2.f32 %v10970_v50  ;;  %v10927_v60 = vsub.f32 %v10798_v37, %v10867_v25 }
 0xb6c   : > { %v17098_v3 = vpop.eup %12824 }
 0xb6d   : > { %v11054_v61 = vsel %vm10813_vm5, %v17098_v3, 0.0  ;;  %v10976_v4 = vmul.f32 1.442695, %v10927_v60 }
 0xb6e   : > { %11055 = vadd.xlane.f32.xlu0 %v11054_v61 }
 0xb6f   : > { %11040 = vadd.xlane.f32.xlu1 %v11039_v16 }
 0xb70   : > { %v12827_v32 = vpop.eup %12826 }
 0xb71   : > { %v11135_v11 = vmul.f32 %v12827_v32, %v16892_v48  ;;  %v11014_v9 = vpop.xlane.xlu1 %11013  ;;  %v10870_v42 = vpop.xlane.xlu0 %10869 }
 0xb72   : > { %12830 = vrcp.f32 %v11014_v9  ;;  %v10928_v13 = vsub.f32 %v10799_v34, %v10870_v42  ;;  %v17109_v37 = vpop.eup %12828 }
 0xb73   : > { %11167 = vst.msk [vmem:[%s17091_s14 + $0x8] sm:$0xff] %vm10813_vm5, %v11135_v11  ;;  %12832 = vpow2.f32 %v10976_v4  ;;  %v11048_v19 = vsel %vm10813_vm5, %v17109_v37, 0.0 }
 0xb74   : > { %v10978_v1 = vmul.f32 1.442695, %v10928_v13 }
 0xb76   : > { %12834 = vpow2.f32 %v10978_v1 }
 0xb77   : > { %11049 = vadd.xlane.f32.xlu1 %v11048_v19 }
 0xb78   : > { %v12831_v48 = vpop.eup %12830 }
 0xb79   : > { %v11136_v47 = vmul.f32 %v12831_v48, %v16906_v53  ;;  %v10873_v46 = vpop.xlane.xlu1 %10872  ;;  %v11017_v18 = vpop.xlane.xlu2 %11016 }
 0xb7a   : > { %v10929_v10 = vsub.f32 %v10800_v7, %v10873_v46  ;;  %12836 = vrcp.f32 %v11017_v18  ;;  %v17118_v34 = vpop.eup %12832 }
 0xb7b   : > { %11168 = vst.msk [vmem:[%s17091_s14 + $0x10] sm:$0xff] %vm10813_vm5, %v11136_v47  ;;  %v11057_v53 = vsel %vm10813_vm5, %v17118_v34, 0.0 }
 0xb7c   : > { %v17122_v51 = vpop.eup %12834  ;;  %v10980_v30 = vmul.f32 1.442695, %v10929_v10 }
 0xb7d   : > { %v11060_v35 = vsel %vm10813_vm5, %v17122_v51, 0.0 }
 0xb7e   : > { %12838 = vpow2.f32 %v10980_v30  ;;  %11061 = vadd.xlane.f32.xlu2 %v11060_v35 }
 0xb7f   : > { %11058 = vadd.xlane.f32.xlu1 %v11057_v53 }
 0xb80   : > { %v12837_v43 = vpop.eup %12836 }
 0xb81   : > { %v11137_v7 = vmul.f32 %v12837_v43, %v16920_v23  ;;  %v11020_v50 = vpop.xlane.xlu0 %11019  ;;  %v10876_v44 = vpop.xlane.xlu2 %10875 }
 0xb82   : > { %12840 = vrcp.f32 %v11020_v50  ;;  %v10930_v14 = vsub.f32 %v10801_v40, %v10876_v44 }
 0xb83   : > { %11169 = vst.msk [vmem:[%s17091_s14 + $0x18] sm:$0xff] %vm10813_vm5, %v11137_v7 }
 0xb84   : > { %v17133_v25 = vpop.eup %12838  ;;  %v10982_v60 = vmul.f32 1.442695, %v10930_v14 }
 0xb85   : > { %v11063_v61 = vsel %vm10813_vm5, %v17133_v25, 0.0 }
 0xb86   : > { %12842 = vpow2.f32 %v10982_v60  ;;  %11064 = vadd.xlane.f32.xlu0 %v11063_v61 }
 0xb88   : > { %v12841_v16 = vpop.eup %12840 }
 0xb89   : > { %v11138_v23 = vmul.f32 %v12841_v16, %v16934_v52  ;;  %v11023_v32 = vpop.xlane.xlu1 %11022  ;;  %v10879_v11 = vpop.xlane.xlu0 %10878 }
 0xb8a   : > { %12844 = vrcp.f32 %v11023_v32  ;;  %v10931_v5 = vsub.f32 %v10802_v36, %v10879_v11 }
 0xb8b   : > { %11170 = vst.msk [vmem:[%s17091_s14 + $0x20] sm:$0xff] %vm10813_vm5, %v11138_v23 }
 0xb8c   : > { %v17142_v40 = vpop.eup %12842  ;;  %v10984_v4 = vmul.f32 1.442695, %v10931_v5 }
 0xb8d   : > { %v11066_v9 = vsel %vm10813_vm5, %v17142_v40, 0.0 }
 0xb8e   : > { %12846 = vpow2.f32 %v10984_v4  ;;  %11067 = vadd.xlane.f32.xlu1 %v11066_v9 }
 0xb90   : > { %v12845_v42 = vpop.eup %12844 }
 0xb91   : > { %v11139_v52 = vmul.f32 %v12845_v42, %v16948_v17  ;;  %v10882_v13 = vpop.xlane.xlu1 %10881  ;;  %v11026_v1 = vpop.xlane.xlu2 %11025 }
 0xb92   : > { %v10932_v58 = vsub.f32 %v10803_v49, %v10882_v13  ;;  %12848 = vrcp.f32 %v11026_v1 }
 0xb93   : > { %11171 = vst.msk [vmem:[%s17091_s14 + $0x28] sm:$0xff] %vm10813_vm5, %v11139_v52  ;;  %v17602_v52 = vmax.f32 %v17025_v24, 0.0 }
 0xb94   : > { %v17151_v36 = vpop.eup %12846  ;;  %v10986_v19 = vmul.f32 1.442695, %v10932_v58 }
 0xb95   : > { %v11069_v48 = vsel %vm10813_vm5, %v17151_v36, 0.0 }
 0xb96   : > { %12850 = vpow2.f32 %v10986_v19  ;;  %11070 = vadd.xlane.f32.xlu2 %v11069_v48 }
 0xb98   : > { %v12849_v47 = vpop.eup %12848 }
 0xb99   : > { %v11140_v17 = vmul.f32 %v12849_v47, %v16962_v57  ;;  %v11029_v46 = vpop.xlane.xlu0 %11028  ;;  %v10885_v18 = vpop.xlane.xlu2 %10884 }
 0xb9a   : > { %12852 = vrcp.f32 %v11029_v46  ;;  %v10933_v54 = vsub.f32 %v10804_v8, %v10885_v18 }
 0xb9b   : > { %11172 = vst.msk [vmem:[%s17091_s14 + $0x30] sm:$0xff] %vm10813_vm5, %v11140_v17 }
 0xb9c   : > { %v17160_v49 = vpop.eup %12850  ;;  %v10988_v10 = vmul.f32 1.442695, %v10933_v54 }
 0xb9d   : > { %v11072_v30 = vsel %vm10813_vm5, %v17160_v49, 0.0 }
 0xb9e   : > { %12854 = vpow2.f32 %v10988_v10  ;;  %11073 = vadd.xlane.f32.xlu0 %v11072_v30 }
 0xba0   : > { %v12853_v35 = vpop.eup %12852 }
 0xba1   : > { %v11141_v57 = vmul.f32 %v12853_v35, %v16976_v6  ;;  %v10888_v53 = vpop.xlane.xlu0 %10887  ;;  %v11032_v43 = vpop.xlane.xlu1 %11031 }
 0xba2   : > { %v10934_v12 = vsub.f32 %v10805_v26, %v10888_v53  ;;  %12856 = vrcp.f32 %v11032_v43 }
 0xba3   : > { %11173 = vst.msk [vmem:[%s17091_s14 + $0x38] sm:$0xff] %vm10813_vm5, %v11141_v57 }
 0xba4   : > { %v17169_v8 = vpop.eup %12854  ;;  %v10990_v7 = vmul.f32 1.442695, %v10934_v12 }
 0xba5   : > { %v11075_v50 = vsel %vm10813_vm5, %v17169_v8, 0.0 }
 0xba6   : > { %12858 = vpow2.f32 %v10990_v7  ;;  %11076 = vadd.xlane.f32.xlu1 %v11075_v50 }
 0xba8   : > { %v12857_v44 = vpop.eup %12856 }
 0xba9   : > { %v11142_v6 = vmul.f32 %v12857_v44, %v16990_v27  ;;  %v10891_v14 = vpop.xlane.xlu1 %10890  ;;  %v11035_v60 = vpop.xlane.xlu2 %11034 }
 0xbaa   : > { %v10935_v31 = vsub.f32 %v10806_v22, %v10891_v14  ;;  %12860 = vrcp.f32 %v11035_v60 }
 0xbab   : > { %11174 = vst.msk [vmem:[%s17091_s14 + $0x40] sm:$0xff] %vm10813_vm5, %v11142_v6 }
 0xbac   : > { %v17178_v26 = vpop.eup %12858  ;;  %v10992_v61 = vmul.f32 1.442695, %v10935_v31 }
 0xbad   : > { %v11078_v16 = vsel %vm10813_vm5, %v17178_v26, 0.0 }
 0xbae   : > { %12862 = vpow2.f32 %v10992_v61  ;;  %11079 = vadd.xlane.f32.xlu2 %v11078_v16 }
 0xbb0   : > { %v12861_v23 = vpop.eup %12860 }
 0xbb1   : > { %v11143_v27 = vmul.f32 %v12861_v23, %v17004_v41  ;;  %v11038_v32 = vpop.xlane.xlu0 %11037  ;;  %v10894_v11 = vpop.xlane.xlu2 %10893 }
 0xbb2   : > { %12864 = vrcp.f32 %v11038_v32  ;;  %v10936_v0 = vsub.f32 %v10807_v62, %v10894_v11 }
 0xbb3   : > { %11175 = vst.msk [vmem:[%s17091_s14 + $0x48] sm:$0xff] %vm10813_vm5, %v11143_v27 }
 0xbb4   : > { %v17187_v22 = vpop.eup %12862  ;;  %v10994_v5 = vmul.f32 1.442695, %v10936_v0 }
 0xbb5   : > { %v11081_v4 = vsel %vm10813_vm5, %v17187_v22, 0.0 }
 0xbb6   : > { %12866 = vpow2.f32 %v10994_v5  ;;  %11082 = vadd.xlane.f32.xlu0 %v11081_v4 }
 0xbb8   : > { %v12865_v9 = vpop.eup %12864 }
 0xbb9   : > { %v11144_v42 = vmul.f32 %v12865_v9, %v17016_v39  ;;  %v10897_v41 = vpop.xlane.xlu0 %10896 }
 0xbba   : > { %v10937_v13 = vsub.f32 %v17602_v52, %v10897_v41 }
 0xbbb   : > { %11176 = vst.msk [vmem:[%s17091_s14 + $0x50] sm:$0xff] %vm10813_vm5, %v11144_v42 }
 0xbbc   : > { %v17196_v63 = vpop.eup %12866  ;;  %v10996_v62 = vmul.f32 1.442695, %v10937_v13 }
 0xbbd   : > { %v11084_v1 = vsel %vm10813_vm5, %v17196_v63, 0.0 }
 0xbbe   : > { %12868 = vpow2.f32 %v10996_v62  ;;  %11085 = vadd.xlane.f32.xlu1 %v11084_v1 }
 0xbc1   : > { %v10900_v58 = vpop.xlane.xlu1 %10899 }
 0xbc2   : > { %v10938_v19 = vsub.f32 %v10809_v59, %v10900_v58 }
 0xbc4   : > { %v17202_v48 = vpop.eup %12868  ;;  %v10998_v39 = vmul.f32 1.442695, %v10938_v19 }
 0xbc5   : > { %v11087_v24 = vsel %vm10813_vm5, %v17202_v48, 0.0 }
 0xbc6   : > { %12870 = vpow2.f32 %v10998_v39  ;;  %11088 = vadd.xlane.f32.xlu2 %v11087_v24 }
 0xbc9   : > { %v10903_v47 = vpop.xlane.xlu2 %10902 }
 0xbca   : > { %v10939_v17 = vsub.f32 %v10810_v56, %v10903_v47 }
 0xbcc   : > { %v17208_v46 = vpop.eup %12870  ;;  %v11000_v18 = vmul.f32 1.442695, %v10939_v17 }
 0xbcd   : > { %v11090_v54 = vsel %vm10813_vm5, %v17208_v46, 0.0 }
 0xbce   : > { %12872 = vpow2.f32 %v11000_v18  ;;  %11091 = vadd.xlane.f32.xlu0 %v11090_v54 }
 0xbd1   : > { %v10906_v33 = vpop.xlane.xlu0 %10905  ;;  %v11044_v59 = vpop.xlane.xlu2 %11043 }
 0xbd2   : > { %v10940_v10 = vsub.f32 %v10811_v15, %v10906_v33  ;;  %12874 = vrcp.f32 %v11044_v59 }
 0xbd4   : > { %v17214_v30 = vpop.eup %12872  ;;  %v11002_v35 = vmul.f32 1.442695, %v10940_v10 }
 0xbd5   : > { %v11093_v55 = vsel %vm10813_vm5, %v17214_v30, 0.0 }
 0xbd6   : > { %12876 = vpow2.f32 %v11002_v35  ;;  %11094 = vadd.xlane.f32.xlu1 %v11093_v55 }
 0xbd8   : > { %v12875_v56 = vpop.eup %12874 }
 0xbd9   : > { %v11146_v57 = vmul.f32 %v12875_v56, %v17055_v45  ;;  %v11047_v53 = vpop.xlane.xlu0 %11046  ;;  %v11053_v43 = vpop.xlane.xlu2 %11052 }
 0xbda   : > { %12878 = vrcp.f32 %v11047_v53  ;;  %v10909_v12 = vpop.xlane.xlu1 %10908 }
 0xbdb   : > { %11178 = vst.msk [vmem:[%s17091_s14 + $0x60] sm:$0xff] %vm10813_vm5, %v11146_v57  ;;  %v10941_v38 = vsub.f32 %v10812_v20, %v10909_v12  ;;  %12880 = vrcp.f32 %v11053_v43 }
 0xbdc   : > { %v17223_v15 = vpop.eup %12876 }
 0xbdd   : > { %v11004_v7 = vmul.f32 1.442695, %v10941_v38  ;;  %v11096_v50 = vsel %vm10813_vm5, %v17223_v15, 0.0 }
 0xbde   : > { %11097 = vadd.xlane.f32.xlu2 %v11096_v50 }
 0xbdf   : > { %12882 = vpow2.f32 %v11004_v7 }
 0xbe0   : > { %v12879_v45 = vpop.eup %12878 }
 0xbe1   : > { %v12881_v44 = vpop.eup %12880  ;;  %v11147_v6 = vmul.f32 %v12879_v45, %v17070_v28  ;;  %v11056_v14 = vpop.xlane.xlu0 %11055 }
 0xbe2   : > { %v11149_v60 = vmul.f32 %v12881_v44, %v17075_v29  ;;  %12884 = vrcp.f32 %v11056_v14  ;;  %v11041_v2 = vpop.xlane.xlu1 %11040 }
 0xbe3   : > { %11179 = vst.msk [vmem:[%s17091_s14 + $0x68] sm:$0xff] %vm10813_vm5, %v11147_v6  ;;  %12886 = vrcp.f32 %v11041_v2 }
 0xbe4   : > { %11181 = vst.msk [vmem:[%s17091_s14 + $0x78] sm:$0xff] %vm10813_vm5, %v11149_v60 }
 0xbe5   : > { %v17233_v20 = vpop.eup %12882 }
 0xbe6   : > { %v11099_v31 = vsel %vm10813_vm5, %v17233_v20, 0.0 }
 0xbe7   : > { %11100 = vadd.xlane.f32.xlu0 %v11099_v31 }
 0xbe8   : > { %v12885_v28 = vpop.eup %12884 }
 0xbe9   : > { %v12887_v61 = vpop.eup %12886  ;;  %v11150_v16 = vmul.f32 %v12885_v28, %v17098_v3 }
 0xbea   : > { %v11145_v29 = vmul.f32 %v12887_v61, %v17094_v21  ;;  %v11050_v23 = vpop.xlane.xlu1 %11049 }
 0xbeb   : > { %11182 = vst.msk [vmem:[%s17091_s14 + $0x80] sm:$0xff] %vm10813_vm5, %v11150_v16  ;;  %12888 = vrcp.f32 %v11050_v23 }
 0xbec   : > { %11177 = vst.msk [vmem:[%s17091_s14 + $0x58] sm:$0xff] %vm10813_vm5, %v11145_v29 }
 0xbf1   : > { %v12889_v27 = vpop.eup %12888  ;;  %v11062_v32 = vpop.xlane.xlu2 %11061 }
 0xbf2   : > { %v11148_v11 = vmul.f32 %v12889_v27, %v17109_v37  ;;  %v11059_v0 = vpop.xlane.xlu1 %11058  ;;  %12890 = vrcp.f32 %v11062_v32 }
 0xbf3   : > { %12892 = vrcp.f32 %v11059_v0 }
 0xbf4   : > { %11180 = vst.msk [vmem:[%s17091_s14 + $0x70] sm:$0xff] %vm10813_vm5, %v11148_v11 }
 0xbf8   : > { %v12891_v3 = vpop.eup %12890 }
 0xbf9   : > { %v12893_v21 = vpop.eup %12892  ;;  %v11152_v5 = vmul.f32 %v12891_v3, %v17122_v51  ;;  %v11065_v4 = vpop.xlane.xlu0 %11064 }
 0xbfa   : > { %v11151_v9 = vmul.f32 %v12893_v21, %v17118_v34  ;;  %12894 = vrcp.f32 %v11065_v4 }
 0xbfb   : > { %11184 = vst.msk [vmem:[%s17091_s14 + $0x90] sm:$0xff] %vm10813_vm5, %v11152_v5 }
 0xbfc   : > { %11183 = vst.msk [vmem:[%s17091_s14 + $0x88] sm:$0xff] %vm10813_vm5, %v11151_v9 }
 0xc00   : > { %v12895_v37 = vpop.eup %12894 }
 0xc01   : > { %v11153_v42 = vmul.f32 %v12895_v37, %v17133_v25  ;;  %v11068_v41 = vpop.xlane.xlu1 %11067 }
 0xc02   : > { %12896 = vrcp.f32 %v11068_v41 }
 0xc03   : > { %11185 = vst.msk [vmem:[%s17091_s14 + $0x98] sm:$0xff] %vm10813_vm5, %v11153_v42 }
 0xc08   : > { %v12897_v52 = vpop.eup %12896 }
 0xc09   : > { %v11154_v51 = vmul.f32 %v12897_v52, %v17142_v40  ;;  %v11071_v13 = vpop.xlane.xlu2 %11070 }
 0xc0a   : > { %12898 = vrcp.f32 %v11071_v13 }
 0xc0b   : > { %11186 = vst.msk [vmem:[%s17091_s14 + $0xa0] sm:$0xff] %vm10813_vm5, %v11154_v51 }
 0xc10   : > { %v12899_v34 = vpop.eup %12898 }
 0xc11   : > { %v11155_v62 = vmul.f32 %v12899_v34, %v17151_v36  ;;  %v11074_v1 = vpop.xlane.xlu0 %11073 }
 0xc12   : > { %12900 = vrcp.f32 %v11074_v1 }
 0xc13   : > { %11187 = vst.msk [vmem:[%s17091_s14 + $0xa8] sm:$0xff] %vm10813_vm5, %v11155_v62 }
 0xc18   : > { %v12901_v25 = vpop.eup %12900 }
 0xc19   : > { %v11156_v58 = vmul.f32 %v12901_v25, %v17160_v49  ;;  %v11077_v19 = vpop.xlane.xlu1 %11076 }
 0xc1a   : > { %12902 = vrcp.f32 %v11077_v19 }
 0xc1b   : > { %11188 = vst.msk [vmem:[%s17091_s14 + $0xb0] sm:$0xff] %vm10813_vm5, %v11156_v58 }
 0xc20   : > { %v12903_v40 = vpop.eup %12902 }
 0xc21   : > { %v11157_v39 = vmul.f32 %v12903_v40, %v17169_v8  ;;  %v11080_v24 = vpop.xlane.xlu2 %11079 }
 0xc22   : > { %12904 = vrcp.f32 %v11080_v24 }
 0xc23   : > { %11189 = vst.msk [vmem:[%s17091_s14 + $0xb8] sm:$0xff] %vm10813_vm5, %v11157_v39 }
 0xc28   : > { %v12905_v36 = vpop.eup %12904 }
 0xc29   : > { %v11158_v47 = vmul.f32 %v12905_v36, %v17178_v26  ;;  %v11083_v17 = vpop.xlane.xlu0 %11082 }
 0xc2a   : > { %12906 = vrcp.f32 %v11083_v17 }
 0xc2b   : > { %11190 = vst.msk [vmem:[%s17091_s14 + $0xc0] sm:$0xff] %vm10813_vm5, %v11158_v47 }
 0xc30   : > { %v12907_v49 = vpop.eup %12906 }
 0xc31   : > { %v11159_v18 = vmul.f32 %v12907_v49, %v17187_v22  ;;  %v11086_v54 = vpop.xlane.xlu1 %11085 }
 0xc32   : > { %12908 = vrcp.f32 %v11086_v54 }
 0xc33   : > { %11191 = vst.msk [vmem:[%s17091_s14 + $0xc8] sm:$0xff] %vm10813_vm5, %v11159_v18 }
 0xc38   : > { %v12909_v8 = vpop.eup %12908 }
 0xc39   : > { %v11160_v33 = vmul.f32 %v12909_v8, %v17196_v63  ;;  %v11089_v59 = vpop.xlane.xlu2 %11088 }
 0xc3a   : > { %12910 = vrcp.f32 %v11089_v59 }
 0xc3b   : > { %11192 = vst.msk [vmem:[%s17091_s14 + $0xd0] sm:$0xff] %vm10813_vm5, %v11160_v33 }
 0xc40   : > { %v12911_v26 = vpop.eup %12910 }
 0xc41   : > { %v11161_v10 = vmul.f32 %v12911_v26, %v17202_v48  ;;  %v11092_v35 = vpop.xlane.xlu0 %11091 }
 0xc42   : > { %12912 = vrcp.f32 %v11092_v35 }
 0xc43   : > { %11193 = vst.msk [vmem:[%s17091_s14 + $0xd8] sm:$0xff] %vm10813_vm5, %v11161_v10 }
 0xc48   : > { %v12913_v22 = vpop.eup %12912 }
 0xc49   : > { %v11162_v55 = vmul.f32 %v12913_v22, %v17208_v46  ;;  %v11095_v56 = vpop.xlane.xlu1 %11094 }
 0xc4a   : > { %12914 = vrcp.f32 %v11095_v56 }
 0xc4b   : > { %11194 = vst.msk [vmem:[%s17091_s14 + $0xe0] sm:$0xff] %vm10813_vm5, %v11162_v55 }
 0xc50   : > { %v12915_v63 = vpop.eup %12914 }
 0xc51   : > { %v11163_v57 = vmul.f32 %v12915_v63, %v17214_v30  ;;  %v11098_v53 = vpop.xlane.xlu2 %11097 }
 0xc52   : > { %12916 = vrcp.f32 %v11098_v53 }
 0xc53   : > { %11195 = vst.msk [vmem:[%s17091_s14 + $0xe8] sm:$0xff] %vm10813_vm5, %v11163_v57 }
 0xc58   : > { %v12917_v48 = vpop.eup %12916 }
 0xc59   : > { %v11164_v43 = vmul.f32 %v12917_v48, %v17223_v15 }
 0xc5a   : > { %v11101_v12 = vpop.xlane.xlu0 %11100 }
 0xc5b   : > { %11196 = vst.msk [vmem:[%s17091_s14 + $0xf0] sm:$0xff] %vm10813_vm5, %v11164_v43  ;;  %12918 = vrcp.f32 %v11101_v12 }
 0xc61   : > { %v12919_v46 = vpop.eup %12918 }
 0xc62   : > { %v11165_v38 = vmul.f32 %v12919_v46, %v17233_v20 }
 0xc64   : > { %11197 = vst.msk [vmem:[%s17091_s14 + $0xf8] sm:$0xff] %vm10813_vm5, %v11165_v38 }
 0xc65 PF: > { %s19_s30 = sadd.s32 1, %s12932_s30  }
 0xc66   : > { %p16_p4 = scmp.ge.s32.totalorder %s19_s30, 4  }
 0xc68   :  { %18 = sbr.rel (!%p16_p4) target bundleno = 1 (0x1), region = 115 }

</bundles_post_ra>
